<compile_context>
chip_gen: v5e
topology: v5e:2x2
jax: 0.10.0
libtpu: 0.0.40
codegen_flags: <defaults>
</compile_context>

<pallas_src>
import jax
import jax.numpy as jnp
from jax.experimental import pallas as pl
from jax.experimental.pallas import tpu as pltpu


def _round_up(x, m):
    return (x + m - 1) // m * m


def _pick_tile_m(M, K, target_bytes=1 << 20, min_blocks=4):
    """Row tile for the [M, K] patch matmul: ~1 MiB bf16 per x tile, but keep
    at least `min_blocks` blocks on the parallel axis (v7x megacore)."""
    tm = max(16, (target_bytes // (2 * K)) // 16 * 16)
    tm = min(tm, _round_up(pl.cdiv(M, min_blocks), 16))
    tm = min(tm, _round_up(M, 16))
    return tm


def _pick_tile_batch(N, cap=64, min_blocks=4):
    """Image tile for the fused tail.  Multiple of 8 (sublane) unless the
    whole batch fits in one block."""
    if N <= 8:
        return N
    tb = max(8, (pl.cdiv(N, min_blocks) // 8) * 8)
    return min(min(tb, cap), N)


# ---------------------------------------------------------------------------
# Pallas kernels
# ---------------------------------------------------------------------------

def _matmul_lrelu_kernel(x_ref, w_ref, o_ref):
    """o = leaky_relu(x @ w, 0.2); bf16 in, f32 accumulate, bf16 store."""
    y = jnp.dot(x_ref[...], w_ref[...], preferred_element_type=jnp.float32)
    o_ref[...] = jnp.where(y > 0, y, 0.2 * y).astype(o_ref.dtype)


def _conv3_conv4_linear_kernel(p3_ref, w3_ref, w4_ref, wl_ref, bl_ref, o_ref):
    """Fused conv3 + conv4 + Flatten + Linear(256, 1).

    p3_ref : [16, TB, 1024] bf16  conv3 patches, position-major over the 4x4
                                   output map (so each position is a
                                   contiguous leading-dim slab).
    w3_ref : [1024, 128]  bf16    conv3 weight as matmul matrix.
    w4_ref : [16, 128, 256] bf16  conv4 weight grouped per spatial position.
    wl_ref : [1, 256]     f32     linear weight row.
    bl_ref : [1]          f32     linear bias (SMEM scalar).
    o_ref  : [TB, 1]      f32
    """
    tb = p3_ref.shape[1]
    acc = jnp.zeros((tb, 256), jnp.float32)
    for p in range(16):                     # 16 spatial positions of conv3 out
        h3 = jnp.dot(p3_ref[p], w3_ref[...],
                     preferred_element_type=jnp.float32)        # [TB, 128]
        h3 = jnp.where(h3 > 0, h3, 0.2 * h3).astype(jnp.bfloat16)
        acc = acc + jnp.dot(h3, w4_ref[p],
                            preferred_element_type=jnp.float32)  # [TB, 256]
    h4 = jnp.where(acc > 0, acc, 0.2 * acc)                      # conv4 lrelu
    # Linear(256, 1) as broadcast-multiply + lane reduction (VPU/XLU).
    y = jnp.sum(h4 * wl_ref[...], axis=-1, keepdims=True) + bl_ref[0]
    o_ref[...] = y


# ---------------------------------------------------------------------------
# Pallas wrappers
# ---------------------------------------------------------------------------

def pallas_matmul_lrelu(patches, wmat):
    """leaky_relu(patches @ wmat, 0.2), row-tiled over M, resident weight."""
    M, K = patches.shape
    K2, cout = wmat.shape
    assert K == K2
    TM = _pick_tile_m(M, K)
    return pl.pallas_call(
        _matmul_lrelu_kernel,
        out_shape=jax.ShapeDtypeStruct((M, cout), jnp.bfloat16),
        grid=(pl.cdiv(M, TM),),
        in_specs=[
            pl.BlockSpec((TM, K), lambda i: (i, 0)),
            pl.BlockSpec((K, cout), lambda i: (0, 0)),   # resident weight
        ],
        out_specs=pl.BlockSpec((TM, cout), lambda i: (i, 0)),
        compiler_params=pltpu.CompilerParams(
            dimension_semantics=("parallel",)),
    )(patches, wmat)


def pallas_conv3_conv4_linear(p3, w3m, w4r, wl, bl):
    """Fused tail: [16, N, 1024] position-major conv3 patches -> [N, 1]."""
    P, N, K = p3.shape
    assert P == 16 and K == 1024
    TB = _pick_tile_batch(N)
    return pl.pallas_call(
        _conv3_conv4_linear_kernel,
        out_shape=jax.ShapeDtypeStruct((N, 1), jnp.float32),
        grid=(pl.cdiv(N, TB),),
        in_specs=[
            pl.BlockSpec((P, TB, K), lambda i: (0, i, 0)),
            pl.BlockSpec((K, 128), lambda i: (0, 0)),
            pl.BlockSpec((P, 128, 256), lambda i: (0, 0, 0)),
            pl.BlockSpec((1, 256), lambda i: (0, 0)),
            pl.BlockSpec(memory_space=pltpu.MemorySpace.SMEM),   # bias scalar
        ],
        out_specs=pl.BlockSpec((TB, 1), lambda i: (i, 0)),
        compiler_params=pltpu.CompilerParams(
            dimension_semantics=("parallel",)),
    )(p3, w3m, w4r, wl, bl)


# ---------------------------------------------------------------------------
# Plain-JAX glue: NHWC im2col (matches PyTorch Conv2d semantics)
# ---------------------------------------------------------------------------
# TODO(synk): fold the conv1/conv2 im2col into the Pallas kernels (phase-split
# input view + per-tap accumulated matmuls) to also remove their patch-matrix
# HBM round trips; they are the only remaining materialized patch arrays.

def _im2col_nhwc(x, kh, kw, stride, pad):
    """x: [N, H, W, C] -> patches [N*OH*OW, KH*KW*C] (kh-major, kw, cin)."""
    N, H, W, C = x.shape
    if pad:
        x = jnp.pad(x, ((0, 0), (pad, pad), (pad, pad), (0, 0)))
    OH = (H + 2 * pad - kh) // stride + 1
    OW = (W + 2 * pad - kw) // stride + 1
    cols = []
    for i in range(kh):
        for j in range(kw):
            cols.append(x[:, i:i + stride * OH:stride,
                          j:j + stride * OW:stride, :])      # [N, OH, OW, C]
    p = jnp.stack(cols, axis=3)                              # [N, OH, OW, KK, C]
    return p.reshape(N * OH * OW, kh * kw * C), N, OH, OW


def _im2col_posmajor(x, kh, kw, stride, pad):
    """Like _im2col_nhwc but returns [OH*OW, N, KH*KW*C] (position-major)."""
    N, H, W, C = x.shape
    if pad:
        x = jnp.pad(x, ((0, 0), (pad, pad), (pad, pad), (0, 0)))
    OH = (H + 2 * pad - kh) // stride + 1
    OW = (W + 2 * pad - kw) // stride + 1
    cols = []
    for i in range(kh):
        for j in range(kw):
            cols.append(x[:, i:i + stride * OH:stride,
                          j:j + stride * OW:stride, :])
    p = jnp.stack(cols, axis=3)                              # [N, OH, OW, KK, C]
    p = p.reshape(N, OH * OW, kh * kw * C)
    return jnp.transpose(p, (1, 0, 2)), OH, OW               # [P, N, K]


def conv2d_lrelu_nhwc(x, wmat, kh, kw, stride, pad):
    """Conv2d(bias=False) + LeakyReLU(0.2); NHWC bf16 in / NHWC bf16 out."""
    cout = wmat.shape[1]
    patches, N, OH, OW = _im2col_nhwc(x, kh, kw, stride, pad)
    out = pallas_matmul_lrelu(patches, wmat)                 # [M, cout]
    return out.reshape(N, OH, OW, cout)


# ---------------------------------------------------------------------------
# Parameters
# ---------------------------------------------------------------------------

def init_params(key):
    ks = jax.random.split(key, 6)
    scale = 0.05
    return {
        "w1": jax.random.normal(ks[0], (32, 3, 4, 4), jnp.float32) * scale,
        "w2": jax.random.normal(ks[1], (64, 32, 4, 4), jnp.float32) * scale,
        "w3": jax.random.normal(ks[2], (128, 64, 4, 4), jnp.float32) * scale,
        "w4": jax.random.normal(ks[3], (256, 128, 4, 4), jnp.float32) * scale,
        # nn.Linear(256, 1): weight [1, 256], bias [1]
        "wl": jax.random.normal(ks[4], (1, 256), jnp.float32) * scale,
        "bl": jax.random.normal(ks[5], (1,), jnp.float32) * scale,
    }


def prepare_params(params):
    """One-time weight prep (hoisted out of the forward pass)."""
    def wmat(w):   # PyTorch [Cout, Cin, KH, KW] -> [KH*KW*Cin, Cout]
        co, ci, kh, kw = w.shape
        return jnp.transpose(w, (2, 3, 1, 0)).reshape(kh * kw * ci, co)
    return {
        "w1m": wmat(params["w1"]).astype(jnp.bfloat16),                 # [48, 32]
        "w2m": wmat(params["w2"]).astype(jnp.bfloat16),                 # [512, 64]
        "w3m": wmat(params["w3"]).astype(jnp.bfloat16),                 # [1024, 128]
        "w4r": wmat(params["w4"]).astype(jnp.bfloat16).reshape(16, 128, 256),
        "wl": params["wl"].astype(jnp.float32).reshape(1, 256),
        "bl": params["bl"].astype(jnp.float32).reshape(1),
    }


# ---------------------------------------------------------------------------
# Discriminator forward
# ---------------------------------------------------------------------------

def discriminator_forward(prepped, x):
    # x: [N, 3, 32, 32] NCHW (PyTorch convention); NHWC + bf16 once, up front.
    x = jnp.transpose(x, (0, 2, 3, 1)).astype(jnp.bfloat16)           # [N,32,32,3]
    out = conv2d_lrelu_nhwc(x, prepped["w1m"], 4, 4, 2, 1)            # [N,16,16,32]
    out = conv2d_lrelu_nhwc(out, prepped["w2m"], 4, 4, 2, 1)          # [N,8,8,64]

    # conv3 patches in position-major layout; conv3+conv4+flatten+linear fused.
    p3, OH3, OW3 = _im2col_posmajor(out, 4, 4, 2, 1)                  # [16, N, 1024]
    assert OH3 == 4 and OW3 == 4
    return pallas_conv3_conv4_linear(
        p3, prepped["w3m"], prepped["w4r"], prepped["wl"], prepped["bl"]
    )                                                                  # [N, 1] f32


if __name__ == "__main__":
    key = jax.random.PRNGKey(0)
    pkey, xkey = jax.random.split(key)
    params = init_params(pkey)
    prepped = prepare_params(params)     # one-time weight prep (outside jit)

    # batch=2, 3 channels, 32x32 (required so conv4 k=4/s=1/p=0 yields 1x1).
    x = jax.random.normal(xkey, (2, 3, 32, 32), jnp.float32)

    fwd = jax.jit(discriminator_forward)
    out = fwd(prepped, x)
    out = jax.block_until_ready(out)
    assert out.shape == (2, 1), out.shape
    assert out.dtype == jnp.float32
    print("KERNEL_OK")
</pallas_src>

<mosaic_0001>
module attributes {stable_mosaic.version = 11 : i64} {
  func.func @_matmul_lrelu_kernel(%arg0: i32, %arg1: memref<128x48xbf16, #tpu.memory_space<vmem>>, %arg2: memref<48x32xbf16, #tpu.memory_space<vmem>>, %arg3: memref<128x32xbf16, #tpu.memory_space<vmem>>) attributes {dimension_semantics = [#tpu.dimension_semantics<parallel>], iteration_bounds = array<i64: 4>, scalar_prefetch = 0 : i64, scratch_operands = 0 : i64, tpu.core_type = #tpu.core_type<tc>, window_params = [{transform_indices = @transform_0, window_bounds = array<i64: 128, 48>}, {pipeline_mode = #tpu.pipeline_mode<synchronous>, transform_indices = @transform_1, window_bounds = array<i64: 48, 32>}, {transform_indices = @transform_2, window_bounds = array<i64: 128, 32>}]} {
    %c0 = arith.constant 0 : index
    %c0_0 = arith.constant 0 : index
    %0 = vector.load %arg1[%c0, %c0_0] : memref<128x48xbf16, #tpu.memory_space<vmem>>, vector<128x48xbf16>
    %c0_1 = arith.constant 0 : index
    %c0_2 = arith.constant 0 : index
    %1 = vector.load %arg2[%c0_1, %c0_2] : memref<48x32xbf16, #tpu.memory_space<vmem>>, vector<48x32xbf16>
    %cst = arith.constant dense<0.000000e+00> : vector<128x32xf32>
    %2 = tpu.matmul %0, %1, %cst {dimension_numbers = #tpu.dot_dimension_numbers<[1], [0], [0], [1], [0, 0, 1, 1], [], []>} : vector<128x48xbf16>, vector<48x32xbf16>, vector<128x32xf32> -> vector<128x32xf32>
    %cst_3 = arith.constant 0.000000e+00 : f32
    %3 = vector.broadcast %cst_3 : f32 to vector<128x32xf32>
    %4 = arith.cmpf ogt, %2, %3 : vector<128x32xf32>
    %cst_4 = arith.constant 2.000000e-01 : f32
    %5 = vector.broadcast %cst_4 : f32 to vector<128x32xf32>
    %6 = arith.mulf %5, %2 : vector<128x32xf32>
    %7 = arith.select %4, %2, %6 : vector<128x32xi1>, vector<128x32xf32>
    %8 = arith.truncf %7 : vector<128x32xf32> to vector<128x32xbf16>
    %c0_5 = arith.constant 0 : index
    %c0_6 = arith.constant 0 : index
    %9 = vector.load %arg3[%c0_5, %c0_6] : memref<128x32xbf16, #tpu.memory_space<vmem>>, vector<128x32xbf16>
    tpu.vector_store %arg3[%c0_5, %c0_6], %8 {strides = array<i32>} : memref<128x32xbf16, #tpu.memory_space<vmem>>, vector<128x32xbf16>,
    return
  }
  func.func @transform_0(%arg0: i32) -> (i32, i32) {
    %c0_i32 = arith.constant 0 : i32
    %c0_i32_0 = arith.constant 0 : i32
    return %arg0, %c0_i32 : i32, i32
  }
  func.func @transform_1(%arg0: i32) -> (i32, i32) {
    %c0_i32 = arith.constant 0 : i32
    %c0_i32_0 = arith.constant 0 : i32
    %c0_i32_1 = arith.constant 0 : i32
    return %c0_i32, %c0_i32_0 : i32, i32
  }
  func.func @transform_2(%arg0: i32) -> (i32, i32) {
    %c0_i32 = arith.constant 0 : i32
    %c0_i32_0 = arith.constant 0 : i32
    return %arg0, %c0_i32 : i32, i32
  }
}

module attributes {stable_mosaic.version = 11 : i64} {
  func.func @_matmul_lrelu_kernel(%arg0: i32, %arg1: memref<32x512xbf16, #tpu.memory_space<vmem>>, %arg2: memref<512x64xbf16, #tpu.memory_space<vmem>>, %arg3: memref<32x64xbf16, #tpu.memory_space<vmem>>) attributes {dimension_semantics = [#tpu.dimension_semantics<parallel>], iteration_bounds = array<i64: 4>, scalar_prefetch = 0 : i64, scratch_operands = 0 : i64, tpu.core_type = #tpu.core_type<tc>, window_params = [{transform_indices = @transform_0, window_bounds = array<i64: 32, 512>}, {pipeline_mode = #tpu.pipeline_mode<synchronous>, transform_indices = @transform_1, window_bounds = array<i64: 512, 64>}, {transform_indices = @transform_2, window_bounds = array<i64: 32, 64>}]} {
    %c0 = arith.constant 0 : index
    %c0_0 = arith.constant 0 : index
    %0 = vector.load %arg1[%c0, %c0_0] : memref<32x512xbf16, #tpu.memory_space<vmem>>, vector<32x512xbf16>
    %c0_1 = arith.constant 0 : index
    %c0_2 = arith.constant 0 : index
    %1 = vector.load %arg2[%c0_1, %c0_2] : memref<512x64xbf16, #tpu.memory_space<vmem>>, vector<512x64xbf16>
    %cst = arith.constant dense<0.000000e+00> : vector<32x64xf32>
    %2 = tpu.matmul %0, %1, %cst {dimension_numbers = #tpu.dot_dimension_numbers<[1], [0], [0], [1], [0, 0, 1, 1], [], []>} : vector<32x512xbf16>, vector<512x64xbf16>, vector<32x64xf32> -> vector<32x64xf32>
    %cst_3 = arith.constant 0.000000e+00 : f32
    %3 = vector.broadcast %cst_3 : f32 to vector<32x64xf32>
    %4 = arith.cmpf ogt, %2, %3 : vector<32x64xf32>
    %cst_4 = arith.constant 2.000000e-01 : f32
    %5 = vector.broadcast %cst_4 : f32 to vector<32x64xf32>
    %6 = arith.mulf %5, %2 : vector<32x64xf32>
    %7 = arith.select %4, %2, %6 : vector<32x64xi1>, vector<32x64xf32>
    %8 = arith.truncf %7 : vector<32x64xf32> to vector<32x64xbf16>
    %c0_5 = arith.constant 0 : index
    %c0_6 = arith.constant 0 : index
    %9 = vector.load %arg3[%c0_5, %c0_6] : memref<32x64xbf16, #tpu.memory_space<vmem>>, vector<32x64xbf16>
    tpu.vector_store %arg3[%c0_5, %c0_6], %8 {strides = array<i32>} : memref<32x64xbf16, #tpu.memory_space<vmem>>, vector<32x64xbf16>,
    return
  }
  func.func @transform_0(%arg0: i32) -> (i32, i32) {
    %c0_i32 = arith.constant 0 : i32
    %c0_i32_0 = arith.constant 0 : i32
    return %arg0, %c0_i32 : i32, i32
  }
  func.func @transform_1(%arg0: i32) -> (i32, i32) {
    %c0_i32 = arith.constant 0 : i32
    %c0_i32_0 = arith.constant 0 : i32
    %c0_i32_1 = arith.constant 0 : i32
    return %c0_i32, %c0_i32_0 : i32, i32
  }
  func.func @transform_2(%arg0: i32) -> (i32, i32) {
    %c0_i32 = arith.constant 0 : i32
    %c0_i32_0 = arith.constant 0 : i32
    return %arg0, %c0_i32 : i32, i32
  }
}

module attributes {stable_mosaic.version = 11 : i64} {
  func.func @_conv3_conv4_linear_kernel(%arg0: i32, %arg1: memref<16x2x1024xbf16, #tpu.memory_space<vmem>>, %arg2: memref<1024x128xbf16, #tpu.memory_space<vmem>>, %arg3: memref<16x128x256xbf16, #tpu.memory_space<vmem>>, %arg4: memref<1x256xf32, #tpu.memory_space<vmem>>, %arg5: memref<1xf32, #tpu.memory_space<smem>>, %arg6: memref<2x1xf32, #tpu.memory_space<vmem>>) attributes {dimension_semantics = [#tpu.dimension_semantics<parallel>], iteration_bounds = array<i64: 1>, scalar_prefetch = 0 : i64, scratch_operands = 0 : i64, tpu.core_type = #tpu.core_type<tc>, window_params = [{transform_indices = @transform_0, window_bounds = array<i64: 16, 2, 1024>}, {pipeline_mode = #tpu.pipeline_mode<synchronous>, transform_indices = @transform_1, window_bounds = array<i64: 1024, 128>}, {pipeline_mode = #tpu.pipeline_mode<synchronous>, transform_indices = @transform_2, window_bounds = array<i64: 16, 128, 256>}, {pipeline_mode = #tpu.pipeline_mode<synchronous>, transform_indices = @transform_3, window_bounds = array<i64: 1, 256>}, {transform_indices = @transform_4, window_bounds = array<i64: 1>}, {transform_indices = @transform_5, window_bounds = array<i64: 2, 1>}]} {
    %cst = arith.constant 0.000000e+00 : f32
    %0 = vector.broadcast %cst : f32 to vector<2x256xf32>
    %c0 = arith.constant 0 : index
    %c0_0 = arith.constant 0 : index
    %c0_1 = arith.constant 0 : index
    %1 = vector.load %arg1[%c0, %c0_0, %c0_1] : memref<16x2x1024xbf16, #tpu.memory_space<vmem>>, vector<1x2x1024xbf16>
    %2 = vector.shape_cast %1 : vector<1x2x1024xbf16> to vector<2x1024xbf16>
    %c0_2 = arith.constant 0 : index
    %c0_3 = arith.constant 0 : index
    %3 = vector.load %arg2[%c0_2, %c0_3] : memref<1024x128xbf16, #tpu.memory_space<vmem>>, vector<1024x128xbf16>
    %cst_4 = arith.constant dense<0.000000e+00> : vector<2x128xf32>
    %4 = tpu.matmul %2, %3, %cst_4 {dimension_numbers = #tpu.dot_dimension_numbers<[1], [0], [0], [1], [0, 0, 1, 1], [], []>} : vector<2x1024xbf16>, vector<1024x128xbf16>, vector<2x128xf32> -> vector<2x128xf32>
    %cst_5 = arith.constant 0.000000e+00 : f32
    %5 = vector.broadcast %cst_5 : f32 to vector<2x128xf32>
    %6 = arith.cmpf ogt, %4, %5 : vector<2x128xf32>
    %cst_6 = arith.constant 2.000000e-01 : f32
    %7 = vector.broadcast %cst_6 : f32 to vector<2x128xf32>
    %8 = arith.mulf %7, %4 : vector<2x128xf32>
    %9 = arith.select %6, %4, %8 : vector<2x128xi1>, vector<2x128xf32>
    %10 = arith.truncf %9 : vector<2x128xf32> to vector<2x128xbf16>
    %c0_7 = arith.constant 0 : index
    %c0_8 = arith.constant 0 : index
    %c0_9 = arith.constant 0 : index
    %11 = vector.load %arg3[%c0_7, %c0_8, %c0_9] : memref<16x128x256xbf16, #tpu.memory_space<vmem>>, vector<1x128x256xbf16>
    %12 = vector.shape_cast %11 : vector<1x128x256xbf16> to vector<128x256xbf16>
    %cst_10 = arith.constant dense<0.000000e+00> : vector<2x256xf32>
    %13 = tpu.matmul %10, %12, %cst_10 {dimension_numbers = #tpu.dot_dimension_numbers<[1], [0], [0], [1], [0, 0, 1, 1], [], []>} : vector<2x128xbf16>, vector<128x256xbf16>, vector<2x256xf32> -> vector<2x256xf32>
    %14 = arith.addf %0, %13 : vector<2x256xf32>
    %c1 = arith.constant 1 : index
    %c0_11 = arith.constant 0 : index
    %c0_12 = arith.constant 0 : index
    %15 = vector.load %arg1[%c1, %c0_11, %c0_12] : memref<16x2x1024xbf16, #tpu.memory_space<vmem>>, vector<1x2x1024xbf16>
    %16 = vector.shape_cast %15 : vector<1x2x1024xbf16> to vector<2x1024xbf16>
    %c0_13 = arith.constant 0 : index
    %c0_14 = arith.constant 0 : index
    %17 = vector.load %arg2[%c0_13, %c0_14] : memref<1024x128xbf16, #tpu.memory_space<vmem>>, vector<1024x128xbf16>
    %cst_15 = arith.constant dense<0.000000e+00> : vector<2x128xf32>
    %18 = tpu.matmul %16, %17, %cst_15 {dimension_numbers = #tpu.dot_dimension_numbers<[1], [0], [0], [1], [0, 0, 1, 1], [], []>} : vector<2x1024xbf16>, vector<1024x128xbf16>, vector<2x128xf32> -> vector<2x128xf32>
    %cst_16 = arith.constant 0.000000e+00 : f32
    %19 = vector.broadcast %cst_16 : f32 to vector<2x128xf32>
    %20 = arith.cmpf ogt, %18, %19 : vector<2x128xf32>
    %cst_17 = arith.constant 2.000000e-01 : f32
    %21 = vector.broadcast %cst_17 : f32 to vector<2x128xf32>
    %22 = arith.mulf %21, %18 : vector<2x128xf32>
    %23 = arith.select %20, %18, %22 : vector<2x128xi1>, vector<2x128xf32>
    %24 = arith.truncf %23 : vector<2x128xf32> to vector<2x128xbf16>
    %c1_18 = arith.constant 1 : index
    %c0_19 = arith.constant 0 : index
    %c0_20 = arith.constant 0 : index
    %25 = vector.load %arg3[%c1_18, %c0_19, %c0_20] : memref<16x128x256xbf16, #tpu.memory_space<vmem>>, vector<1x128x256xbf16>
    %26 = vector.shape_cast %25 : vector<1x128x256xbf16> to vector<128x256xbf16>
    %cst_21 = arith.constant dense<0.000000e+00> : vector<2x256xf32>
    %27 = tpu.matmul %24, %26, %cst_21 {dimension_numbers = #tpu.dot_dimension_numbers<[1], [0], [0], [1], [0, 0, 1, 1], [], []>} : vector<2x128xbf16>, vector<128x256xbf16>, vector<2x256xf32> -> vector<2x256xf32>
    %28 = arith.addf %14, %27 : vector<2x256xf32>
    %c2 = arith.constant 2 : index
    %c0_22 = arith.constant 0 : index
    %c0_23 = arith.constant 0 : index
    %29 = vector.load %arg1[%c2, %c0_22, %c0_23] : memref<16x2x1024xbf16, #tpu.memory_space<vmem>>, vector<1x2x1024xbf16>
    %30 = vector.shape_cast %29 : vector<1x2x1024xbf16> to vector<2x1024xbf16>
    %c0_24 = arith.constant 0 : index
    %c0_25 = arith.constant 0 : index
    %31 = vector.load %arg2[%c0_24, %c0_25] : memref<1024x128xbf16, #tpu.memory_space<vmem>>, vector<1024x128xbf16>
    %cst_26 = arith.constant dense<0.000000e+00> : vector<2x128xf32>
    %32 = tpu.matmul %30, %31, %cst_26 {dimension_numbers = #tpu.dot_dimension_numbers<[1], [0], [0], [1], [0, 0, 1, 1], [], []>} : vector<2x1024xbf16>, vector<1024x128xbf16>, vector<2x128xf32> -> vector<2x128xf32>
    %cst_27 = arith.constant 0.000000e+00 : f32
    %33 = vector.broadcast %cst_27 : f32 to vector<2x128xf32>
    %34 = arith.cmpf ogt, %32, %33 : vector<2x128xf32>
    %cst_28 = arith.constant 2.000000e-01 : f32
    %35 = vector.broadcast %cst_28 : f32 to vector<2x128xf32>
    %36 = arith.mulf %35, %32 : vector<2x128xf32>
    %37 = arith.select %34, %32, %36 : vector<2x128xi1>, vector<2x128xf32>
    %38 = arith.truncf %37 : vector<2x128xf32> to vector<2x128xbf16>
    %c2_29 = arith.constant 2 : index
    %c0_30 = arith.constant 0 : index
    %c0_31 = arith.constant 0 : index
    %39 = vector.load %arg3[%c2_29, %c0_30, %c0_31] : memref<16x128x256xbf16, #tpu.memory_space<vmem>>, vector<1x128x256xbf16>
    %40 = vector.shape_cast %39 : vector<1x128x256xbf16> to vector<128x256xbf16>
    %cst_32 = arith.constant dense<0.000000e+00> : vector<2x256xf32>
    %41 = tpu.matmul %38, %40, %cst_32 {dimension_numbers = #tpu.dot_dimension_numbers<[1], [0], [0], [1], [0, 0, 1, 1], [], []>} : vector<2x128xbf16>, vector<128x256xbf16>, vector<2x256xf32> -> vector<2x256xf32>
    %42 = arith.addf %28, %41 : vector<2x256xf32>
    %c3 = arith.constant 3 : index
    %c0_33 = arith.constant 0 : index
    %c0_34 = arith.constant 0 : index
    %43 = vector.load %arg1[%c3, %c0_33, %c0_34] : memref<16x2x1024xbf16, #tpu.memory_space<vmem>>, vector<1x2x1024xbf16>
    %44 = vector.shape_cast %43 : vector<1x2x1024xbf16> to vector<2x1024xbf16>
    %c0_35 = arith.constant 0 : index
    %c0_36 = arith.constant 0 : index
    %45 = vector.load %arg2[%c0_35, %c0_36] : memref<1024x128xbf16, #tpu.memory_space<vmem>>, vector<1024x128xbf16>
    %cst_37 = arith.constant dense<0.000000e+00> : vector<2x128xf32>
    %46 = tpu.matmul %44, %45, %cst_37 {dimension_numbers = #tpu.dot_dimension_numbers<[1], [0], [0], [1], [0, 0, 1, 1], [], []>} : vector<2x1024xbf16>, vector<1024x128xbf16>, vector<2x128xf32> -> vector<2x128xf32>
    %cst_38 = arith.constant 0.000000e+00 : f32
    %47 = vector.broadcast %cst_38 : f32 to vector<2x128xf32>
    %48 = arith.cmpf ogt, %46, %47 : vector<2x128xf32>
    %cst_39 = arith.constant 2.000000e-01 : f32
    %49 = vector.broadcast %cst_39 : f32 to vector<2x128xf32>
    %50 = arith.mulf %49, %46 : vector<2x128xf32>
    %51 = arith.select %48, %46, %50 : vector<2x128xi1>, vector<2x128xf32>
    %52 = arith.truncf %51 : vector<2x128xf32> to vector<2x128xbf16>
    %c3_40 = arith.constant 3 : index
    %c0_41 = arith.constant 0 : index
    %c0_42 = arith.constant 0 : index
    %53 = vector.load %arg3[%c3_40, %c0_41, %c0_42] : memref<16x128x256xbf16, #tpu.memory_space<vmem>>, vector<1x128x256xbf16>
    %54 = vector.shape_cast %53 : vector<1x128x256xbf16> to vector<128x256xbf16>
    %cst_43 = arith.constant dense<0.000000e+00> : vector<2x256xf32>
    %55 = tpu.matmul %52, %54, %cst_43 {dimension_numbers = #tpu.dot_dimension_numbers<[1], [0], [0], [1], [0, 0, 1, 1], [], []>} : vector<2x128xbf16>, vector<128x256xbf16>, vector<2x256xf32> -> vector<2x256xf32>
    %56 = arith.addf %42, %55 : vector<2x256xf32>
    %c4 = arith.constant 4 : index
    %c0_44 = arith.constant 0 : index
    %c0_45 = arith.constant 0 : index
    %57 = vector.load %arg1[%c4, %c0_44, %c0_45] : memref<16x2x1024xbf16, #tpu.memory_space<vmem>>, vector<1x2x1024xbf16>
    %58 = vector.shape_cast %57 : vector<1x2x1024xbf16> to vector<2x1024xbf16>
    %c0_46 = arith.constant 0 : index
    %c0_47 = arith.constant 0 : index
    %59 = vector.load %arg2[%c0_46, %c0_47] : memref<1024x128xbf16, #tpu.memory_space<vmem>>, vector<1024x128xbf16>
    %cst_48 = arith.constant dense<0.000000e+00> : vector<2x128xf32>
    %60 = tpu.matmul %58, %59, %cst_48 {dimension_numbers = #tpu.dot_dimension_numbers<[1], [0], [0], [1], [0, 0, 1, 1], [], []>} : vector<2x1024xbf16>, vector<1024x128xbf16>, vector<2x128xf32> -> vector<2x128xf32>
    %cst_49 = arith.constant 0.000000e+00 : f32
    %61 = vector.broadcast %cst_49 : f32 to vector<2x128xf32>
    %62 = arith.cmpf ogt, %60, %61 : vector<2x128xf32>
    %cst_50 = arith.constant 2.000000e-01 : f32
    %63 = vector.broadcast %cst_50 : f32 to vector<2x128xf32>
    %64 = arith.mulf %63, %60 : vector<2x128xf32>
    %65 = arith.select %62, %60, %64 : vector<2x128xi1>, vector<2x128xf32>
    %66 = arith.truncf %65 : vector<2x128xf32> to vector<2x128xbf16>
    %c4_51 = arith.constant 4 : index
    %c0_52 = arith.constant 0 : index
    %c0_53 = arith.constant 0 : index
    %67 = vector.load %arg3[%c4_51, %c0_52, %c0_53] : memref<16x128x256xbf16, #tpu.memory_space<vmem>>, vector<1x128x256xbf16>
    %68 = vector.shape_cast %67 : vector<1x128x256xbf16> to vector<128x256xbf16>
    %cst_54 = arith.constant dense<0.000000e+00> : vector<2x256xf32>
    %69 = tpu.matmul %66, %68, %cst_54 {dimension_numbers = #tpu.dot_dimension_numbers<[1], [0], [0], [1], [0, 0, 1, 1], [], []>} : vector<2x128xbf16>, vector<128x256xbf16>, vector<2x256xf32> -> vector<2x256xf32>
    %70 = arith.addf %56, %69 : vector<2x256xf32>
    %c5 = arith.constant 5 : index
    %c0_55 = arith.constant 0 : index
    %c0_56 = arith.constant 0 : index
    %71 = vector.load %arg1[%c5, %c0_55, %c0_56] : memref<16x2x1024xbf16, #tpu.memory_space<vmem>>, vector<1x2x1024xbf16>
    %72 = vector.shape_cast %71 : vector<1x2x1024xbf16> to vector<2x1024xbf16>
    %c0_57 = arith.constant 0 : index
    %c0_58 = arith.constant 0 : index
    %73 = vector.load %arg2[%c0_57, %c0_58] : memref<1024x128xbf16, #tpu.memory_space<vmem>>, vector<1024x128xbf16>
    %cst_59 = arith.constant dense<0.000000e+00> : vector<2x128xf32>
    %74 = tpu.matmul %72, %73, %cst_59 {dimension_numbers = #tpu.dot_dimension_numbers<[1], [0], [0], [1], [0, 0, 1, 1], [], []>} : vector<2x1024xbf16>, vector<1024x128xbf16>, vector<2x128xf32> -> vector<2x128xf32>
    %cst_60 = arith.constant 0.000000e+00 : f32
    %75 = vector.broadcast %cst_60 : f32 to vector<2x128xf32>
    %76 = arith.cmpf ogt, %74, %75 : vector<2x128xf32>
    %cst_61 = arith.constant 2.000000e-01 : f32
    %77 = vector.broadcast %cst_61 : f32 to vector<2x128xf32>
    %78 = arith.mulf %77, %74 : vector<2x128xf32>
    %79 = arith.select %76, %74, %78 : vector<2x128xi1>, vector<2x128xf32>
    %80 = arith.truncf %79 : vector<2x128xf32> to vector<2x128xbf16>
    %c5_62 = arith.constant 5 : index
    %c0_63 = arith.constant 0 : index
    %c0_64 = arith.constant 0 : index
    %81 = vector.load %arg3[%c5_62, %c0_63, %c0_64] : memref<16x128x256xbf16, #tpu.memory_space<vmem>>, vector<1x128x256xbf16>
    %82 = vector.shape_cast %81 : vector<1x128x256xbf16> to vector<128x256xbf16>
    %cst_65 = arith.constant dense<0.000000e+00> : vector<2x256xf32>
    %83 = tpu.matmul %80, %82, %cst_65 {dimension_numbers = #tpu.dot_dimension_numbers<[1], [0], [0], [1], [0, 0, 1, 1], [], []>} : vector<2x128xbf16>, vector<128x256xbf16>, vector<2x256xf32> -> vector<2x256xf32>
    %84 = arith.addf %70, %83 : vector<2x256xf32>
    %c6 = arith.constant 6 : index
    %c0_66 = arith.constant 0 : index
    %c0_67 = arith.constant 0 : index
    %85 = vector.load %arg1[%c6, %c0_66, %c0_67] : memref<16x2x1024xbf16, #tpu.memory_space<vmem>>, vector<1x2x1024xbf16>
    %86 = vector.shape_cast %85 : vector<1x2x1024xbf16> to vector<2x1024xbf16>
    %c0_68 = arith.constant 0 : index
    %c0_69 = arith.constant 0 : index
    %87 = vector.load %arg2[%c0_68, %c0_69] : memref<1024x128xbf16, #tpu.memory_space<vmem>>, vector<1024x128xbf16>
    %cst_70 = arith.constant dense<0.000000e+00> : vector<2x128xf32>
    %88 = tpu.matmul %86, %87, %cst_70 {dimension_numbers = #tpu.dot_dimension_numbers<[1], [0], [0], [1], [0, 0, 1, 1], [], []>} : vector<2x1024xbf16>, vector<1024x128xbf16>, vector<2x128xf32> -> vector<2x128xf32>
    %cst_71 = arith.constant 0.000000e+00 : f32
    %89 = vector.broadcast %cst_71 : f32 to vector<2x128xf32>
    %90 = arith.cmpf ogt, %88, %89 : vector<2x128xf32>
    %cst_72 = arith.constant 2.000000e-01 : f32
    %91 = vector.broadcast %cst_72 : f32 to vector<2x128xf32>
    %92 = arith.mulf %91, %88 : vector<2x128xf32>
    %93 = arith.select %90, %88, %92 : vector<2x128xi1>, vector<2x128xf32>
    %94 = arith.truncf %93 : vector<2x128xf32> to vector<2x128xbf16>
    %c6_73 = arith.constant 6 : index
    %c0_74 = arith.constant 0 : index
    %c0_75 = arith.constant 0 : index
    %95 = vector.load %arg3[%c6_73, %c0_74, %c0_75] : memref<16x128x256xbf16, #tpu.memory_space<vmem>>, vector<1x128x256xbf16>
    %96 = vector.shape_cast %95 : vector<1x128x256xbf16> to vector<128x256xbf16>
    %cst_76 = arith.constant dense<0.000000e+00> : vector<2x256xf32>
    %97 = tpu.matmul %94, %96, %cst_76 {dimension_numbers = #tpu.dot_dimension_numbers<[1], [0], [0], [1], [0, 0, 1, 1], [], []>} : vector<2x128xbf16>, vector<128x256xbf16>, vector<2x256xf32> -> vector<2x256xf32>
    %98 = arith.addf %84, %97 : vector<2x256xf32>
    %c7 = arith.constant 7 : index
    %c0_77 = arith.constant 0 : index
    %c0_78 = arith.constant 0 : index
    %99 = vector.load %arg1[%c7, %c0_77, %c0_78] : memref<16x2x1024xbf16, #tpu.memory_space<vmem>>, vector<1x2x1024xbf16>
    %100 = vector.shape_cast %99 : vector<1x2x1024xbf16> to vector<2x1024xbf16>
    %c0_79 = arith.constant 0 : index
    %c0_80 = arith.constant 0 : index
    %101 = vector.load %arg2[%c0_79, %c0_80] : memref<1024x128xbf16, #tpu.memory_space<vmem>>, vector<1024x128xbf16>
    %cst_81 = arith.constant dense<0.000000e+00> : vector<2x128xf32>
    %102 = tpu.matmul %100, %101, %cst_81 {dimension_numbers = #tpu.dot_dimension_numbers<[1], [0], [0], [1], [0, 0, 1, 1], [], []>} : vector<2x1024xbf16>, vector<1024x128xbf16>, vector<2x128xf32> -> vector<2x128xf32>
    %cst_82 = arith.constant 0.000000e+00 : f32
    %103 = vector.broadcast %cst_82 : f32 to vector<2x128xf32>
    %104 = arith.cmpf ogt, %102, %103 : vector<2x128xf32>
    %cst_83 = arith.constant 2.000000e-01 : f32
    %105 = vector.broadcast %cst_83 : f32 to vector<2x128xf32>
    %106 = arith.mulf %105, %102 : vector<2x128xf32>
    %107 = arith.select %104, %102, %106 : vector<2x128xi1>, vector<2x128xf32>
    %108 = arith.truncf %107 : vector<2x128xf32> to vector<2x128xbf16>
    %c7_84 = arith.constant 7 : index
    %c0_85 = arith.constant 0 : index
    %c0_86 = arith.constant 0 : index
    %109 = vector.load %arg3[%c7_84, %c0_85, %c0_86] : memref<16x128x256xbf16, #tpu.memory_space<vmem>>, vector<1x128x256xbf16>
    %110 = vector.shape_cast %109 : vector<1x128x256xbf16> to vector<128x256xbf16>
    %cst_87 = arith.constant dense<0.000000e+00> : vector<2x256xf32>
    %111 = tpu.matmul %108, %110, %cst_87 {dimension_numbers = #tpu.dot_dimension_numbers<[1], [0], [0], [1], [0, 0, 1, 1], [], []>} : vector<2x128xbf16>, vector<128x256xbf16>, vector<2x256xf32> -> vector<2x256xf32>
    %112 = arith.addf %98, %111 : vector<2x256xf32>
    %c8 = arith.constant 8 : index
    %c0_88 = arith.constant 0 : index
    %c0_89 = arith.constant 0 : index
    %113 = vector.load %arg1[%c8, %c0_88, %c0_89] : memref<16x2x1024xbf16, #tpu.memory_space<vmem>>, vector<1x2x1024xbf16>
    %114 = vector.shape_cast %113 : vector<1x2x1024xbf16> to vector<2x1024xbf16>
    %c0_90 = arith.constant 0 : index
    %c0_91 = arith.constant 0 : index
    %115 = vector.load %arg2[%c0_90, %c0_91] : memref<1024x128xbf16, #tpu.memory_space<vmem>>, vector<1024x128xbf16>
    %cst_92 = arith.constant dense<0.000000e+00> : vector<2x128xf32>
    %116 = tpu.matmul %114, %115, %cst_92 {dimension_numbers = #tpu.dot_dimension_numbers<[1], [0], [0], [1], [0, 0, 1, 1], [], []>} : vector<2x1024xbf16>, vector<1024x128xbf16>, vector<2x128xf32> -> vector<2x128xf32>
    %cst_93 = arith.constant 0.000000e+00 : f32
    %117 = vector.broadcast %cst_93 : f32 to vector<2x128xf32>
    %118 = arith.cmpf ogt, %116, %117 : vector<2x128xf32>
    %cst_94 = arith.constant 2.000000e-01 : f32
    %119 = vector.broadcast %cst_94 : f32 to vector<2x128xf32>
    %120 = arith.mulf %119, %116 : vector<2x128xf32>
    %121 = arith.select %118, %116, %120 : vector<2x128xi1>, vector<2x128xf32>
    %122 = arith.truncf %121 : vector<2x128xf32> to vector<2x128xbf16>
    %c8_95 = arith.constant 8 : index
    %c0_96 = arith.constant 0 : index
    %c0_97 = arith.constant 0 : index
    %123 = vector.load %arg3[%c8_95, %c0_96, %c0_97] : memref<16x128x256xbf16, #tpu.memory_space<vmem>>, vector<1x128x256xbf16>
    %124 = vector.shape_cast %123 : vector<1x128x256xbf16> to vector<128x256xbf16>
    %cst_98 = arith.constant dense<0.000000e+00> : vector<2x256xf32>
    %125 = tpu.matmul %122, %124, %cst_98 {dimension_numbers = #tpu.dot_dimension_numbers<[1], [0], [0], [1], [0, 0, 1, 1], [], []>} : vector<2x128xbf16>, vector<128x256xbf16>, vector<2x256xf32> -> vector<2x256xf32>
    %126 = arith.addf %112, %125 : vector<2x256xf32>
    %c9 = arith.constant 9 : index
    %c0_99 = arith.constant 0 : index
    %c0_100 = arith.constant 0 : index
    %127 = vector.load %arg1[%c9, %c0_99, %c0_100] : memref<16x2x1024xbf16, #tpu.memory_space<vmem>>, vector<1x2x1024xbf16>
    %128 = vector.shape_cast %127 : vector<1x2x1024xbf16> to vector<2x1024xbf16>
    %c0_101 = arith.constant 0 : index
    %c0_102 = arith.constant 0 : index
    %129 = vector.load %arg2[%c0_101, %c0_102] : memref<1024x128xbf16, #tpu.memory_space<vmem>>, vector<1024x128xbf16>
    %cst_103 = arith.constant dense<0.000000e+00> : vector<2x128xf32>
    %130 = tpu.matmul %128, %129, %cst_103 {dimension_numbers = #tpu.dot_dimension_numbers<[1], [0], [0], [1], [0, 0, 1, 1], [], []>} : vector<2x1024xbf16>, vector<1024x128xbf16>, vector<2x128xf32> -> vector<2x128xf32>
    %cst_104 = arith.constant 0.000000e+00 : f32
    %131 = vector.broadcast %cst_104 : f32 to vector<2x128xf32>
    %132 = arith.cmpf ogt, %130, %131 : vector<2x128xf32>
    %cst_105 = arith.constant 2.000000e-01 : f32
    %133 = vector.broadcast %cst_105 : f32 to vector<2x128xf32>
    %134 = arith.mulf %133, %130 : vector<2x128xf32>
    %135 = arith.select %132, %130, %134 : vector<2x128xi1>, vector<2x128xf32>
    %136 = arith.truncf %135 : vector<2x128xf32> to vector<2x128xbf16>
    %c9_106 = arith.constant 9 : index
    %c0_107 = arith.constant 0 : index
    %c0_108 = arith.constant 0 : index
    %137 = vector.load %arg3[%c9_106, %c0_107, %c0_108] : memref<16x128x256xbf16, #tpu.memory_space<vmem>>, vector<1x128x256xbf16>
    %138 = vector.shape_cast %137 : vector<1x128x256xbf16> to vector<128x256xbf16>
    %cst_109 = arith.constant dense<0.000000e+00> : vector<2x256xf32>
    %139 = tpu.matmul %136, %138, %cst_109 {dimension_numbers = #tpu.dot_dimension_numbers<[1], [0], [0], [1], [0, 0, 1, 1], [], []>} : vector<2x128xbf16>, vector<128x256xbf16>, vector<2x256xf32> -> vector<2x256xf32>
    %140 = arith.addf %126, %139 : vector<2x256xf32>
    %c10 = arith.constant 10 : index
    %c0_110 = arith.constant 0 : index
    %c0_111 = arith.constant 0 : index
    %141 = vector.load %arg1[%c10, %c0_110, %c0_111] : memref<16x2x1024xbf16, #tpu.memory_space<vmem>>, vector<1x2x1024xbf16>
    %142 = vector.shape_cast %141 : vector<1x2x1024xbf16> to vector<2x1024xbf16>
    %c0_112 = arith.constant 0 : index
    %c0_113 = arith.constant 0 : index
    %143 = vector.load %arg2[%c0_112, %c0_113] : memref<1024x128xbf16, #tpu.memory_space<vmem>>, vector<1024x128xbf16>
    %cst_114 = arith.constant dense<0.000000e+00> : vector<2x128xf32>
    %144 = tpu.matmul %142, %143, %cst_114 {dimension_numbers = #tpu.dot_dimension_numbers<[1], [0], [0], [1], [0, 0, 1, 1], [], []>} : vector<2x1024xbf16>, vector<1024x128xbf16>, vector<2x128xf32> -> vector<2x128xf32>
    %cst_115 = arith.constant 0.000000e+00 : f32
    %145 = vector.broadcast %cst_115 : f32 to vector<2x128xf32>
    %146 = arith.cmpf ogt, %144, %145 : vector<2x128xf32>
    %cst_116 = arith.constant 2.000000e-01 : f32
    %147 = vector.broadcast %cst_116 : f32 to vector<2x128xf32>
    %148 = arith.mulf %147, %144 : vector<2x128xf32>
    %149 = arith.select %146, %144, %148 : vector<2x128xi1>, vector<2x128xf32>
    %150 = arith.truncf %149 : vector<2x128xf32> to vector<2x128xbf16>
    %c10_117 = arith.constant 10 : index
    %c0_118 = arith.constant 0 : index
    %c0_119 = arith.constant 0 : index
    %151 = vector.load %arg3[%c10_117, %c0_118, %c0_119] : memref<16x128x256xbf16, #tpu.memory_space<vmem>>, vector<1x128x256xbf16>
    %152 = vector.shape_cast %151 : vector<1x128x256xbf16> to vector<128x256xbf16>
    %cst_120 = arith.constant dense<0.000000e+00> : vector<2x256xf32>
    %153 = tpu.matmul %150, %152, %cst_120 {dimension_numbers = #tpu.dot_dimension_numbers<[1], [0], [0], [1], [0, 0, 1, 1], [], []>} : vector<2x128xbf16>, vector<128x256xbf16>, vector<2x256xf32> -> vector<2x256xf32>
    %154 = arith.addf %140, %153 : vector<2x256xf32>
    %c11 = arith.constant 11 : index
    %c0_121 = arith.constant 0 : index
    %c0_122 = arith.constant 0 : index
    %155 = vector.load %arg1[%c11, %c0_121, %c0_122] : memref<16x2x1024xbf16, #tpu.memory_space<vmem>>, vector<1x2x1024xbf16>
    %156 = vector.shape_cast %155 : vector<1x2x1024xbf16> to vector<2x1024xbf16>
    %c0_123 = arith.constant 0 : index
    %c0_124 = arith.constant 0 : index
    %157 = vector.load %arg2[%c0_123, %c0_124] : memref<1024x128xbf16, #tpu.memory_space<vmem>>, vector<1024x128xbf16>
    %cst_125 = arith.constant dense<0.000000e+00> : vector<2x128xf32>
    %158 = tpu.matmul %156, %157, %cst_125 {dimension_numbers = #tpu.dot_dimension_numbers<[1], [0], [0], [1], [0, 0, 1, 1], [], []>} : vector<2x1024xbf16>, vector<1024x128xbf16>, vector<2x128xf32> -> vector<2x128xf32>
    %cst_126 = arith.constant 0.000000e+00 : f32
    %159 = vector.broadcast %cst_126 : f32 to vector<2x128xf32>
    %160 = arith.cmpf ogt, %158, %159 : vector<2x128xf32>
    %cst_127 = arith.constant 2.000000e-01 : f32
    %161 = vector.broadcast %cst_127 : f32 to vector<2x128xf32>
    %162 = arith.mulf %161, %158 : vector<2x128xf32>
    %163 = arith.select %160, %158, %162 : vector<2x128xi1>, vector<2x128xf32>
    %164 = arith.truncf %163 : vector<2x128xf32> to vector<2x128xbf16>
    %c11_128 = arith.constant 11 : index
    %c0_129 = arith.constant 0 : index
    %c0_130 = arith.constant 0 : index
    %165 = vector.load %arg3[%c11_128, %c0_129, %c0_130] : memref<16x128x256xbf16, #tpu.memory_space<vmem>>, vector<1x128x256xbf16>
    %166 = vector.shape_cast %165 : vector<1x128x256xbf16> to vector<128x256xbf16>
    %cst_131 = arith.constant dense<0.000000e+00> : vector<2x256xf32>
    %167 = tpu.matmul %164, %166, %cst_131 {dimension_numbers = #tpu.dot_dimension_numbers<[1], [0], [0], [1], [0, 0, 1, 1], [], []>} : vector<2x128xbf16>, vector<128x256xbf16>, vector<2x256xf32> -> vector<2x256xf32>
    %168 = arith.addf %154, %167 : vector<2x256xf32>
    %c12 = arith.constant 12 : index
    %c0_132 = arith.constant 0 : index
    %c0_133 = arith.constant 0 : index
    %169 = vector.load %arg1[%c12, %c0_132, %c0_133] : memref<16x2x1024xbf16, #tpu.memory_space<vmem>>, vector<1x2x1024xbf16>
    %170 = vector.shape_cast %169 : vector<1x2x1024xbf16> to vector<2x1024xbf16>
    %c0_134 = arith.constant 0 : index
    %c0_135 = arith.constant 0 : index
    %171 = vector.load %arg2[%c0_134, %c0_135] : memref<1024x128xbf16, #tpu.memory_space<vmem>>, vector<1024x128xbf16>
    %cst_136 = arith.constant dense<0.000000e+00> : vector<2x128xf32>
    %172 = tpu.matmul %170, %171, %cst_136 {dimension_numbers = #tpu.dot_dimension_numbers<[1], [0], [0], [1], [0, 0, 1, 1], [], []>} : vector<2x1024xbf16>, vector<1024x128xbf16>, vector<2x128xf32> -> vector<2x128xf32>
    %cst_137 = arith.constant 0.000000e+00 : f32
    %173 = vector.broadcast %cst_137 : f32 to vector<2x128xf32>
    %174 = arith.cmpf ogt, %172, %173 : vector<2x128xf32>
    %cst_138 = arith.constant 2.000000e-01 : f32
    %175 = vector.broadcast %cst_138 : f32 to vector<2x128xf32>
    %176 = arith.mulf %175, %172 : vector<2x128xf32>
    %177 = arith.select %174, %172, %176 : vector<2x128xi1>, vector<2x128xf32>
    %178 = arith.truncf %177 : vector<2x128xf32> to vector<2x128xbf16>
    %c12_139 = arith.constant 12 : index
    %c0_140 = arith.constant 0 : index
    %c0_141 = arith.constant 0 : index
    %179 = vector.load %arg3[%c12_139, %c0_140, %c0_141] : memref<16x128x256xbf16, #tpu.memory_space<vmem>>, vector<1x128x256xbf16>
    %180 = vector.shape_cast %179 : vector<1x128x256xbf16> to vector<128x256xbf16>
    %cst_142 = arith.constant dense<0.000000e+00> : vector<2x256xf32>
    %181 = tpu.matmul %178, %180, %cst_142 {dimension_numbers = #tpu.dot_dimension_numbers<[1], [0], [0], [1], [0, 0, 1, 1], [], []>} : vector<2x128xbf16>, vector<128x256xbf16>, vector<2x256xf32> -> vector<2x256xf32>
    %182 = arith.addf %168, %181 : vector<2x256xf32>
    %c13 = arith.constant 13 : index
    %c0_143 = arith.constant 0 : index
    %c0_144 = arith.constant 0 : index
    %183 = vector.load %arg1[%c13, %c0_143, %c0_144] : memref<16x2x1024xbf16, #tpu.memory_space<vmem>>, vector<1x2x1024xbf16>
    %184 = vector.shape_cast %183 : vector<1x2x1024xbf16> to vector<2x1024xbf16>
    %c0_145 = arith.constant 0 : index
    %c0_146 = arith.constant 0 : index
    %185 = vector.load %arg2[%c0_145, %c0_146] : memref<1024x128xbf16, #tpu.memory_space<vmem>>, vector<1024x128xbf16>
    %cst_147 = arith.constant dense<0.000000e+00> : vector<2x128xf32>
    %186 = tpu.matmul %184, %185, %cst_147 {dimension_numbers = #tpu.dot_dimension_numbers<[1], [0], [0], [1], [0, 0, 1, 1], [], []>} : vector<2x1024xbf16>, vector<1024x128xbf16>, vector<2x128xf32> -> vector<2x128xf32>
    %cst_148 = arith.constant 0.000000e+00 : f32
    %187 = vector.broadcast %cst_148 : f32 to vector<2x128xf32>
    %188 = arith.cmpf ogt, %186, %187 : vector<2x128xf32>
    %cst_149 = arith.constant 2.000000e-01 : f32
    %189 = vector.broadcast %cst_149 : f32 to vector<2x128xf32>
    %190 = arith.mulf %189, %186 : vector<2x128xf32>
    %191 = arith.select %188, %186, %190 : vector<2x128xi1>, vector<2x128xf32>
    %192 = arith.truncf %191 : vector<2x128xf32> to vector<2x128xbf16>
    %c13_150 = arith.constant 13 : index
    %c0_151 = arith.constant 0 : index
    %c0_152 = arith.constant 0 : index
    %193 = vector.load %arg3[%c13_150, %c0_151, %c0_152] : memref<16x128x256xbf16, #tpu.memory_space<vmem>>, vector<1x128x256xbf16>
    %194 = vector.shape_cast %193 : vector<1x128x256xbf16> to vector<128x256xbf16>
    %cst_153 = arith.constant dense<0.000000e+00> : vector<2x256xf32>
    %195 = tpu.matmul %192, %194, %cst_153 {dimension_numbers = #tpu.dot_dimension_numbers<[1], [0], [0], [1], [0, 0, 1, 1], [], []>} : vector<2x128xbf16>, vector<128x256xbf16>, vector<2x256xf32> -> vector<2x256xf32>
    %196 = arith.addf %182, %195 : vector<2x256xf32>
    %c14 = arith.constant 14 : index
    %c0_154 = arith.constant 0 : index
    %c0_155 = arith.constant 0 : index
    %197 = vector.load %arg1[%c14, %c0_154, %c0_155] : memref<16x2x1024xbf16, #tpu.memory_space<vmem>>, vector<1x2x1024xbf16>
    %198 = vector.shape_cast %197 : vector<1x2x1024xbf16> to vector<2x1024xbf16>
    %c0_156 = arith.constant 0 : index
    %c0_157 = arith.constant 0 : index
    %199 = vector.load %arg2[%c0_156, %c0_157] : memref<1024x128xbf16, #tpu.memory_space<vmem>>, vector<1024x128xbf16>
    %cst_158 = arith.constant dense<0.000000e+00> : vector<2x128xf32>
    %200 = tpu.matmul %198, %199, %cst_158 {dimension_numbers = #tpu.dot_dimension_numbers<[1], [0], [0], [1], [0, 0, 1, 1], [], []>} : vector<2x1024xbf16>, vector<1024x128xbf16>, vector<2x128xf32> -> vector<2x128xf32>
    %cst_159 = arith.constant 0.000000e+00 : f32
    %201 = vector.broadcast %cst_159 : f32 to vector<2x128xf32>
    %202 = arith.cmpf ogt, %200, %201 : vector<2x128xf32>
    %cst_160 = arith.constant 2.000000e-01 : f32
    %203 = vector.broadcast %cst_160 : f32 to vector<2x128xf32>
    %204 = arith.mulf %203, %200 : vector<2x128xf32>
    %205 = arith.select %202, %200, %204 : vector<2x128xi1>, vector<2x128xf32>
    %206 = arith.truncf %205 : vector<2x128xf32> to vector<2x128xbf16>
    %c14_161 = arith.constant 14 : index
    %c0_162 = arith.constant 0 : index
    %c0_163 = arith.constant 0 : index
    %207 = vector.load %arg3[%c14_161, %c0_162, %c0_163] : memref<16x128x256xbf16, #tpu.memory_space<vmem>>, vector<1x128x256xbf16>
    %208 = vector.shape_cast %207 : vector<1x128x256xbf16> to vector<128x256xbf16>
    %cst_164 = arith.constant dense<0.000000e+00> : vector<2x256xf32>
    %209 = tpu.matmul %206, %208, %cst_164 {dimension_numbers = #tpu.dot_dimension_numbers<[1], [0], [0], [1], [0, 0, 1, 1], [], []>} : vector<2x128xbf16>, vector<128x256xbf16>, vector<2x256xf32> -> vector<2x256xf32>
    %210 = arith.addf %196, %209 : vector<2x256xf32>
    %c15 = arith.constant 15 : index
    %c0_165 = arith.constant 0 : index
    %c0_166 = arith.constant 0 : index
    %211 = vector.load %arg1[%c15, %c0_165, %c0_166] : memref<16x2x1024xbf16, #tpu.memory_space<vmem>>, vector<1x2x1024xbf16>
    %212 = vector.shape_cast %211 : vector<1x2x1024xbf16> to vector<2x1024xbf16>
    %c0_167 = arith.constant 0 : index
    %c0_168 = arith.constant 0 : index
    %213 = vector.load %arg2[%c0_167, %c0_168] : memref<1024x128xbf16, #tpu.memory_space<vmem>>, vector<1024x128xbf16>
    %cst_169 = arith.constant dense<0.000000e+00> : vector<2x128xf32>
    %214 = tpu.matmul %212, %213, %cst_169 {dimension_numbers = #tpu.dot_dimension_numbers<[1], [0], [0], [1], [0, 0, 1, 1], [], []>} : vector<2x1024xbf16>, vector<1024x128xbf16>, vector<2x128xf32> -> vector<2x128xf32>
    %cst_170 = arith.constant 0.000000e+00 : f32
    %215 = vector.broadcast %cst_170 : f32 to vector<2x128xf32>
    %216 = arith.cmpf ogt, %214, %215 : vector<2x128xf32>
    %cst_171 = arith.constant 2.000000e-01 : f32
    %217 = vector.broadcast %cst_171 : f32 to vector<2x128xf32>
    %218 = arith.mulf %217, %214 : vector<2x128xf32>
    %219 = arith.select %216, %214, %218 : vector<2x128xi1>, vector<2x128xf32>
    %220 = arith.truncf %219 : vector<2x128xf32> to vector<2x128xbf16>
    %c15_172 = arith.constant 15 : index
    %c0_173 = arith.constant 0 : index
    %c0_174 = arith.constant 0 : index
    %221 = vector.load %arg3[%c15_172, %c0_173, %c0_174] : memref<16x128x256xbf16, #tpu.memory_space<vmem>>, vector<1x128x256xbf16>
    %222 = vector.shape_cast %221 : vector<1x128x256xbf16> to vector<128x256xbf16>
    %cst_175 = arith.constant dense<0.000000e+00> : vector<2x256xf32>
    %223 = tpu.matmul %220, %222, %cst_175 {dimension_numbers = #tpu.dot_dimension_numbers<[1], [0], [0], [1], [0, 0, 1, 1], [], []>} : vector<2x128xbf16>, vector<128x256xbf16>, vector<2x256xf32> -> vector<2x256xf32>
    %224 = arith.addf %210, %223 : vector<2x256xf32>
    %cst_176 = arith.constant 0.000000e+00 : f32
    %225 = vector.broadcast %cst_176 : f32 to vector<2x256xf32>
    %226 = arith.cmpf ogt, %224, %225 : vector<2x256xf32>
    %cst_177 = arith.constant 2.000000e-01 : f32
    %227 = vector.broadcast %cst_177 : f32 to vector<2x256xf32>
    %228 = arith.mulf %227, %224 : vector<2x256xf32>
    %229 = arith.select %226, %224, %228 : vector<2x256xi1>, vector<2x256xf32>
    %c0_178 = arith.constant 0 : index
    %c0_179 = arith.constant 0 : index
    %230 = vector.load %arg4[%c0_178, %c0_179] : memref<1x256xf32, #tpu.memory_space<vmem>>, vector<1x256xf32>
    %231 = vector.broadcast %230 : vector<1x256xf32> to vector<2x256xf32>
    %232 = arith.mulf %229, %231 : vector<2x256xf32>
    %cst_180 = arith.constant dense<0.000000e+00> : vector<2xf32>
    %233 = vector.multi_reduction <add>, %232, %cst_180 [1] : vector<2x256xf32> to vector<2xf32>
    %234 = vector.shape_cast %233 : vector<2xf32> to vector<2x1xf32>
    %c0_181 = arith.constant 0 : index
    %235 = memref.load %arg5[%c0_181] : memref<1xf32, #tpu.memory_space<smem>>
    %236 = vector.broadcast %235 : f32 to vector<2x1xf32>
    %237 = arith.addf %234, %236 : vector<2x1xf32>
    %c0_182 = arith.constant 0 : index
    %c0_183 = arith.constant 0 : index
    %238 = vector.load %arg6[%c0_182, %c0_183] : memref<2x1xf32, #tpu.memory_space<vmem>>, vector<2x1xf32>
    tpu.vector_store %arg6[%c0_182, %c0_183], %237 {strides = array<i32>} : memref<2x1xf32, #tpu.memory_space<vmem>>, vector<2x1xf32>,
    return
  }
  func.func @transform_0(%arg0: i32) -> (i32, i32, i32) {
    %c0_i32 = arith.constant 0 : i32
    %c0_i32_0 = arith.constant 0 : i32
    %c0_i32_1 = arith.constant 0 : i32
    return %c0_i32, %arg0, %c0_i32_0 : i32, i32, i32
  }
  func.func @transform_1(%arg0: i32) -> (i32, i32) {
    %c0_i32 = arith.constant 0 : i32
    %c0_i32_0 = arith.constant 0 : i32
    %c0_i32_1 = arith.constant 0 : i32
    return %c0_i32, %c0_i32_0 : i32, i32
  }
  func.func @transform_2(%arg0: i32) -> (i32, i32, i32) {
    %c0_i32 = arith.constant 0 : i32
    %c0_i32_0 = arith.constant 0 : i32
    %c0_i32_1 = arith.constant 0 : i32
    %c0_i32_2 = arith.constant 0 : i32
    return %c0_i32, %c0_i32_0, %c0_i32_1 : i32, i32, i32
  }
  func.func @transform_3(%arg0: i32) -> (i32, i32) {
    %c0_i32 = arith.constant 0 : i32
    %c0_i32_0 = arith.constant 0 : i32
    %c0_i32_1 = arith.constant 0 : i32
    return %c0_i32, %c0_i32_0 : i32, i32
  }
  func.func @transform_4(%arg0: i32) -> i32 {
    %c0_i32 = arith.constant 0 : i32
    %c0_i32_0 = arith.constant 0 : i32
    return %c0_i32 : i32
  }
  func.func @transform_5(%arg0: i32) -> (i32, i32) {
    %c0_i32 = arith.constant 0 : i32
    %c0_i32_0 = arith.constant 0 : i32
    return %arg0, %c0_i32 : i32, i32
  }
}

</mosaic_0001>

<bundles_post_ra>
// kernel: discriminator_forward.3
= control target key start
LH: loop header
LB: loop body
LE: loop exit
PB: predicated region body
PF: predicated region fallthrough
CT: control target
= control target key end

     0   :  { %s553_s9 = smov 0   ;;  %s628_s0 = inlined_call_operand.vmem [shape: bf16[512,48], index: 0, kind: input, shape index: {}]   ;;  %s629_s1 = inlined_call_operand.vmem [shape: bf16[48,32], index: 1, kind: input, shape index: {}]   ;;  %s630_s2 = inlined_call_operand.vmem [shape: bf16[512,32], index: 2, kind: output, shape index: {}]  }
   0x1 LB: > { %s439_s10 = sadd.s32 4294967295, %s536_s9   ;;  %p443_p0 = scmp.ge.s32.totalorder %s536_s9, 1  ;;  %s536_s9 = sphi %s553_s9, %s12_s9  }
   0x2   : > { %p113_p1 = scmp.lt.s32.totalorder %s536_s9, 5 }
   0x4   : > { %p114_p2 = pnand %p443_p0, %p113_p1 }
   0x5   : > { %s444_s13 = sshll.u32 (!%p114_p2), %s439_s10, 4 }
   0x6   : > { %117 = sbr.rel (%p114_p2) target bundleno = 187 (0xbb), region = 28  ;;  %p136_p3 = scmp.lt.s32.totalorder (!%p114_p2), %s444_s13, 63 }
   0xb   : > { %v512_v0 = vld [vmem:[%s629_s1 + $0x10] sm:$0xff]  ;;  %v511_v1 = vld [vmem:[%s629_s1 + $0x8] sm:$0xff]  ;;  %s632_s13 = smov (!%p136_p3, %s444_s13), 63  ;;  %v510_v2 = vld [vmem:[%s629_s1] sm:$0xff]  ;;  %vm228_vm0 = vcmask 392192   ;;  %vm366_vm3 = vcmask 257024  }
   0xc   : > { %258 = vmatpush.bf16.msra.mxu0 %v512_v0  ;;  %513 = vmatpush.bf16.msra.mxu1 %v512_v0  ;;  %s445_s16 = sshll.u32 %s632_s13, 2 }
   0xd   : > { %514 = vmatpush.bf16.msra.mxu2 %v512_v0  ;;  %515 = vmatpush.bf16.msra.mxu3 %v512_v0  ;;  %s139_s21 = scalar_lea.vmem %s628_s0, %s445_s16  ;;  %s591_s24 = scalar_lea.vmem %s630_s2, %s445_s16 }
   0xe   : > { %v502_v3 = vld [vmem:[%s139_s21] sm:$0xff]  ;;  %v504_v4 = vld [vmem:[%s139_s21 + $0x10] sm:$0xff]  ;;  %v503_v7 = vld [vmem:[%s139_s21 + $0x8] sm:$0xff] }
   0xf   : > { %v506_v5 = vld [vmem:[%s139_s21 + $0x20] sm:$0xff]  ;;  %v508_v6 = vld [vmem:[%s139_s21 + $0x30] sm:$0xff]  ;;  %v505_v8 = vld [vmem:[%s139_s21 + $0x18] sm:$0xff] }
  0x10   : > { %259 = vmatpush.bf16.msra.mxu0 %v511_v1  ;;  %516 = vmatpush.bf16.msra.mxu1 %v511_v1  ;;  %v507_v9 = vld [vmem:[%s139_s21 + $0x28] sm:$0xff]  ;;  %v509_v10 = vld [vmem:[%s139_s21 + $0x38] sm:$0xff] }
  0x11   : > { %517 = vmatpush.bf16.msra.mxu2 %v511_v1  ;;  %518 = vmatpush.bf16.msra.mxu3 %v511_v1 }
  0x14   : > { %260 = vmatpush.bf16.msra.mxu0 %v510_v2  ;;  %519 = vmatpush.bf16.msra.mxu1 %v510_v2 }
  0x15   : > { %520 = vmatpush.bf16.msra.mxu2 %v510_v2  ;;  %521 = vmatpush.bf16.msra.mxu3 %v510_v2 }
  0x17   : > { %492 = vmatmul.msk.bf16.vlgmr.msra.gmra.mxu0 %vm228_vm0, %v502_v3  ;;  %494 = vmatmul.msk.bf16.vlgmr.msra.gmra.mxu1 %vm228_vm0, %v504_v4 }
  0x18   : > { %496 = vmatmul.msk.bf16.vlgmr.msra.gmra.mxu2 %vm228_vm0, %v506_v5  ;;  %498 = vmatmul.msk.bf16.vlgmr.msra.gmra.mxu3 %vm228_vm0, %v508_v6 }
  0x27   : > { %493 = vmatmul.msk.bf16.gmra.mxu0 %vm228_vm0, %v503_v7  ;;  %495 = vmatmul.msk.bf16.gmra.mxu1 %vm228_vm0, %v505_v8 }
  0x28   : > { %497 = vmatmul.msk.bf16.gmra.mxu2 %vm228_vm0, %v507_v9  ;;  %499 = vmatmul.msk.bf16.gmra.mxu3 %vm228_vm0, %v509_v10 }
  0x94   : > { %v262_v11 = vpop.f32.mrf.mxu0  ;;  %v272_v12 = vpop.f32.mrf.mxu1 }
  0x95   : > { %vm302_vm1 = vcmp.gt.f32.partialorder %v262_v11, 0.0  ;;  %v318_v13 = vmul.f32 0.2, %v262_v11  ;;  %vm306_vm2 = vcmp.gt.f32.partialorder %v272_v12, 0.0  ;;  %v322_v14 = vmul.f32 0.2, %v272_v12 }
  0x97   : > { %v334_v15 = vsel %vm302_vm1, %v262_v11, %v318_v13  ;;  %v338_v16 = vsel %vm306_vm2, %v272_v12, %v322_v14 }
  0x98   : > { %v350_v17 = vpack.c.bf16 %v334_v15, %v334_v15  ;;  %v354_v18 = vpack.c.bf16 %v338_v16, %v338_v16 }
  0x9a   : > { %367 = vst.msk [vmem:[%s591_s24] sm:$0xf] %vm366_vm3, %v350_v17 }
  0x9b   : > { %371 = vst.msk [vmem:[%s591_s24 + $0x10] sm:$0xf] %vm366_vm3, %v354_v18  ;;  %v282_v19 = vpop.f32.mrf.mxu2  ;;  %v292_v20 = vpop.f32.mrf.mxu3 }
  0x9c   : > { %vm310_vm4 = vcmp.gt.f32.partialorder %v282_v19, 0.0  ;;  %v326_v21 = vmul.f32 0.2, %v282_v19  ;;  %vm314_vm5 = vcmp.gt.f32.partialorder %v292_v20, 0.0  ;;  %v330_v22 = vmul.f32 0.2, %v292_v20  ;;  %v264_v23 = vpop.f32.mrf.mxu0  ;;  %v274_v24 = vpop.f32.mrf.mxu1 }
  0x9d   : > { %vm303_vm6 = vcmp.gt.f32.partialorder %v264_v23, 0.0  ;;  %v319_v25 = vmul.f32 0.2, %v264_v23  ;;  %vm307_vm7 = vcmp.gt.f32.partialorder %v274_v24, 0.0  ;;  %v323_v26 = vmul.f32 0.2, %v274_v24 }
  0x9e   : > { %v342_v27 = vsel %vm310_vm4, %v282_v19, %v326_v21  ;;  %v346_v28 = vsel %vm314_vm5, %v292_v20, %v330_v22 }
  0x9f   : > { %v358_v29 = vpack.c.bf16 %v342_v27, %v342_v27  ;;  %v362_v30 = vpack.c.bf16 %v346_v28, %v346_v28  ;;  %v335_v31 = vsel %vm303_vm6, %v264_v23, %v319_v25  ;;  %v339_v32 = vsel %vm307_vm7, %v274_v24, %v323_v26 }
  0xa0   : > { %v351_v33 = vpack.c.bf16 %v335_v31, %v335_v31  ;;  %v355_v34 = vpack.c.bf16 %v339_v32, %v339_v32 }
  0xa1   : > { %375 = vst.msk [vmem:[%s591_s24 + $0x20] sm:$0xf] %vm366_vm3, %v358_v29 }
  0xa2   : > { %379 = vst.msk [vmem:[%s591_s24 + $0x30] sm:$0xf] %vm366_vm3, %v362_v30 }
  0xa3   : > { %368 = vst.msk [vmem:[%s591_s24 + $0x4] sm:$0xf] %vm366_vm3, %v351_v33  ;;  %v284_v35 = vpop.f32.mrf.mxu2  ;;  %v294_v36 = vpop.f32.mrf.mxu3 }
  0xa4   : > { %372 = vst.msk [vmem:[%s591_s24 + $0x14] sm:$0xf] %vm366_vm3, %v355_v34  ;;  %vm311_vm8 = vcmp.gt.f32.partialorder %v284_v35, 0.0  ;;  %v327_v37 = vmul.f32 0.2, %v284_v35  ;;  %vm315_vm9 = vcmp.gt.f32.partialorder %v294_v36, 0.0  ;;  %v267_v38 = vpop.f32.mrf.mxu0  ;;  %v277_v39 = vpop.f32.mrf.mxu1 }
  0xa5   : > { %v331_v40 = vmul.f32 0.2, %v294_v36  ;;  %vm304_vm10 = vcmp.gt.f32.partialorder %v267_v38, 0.0  ;;  %v320_v41 = vmul.f32 0.2, %v267_v38  ;;  %vm308_vm11 = vcmp.gt.f32.partialorder %v277_v39, 0.0 }
  0xa6   : > { %v343_v42 = vsel %vm311_vm8, %v284_v35, %v327_v37  ;;  %v324_v43 = vmul.f32 0.2, %v277_v39 }
  0xa7   : > { %v359_v44 = vpack.c.bf16 %v343_v42, %v343_v42  ;;  %v347_v45 = vsel %vm315_vm9, %v294_v36, %v331_v40  ;;  %v336_v46 = vsel %vm304_vm10, %v267_v38, %v320_v41 }
  0xa8   : > { %v363_v47 = vpack.c.bf16 %v347_v45, %v347_v45  ;;  %v352_v48 = vpack.c.bf16 %v336_v46, %v336_v46  ;;  %v340_v49 = vsel %vm308_vm11, %v277_v39, %v324_v43 }
  0xa9   : > { %376 = vst.msk [vmem:[%s591_s24 + $0x24] sm:$0xf] %vm366_vm3, %v359_v44  ;;  %v356_v50 = vpack.c.bf16 %v340_v49, %v340_v49 }
  0xaa   : > { %380 = vst.msk [vmem:[%s591_s24 + $0x34] sm:$0xf] %vm366_vm3, %v363_v47 }
  0xab   : > { %369 = vst.msk [vmem:[%s591_s24 + $0x8] sm:$0xf] %vm366_vm3, %v352_v48  ;;  %v287_v51 = vpop.f32.mrf.mxu2  ;;  %v297_v52 = vpop.f32.mrf.mxu3 }
  0xac   : > { %373 = vst.msk [vmem:[%s591_s24 + $0x18] sm:$0xf] %vm366_vm3, %v356_v50  ;;  %vm312_vm12 = vcmp.gt.f32.partialorder %v287_v51, 0.0  ;;  %v328_v53 = vmul.f32 0.2, %v287_v51  ;;  %vm316_vm13 = vcmp.gt.f32.partialorder %v297_v52, 0.0  ;;  %v269_v54 = vpop.f32.mrf.mxu0  ;;  %v279_v55 = vpop.f32.mrf.mxu1 }
  0xad   : > { %v332_v56 = vmul.f32 0.2, %v297_v52  ;;  %vm305_vm14 = vcmp.gt.f32.partialorder %v269_v54, 0.0  ;;  %v321_v57 = vmul.f32 0.2, %v269_v54  ;;  %vm309_vm15 = vcmp.gt.f32.partialorder %v279_v55, 0.0 }
  0xae   : > { %v344_v58 = vsel %vm312_vm12, %v287_v51, %v328_v53  ;;  %v325_v59 = vmul.f32 0.2, %v279_v55 }
  0xaf   : > { %v360_v60 = vpack.c.bf16 %v344_v58, %v344_v58  ;;  %v348_v61 = vsel %vm316_vm13, %v297_v52, %v332_v56  ;;  %v337_v62 = vsel %vm305_vm14, %v269_v54, %v321_v57 }
  0xb0   : > { %v364_v63 = vpack.c.bf16 %v348_v61, %v348_v61  ;;  %v353_v0 = vpack.c.bf16 %v337_v62, %v337_v62  ;;  %v341_v1 = vsel %vm309_vm15, %v279_v55, %v325_v59 }
  0xb1   : > { %377 = vst.msk [vmem:[%s591_s24 + $0x28] sm:$0xf] %vm366_vm3, %v360_v60  ;;  %v357_v2 = vpack.c.bf16 %v341_v1, %v341_v1 }
  0xb2   : > { %381 = vst.msk [vmem:[%s591_s24 + $0x38] sm:$0xf] %vm366_vm3, %v364_v63 }
  0xb3   : > { %370 = vst.msk [vmem:[%s591_s24 + $0xc] sm:$0xf] %vm366_vm3, %v353_v0  ;;  %v289_v3 = vpop.f32.mrf.mxu2  ;;  %v299_v4 = vpop.f32.mrf.mxu3 }
  0xb4   : > { %374 = vst.msk [vmem:[%s591_s24 + $0x1c] sm:$0xf] %vm366_vm3, %v357_v2  ;;  %vm313_vm0 = vcmp.gt.f32.partialorder %v289_v3, 0.0  ;;  %v329_v5 = vmul.f32 0.2, %v289_v3  ;;  %vm317_vm1 = vcmp.gt.f32.partialorder %v299_v4, 0.0 }
  0xb5   : > { %v333_v6 = vmul.f32 0.2, %v299_v4 }
  0xb6   : > { %v345_v7 = vsel %vm313_vm0, %v289_v3, %v329_v5 }
  0xb7   : > { %v361_v8 = vpack.c.bf16 %v345_v7, %v345_v7  ;;  %v349_v9 = vsel %vm317_vm1, %v299_v4, %v333_v6 }
  0xb8   : > { %v365_v10 = vpack.c.bf16 %v349_v9, %v349_v9 }
  0xb9   : > { %378 = vst.msk [vmem:[%s591_s24 + $0x2c] sm:$0xf] %vm366_vm3, %v361_v8 }
  0xba   : > { %382 = vst.msk [vmem:[%s591_s24 + $0x3c] sm:$0xf] %vm366_vm3, %v365_v10 }
  0xbb PF: > { %s12_s9 = sadd.s32 1, %s536_s9  }
  0xbc   : > { %p9_p4 = scmp.ge.s32.totalorder %s12_s9, 6  }
  0xbe   :  { %11 = sbr.rel (!%p9_p4) target bundleno = 1 (0x1), region = 58 }

// kernel: discriminator_forward.4
= control target key start
LH: loop header
LB: loop body
LE: loop exit
PB: predicated region body
PF: predicated region fallthrough
CT: control target
= control target key end

     0   :  { %s851_s9 = smov 0   ;;  %s996_s0 = inlined_call_operand.vmem [shape: bf16[128,512], index: 0, kind: input, shape index: {}]   ;;  %s997_s1 = inlined_call_operand.vmem [shape: bf16[512,64], index: 1, kind: input, shape index: {}]   ;;  %s998_s2 = inlined_call_operand.vmem [shape: bf16[128,64], index: 2, kind: output, shape index: {}]  }
   0x1 LB: > { %s607_s10 = sadd.s32 4294967295, %s834_s9   ;;  %p611_p0 = scmp.ge.s32.totalorder %s834_s9, 1  ;;  %s834_s9 = sphi %s851_s9, %s12_s9  }
   0x2   : > { %p114_p1 = scmp.lt.s32.totalorder %s834_s9, 5 }
   0x4   : > { %p115_p2 = pnand %p611_p0, %p114_p1 }
   0x5   : > { %s612_s7 = sshll.u32 (!%p115_p2), %s607_s10, 2 }
   0x6   : > { %118 = sbr.rel (%p115_p2) target bundleno = 211 (0xd3), region = 28  ;;  %p138_p3 = scmp.lt.s32.totalorder (!%p115_p2), %s612_s7, 15 }
   0xb   : > { %v795_v0 = vld [vmem:[%s997_s1 + $0x38] sm:$0xff]  ;;  %v794_v4 = vld [vmem:[%s997_s1 + $0x30] sm:$0xff]  ;;  %v793_v8 = vld [vmem:[%s997_s1 + $0x28] sm:$0xff]  ;;  %s1000_s7 = smov (!%p138_p3, %s612_s7), 15  ;;  %vm546_vm1 = vcmask 519168  }
   0xc   : > { %v803_v1 = vld [vmem:[%s997_s1 + $0x78] sm:$0xff]  ;;  %454 = vmatpush.bf16.msra.mxu0 %v795_v0  ;;  %v802_v5 = vld [vmem:[%s997_s1 + $0x70] sm:$0xff]  ;;  %v801_v9 = vld [vmem:[%s997_s1 + $0x68] sm:$0xff]  ;;  %s779_s5 = sshll.u32 %s1000_s7, 4  ;;  %s616_s27 = sshll.u32 %s1000_s7, 2 }
   0xd   : > { %v811_v2 = vld [vmem:[%s997_s1 + $0xb8] sm:$0xff]  ;;  %473 = vmatpush.bf16.msra.mxu1 %v803_v1  ;;  %v810_v6 = vld [vmem:[%s997_s1 + $0xb0] sm:$0xff]  ;;  %v809_v10 = vld [vmem:[%s997_s1 + $0xa8] sm:$0xff]  ;;  %s943_s15 = scalar_lea.vmem %s996_s0, %s779_s5  ;;  %s983_s30 = scalar_lea.vmem %s998_s2, %s616_s27 }
   0xe   : > { %v819_v3 = vld [vmem:[%s997_s1 + $0xf8] sm:$0xff]  ;;  %492 = vmatpush.bf16.msra.mxu2 %v811_v2  ;;  %v818_v7 = vld [vmem:[%s997_s1 + $0xf0] sm:$0xff]  ;;  %v817_v11 = vld [vmem:[%s997_s1 + $0xe8] sm:$0xff] }
   0xf   : > { %511 = vmatpush.bf16.msra.mxu3 %v819_v3  ;;  %v792_v12 = vld [vmem:[%s997_s1 + $0x20] sm:$0xff]  ;;  %v791_v16 = vld [vmem:[%s997_s1 + $0x18] sm:$0xff]  ;;  %v790_v20 = vld [vmem:[%s997_s1 + $0x10] sm:$0xff] }
  0x10   : > { %455 = vmatpush.bf16.msra.mxu0 %v794_v4  ;;  %v800_v13 = vld [vmem:[%s997_s1 + $0x60] sm:$0xff]  ;;  %v799_v17 = vld [vmem:[%s997_s1 + $0x58] sm:$0xff]  ;;  %v798_v21 = vld [vmem:[%s997_s1 + $0x50] sm:$0xff] }
  0x11   : > { %474 = vmatpush.bf16.msra.mxu1 %v802_v5  ;;  %v808_v14 = vld [vmem:[%s997_s1 + $0xa0] sm:$0xff]  ;;  %v807_v18 = vld [vmem:[%s997_s1 + $0x98] sm:$0xff]  ;;  %v806_v22 = vld [vmem:[%s997_s1 + $0x90] sm:$0xff] }
  0x12   : > { %493 = vmatpush.bf16.msra.mxu2 %v810_v6  ;;  %v816_v15 = vld [vmem:[%s997_s1 + $0xe0] sm:$0xff]  ;;  %v815_v19 = vld [vmem:[%s997_s1 + $0xd8] sm:$0xff]  ;;  %v814_v23 = vld [vmem:[%s997_s1 + $0xd0] sm:$0xff] }
  0x13   : > { %512 = vmatpush.bf16.msra.mxu3 %v818_v7  ;;  %v789_v24 = vld [vmem:[%s997_s1 + $0x8] sm:$0xff]  ;;  %v788_v28 = vld [vmem:[%s997_s1] sm:$0xff]  ;;  %v782_v33 = vld [vmem:[%s943_s15 + $0xc] sm:$0xf0] }
  0x14   : > { %456 = vmatpush.bf16.msra.mxu0 %v793_v8  ;;  %v797_v25 = vld [vmem:[%s997_s1 + $0x48] sm:$0xff]  ;;  %v796_v29 = vld [vmem:[%s997_s1 + $0x40] sm:$0xff]  ;;  %v621_v35 = vld [vmem:[%s943_s15 + $0x10] sm:$0xf0] }
  0x15   : > { %475 = vmatpush.bf16.msra.mxu1 %v801_v9  ;;  %v805_v26 = vld [vmem:[%s997_s1 + $0x88] sm:$0xff]  ;;  %v804_v30 = vld [vmem:[%s997_s1 + $0x80] sm:$0xff]  ;;  %v783_v37 = vld [vmem:[%s943_s15 + $0x14] sm:$0xf0] }
  0x16   : > { %494 = vmatpush.bf16.msra.mxu2 %v809_v10  ;;  %v813_v27 = vld [vmem:[%s997_s1 + $0xc8] sm:$0xff]  ;;  %v812_v31 = vld [vmem:[%s997_s1 + $0xc0] sm:$0xff]  ;;  %v629_v39 = vld [vmem:[%s943_s15 + $0x18] sm:$0xf0] }
  0x17   : > { %513 = vmatpush.bf16.msra.mxu3 %v817_v11  ;;  %v619_v32 = vld [vmem:[%s943_s15] sm:$0xf]  ;;  %v780_v34 = vld [vmem:[%s943_s15 + $0x4] sm:$0xf]  ;;  %v627_v36 = vld [vmem:[%s943_s15 + $0x8] sm:$0xf] }
  0x18   : > { %457 = vmatpush.bf16.msra.mxu0 %v792_v12  ;;  %v781_v38 = vld [vmem:[%s943_s15 + $0xc] sm:$0xf]  ;;  %v620_v40 = vor.u32 %v782_v33, %v619_v32  ;;  %v624_v41 = vor.u32 %v780_v34, %v621_v35  ;;  %v628_v42 = vor.u32 %v783_v37, %v627_v36  ;;  %v635_v44 = vld [vmem:[%s943_s15 + $0x20] sm:$0xf]  ;;  %v786_v45 = vld [vmem:[%s943_s15 + $0x2c] sm:$0xf0] }
  0x19   : > { %476 = vmatpush.bf16.msra.mxu1 %v800_v13  ;;  %v632_v43 = vor.u32 %v781_v38, %v629_v39  ;;  %v784_v46 = vld [vmem:[%s943_s15 + $0x24] sm:$0xf]  ;;  %v637_v47 = vld [vmem:[%s943_s15 + $0x30] sm:$0xf0]  ;;  %v643_v48 = vld [vmem:[%s943_s15 + $0x28] sm:$0xf]  ;;  %v636_v52 = vor.u32 %v786_v45, %v635_v44 }
  0x1a   : > { %495 = vmatpush.bf16.msra.mxu2 %v808_v14  ;;  %v787_v49 = vld [vmem:[%s943_s15 + $0x34] sm:$0xf0]  ;;  %v785_v50 = vld [vmem:[%s943_s15 + $0x2c] sm:$0xf]  ;;  %v645_v51 = vld [vmem:[%s943_s15 + $0x38] sm:$0xf0]  ;;  %v640_v53 = vor.u32 %v784_v46, %v637_v47 }
  0x1b   : > { %514 = vmatpush.bf16.msra.mxu3 %v816_v15  ;;  %v644_v54 = vor.u32 %v787_v49, %v643_v48  ;;  %v648_v55 = vor.u32 %v785_v50, %v645_v51 }
  0x1c   : > { %458 = vmatpush.bf16.msra.mxu0 %v791_v16 }
  0x1d   : > { %477 = vmatpush.bf16.msra.mxu1 %v799_v17 }
  0x1e   : > { %496 = vmatpush.bf16.msra.mxu2 %v807_v18 }
  0x1f   : > { %515 = vmatpush.bf16.msra.mxu3 %v815_v19 }
  0x20   : > { %459 = vmatpush.bf16.msra.mxu0 %v790_v20 }
  0x21   : > { %478 = vmatpush.bf16.msra.mxu1 %v798_v21 }
  0x22   : > { %497 = vmatpush.bf16.msra.mxu2 %v806_v22 }
  0x23   : > { %516 = vmatpush.bf16.msra.mxu3 %v814_v23 }
  0x24   : > { %460 = vmatpush.bf16.msra.mxu0 %v789_v24 }
  0x25   : > { %479 = vmatpush.bf16.msra.mxu1 %v797_v25 }
  0x26   : > { %498 = vmatpush.bf16.msra.mxu2 %v805_v26 }
  0x27   : > { %517 = vmatpush.bf16.msra.mxu3 %v813_v27 }
  0x28   : > { %461 = vmatpush.bf16.msra.mxu0 %v788_v28 }
  0x29   : > { %480 = vmatpush.bf16.msra.mxu1 %v796_v29 }
  0x2a   : > { %499 = vmatpush.bf16.msra.mxu2 %v804_v30 }
  0x2b   : > { %518 = vmatpush.bf16.msra.mxu3 %v812_v31  ;;  %462 = vmatmul.bf16.vlgmr.msra.gmra.mxu0 %v620_v40 }
  0x2c   : > { %481 = vmatmul.bf16.vlgmr.msra.gmra.mxu1 %v624_v41 }
  0x2d   : > { %500 = vmatmul.bf16.vlgmr.msra.gmra.mxu2 %v628_v42 }
  0x2e   : > { %519 = vmatmul.bf16.vlgmr.msra.gmra.mxu3 %v632_v43 }
  0x3b   : > { %467 = vmatmul.bf16.gmra.mxu0 %v636_v52 }
  0x3c   : > { %486 = vmatmul.bf16.gmra.mxu1 %v640_v53 }
  0x3d   : > { %505 = vmatmul.bf16.gmra.mxu2 %v644_v54 }
  0x3e   : > { %524 = vmatmul.bf16.gmra.mxu3 %v648_v55 }
  0xa8   : > { %v463_v56 = vpop.f32.mrf.mxu0 }
  0xa9   : > { %v482_v57 = vpop.f32.mrf.mxu1 }
  0xaa   : > { %v483_v58 = vadd.f32 %v482_v57, %v463_v56 }
  0xb0   : > { %v501_v59 = vpop.f32.mrf.mxu2  ;;  %v465_v62 = vpop.f32.mrf.mxu0 }
  0xb1   : > { %v520_v60 = vpop.f32.mrf.mxu3  ;;  %v502_v61 = vadd.f32 %v501_v59, %v483_v58  ;;  %v484_v63 = vpop.f32.mrf.mxu1 }
  0xb2   : > { %v485_v3 = vadd.f32 %v484_v63, %v465_v62 }
  0xb3   : > { %v521_v0 = vadd.f32 %v520_v60, %v502_v61 }
  0xb5   : > { %vm530_vm0 = vcmp.gt.f32.partialorder %v521_v0, 0.0  ;;  %v534_v1 = vmul.f32 0.2, %v521_v0 }
  0xb7   : > { %v538_v2 = vsel %vm530_vm0, %v521_v0, %v534_v1 }
  0xb8   : > { %v542_v4 = vpack.c.bf16 %v538_v2, %v538_v2  ;;  %v503_v5 = vpop.f32.mrf.mxu2  ;;  %v468_v8 = vpop.f32.mrf.mxu0 }
  0xb9   : > { %v522_v6 = vpop.f32.mrf.mxu3  ;;  %v504_v7 = vadd.f32 %v503_v5, %v485_v3  ;;  %v487_v9 = vpop.f32.mrf.mxu1 }
  0xba   : > { %547 = vst.msk [vmem:[%s983_s30] sm:$0xf] %vm546_vm1, %v542_v4  ;;  %v488_v12 = vadd.f32 %v487_v9, %v468_v8 }
  0xbb   : > { %v523_v10 = vadd.f32 %v522_v6, %v504_v7 }
  0xbd   : > { %vm531_vm2 = vcmp.gt.f32.partialorder %v523_v10, 0.0  ;;  %v535_v11 = vmul.f32 0.2, %v523_v10 }
  0xbf   : > { %v539_v13 = vsel %vm531_vm2, %v523_v10, %v535_v11 }
  0xc0   : > { %v543_v14 = vpack.c.bf16 %v539_v13, %v539_v13  ;;  %v506_v15 = vpop.f32.mrf.mxu2  ;;  %v470_v19 = vpop.f32.mrf.mxu0 }
  0xc1   : > { %v525_v16 = vpop.f32.mrf.mxu3  ;;  %v507_v17 = vadd.f32 %v506_v15, %v488_v12  ;;  %v489_v20 = vpop.f32.mrf.mxu1 }
  0xc2   : > { %548 = vst.msk [vmem:[%s983_s30 + $0x4] sm:$0xf] %vm546_vm1, %v543_v14  ;;  %v490_v23 = vadd.f32 %v489_v20, %v470_v19 }
  0xc3   : > { %v526_v18 = vadd.f32 %v525_v16, %v507_v17 }
  0xc5   : > { %vm532_vm3 = vcmp.gt.f32.partialorder %v526_v18, 0.0  ;;  %v536_v21 = vmul.f32 0.2, %v526_v18 }
  0xc7   : > { %v540_v22 = vsel %vm532_vm3, %v526_v18, %v536_v21 }
  0xc8   : > { %v544_v24 = vpack.c.bf16 %v540_v22, %v540_v22  ;;  %v508_v25 = vpop.f32.mrf.mxu2 }
  0xc9   : > { %v509_v26 = vadd.f32 %v508_v25, %v490_v23  ;;  %v527_v27 = vpop.f32.mrf.mxu3 }
  0xca   : > { %549 = vst.msk [vmem:[%s983_s30 + $0x8] sm:$0xf] %vm546_vm1, %v544_v24 }
  0xcb   : > { %v528_v28 = vadd.f32 %v527_v27, %v509_v26 }
  0xcd   : > { %vm533_vm4 = vcmp.gt.f32.partialorder %v528_v28, 0.0  ;;  %v537_v29 = vmul.f32 0.2, %v528_v28 }
  0xcf   : > { %v541_v30 = vsel %vm533_vm4, %v528_v28, %v537_v29 }
  0xd0   : > { %v545_v31 = vpack.c.bf16 %v541_v30, %v541_v30 }
  0xd2   : > { %550 = vst.msk [vmem:[%s983_s30 + $0xc] sm:$0xf] %vm546_vm1, %v545_v31 }
  0xd3 PF: > { %s12_s9 = sadd.s32 1, %s834_s9  }
  0xd4   : > { %p9_p4 = scmp.ge.s32.totalorder %s12_s9, 6  }
  0xd6   :  { %11 = sbr.rel (!%p9_p4) target bundleno = 1 (0x1), region = 58 }

// kernel: discriminator_forward.5
= control target key start
LH: loop header
LB: loop body
LE: loop exit
PB: predicated region body
PF: predicated region fallthrough
CT: control target
= control target key end

     0   :  { %s11172_s1 = inlined_call_operand.vmem [shape: bf16[1024,128], index: 1, kind: input, shape index: {}]   ;;  %s11173_s0 = inlined_call_operand.vmem [shape: bf16[16,2,1024], index: 0, kind: input, shape index: {}]   ;;  %s11174_s2 = inlined_call_operand.vmem [shape: bf16[16,128,256], index: 2, kind: input, shape index: {}]   ;;  %s11175_s3 = inlined_call_operand.vmem [shape: f32[1,256], index: 3, kind: input, shape index: {}]   ;;  %s11176_s4 = inlined_call_operand.<no memory space> [shape: f32[1], index: 4, kind: input, shape index: {}]   ;;  %s11177_s5 = inlined_call_operand.vmem [shape: f32[2,1], index: 5, kind: output, shape index: {}]  }
   0x1   :  { %v6770_v0 = vld [vmem:[%s11172_s1 + $0x38] sm:$0xff]  ;;  %v6792_v4 = vld [vmem:[%s11172_s1 + $0x30] sm:$0xff]  ;;  %v6816_v8 = vld [vmem:[%s11172_s1 + $0x28] sm:$0xff] }
   0x2   :  { %v6775_v1 = vld [vmem:[%s11172_s1 + $0x78] sm:$0xff]  ;;  %552 = vmatpush.bf16.msra.mxu0 %v6770_v0  ;;  %v6797_v5 = vld [vmem:[%s11172_s1 + $0x70] sm:$0xff]  ;;  %v6821_v9 = vld [vmem:[%s11172_s1 + $0x68] sm:$0xff] }
   0x3   :  { %v6780_v2 = vld [vmem:[%s11172_s1 + $0xb8] sm:$0xff]  ;;  %565 = vmatpush.bf16.msra.mxu1 %v6775_v1  ;;  %v6804_v6 = vld [vmem:[%s11172_s1 + $0xb0] sm:$0xff]  ;;  %v6828_v10 = vld [vmem:[%s11172_s1 + $0xa8] sm:$0xff] }
   0x4   :  { %v6785_v3 = vld [vmem:[%s11172_s1 + $0xf8] sm:$0xff]  ;;  %578 = vmatpush.bf16.msra.mxu2 %v6780_v2  ;;  %v6809_v7 = vld [vmem:[%s11172_s1 + $0xf0] sm:$0xff]  ;;  %v6833_v11 = vld [vmem:[%s11172_s1 + $0xe8] sm:$0xff] }
   0x5   :  { %591 = vmatpush.bf16.msra.mxu3 %v6785_v3  ;;  %v6840_v12 = vld [vmem:[%s11172_s1 + $0x20] sm:$0xff]  ;;  %v6864_v16 = vld [vmem:[%s11172_s1 + $0x18] sm:$0xff]  ;;  %v6891_v21 = vld [vmem:[%s11172_s1 + $0x10] sm:$0xff] }
   0x6   :  { %553 = vmatpush.bf16.msra.mxu0 %v6792_v4  ;;  %v6845_v13 = vld [vmem:[%s11172_s1 + $0x60] sm:$0xff]  ;;  %v6869_v17 = vld [vmem:[%s11172_s1 + $0x58] sm:$0xff]  ;;  %v6896_v22 = vld [vmem:[%s11172_s1 + $0x50] sm:$0xff] }
   0x7   :  { %566 = vmatpush.bf16.msra.mxu1 %v6797_v5  ;;  %v6852_v14 = vld [vmem:[%s11172_s1 + $0xa0] sm:$0xff]  ;;  %v6876_v18 = vld [vmem:[%s11172_s1 + $0x98] sm:$0xff]  ;;  %v6903_v23 = vld [vmem:[%s11172_s1 + $0x90] sm:$0xff] }
   0x8   :  { %579 = vmatpush.bf16.msra.mxu2 %v6804_v6  ;;  %v6857_v15 = vld [vmem:[%s11172_s1 + $0xe0] sm:$0xff]  ;;  %v6881_v19 = vld [vmem:[%s11172_s1 + $0xd8] sm:$0xff]  ;;  %v6908_v24 = vld [vmem:[%s11172_s1 + $0xd0] sm:$0xff] }
   0x9   :  { %592 = vmatpush.bf16.msra.mxu3 %v6809_v7  ;;  %v21_v20 = vld [vmem:[%s11173_s0] sm:$0xff]  ;;  %v6915_v25 = vld [vmem:[%s11172_s1 + $0x8] sm:$0xff]  ;;  %v6961_v33 = vld [vmem:[%s11172_s1 + $0x138] sm:$0xff] }
   0xa   :  { %554 = vmatpush.bf16.msra.mxu0 %v6816_v8  ;;  %151 = vst [vmem:[#allocation1] ss:$9 sm:$0xff] %v21_v20  ;;  %v6920_v26 = vld [vmem:[%s11172_s1 + $0x48] sm:$0xff]  ;;  %v6939_v29 = vld [vmem:[%s11172_s1] sm:$0xff]  ;;  %v6966_v34 = vld [vmem:[%s11172_s1 + $0x178] sm:$0xff] }
   0xb   :  { %567 = vmatpush.bf16.msra.mxu1 %v6821_v9  ;;  %v6927_v27 = vld [vmem:[%s11172_s1 + $0x88] sm:$0xff]  ;;  %v6944_v30 = vld [vmem:[%s11172_s1 + $0x40] sm:$0xff]  ;;  %v6971_v35 = vld [vmem:[%s11172_s1 + $0x1b8] sm:$0xff] }
   0xc   :  { %580 = vmatpush.bf16.msra.mxu2 %v6828_v10  ;;  %v6932_v28 = vld [vmem:[%s11172_s1 + $0xc8] sm:$0xff]  ;;  %v6951_v31 = vld [vmem:[%s11172_s1 + $0x80] sm:$0xff]  ;;  %v6976_v36 = vld [vmem:[%s11172_s1 + $0x1f8] sm:$0xff] }
   0xd   :  { %593 = vmatpush.bf16.msra.mxu3 %v6833_v11  ;;  %v6956_v32 = vld [vmem:[%s11172_s1 + $0xc0] sm:$0xff]  ;;  %v6985_v37 = vld [vmem:[%s11172_s1 + $0x130] sm:$0xff]  ;;  %v7011_v45 = vld [vmem:[%s11172_s1 + $0x128] sm:$0xff] }
   0xe   :  { %555 = vmatpush.bf16.msra.mxu0 %v6840_v12  ;;  %11350 = vst [vmem:[#allocation3_spill] sm:$0xff] %v6985_v37  ;;  %v6992_v40 = vld [vmem:[%s11172_s1 + $0x170] sm:$0xff]  ;;  %v7016_v46 = vld [vmem:[%s11172_s1 + $0x168] sm:$0xff]  ;;  %v7035_v49 = vld [vmem:[%s11172_s1 + $0x120] sm:$0xff] }
   0xf   :  { %568 = vmatpush.bf16.msra.mxu1 %v6845_v13  ;;  %11351 = vst [vmem:[#allocation4_spill] sm:$0xff] %v6992_v40  ;;  %v6999_v43 = vld [vmem:[%s11172_s1 + $0x1b0] sm:$0xff]  ;;  %v7023_v47 = vld [vmem:[%s11172_s1 + $0x1a8] sm:$0xff]  ;;  %v7040_v50 = vld [vmem:[%s11172_s1 + $0x160] sm:$0xff] }
  0x10   :  { %581 = vmatpush.bf16.msra.mxu2 %v6852_v14  ;;  %v7004_v44 = vld [vmem:[%s11172_s1 + $0x1f0] sm:$0xff]  ;;  %11352 = vst [vmem:[#allocation5_spill] sm:$0xff] %v7011_v45  ;;  %v7028_v48 = vld [vmem:[%s11172_s1 + $0x1e8] sm:$0xff]  ;;  %v7047_v51 = vld [vmem:[%s11172_s1 + $0x1a0] sm:$0xff] }
  0x11   :  { %594 = vmatpush.bf16.msra.mxu3 %v6857_v15  ;;  %v154_v38 = vld [vmem:[#allocation1 + $0x12] sm:$0xff]  ;;  %v152_v39 = vld [vmem:[#allocation1] sm:$0xff]  ;;  %v153_v42 = vld [vmem:[#allocation1 + $0x9] sm:$0xff]  ;;  %11353 = vst [vmem:[#allocation6_spill] sm:$0xff] %v7016_v46 }
  0x12   :  { %556 = vmatpush.bf16.msra.mxu0 %v6864_v16  ;;  %v155_v41 = vld [vmem:[#allocation1 + $0x1b] sm:$0xff]  ;;  %11354 = vst [vmem:[#allocation7_spill] sm:$0xff] %v7035_v49  ;;  %v7083_v57 = vld [vmem:[%s11172_s1 + $0x110] sm:$0xff]  ;;  %v7107_v61 = vld [vmem:[%s11172_s1 + $0x108] sm:$0xff] }
  0x13   :  { %569 = vmatpush.bf16.msra.mxu1 %v6869_v17  ;;  %11355 = vst [vmem:[#allocation8_spill] sm:$0xff] %v7040_v50  ;;  %v7052_v52 = vld [vmem:[%s11172_s1 + $0x1e0] sm:$0xff]  ;;  %v7059_v53 = vld [vmem:[%s11172_s1 + $0x118] sm:$0xff]  ;;  %v7088_v58 = vld [vmem:[%s11172_s1 + $0x150] sm:$0xff] }
  0x14   :  { %582 = vmatpush.bf16.msra.mxu2 %v6876_v18  ;;  %11356 = vst [vmem:[#allocation9_spill] sm:$0xff] %v7059_v53  ;;  %v7064_v54 = vld [vmem:[%s11172_s1 + $0x158] sm:$0xff]  ;;  %v7095_v59 = vld [vmem:[%s11172_s1 + $0x190] sm:$0xff]  ;;  %v7112_v62 = vld [vmem:[%s11172_s1 + $0x148] sm:$0xff] }
  0x15   :  { %595 = vmatpush.bf16.msra.mxu3 %v6881_v19  ;;  %11357 = vst [vmem:[#allocation10_spill] sm:$0xff] %v7064_v54  ;;  %v7071_v55 = vld [vmem:[%s11172_s1 + $0x198] sm:$0xff]  ;;  %v7100_v60 = vld [vmem:[%s11172_s1 + $0x1d0] sm:$0xff]  ;;  %v7119_v63 = vld [vmem:[%s11172_s1 + $0x188] sm:$0xff] }
  0x16   :  { %557 = vmatpush.bf16.msra.mxu0 %v6891_v21  ;;  %v7076_v56 = vld [vmem:[%s11172_s1 + $0x1d8] sm:$0xff]  ;;  %11358 = vst [vmem:[#allocation11_spill] sm:$0xff] %v7083_v57  ;;  %v7124_v20 = vld [vmem:[%s11172_s1 + $0x1c8] sm:$0xff] }
  0x17   :  { %570 = vmatpush.bf16.msra.mxu1 %v6896_v22  ;;  %11359 = vst [vmem:[#allocation12_spill] sm:$0xff] %v7088_v58 }
  0x18   :  { %583 = vmatpush.bf16.msra.mxu2 %v6903_v23  ;;  %11360 = vst [vmem:[#allocation13_spill] sm:$0xff] %v7095_v59 }
  0x19   :  { %596 = vmatpush.bf16.msra.mxu3 %v6908_v24  ;;  %11361 = vst [vmem:[#allocation14_spill] sm:$0xff] %v7100_v60 }
  0x1a   :  { %558 = vmatpush.bf16.msra.mxu0 %v6915_v25  ;;  %11362 = vst [vmem:[#allocation15_spill] sm:$0xff] %v7107_v61 }
  0x1b   :  { %571 = vmatpush.bf16.msra.mxu1 %v6920_v26  ;;  %11363 = vst [vmem:[#allocation16_spill] sm:$0xff] %v7112_v62 }
  0x1c   :  { %584 = vmatpush.bf16.msra.mxu2 %v6927_v27  ;;  %11364 = vst [vmem:[#allocation17_spill] sm:$0xff] %v7119_v63 }
  0x1d   :  { %597 = vmatpush.bf16.msra.mxu3 %v6932_v28 }
  0x1e   :  { %559 = vmatpush.bf16.msra.mxu0 %v6939_v29 }
  0x1f   :  { %572 = vmatpush.bf16.msra.mxu1 %v6944_v30 }
  0x20   :  { %585 = vmatpush.bf16.msra.mxu2 %v6951_v31 }
  0x21   :  { %598 = vmatpush.bf16.msra.mxu3 %v6956_v32  ;;  %560 = vmatmul.bf16.vlgmr.msra.gmra.mxu0 %v152_v39  ;;  %v7136_v39 = vld [vmem:[%s11172_s1 + $0x140] sm:$0xff] }
  0x22   :  { %604 = vmatpush.bf16.msrb.mxu0 %v6961_v33  ;;  %573 = vmatmul.bf16.vlgmr.msra.gmra.mxu1 %v153_v42  ;;  %11366 = vst [vmem:[#allocation19_spill] sm:$0xff] %v7136_v39  ;;  %v7148_v42 = vld [vmem:[%s11172_s1 + $0x1c0] sm:$0xff] }
  0x23   :  { %617 = vmatpush.bf16.msrb.mxu1 %v6966_v34  ;;  %586 = vmatmul.bf16.vlgmr.msra.gmra.mxu2 %v154_v38  ;;  %v7131_v38 = vld [vmem:[%s11172_s1 + $0x100] sm:$0xff] }
  0x24   :  { %630 = vmatpush.bf16.msrb.mxu2 %v6971_v35  ;;  %599 = vmatmul.bf16.vlgmr.msra.gmra.mxu3 %v155_v41  ;;  %11365 = vst [vmem:[#allocation18_spill] sm:$0xff] %v7131_v38  ;;  %v7143_v41 = vld [vmem:[%s11172_s1 + $0x180] sm:$0xff] }
  0x25   :  { %643 = vmatpush.bf16.msrb.mxu3 %v6976_v36 }
  0x26   :  { %605 = vmatpush.bf16.msrb.mxu0 %v6985_v37 }
  0x27   :  { %618 = vmatpush.bf16.msrb.mxu1 %v6992_v40 }
  0x28   :  { %631 = vmatpush.bf16.msrb.mxu2 %v6999_v43 }
  0x29   :  { %644 = vmatpush.bf16.msrb.mxu3 %v7004_v44 }
  0x2a   :  { %606 = vmatpush.bf16.msrb.mxu0 %v7011_v45 }
  0x2b   :  { %619 = vmatpush.bf16.msrb.mxu1 %v7016_v46 }
  0x2c   :  { %632 = vmatpush.bf16.msrb.mxu2 %v7023_v47 }
  0x2d   :  { %645 = vmatpush.bf16.msrb.mxu3 %v7028_v48 }
  0x2e   :  { %607 = vmatpush.bf16.msrb.mxu0 %v7035_v49 }
  0x2f   :  { %620 = vmatpush.bf16.msrb.mxu1 %v7040_v50 }
  0x30   :  { %633 = vmatpush.bf16.msrb.mxu2 %v7047_v51 }
  0x31   :  { %646 = vmatpush.bf16.msrb.mxu3 %v7052_v52 }
  0x32   :  { %608 = vmatpush.bf16.msrb.mxu0 %v7059_v53 }
  0x33   :  { %621 = vmatpush.bf16.msrb.mxu1 %v7064_v54 }
  0x34   :  { %634 = vmatpush.bf16.msrb.mxu2 %v7071_v55 }
  0x35   :  { %647 = vmatpush.bf16.msrb.mxu3 %v7076_v56 }
  0x36   :  { %609 = vmatpush.bf16.msrb.mxu0 %v7083_v57 }
  0x37   :  { %622 = vmatpush.bf16.msrb.mxu1 %v7088_v58 }
  0x38   :  { %635 = vmatpush.bf16.msrb.mxu2 %v7095_v59  ;;  %v157_v59 = vld [vmem:[#allocation1 + $0x2d] sm:$0xff] }
  0x39   :  { %648 = vmatpush.bf16.msrb.mxu3 %v7100_v60  ;;  %v159_v60 = vld [vmem:[#allocation1 + $0x3f] sm:$0xff] }
  0x3a   :  { %610 = vmatpush.bf16.msrb.mxu0 %v7107_v61  ;;  %v156_v61 = vld [vmem:[#allocation1 + $0x24] sm:$0xff] }
  0x3b   :  { %623 = vmatpush.bf16.msrb.mxu1 %v7112_v62  ;;  %v158_v62 = vld [vmem:[#allocation1 + $0x36] sm:$0xff] }
  0x3c   :  { %636 = vmatpush.bf16.msrb.mxu2 %v7119_v63  ;;  %v4860_v63 = vld [vmem:[%s11173_s0 + $0x8] sm:$0xff] }
  0x3d   :  { %649 = vmatpush.bf16.msrb.mxu3 %v7124_v20  ;;  %679 = vst [vmem:[#allocation1] ss:$9 sm:$0xff] %v4860_v63  ;;  %v11367_v63 = vld [vmem:[#allocation13_spill] sm:$0xff] }
  0x3e   :  { %611 = vmatpush.bf16.msrb.mxu0 %v7131_v38 }
  0x3f   :  { %624 = vmatpush.bf16.msrb.mxu1 %v7136_v39 }
  0x40   :  { %637 = vmatpush.bf16.msrb.mxu2 %v7143_v41 }
  0x41   :  { %650 = vmatpush.bf16.msrb.mxu3 %v7148_v42  ;;  %612 = vmatmul.bf16.vlgmr.msrb.gmra.mxu0 %v156_v61 }
  0x42   :  { %696 = vmatpush.bf16.msra.mxu0 %v6770_v0  ;;  %625 = vmatmul.bf16.vlgmr.msrb.gmra.mxu1 %v157_v59 }
  0x43   :  { %709 = vmatpush.bf16.msra.mxu1 %v6775_v1  ;;  %638 = vmatmul.bf16.vlgmr.msrb.gmra.mxu2 %v158_v62 }
  0x44   :  { %722 = vmatpush.bf16.msra.mxu2 %v6780_v2  ;;  %651 = vmatmul.bf16.vlgmr.msrb.gmra.mxu3 %v159_v60  ;;  %v682_v59 = vld [vmem:[#allocation1 + $0x12] sm:$0xff]  ;;  %v680_v60 = vld [vmem:[#allocation1] sm:$0xff]  ;;  %v681_v62 = vld [vmem:[#allocation1 + $0x9] sm:$0xff] }
  0x45   :  { %735 = vmatpush.bf16.msra.mxu3 %v6785_v3  ;;  %v683_v61 = vld [vmem:[#allocation1 + $0x1b] sm:$0xff] }
  0x46   :  { %697 = vmatpush.bf16.msra.mxu0 %v6792_v4 }
  0x47   :  { %710 = vmatpush.bf16.msra.mxu1 %v6797_v5 }
  0x48   :  { %723 = vmatpush.bf16.msra.mxu2 %v6804_v6 }
  0x49   :  { %736 = vmatpush.bf16.msra.mxu3 %v6809_v7 }
  0x4a   :  { %698 = vmatpush.bf16.msra.mxu0 %v6816_v8 }
  0x4b   :  { %711 = vmatpush.bf16.msra.mxu1 %v6821_v9 }
  0x4c   :  { %724 = vmatpush.bf16.msra.mxu2 %v6828_v10 }
  0x4d   :  { %737 = vmatpush.bf16.msra.mxu3 %v6833_v11 }
  0x4e   :  { %699 = vmatpush.bf16.msra.mxu0 %v6840_v12 }
  0x4f   :  { %712 = vmatpush.bf16.msra.mxu1 %v6845_v13 }
  0x50   :  { %725 = vmatpush.bf16.msra.mxu2 %v6852_v14 }
  0x51   :  { %738 = vmatpush.bf16.msra.mxu3 %v6857_v15 }
  0x52   :  { %700 = vmatpush.bf16.msra.mxu0 %v6864_v16 }
  0x53   :  { %713 = vmatpush.bf16.msra.mxu1 %v6869_v17 }
  0x54   :  { %726 = vmatpush.bf16.msra.mxu2 %v6876_v18 }
  0x55   :  { %739 = vmatpush.bf16.msra.mxu3 %v6881_v19 }
  0x56   :  { %701 = vmatpush.bf16.msra.mxu0 %v6891_v21 }
  0x57   :  { %714 = vmatpush.bf16.msra.mxu1 %v6896_v22 }
  0x58   :  { %727 = vmatpush.bf16.msra.mxu2 %v6903_v23 }
  0x59   :  { %740 = vmatpush.bf16.msra.mxu3 %v6908_v24 }
  0x5a   :  { %702 = vmatpush.bf16.msra.mxu0 %v6915_v25 }
  0x5b   :  { %715 = vmatpush.bf16.msra.mxu1 %v6920_v26 }
  0x5c   :  { %728 = vmatpush.bf16.msra.mxu2 %v6927_v27 }
  0x5d   :  { %741 = vmatpush.bf16.msra.mxu3 %v6932_v28 }
  0x5e   :  { %703 = vmatpush.bf16.msra.mxu0 %v6939_v29 }
  0x5f   :  { %716 = vmatpush.bf16.msra.mxu1 %v6944_v30 }
  0x60   :  { %729 = vmatpush.bf16.msra.mxu2 %v6951_v31 }
  0x61   :  { %742 = vmatpush.bf16.msra.mxu3 %v6956_v32  ;;  %704 = vmatmul.bf16.vlgmr.msra.gmra.mxu0 %v680_v60  ;;  %v4999_v60 = vld [vmem:[%s11174_s2 + $0x70] sm:$0xf] }
  0x62   :  { %748 = vmatpush.bf16.msrb.mxu0 %v6961_v33  ;;  %717 = vmatmul.bf16.vlgmr.msra.gmra.mxu1 %v681_v62  ;;  %v6217_v62 = vld [vmem:[%s11174_s2 + $0x74] sm:$0xf] }
  0x63   :  { %761 = vmatpush.bf16.msrb.mxu1 %v6966_v34  ;;  %730 = vmatmul.bf16.vlgmr.msra.gmra.mxu2 %v682_v59  ;;  %v11368_v59 = vld [vmem:[#allocation14_spill] sm:$0xff] }
  0x64   :  { %774 = vmatpush.bf16.msrb.mxu2 %v6971_v35  ;;  %743 = vmatmul.bf16.vlgmr.msra.gmra.mxu3 %v683_v61  ;;  %v6218_v61 = vld [vmem:[%s11174_s2 + $0x74] sm:$0xf0] }
  0x65   :  { %787 = vmatpush.bf16.msrb.mxu3 %v6976_v36 }
  0x66   :  { %749 = vmatpush.bf16.msrb.mxu0 %v6985_v37  ;;  %v6204_v37 = vld [vmem:[%s11174_s2 + $0x4] sm:$0xf0] }
  0x67   :  { %762 = vmatpush.bf16.msrb.mxu1 %v6992_v40  ;;  %v686_v40 = vld [vmem:[#allocation1 + $0x36] sm:$0xff] }
  0x68   :  { %775 = vmatpush.bf16.msrb.mxu2 %v6999_v43 }
  0x69   :  { %788 = vmatpush.bf16.msrb.mxu3 %v7004_v44 }
  0x6a   :  { %750 = vmatpush.bf16.msrb.mxu0 %v7011_v45  ;;  %v685_v45 = vld [vmem:[#allocation1 + $0x2d] sm:$0xff] }
  0x6b   :  { %763 = vmatpush.bf16.msrb.mxu1 %v7016_v46  ;;  %v684_v46 = vld [vmem:[#allocation1 + $0x24] sm:$0xff] }
  0x6c   :  { %776 = vmatpush.bf16.msrb.mxu2 %v7023_v47 }
  0x6d   :  { %789 = vmatpush.bf16.msrb.mxu3 %v7028_v48 }
  0x6e   :  { %751 = vmatpush.bf16.msrb.mxu0 %v7035_v49 }
  0x6f   :  { %764 = vmatpush.bf16.msrb.mxu1 %v7040_v50  ;;  %v5000_v50 = vor.u32 %v6218_v61, %v4999_v60  ;;  %v6216_v60 = vld [vmem:[%s11174_s2 + $0x64] sm:$0xf0]  ;;  %v6215_v61 = vld [vmem:[%s11174_s2 + $0x64] sm:$0xf] }
  0x70   :  { %777 = vmatpush.bf16.msrb.mxu2 %v7047_v51 }
  0x71   :  { %790 = vmatpush.bf16.msrb.mxu3 %v7052_v52 }
  0x72   :  { %752 = vmatpush.bf16.msrb.mxu0 %v7059_v53  ;;  %v11371_v53 = vld [vmem:[#allocation17_spill] sm:$0xff] }
  0x73   :  { %765 = vmatpush.bf16.msrb.mxu1 %v7064_v54  ;;  %v11370_v54 = vld [vmem:[#allocation16_spill] sm:$0xff] }
  0x74   :  { %778 = vmatpush.bf16.msrb.mxu2 %v7071_v55 }
  0x75   :  { %791 = vmatpush.bf16.msrb.mxu3 %v7076_v56 }
  0x76   :  { %753 = vmatpush.bf16.msrb.mxu0 %v7083_v57  ;;  %v11369_v57 = vld [vmem:[#allocation15_spill] sm:$0xff] }
  0x77   :  { %766 = vmatpush.bf16.msrb.mxu1 %v7088_v58  ;;  %v5001_v58 = vld [vmem:[%s11174_s2 + $0x78] sm:$0xf0] }
  0x78   :  { %779 = vmatpush.bf16.msrb.mxu2 %v11367_v63  ;;  %v5004_v49 = vor.u32 %v6217_v62, %v5001_v58  ;;  %v4991_v58 = vld [vmem:[%s11174_s2 + $0x60] sm:$0xf] }
  0x79   :  { %792 = vmatpush.bf16.msrb.mxu3 %v11368_v59  ;;  %v4992_v62 = vor.u32 %v6216_v60, %v4991_v58  ;;  %v4985_v58 = vld [vmem:[%s11174_s2 + $0x58] sm:$0xf0]  ;;  %v4975_v60 = vld [vmem:[%s11174_s2 + $0x40] sm:$0xf] }
  0x7a   :  { %754 = vmatpush.bf16.msrb.mxu0 %v11369_v57  ;;  %v687_v57 = vld [vmem:[#allocation1 + $0x3f] sm:$0xff] }
  0x7b   :  { %767 = vmatpush.bf16.msrb.mxu1 %v11370_v54  ;;  %v4943_v54 = vld [vmem:[%s11174_s2] sm:$0xf] }
  0x7c   :  { %780 = vmatpush.bf16.msrb.mxu2 %v11371_v53 }
  0x7d   :  { %793 = vmatpush.bf16.msrb.mxu3 %v7124_v20 }
  0x7e   :  { %755 = vmatpush.bf16.msrb.mxu0 %v7131_v38 }
  0x7f   :  { %768 = vmatpush.bf16.msrb.mxu1 %v7136_v39  ;;  %v4967_v39 = vld [vmem:[%s11174_s2 + $0x30] sm:$0xf] }
  0x80   :  { %781 = vmatpush.bf16.msrb.mxu2 %v7143_v41 }
  0x81   :  { %794 = vmatpush.bf16.msrb.mxu3 %v7148_v42  ;;  %756 = vmatmul.bf16.vlgmr.msrb.gmra.mxu0 %v684_v46  ;;  %v4993_v46 = vld [vmem:[%s11174_s2 + $0x68] sm:$0xf0] }
  0x82   :  { %769 = vmatmul.bf16.vlgmr.msrb.gmra.mxu1 %v685_v45  ;;  %v4996_v45 = vor.u32 %v6215_v61, %v4993_v46  ;;  %v6212_v61 = vld [vmem:[%s11174_s2 + $0x44] sm:$0xf0]  ;;  %v6211_v46 = vld [vmem:[%s11174_s2 + $0x44] sm:$0xf] }
  0x83   :  { %782 = vmatmul.bf16.vlgmr.msrb.gmra.mxu2 %v686_v40  ;;  %v4983_v40 = vld [vmem:[%s11174_s2 + $0x50] sm:$0xf] }
  0x84   :  { %1007 = vmatpush.bf16.msra.mxu2 %v5000_v50  ;;  %795 = vmatmul.bf16.vlgmr.msrb.gmra.mxu3 %v687_v57  ;;  %v6213_v50 = vld [vmem:[%s11174_s2 + $0x54] sm:$0xf] }
  0x85   :  { %1020 = vmatpush.bf16.msra.mxu3 %v5004_v49  ;;  %v6214_v49 = vld [vmem:[%s11174_s2 + $0x54] sm:$0xf0] }
  0x86   :  { %v4984_v57 = vor.u32 %v6214_v49, %v4983_v40  ;;  %v4976_v40 = vor.u32 %v6212_v61, %v4975_v60 }
  0x88   :  { %1008 = vmatpush.bf16.msra.mxu2 %v4992_v62  ;;  %v4988_v62 = vor.u32 %v6213_v50, %v4985_v58  ;;  %v6210_v50 = vld [vmem:[%s11174_s2 + $0x34] sm:$0xf0]  ;;  %v6209_v58 = vld [vmem:[%s11174_s2 + $0x34] sm:$0xf] }
  0x89   :  { %1021 = vmatpush.bf16.msra.mxu3 %v4996_v45  ;;  %v4977_v45 = vld [vmem:[%s11174_s2 + $0x48] sm:$0xf0]  ;;  %v4968_v38 = vor.u32 %v6210_v50, %v4967_v39  ;;  %v6207_v39 = vld [vmem:[%s11174_s2 + $0x24] sm:$0xf] }
  0x8a   :  { %v4980_v49 = vor.u32 %v6211_v46, %v4977_v45  ;;  %v4959_v46 = vld [vmem:[%s11174_s2 + $0x20] sm:$0xf]  ;;  %v6208_v45 = vld [vmem:[%s11174_s2 + $0x24] sm:$0xf0] }
  0x8c   :  { %1009 = vmatpush.bf16.msra.mxu2 %v4984_v57  ;;  %v4969_v57 = vld [vmem:[%s11174_s2 + $0x38] sm:$0xf0] }
  0x8d   :  { %1022 = vmatpush.bf16.msra.mxu3 %v4988_v62  ;;  %v4972_v60 = vor.u32 %v6209_v58, %v4969_v57  ;;  %v4951_v58 = vld [vmem:[%s11174_s2 + $0x10] sm:$0xf]  ;;  %v6206_v57 = vld [vmem:[%s11174_s2 + $0x14] sm:$0xf0] }
  0x90   :  { %1010 = vmatpush.bf16.msra.mxu2 %v4976_v40  ;;  %v4960_v40 = vor.u32 %v6208_v45, %v4959_v46  ;;  %v4952_v45 = vor.u32 %v6206_v57, %v4951_v58  ;;  %v6203_v58 = vld [vmem:[%s11174_s2 + $0x4] sm:$0xf]  ;;  %v4944_v57 = vor.u32 %v6204_v37, %v4943_v54  ;;  %v6233_v37 = vld [vmem:[%s11174_s2 + $0xf4] sm:$0xf] }
  0x91   :  { %1023 = vmatpush.bf16.msra.mxu3 %v4980_v49 }
  0x94   :  { %1011 = vmatpush.bf16.msra.mxu2 %v4968_v38  ;;  %v4961_v38 = vld [vmem:[%s11174_s2 + $0x28] sm:$0xf0] }
  0x95   :  { %1024 = vmatpush.bf16.msra.mxu3 %v4972_v60  ;;  %v4964_v49 = vor.u32 %v6207_v39, %v4961_v38  ;;  %v6205_v60 = vld [vmem:[%s11174_s2 + $0x14] sm:$0xf]  ;;  %v4953_v39 = vld [vmem:[%s11174_s2 + $0x18] sm:$0xf0] }
  0x96   :  { %v4956_v38 = vor.u32 %v6205_v60, %v4953_v39  ;;  %v4945_v60 = vld [vmem:[%s11174_s2 + $0x8] sm:$0xf0] }
  0x97   :  { %v4948_v39 = vor.u32 %v6203_v58, %v4945_v60  ;;  %v4937_v58 = vld [vmem:[%s11174_s2 + $0xf8] sm:$0xf0]  ;;  %v6232_v60 = vld [vmem:[%s11174_s2 + $0xe4] sm:$0xf0] }
  0x98   :  { %1012 = vmatpush.bf16.msra.mxu2 %v4960_v40 }
  0x99   :  { %1025 = vmatpush.bf16.msra.mxu3 %v4964_v49 }
  0x9c   :  { %1013 = vmatpush.bf16.msra.mxu2 %v4952_v45 }
  0x9d   :  { %1026 = vmatpush.bf16.msra.mxu3 %v4956_v38  ;;  %v6234_v38 = vld [vmem:[%s11174_s2 + $0xf4] sm:$0xf0] }
  0x9e   :  { %v561_v61 = vpop.f32.mrf.mxu0 }
  0x9f   :  { %v574_v62 = vpop.f32.mrf.mxu1 }
  0xa0   :  { %1014 = vmatpush.bf16.msra.mxu2 %v4944_v57  ;;  %v4927_v57 = vld [vmem:[%s11174_s2 + $0xe0] sm:$0xf] }
  0xa1   :  { %1027 = vmatpush.bf16.msra.mxu3 %v4948_v39  ;;  %v4940_v39 = vor.u32 %v6233_v37, %v4937_v58  ;;  %v575_v37 = vadd.f32 %v574_v62, %v561_v61  ;;  %v6229_v58 = vld [vmem:[%s11174_s2 + $0xd4] sm:$0xf]  ;;  %v6227_v62 = vld [vmem:[%s11174_s2 + $0xc4] sm:$0xf] }
  0xa3   :  { %914 = vmatpush.bf16.msra.mxu1 %v4940_v39  ;;  %v4911_v39 = vld [vmem:[%s11174_s2 + $0xc0] sm:$0xf] }
  0xa4   :  { %1079 = vmatpush.bf16.msrb.mxu2 %v6780_v2  ;;  %v6231_v2 = vld [vmem:[%s11174_s2 + $0xe4] sm:$0xf] }
  0xa5   :  { %1092 = vmatpush.bf16.msrb.mxu3 %v6785_v3  ;;  %v6230_v3 = vld [vmem:[%s11174_s2 + $0xd4] sm:$0xf0] }
  0xa6   :  { %v587_v50 = vpop.f32.mrf.mxu2  ;;  %v563_v40 = vpop.f32.mrf.mxu0 }
  0xa7   :  { %v600_v46 = vpop.f32.mrf.mxu3  ;;  %v576_v49 = vpop.f32.mrf.mxu1  ;;  %v4935_v40 = vld [vmem:[%s11174_s2 + $0xf0] sm:$0xf]  ;;  %v588_v61 = vadd.f32 %v587_v50, %v575_v37 }
  0xa8   :  { %v4936_v49 = vor.u32 %v6234_v38, %v4935_v40  ;;  %v4928_v40 = vor.u32 %v6232_v60, %v4927_v57  ;;  %1080 = vmatpush.bf16.msrb.mxu2 %v6804_v6  ;;  %v6228_v6 = vld [vmem:[%s11174_s2 + $0xc4] sm:$0xf0] }
  0xa9   :  { %1093 = vmatpush.bf16.msrb.mxu3 %v6809_v7  ;;  %v4913_v7 = vld [vmem:[%s11174_s2 + $0xc8] sm:$0xf0]  ;;  %v601_v50 = vadd.f32 %v600_v46, %v588_v61  ;;  %v6224_v46 = vld [vmem:[%s11174_s2 + $0xa4] sm:$0xf0]  ;;  %v6222_v61 = vld [vmem:[%s11174_s2 + $0x94] sm:$0xf0] }
  0xaa   :  { %901 = vmatpush.bf16.msra.mxu0 %v4936_v49  ;;  %v4921_v49 = vld [vmem:[%s11174_s2 + $0xd8] sm:$0xf0] }
  0xab   :  { %v4924_v60 = vor.u32 %v6229_v58, %v4921_v49 }
  0xac   :  { %1081 = vmatpush.bf16.msrb.mxu2 %v6828_v10  ;;  %v6226_v10 = vld [vmem:[%s11174_s2 + $0xb4] sm:$0xf0] }
  0xad   :  { %1094 = vmatpush.bf16.msrb.mxu3 %v6833_v11  ;;  %v4905_v11 = vld [vmem:[%s11174_s2 + $0xb8] sm:$0xf0] }
  0xae   :  { %v589_v45 = vpop.f32.mrf.mxu2  ;;  %902 = vmatpush.bf16.msra.mxu0 %v4928_v40  ;;  %v4903_v40 = vld [vmem:[%s11174_s2 + $0xb0] sm:$0xf] }
  0xaf   :  { %v602_v54 = vpop.f32.mrf.mxu3  ;;  %v4929_v45 = vld [vmem:[%s11174_s2 + $0xe8] sm:$0xf0] }
  0xb0   :  { %v4932_v38 = vor.u32 %v6231_v2, %v4929_v45  ;;  %v4919_v54 = vld [vmem:[%s11174_s2 + $0xd0] sm:$0xf]  ;;  %v4912_v2 = vor.u32 %v6228_v6, %v4911_v39  ;;  %v4916_v45 = vor.u32 %v6227_v62, %v4913_v7  ;;  %1082 = vmatpush.bf16.msrb.mxu2 %v6852_v14  ;;  %v4895_v14 = vld [vmem:[%s11174_s2 + $0xa0] sm:$0xf]  ;;  %v6221_v62 = vld [vmem:[%s11174_s2 + $0x94] sm:$0xf] }
  0xb1   :  { %v4920_v57 = vor.u32 %v6230_v3, %v4919_v54  ;;  %1095 = vmatpush.bf16.msrb.mxu3 %v6857_v15  ;;  %v4904_v54 = vor.u32 %v6226_v10, %v4903_v40  ;;  %v6223_v15 = vld [vmem:[%s11174_s2 + $0xa4] sm:$0xf]  ;;  %v4896_v39 = vor.u32 %v6224_v46, %v4895_v14  ;;  %v4889_v7 = vld [vmem:[%s11174_s2 + $0x98] sm:$0xf0] }
  0xb2   :  { %915 = vmatpush.bf16.msra.mxu1 %v4932_v38  ;;  %v6225_v38 = vld [vmem:[%s11174_s2 + $0xb4] sm:$0xf]  ;;  %v4892_v10 = vor.u32 %v6221_v62, %v4889_v7 }
  0xb3   :  { %903 = vmatpush.bf16.msra.mxu0 %v4920_v57  ;;  %v4908_v37 = vor.u32 %v6225_v38, %v4905_v11  ;;  %v4897_v57 = vld [vmem:[%s11174_s2 + $0xa8] sm:$0xf0]  ;;  %v11381_v7 = vld [vmem:[#allocation12_spill] sm:$0xff] }
  0xb4   :  { %1083 = vmatpush.bf16.msrb.mxu2 %v6876_v18  ;;  %v4900_v6 = vor.u32 %v6223_v15, %v4897_v57  ;;  %v4887_v18 = vld [vmem:[%s11174_s2 + $0x90] sm:$0xf] }
  0xb5   :  { %1096 = vmatpush.bf16.msrb.mxu3 %v6881_v19 }
  0xb6   :  { %916 = vmatpush.bf16.msra.mxu1 %v4924_v60 }
  0xb7   :  { %904 = vmatpush.bf16.msra.mxu0 %v4912_v2 }
  0xb8   :  { %1084 = vmatpush.bf16.msrb.mxu2 %v6903_v23 }
  0xb9   :  { %1097 = vmatpush.bf16.msrb.mxu3 %v6908_v24  ;;  %v6220_v24 = vld [vmem:[%s11174_s2 + $0x84] sm:$0xf0] }
  0xba   :  { %917 = vmatpush.bf16.msra.mxu1 %v4916_v45  ;;  %v4888_v45 = vor.u32 %v6222_v61, %v4887_v18 }
  0xbb   :  { %905 = vmatpush.bf16.msra.mxu0 %v4904_v54  ;;  %v6219_v54 = vld [vmem:[%s11174_s2 + $0x84] sm:$0xf] }
  0xbc   :  { %1085 = vmatpush.bf16.msrb.mxu2 %v6927_v27 }
  0xbd   :  { %1098 = vmatpush.bf16.msrb.mxu3 %v6932_v28 }
  0xbe   :  { %v613_v3 = vpop.f32.mrf.mxu0  ;;  %918 = vmatpush.bf16.msra.mxu1 %v4908_v37 }
  0xbf   :  { %v614_v58 = vadd.f32 %v613_v3, %v601_v50  ;;  %v626_v49 = vpop.f32.mrf.mxu1  ;;  %906 = vmatpush.bf16.msra.mxu0 %v4896_v39  ;;  %v4879_v50 = vld [vmem:[%s11174_s2 + $0x80] sm:$0xf]  ;;  %v4881_v3 = vld [vmem:[%s11174_s2 + $0x88] sm:$0xf0] }
  0xc0   :  { %v4880_v14 = vor.u32 %v6220_v24, %v4879_v50  ;;  %1086 = vmatpush.bf16.msrb.mxu2 %v6951_v31  ;;  %v4884_v46 = vor.u32 %v6219_v54, %v4881_v3  ;;  %v6250_v50 = vld [vmem:[%s11174_s2 + $0x174] sm:$0xf0]  ;;  %v6249_v24 = vld [vmem:[%s11174_s2 + $0x174] sm:$0xf]  ;;  %v5072_v54 = vld [vmem:[%s11174_s2 + $0x160] sm:$0xf] }
  0xc1   :  { %v627_v60 = vadd.f32 %v626_v49, %v614_v58  ;;  %1099 = vmatpush.bf16.msrb.mxu3 %v6956_v32  ;;  %v6248_v3 = vld [vmem:[%s11174_s2 + $0x164] sm:$0xf0] }
  0xc2   :  { %919 = vmatpush.bf16.msra.mxu1 %v4900_v6 }
  0xc3   :  { %907 = vmatpush.bf16.msra.mxu0 %v4888_v45  ;;  %v11384_v45 = vld [vmem:[#allocation18_spill] sm:$0xff] }
  0xc6   :  { %v639_v19 = vpop.f32.mrf.mxu2  ;;  %v615_v40 = vpop.f32.mrf.mxu0  ;;  %920 = vmatpush.bf16.msra.mxu1 %v4892_v10  ;;  %v5080_v10 = vld [vmem:[%s11174_s2 + $0x170] sm:$0xf] }
  0xc7   :  { %v640_v23 = vadd.f32 %v639_v19, %v627_v60  ;;  %v652_v2 = vpop.f32.mrf.mxu3  ;;  %v628_v11 = vpop.f32.mrf.mxu1  ;;  %908 = vmatpush.bf16.msra.mxu0 %v4880_v14  ;;  %v11385_v40 = vld [vmem:[#allocation19_spill] sm:$0xff]  ;;  %v6247_v14 = vld [vmem:[%s11174_s2 + $0x164] sm:$0xf] }
  0xc8   :  { %v5082_v11 = vld [vmem:[%s11174_s2 + $0x178] sm:$0xf0] }
  0xc9   :  { %v653_v38 = vadd.f32 %v652_v2, %v640_v23  ;;  %v11382_v23 = vld [vmem:[#allocation15_spill] sm:$0xff]  ;;  %v11383_v2 = vld [vmem:[#allocation16_spill] sm:$0xff] }
  0xca   :  { %921 = vmatpush.bf16.msra.mxu1 %v4884_v46  ;;  %v5073_v46 = vor.u32 %v6248_v3, %v5072_v54  ;;  %v7676_v3 = vld [vmem:[%s11172_s1 + $0x98] sm:$0xff] }
  0xcb   :  { %vm656_vm0 = vcmp.gt.f32.partialorder %v653_v38, 0.0  ;;  %v657_v37 = vmul.f32 0.2, %v653_v38  ;;  %1053 = vmatpush.bf16.msrb.mxu0 %v6770_v0  ;;  %11386 = vst [vmem:[#allocation13_spill] sm:$0xff] %v7676_v3 }
  0xcd   :  { %v658_v27 = vsel %vm656_vm0, %v653_v38, %v657_v37  ;;  %v5081_v38 = vor.u32 %v6250_v50, %v5080_v10  ;;  %v5085_v37 = vor.u32 %v6249_v24, %v5082_v11  ;;  %v7658_v10 = vld [vmem:[%s11172_s1 + $0xa0] sm:$0xff] }
  0xce   :  { %v659_v28 = vpack.c.bf16 %v658_v27, %v658_v27  ;;  %v641_v58 = vpop.f32.mrf.mxu2  ;;  %1066 = vmatpush.bf16.msrb.mxu1 %v6775_v1  ;;  %v5074_v27 = vld [vmem:[%s11174_s2 + $0x168] sm:$0xf0]  ;;  %v7664_v50 = vld [vmem:[%s11172_s1 + $0xe0] sm:$0xff] }
  0xcf   :  { %v654_v49 = vpop.f32.mrf.mxu3  ;;  %1054 = vmatpush.bf16.msrb.mxu0 %v6792_v4  ;;  %v5064_v58 = vld [vmem:[%s11174_s2 + $0x150] sm:$0xf] }
  0xd0   :  { %1015 = vmatmul.bf16.vlgmr.msra.gmra.mxu2 %v659_v28  ;;  %1028 = vmatmul.bf16.vlgmr.msra.gmra.mxu3 %v659_v28  ;;  %v5077_v28 = vor.u32 %v6247_v14, %v5074_v27  ;;  %v6246_v49 = vld [vmem:[%s11174_s2 + $0x154] sm:$0xf0] }
  0xd1   :  { %1131 = vmatpush.bf16.msra.mxu2 %v6971_v35  ;;  %1144 = vmatpush.bf16.msra.mxu3 %v6976_v36 }
  0xd2   :  { %1067 = vmatpush.bf16.msrb.mxu1 %v6797_v5 }
  0xd3   :  { %1055 = vmatpush.bf16.msrb.mxu0 %v6816_v8 }
  0xd5   :  { %1132 = vmatpush.bf16.msra.mxu2 %v6999_v43  ;;  %1145 = vmatpush.bf16.msra.mxu3 %v7004_v44 }
  0xd6   :  { %1068 = vmatpush.bf16.msrb.mxu1 %v6821_v9 }
  0xd7   :  { %1056 = vmatpush.bf16.msrb.mxu0 %v6840_v12 }
  0xd9   :  { %1133 = vmatpush.bf16.msra.mxu2 %v7023_v47  ;;  %1146 = vmatpush.bf16.msra.mxu3 %v7028_v48  ;;  %v5005_v47 = vld [vmem:[%s11173_s0 + $0x10] sm:$0xff] }
  0xda   :  { %1069 = vmatpush.bf16.msrb.mxu1 %v6845_v13  ;;  %1036 = vst [vmem:[#allocation1] ss:$9 sm:$0xff] %v5005_v47 }
  0xdb   :  { %1057 = vmatpush.bf16.msrb.mxu0 %v6864_v16 }
  0xdd   :  { %1134 = vmatpush.bf16.msra.mxu2 %v7047_v51  ;;  %1147 = vmatpush.bf16.msra.mxu3 %v7052_v52 }
  0xde   :  { %v705_v31 = vpop.f32.mrf.mxu0  ;;  %1070 = vmatpush.bf16.msrb.mxu1 %v6869_v17 }
  0xdf   :  { %v718_v32 = vpop.f32.mrf.mxu1  ;;  %1058 = vmatpush.bf16.msrb.mxu0 %v6891_v21 }
  0xe1   :  { %1135 = vmatpush.bf16.msra.mxu2 %v7071_v55  ;;  %1148 = vmatpush.bf16.msra.mxu3 %v7076_v56  ;;  %v1039_v52 = vld [vmem:[#allocation1 + $0x12] sm:$0xff]  ;;  %v1040_v55 = vld [vmem:[#allocation1 + $0x1b] sm:$0xff]  ;;  %v719_v56 = vadd.f32 %v718_v32, %v705_v31  ;;  %v1038_v62 = vld [vmem:[#allocation1 + $0x9] sm:$0xff] }
  0xe2   :  { %1071 = vmatpush.bf16.msrb.mxu1 %v6896_v22  ;;  %1087 = vmatmul.bf16.vlgmr.msrb.gmra.mxu2 %v1039_v52  ;;  %v1037_v61 = vld [vmem:[#allocation1] sm:$0xff]  ;;  %v1042_v19 = vld [vmem:[#allocation1 + $0x2d] sm:$0xff]  ;;  %v5066_v32 = vld [vmem:[%s11174_s2 + $0x158] sm:$0xf0] }
  0xe3   :  { %1059 = vmatpush.bf16.msrb.mxu0 %v6915_v25  ;;  %1100 = vmatmul.bf16.vlgmr.msrb.gmra.mxu3 %v1040_v55  ;;  %v6245_v31 = vld [vmem:[%s11174_s2 + $0x154] sm:$0xf]  ;;  %v6244_v52 = vld [vmem:[%s11174_s2 + $0x144] sm:$0xf0]  ;;  %v6243_v55 = vld [vmem:[%s11174_s2 + $0x144] sm:$0xf] }
  0xe5   :  { %1136 = vmatpush.bf16.msra.mxu2 %v11367_v63  ;;  %1149 = vmatpush.bf16.msra.mxu3 %v11368_v59 }
  0xe6   :  { %v731_v35 = vpop.f32.mrf.mxu2  ;;  %v707_v43 = vpop.f32.mrf.mxu0  ;;  %1072 = vmatpush.bf16.msrb.mxu1 %v6920_v26 }
  0xe7   :  { %v744_v36 = vpop.f32.mrf.mxu3  ;;  %v720_v44 = vpop.f32.mrf.mxu1  ;;  %1060 = vmatpush.bf16.msrb.mxu0 %v6939_v29 }
  0xe9   :  { %1137 = vmatpush.bf16.msra.mxu2 %v11371_v53  ;;  %1150 = vmatpush.bf16.msra.mxu3 %v7124_v20  ;;  %v732_v53 = vadd.f32 %v731_v35, %v719_v56  ;;  %v5065_v35 = vor.u32 %v6246_v49, %v5064_v58 }
  0xea   :  { %1073 = vmatpush.bf16.msrb.mxu1 %v6944_v30 }
  0xeb   :  { %v745_v20 = vadd.f32 %v744_v36, %v732_v53  ;;  %v5069_v36 = vor.u32 %v6245_v31, %v5066_v32  ;;  %v5058_v53 = vld [vmem:[%s11174_s2 + $0x148] sm:$0xf0] }
  0xec   :  { %v7700_v32 = vld [vmem:[%s11172_s1 + $0x88] sm:$0xff] }
  0xed   :  { %1138 = vmatpush.bf16.msra.mxu2 %v7143_v41  ;;  %1151 = vmatpush.bf16.msra.mxu3 %v7148_v42  ;;  %v1043_v42 = vld [vmem:[#allocation1 + $0x36] sm:$0xff] }
  0xee   :  { %v733_v48 = vpop.f32.mrf.mxu2 }
  0xef   :  { %v746_v51 = vpop.f32.mrf.mxu3 }
  0xf0   :  { %v5056_v51 = vld [vmem:[%s11174_s2 + $0x140] sm:$0xf] }
  0xf1   :  { %1306 = vmatpush.bf16.msrb.mxu2 %v6770_v0  ;;  %1319 = vmatpush.bf16.msrb.mxu3 %v6775_v1  ;;  %v1044_v1 = vld [vmem:[#allocation1 + $0x3f] sm:$0xff]  ;;  %v5057_v56 = vor.u32 %v6244_v52, %v5056_v51 }
  0xf2   :  { %1139 = vmatmul.bf16.vlgmr.msra.gmra.mxu2 %v1043_v42  ;;  %v5050_v42 = vld [vmem:[%s11174_s2 + $0x138] sm:$0xf0] }
  0xf3   :  { %1152 = vmatmul.bf16.vlgmr.msra.gmra.mxu3 %v1044_v1 }
  0xf5   :  { %1307 = vmatpush.bf16.msrb.mxu2 %v6792_v4  ;;  %1320 = vmatpush.bf16.msrb.mxu3 %v6797_v5 }
  0xf9   :  { %1308 = vmatpush.bf16.msrb.mxu2 %v6816_v8  ;;  %1321 = vmatpush.bf16.msrb.mxu3 %v6821_v9 }
  0xfd   :  { %1309 = vmatpush.bf16.msrb.mxu2 %v6840_v12  ;;  %1322 = vmatpush.bf16.msrb.mxu3 %v6845_v13  ;;  %v5086_v12 = vld [vmem:[%s11173_s0 + $0x18] sm:$0xff] }
  0xfe   :  { %v757_v63 = vpop.f32.mrf.mxu0 }
  0xff   :  { %v770_v59 = vpop.f32.mrf.mxu1  ;;  %v758_v41 = vadd.f32 %v757_v63, %v745_v20  ;;  %v5061_v20 = vor.u32 %v6243_v55, %v5058_v53  ;;  %v5048_v63 = vld [vmem:[%s11174_s2 + $0x130] sm:$0xf] }
 0x101   :  { %v771_v0 = vadd.f32 %v770_v59, %v758_v41  ;;  %1310 = vmatpush.bf16.msrb.mxu2 %v6864_v16  ;;  %1323 = vmatpush.bf16.msrb.mxu3 %v6869_v17  ;;  %v1041_v16 = vld [vmem:[#allocation1 + $0x24] sm:$0xff]  ;;  %v6242_v59 = vld [vmem:[%s11174_s2 + $0x134] sm:$0xf0]  ;;  %v6241_v41 = vld [vmem:[%s11174_s2 + $0x134] sm:$0xf] }
 0x102   :  { %1289 = vst [vmem:[#allocation1] ss:$9 sm:$0xff] %v5086_v12  ;;  %v11372_v17 = vld [vmem:[#allocation3_spill] sm:$0xff]  ;;  %v5053_v1 = vor.u32 %v6241_v41, %v5050_v42  ;;  %v6238_v12 = vld [vmem:[%s11174_s2 + $0x114] sm:$0xf0] }
 0x105   :  { %1311 = vmatpush.bf16.msrb.mxu2 %v6891_v21  ;;  %1324 = vmatpush.bf16.msrb.mxu3 %v6896_v22  ;;  %v11373_v21 = vld [vmem:[#allocation4_spill] sm:$0xff]  ;;  %v11374_v22 = vld [vmem:[#allocation5_spill] sm:$0xff] }
 0x106   :  { %v783_v15 = vpop.f32.mrf.mxu2  ;;  %v759_v5 = vpop.f32.mrf.mxu0  ;;  %11390 = vst [vmem:[#allocation4_spill] sm:$0xff] %v7700_v32 }
 0x107   :  { %v796_v57 = vpop.f32.mrf.mxu3  ;;  %v784_v4 = vadd.f32 %v783_v15, %v771_v0  ;;  %v772_v60 = vpop.f32.mrf.mxu1  ;;  %v5049_v0 = vor.u32 %v6242_v59, %v5048_v63  ;;  %v5040_v15 = vld [vmem:[%s11174_s2 + $0x120] sm:$0xf] }
 0x108   :  { %v5042_v60 = vld [vmem:[%s11174_s2 + $0x128] sm:$0xf0] }
 0x109   :  { %v797_v8 = vadd.f32 %v796_v57, %v784_v4  ;;  %1312 = vmatpush.bf16.msrb.mxu2 %v6915_v25  ;;  %1325 = vmatpush.bf16.msrb.mxu3 %v6920_v26  ;;  %v11375_v25 = vld [vmem:[#allocation6_spill] sm:$0xff]  ;;  %v11376_v26 = vld [vmem:[#allocation7_spill] sm:$0xff] }
 0x10a   :  { %v6240_v57 = vld [vmem:[%s11174_s2 + $0x124] sm:$0xf0]  ;;  %v6239_v4 = vld [vmem:[%s11174_s2 + $0x124] sm:$0xf] }
 0x10b   :  { %vm800_vm1 = vcmp.gt.f32.partialorder %v797_v8, 0.0  ;;  %v801_v9 = vmul.f32 0.2, %v797_v8  ;;  %v5041_v5 = vor.u32 %v6240_v57, %v5040_v15  ;;  %v1290_v31 = vld [vmem:[#allocation1] sm:$0xff] }
 0x10c   :  { %v1294_v53 = vld [vmem:[#allocation1 + $0x24] sm:$0xff] }
 0x10d   :  { %v802_v13 = vsel %vm800_vm1, %v797_v8, %v801_v9  ;;  %1313 = vmatpush.bf16.msrb.mxu2 %v6939_v29  ;;  %1326 = vmatpush.bf16.msrb.mxu3 %v6944_v30  ;;  %v11377_v29 = vld [vmem:[#allocation8_spill] sm:$0xff]  ;;  %v11378_v30 = vld [vmem:[#allocation9_spill] sm:$0xff]  ;;  %v5045_v8 = vor.u32 %v6239_v4, %v5042_v60  ;;  %v5167_v60 = vld [vmem:[%s11173_s0 + $0x20] sm:$0xff] }
 0x10e   :  { %v803_v39 = vpack.c.bf16 %v802_v13, %v802_v13  ;;  %v785_v6 = vpop.f32.mrf.mxu2  ;;  %v5032_v9 = vld [vmem:[%s11174_s2 + $0x110] sm:$0xf]  ;;  %v6237_v13 = vld [vmem:[%s11174_s2 + $0x114] sm:$0xf] }
 0x10f   :  { %v798_v18 = vpop.f32.mrf.mxu3  ;;  %v5034_v6 = vld [vmem:[%s11174_s2 + $0x118] sm:$0xf0] }
 0x110   :  { %909 = vmatmul.bf16.vlgmr.msra.gmra.mxu0 %v803_v39  ;;  %922 = vmatmul.bf16.vlgmr.msra.gmra.mxu1 %v803_v39  ;;  %v5033_v39 = vor.u32 %v6238_v12, %v5032_v9  ;;  %v5037_v18 = vor.u32 %v6237_v13, %v5034_v6  ;;  %v1292_v12 = vld [vmem:[#allocation1 + $0x12] sm:$0xff]  ;;  %v1293_v13 = vld [vmem:[#allocation1 + $0x1b] sm:$0xff] }
 0x111   :  { %1105 = vmatpush.bf16.msra.mxu0 %v6961_v33  ;;  %1118 = vmatpush.bf16.msra.mxu1 %v6966_v34  ;;  %v7728_v6 = vld [vmem:[#allocation1 + $0x3f] sm:$0xff] }
 0x112   :  { %1358 = vmatpush.bf16.msra.mxu2 %v6961_v33  ;;  %1371 = vmatpush.bf16.msra.mxu3 %v6966_v34  ;;  %v11379_v33 = vld [vmem:[#allocation10_spill] sm:$0xff]  ;;  %v11380_v34 = vld [vmem:[#allocation11_spill] sm:$0xff] }
 0x113   :  { %1314 = vmatmul.bf16.vlgmr.msrb.gmra.mxu2 %v1290_v31  ;;  %v5147_v31 = vld [vmem:[%s11174_s2 + $0x1d8] sm:$0xf0] }
 0x115   :  { %1106 = vmatpush.bf16.msra.mxu0 %v11372_v17  ;;  %1119 = vmatpush.bf16.msra.mxu1 %v11373_v21 }
 0x116   :  { %1359 = vmatpush.bf16.msra.mxu2 %v11372_v17  ;;  %1372 = vmatpush.bf16.msra.mxu3 %v11373_v21  ;;  %v6235_v17 = vld [vmem:[%s11174_s2 + $0x104] sm:$0xf] }
 0x119   :  { %1107 = vmatpush.bf16.msra.mxu0 %v11374_v22  ;;  %1120 = vmatpush.bf16.msra.mxu1 %v11375_v25 }
 0x11a   :  { %1360 = vmatpush.bf16.msra.mxu2 %v11374_v22  ;;  %1373 = vmatpush.bf16.msra.mxu3 %v11375_v25  ;;  %v5026_v22 = vld [vmem:[%s11174_s2 + $0x108] sm:$0xf0] }
 0x11b   :  { %v5029_v25 = vor.u32 %v6235_v17, %v5026_v22  ;;  %v6265_v17 = vld [vmem:[%s11174_s2 + $0x1f4] sm:$0xf]  ;;  %v5153_v22 = vld [vmem:[%s11174_s2 + $0x1e0] sm:$0xf] }
 0x11d   :  { %1108 = vmatpush.bf16.msra.mxu0 %v11376_v26  ;;  %1121 = vmatpush.bf16.msra.mxu1 %v11377_v29 }
 0x11e   :  { %1361 = vmatpush.bf16.msra.mxu2 %v11376_v26  ;;  %1374 = vmatpush.bf16.msra.mxu3 %v11377_v29  ;;  %v7622_v26 = vld [vmem:[%s11172_s1 + $0xb8] sm:$0xff] }
 0x11f   :  { %v7628_v29 = vld [vmem:[%s11172_s1 + $0xf8] sm:$0xff] }
 0x120   :  { %1061 = vmatmul.bf16.vlgmr.msrb.gmra.mxu0 %v1037_v61  ;;  %1074 = vmatmul.bf16.vlgmr.msrb.gmra.mxu1 %v1038_v62 }
 0x121   :  { %1109 = vmatpush.bf16.msra.mxu0 %v11378_v30  ;;  %1122 = vmatpush.bf16.msra.mxu1 %v11379_v33 }
 0x122   :  { %1362 = vmatpush.bf16.msra.mxu2 %v11378_v30  ;;  %1375 = vmatpush.bf16.msra.mxu3 %v11379_v33 }
 0x125   :  { %1110 = vmatpush.bf16.msra.mxu0 %v11380_v34  ;;  %1123 = vmatpush.bf16.msra.mxu1 %v11381_v7 }
 0x126   :  { %1363 = vmatpush.bf16.msra.mxu2 %v11380_v34  ;;  %1376 = vmatpush.bf16.msra.mxu3 %v11381_v7  ;;  %v7634_v34 = vld [vmem:[%s11172_s1 + $0xb0] sm:$0xff] }
 0x127   :  { %v7640_v7 = vld [vmem:[%s11172_s1 + $0xf0] sm:$0xff] }
 0x129   :  { %1111 = vmatpush.bf16.msra.mxu0 %v11382_v23  ;;  %1124 = vmatpush.bf16.msra.mxu1 %v11383_v2 }
 0x12a   :  { %1364 = vmatpush.bf16.msra.mxu2 %v11382_v23  ;;  %1377 = vmatpush.bf16.msra.mxu3 %v11383_v2  ;;  %v7646_v23 = vld [vmem:[%s11172_s1 + $0xa8] sm:$0xff] }
 0x12b   :  { %v7652_v2 = vld [vmem:[%s11172_s1 + $0xe8] sm:$0xff] }
 0x12d   :  { %1112 = vmatpush.bf16.msra.mxu0 %v11384_v45  ;;  %1125 = vmatpush.bf16.msra.mxu1 %v11385_v40 }
 0x12e   :  { %1365 = vmatpush.bf16.msra.mxu2 %v11384_v45  ;;  %1378 = vmatpush.bf16.msra.mxu3 %v11385_v40 }
 0x130   :  { %1113 = vmatmul.bf16.vlgmr.msra.gmra.mxu0 %v1041_v16  ;;  %1126 = vmatmul.bf16.vlgmr.msra.gmra.mxu1 %v1042_v19  ;;  %v5024_v16 = vld [vmem:[%s11174_s2 + $0x100] sm:$0xf]  ;;  %v6236_v19 = vld [vmem:[%s11174_s2 + $0x104] sm:$0xf0] }
 0x131   :  { %1258 = vmatpush.bf16.msrb.mxu0 %v5081_v38  ;;  %1271 = vmatpush.bf16.msrb.mxu1 %v5085_v37  ;;  %v5025_v21 = vor.u32 %v6236_v19, %v5024_v16  ;;  %v7682_v37 = vld [vmem:[%s11172_s1 + $0xd8] sm:$0xff] }
 0x132   :  { %11387 = vst [vmem:[#allocation14_spill] sm:$0xff] %v7682_v37  ;;  %1366 = vmatmul.bf16.vlgmr.msra.gmra.mxu2 %v1294_v53  ;;  %v7745_v16 = vld [vmem:[%s11172_s1 + $0x1f8] sm:$0xff]  ;;  %v6259_v53 = vld [vmem:[%s11174_s2 + $0x1c4] sm:$0xf] }
 0x135   :  { %1259 = vmatpush.bf16.msrb.mxu0 %v5073_v46  ;;  %1272 = vmatpush.bf16.msrb.mxu1 %v5077_v28  ;;  %v7688_v46 = vld [vmem:[%s11172_s1 + $0x90] sm:$0xff] }
 0x136   :  { %11388 = vst [vmem:[#allocation17_spill] sm:$0xff] %v7688_v46  ;;  %v7694_v28 = vld [vmem:[%s11172_s1 + $0xd0] sm:$0xff] }
 0x137   :  { %11389 = vst [vmem:[#allocation3_spill] sm:$0xff] %v7694_v28 }
 0x139   :  { %1260 = vmatpush.bf16.msrb.mxu0 %v5065_v35  ;;  %1273 = vmatpush.bf16.msrb.mxu1 %v5069_v36  ;;  %v7706_v35 = vld [vmem:[%s11172_s1 + $0xc8] sm:$0xff] }
 0x13a   :  { %11391 = vst [vmem:[#allocation5_spill] sm:$0xff] %v7706_v35  ;;  %v1291_v36 = vld [vmem:[#allocation1 + $0x9] sm:$0xff] }
 0x13b   :  { %1327 = vmatmul.bf16.vlgmr.msrb.gmra.mxu3 %v1291_v36 }
 0x13d   :  { %1261 = vmatpush.bf16.msrb.mxu0 %v5057_v56  ;;  %1274 = vmatpush.bf16.msrb.mxu1 %v5061_v20  ;;  %v1295_v20 = vld [vmem:[#allocation1 + $0x2d] sm:$0xff] }
 0x141   :  { %1262 = vmatpush.bf16.msrb.mxu0 %v5049_v0  ;;  %1275 = vmatpush.bf16.msrb.mxu1 %v5053_v1 }
 0x145   :  { %1263 = vmatpush.bf16.msrb.mxu0 %v5041_v5  ;;  %1276 = vmatpush.bf16.msrb.mxu1 %v5045_v8 }
 0x149   :  { %1264 = vmatpush.bf16.msrb.mxu0 %v5033_v39  ;;  %1277 = vmatpush.bf16.msrb.mxu1 %v5037_v18  ;;  %v7726_v39 = vld [vmem:[#allocation1 + $0x36] sm:$0xff]  ;;  %v5161_v18 = vld [vmem:[%s11174_s2 + $0x1f0] sm:$0xf] }
 0x14a   :  { %1542 = vst [vmem:[#allocation1] ss:$9 sm:$0xff] %v5167_v60  ;;  %v7871_v60 = vld [vmem:[%s11172_s1 + $0x1c0] sm:$0xff] }
 0x14b   :  { %1379 = vmatmul.bf16.vlgmr.msra.gmra.mxu3 %v1295_v20  ;;  %v5139_v20 = vld [vmem:[%s11174_s2 + $0x1c8] sm:$0xf0] }
 0x14d   :  { %1265 = vmatpush.bf16.msrb.mxu0 %v5025_v21  ;;  %1278 = vmatpush.bf16.msrb.mxu1 %v5029_v25  ;;  %v5163_v21 = vld [vmem:[%s11174_s2 + $0x1f8] sm:$0xf0] }
 0x14e   :  { %v5166_v25 = vor.u32 %v6265_v17, %v5163_v21  ;;  %v7933_v17 = vld [vmem:[%s11172_s1 + $0x58] sm:$0xff]  ;;  %v7939_v21 = vld [vmem:[%s11172_s1 + $0x10] sm:$0xff] }
 0x150   :  { %1524 = vmatpush.bf16.msrb.mxu3 %v5166_v25  ;;  %v7951_v25 = vld [vmem:[%s11172_s1 + $0x8] sm:$0xff] }
 0x151   :  { %1332 = vmatpush.bf16.msra.mxu0 %v7622_v26  ;;  %1345 = vmatpush.bf16.msra.mxu1 %v7628_v29 }
 0x153   :  { %v7551_v43 = vpop.f32.mrf.mxu2  ;;  %v7553_v44 = vpop.f32.mrf.mxu3 }
 0x155   :  { %1333 = vmatpush.bf16.msra.mxu0 %v7634_v34  ;;  %1346 = vmatpush.bf16.msra.mxu1 %v7640_v7 }
 0x159   :  { %1334 = vmatpush.bf16.msra.mxu0 %v7646_v23  ;;  %1347 = vmatpush.bf16.msra.mxu1 %v7652_v2 }
 0x15b   :  { %v1018_v47 = vpop.f32.mrf.mxu2  ;;  %v1031_v48 = vpop.f32.mrf.mxu3 }
 0x15d   :  { %1335 = vmatpush.bf16.msra.mxu0 %v7658_v10  ;;  %1348 = vmatpush.bf16.msra.mxu1 %v7664_v50 }
 0x161   :  { %1336 = vmatpush.bf16.msra.mxu0 %v7676_v3  ;;  %1349 = vmatpush.bf16.msra.mxu1 %v7682_v37 }
 0x165   :  { %v7603_v61 = vpop.f32.mrf.mxu2  ;;  %1337 = vmatpush.bf16.msra.mxu0 %v7688_v46  ;;  %1350 = vmatpush.bf16.msra.mxu1 %v7694_v28 }
 0x166   :  { %v7605_v62 = vpop.f32.mrf.mxu3 }
 0x169   :  { %1338 = vmatpush.bf16.msra.mxu0 %v7700_v32  ;;  %1351 = vmatpush.bf16.msra.mxu1 %v7706_v35 }
 0x16d   :  { %v1090_v30 = vpop.f32.mrf.mxu2 }
 0x16e   :  { %v1103_v33 = vpop.f32.mrf.mxu3  ;;  %v6264_v30 = vld [vmem:[%s11174_s2 + $0x1e4] sm:$0xf0] }
 0x16f   :  { %v6263_v33 = vld [vmem:[%s11174_s2 + $0x1e4] sm:$0xf] }
 0x175   :  { %v1140_v45 = vpop.f32.mrf.mxu2 }
 0x176   :  { %v1153_v40 = vpop.f32.mrf.mxu3 }
 0x17d   :  { %v1142_v14 = vpop.f32.mrf.mxu2 }
 0x17e   :  { %v1155_v27 = vpop.f32.mrf.mxu3  ;;  %v6262_v14 = vld [vmem:[%s11174_s2 + $0x1d4] sm:$0xf0] }
 0x17f   :  { %v7775_v27 = vld [vmem:[%s11172_s1 + $0x1b0] sm:$0xff] }
 0x18d   :  { %v910_v24 = vpop.f32.mrf.mxu0  ;;  %v923_v38 = vpop.f32.mrf.mxu1 }
 0x18e   :  { %v7668_v11 = vadd.f32 %v7551_v43, %v910_v24  ;;  %v7671_v54 = vadd.f32 %v7553_v44, %v923_v38  ;;  %v7712_v43 = vld [vmem:[%s11172_s1 + $0x80] sm:$0xff]  ;;  %v5145_v38 = vld [vmem:[%s11174_s2 + $0x1d0] sm:$0xf] }
 0x18f   :  { %11392 = vst [vmem:[#allocation6_spill] sm:$0xff] %v7712_v43  ;;  %1339 = vmatpush.bf16.msra.mxu0 %v7712_v43  ;;  %v7718_v44 = vld [vmem:[%s11172_s1 + $0xc0] sm:$0xff]  ;;  %v5146_v36 = vor.u32 %v6262_v14, %v5145_v38  ;;  %v7987_v38 = vld [vmem:[%s11172_s1 + $0x130] sm:$0xff] }
 0x190   :  { %1352 = vmatpush.bf16.msra.mxu1 %v7718_v44  ;;  %11393 = vst [vmem:[#allocation7_spill] sm:$0xff] %v7987_v38  ;;  %v7993_v14 = vld [vmem:[%s11172_s1 + $0x170] sm:$0xff] }
 0x191   :  { %11394 = vst [vmem:[#allocation8_spill] sm:$0xff] %v7993_v14 }
 0x195   :  { %v912_v58 = vpop.f32.mrf.mxu0  ;;  %v925_v49 = vpop.f32.mrf.mxu1 }
 0x196   :  { %v7781_v58 = vld [vmem:[%s11172_s1 + $0x1f0] sm:$0xff] }
 0x197   :  { %v6261_v49 = vld [vmem:[%s11174_s2 + $0x1d4] sm:$0xf] }
 0x19d   :  { %v1062_v47 = vpop.f32.mrf.mxu0  ;;  %v1075_v48 = vpop.f32.mrf.mxu1 }
 0x19e   :  { %v1076_v51 = vadd.f32 %v1075_v48, %v1062_v47  ;;  %v5150_v47 = vor.u32 %v6261_v49, %v5147_v31  ;;  %v5137_v48 = vld [vmem:[%s11174_s2 + $0x1c0] sm:$0xf]  ;;  %v7999_v49 = vld [vmem:[%s11172_s1 + $0x128] sm:$0xff] }
 0x19f   :  { %11395 = vst [vmem:[#allocation9_spill] sm:$0xff] %v7999_v49  ;;  %v8005_v31 = vld [vmem:[%s11172_s1 + $0x168] sm:$0xff] }
 0x1a0   :  { %v1089_v56 = vadd.f32 %v7603_v61, %v1076_v51  ;;  %v6266_v61 = vld [vmem:[%s11174_s2 + $0x1f4] sm:$0xf0]  ;;  %v6260_v51 = vld [vmem:[%s11174_s2 + $0x1c4] sm:$0xf0]  ;;  %11396 = vst [vmem:[#allocation10_spill] sm:$0xff] %v8005_v31 }
 0x1a1   :  { %v5162_v19 = vor.u32 %v6266_v61, %v5161_v18  ;;  %v7915_v18 = vld [vmem:[%s11172_s1 + $0x20] sm:$0xff] }
 0x1a2   :  { %v1102_v63 = vadd.f32 %v7605_v62, %v1089_v56  ;;  %v7739_v62 = vld [vmem:[%s11172_s1 + $0x1b8] sm:$0xff]  ;;  %v5138_v56 = vor.u32 %v6260_v51, %v5137_v48  ;;  %v7921_v61 = vld [vmem:[%s11172_s1 + $0x60] sm:$0xff] }
 0x1a3   :  { %1511 = vmatpush.bf16.msrb.mxu2 %v5162_v19  ;;  %v7927_v19 = vld [vmem:[%s11172_s1 + $0x18] sm:$0xff] }
 0x1a4   :  { %v8023_v48 = vld [vmem:[%s11172_s1 + $0x118] sm:$0xff] }
 0x1a5   :  { %v1064_v52 = vpop.f32.mrf.mxu0  ;;  %v1077_v55 = vpop.f32.mrf.mxu1  ;;  %11399 = vst [vmem:[#allocation15_spill] sm:$0xff] %v8023_v48  ;;  %v8029_v51 = vld [vmem:[%s11172_s1 + $0x158] sm:$0xff] }
 0x1a6   :  { %v7799_v52 = vld [vmem:[%s11172_s1 + $0x1a8] sm:$0xff]  ;;  %11400 = vst [vmem:[#allocation16_spill] sm:$0xff] %v8029_v51 }
 0x1a7   :  { %v7805_v55 = vld [vmem:[%s11172_s1 + $0x1e8] sm:$0xff] }
 0x1ad   :  { %v1114_v59 = vpop.f32.mrf.mxu0  ;;  %v1127_v41 = vpop.f32.mrf.mxu1 }
 0x1ae   :  { %v1115_v0 = vadd.f32 %v1114_v59, %v1102_v63  ;;  %v7817_v63 = vld [vmem:[%s11172_s1 + $0x1a0] sm:$0xff] }
 0x1af   :  { %v7823_v59 = vld [vmem:[%s11172_s1 + $0x1e0] sm:$0xff] }
 0x1b0   :  { %v1128_v42 = vadd.f32 %v1127_v41, %v1115_v0  ;;  %v5142_v41 = vor.u32 %v6259_v53, %v5139_v20  ;;  %v7829_v0 = vld [vmem:[%s11172_s1 + $0x198] sm:$0xff]  ;;  %v8041_v53 = vld [vmem:[%s11172_s1 + $0x150] sm:$0xff]  ;;  %v8047_v20 = vld [vmem:[%s11172_s1 + $0x108] sm:$0xff] }
 0x1b1   :  { %11402 = vst [vmem:[#allocation19_spill] sm:$0xff] %v8041_v53 }
 0x1b2   :  { %v1141_v1 = vadd.f32 %v1140_v45, %v1128_v42  ;;  %v5155_v45 = vld [vmem:[%s11174_s2 + $0x1e8] sm:$0xf0]  ;;  %v7835_v42 = vld [vmem:[%s11172_s1 + $0x1d8] sm:$0xff]  ;;  %11403 = vst [vmem:[#allocation20_spill] sm:$0xff] %v8047_v20 }
 0x1b3   :  { %v5158_v24 = vor.u32 %v6263_v33, %v5155_v45  ;;  %v7963_v33 = vld [vmem:[%s11172_s1] sm:$0xff] }
 0x1b4   :  { %v1154_v15 = vadd.f32 %v1153_v40, %v1141_v1  ;;  %v5154_v40 = vor.u32 %v6264_v30, %v5153_v22  ;;  %v7841_v1 = vld [vmem:[%s11172_s1 + $0x190] sm:$0xff]  ;;  %v7957_v30 = vld [vmem:[%s11172_s1 + $0x48] sm:$0xff]  ;;  %v7969_v45 = vld [vmem:[%s11172_s1 + $0x40] sm:$0xff] }
 0x1b5   :  { %v1116_v57 = vpop.f32.mrf.mxu0  ;;  %v1129_v4 = vpop.f32.mrf.mxu1  ;;  %1525 = vmatpush.bf16.msrb.mxu3 %v5158_v24  ;;  %v7945_v22 = vld [vmem:[%s11172_s1 + $0x50] sm:$0xff]  ;;  %v7981_v24 = vld [vmem:[%s11172_s1 + $0x178] sm:$0xff] }
 0x1b6   :  { %vm1157_vm2 = vcmp.gt.f32.partialorder %v1154_v15, 0.0  ;;  %v1158_v5 = vmul.f32 0.2, %v1154_v15  ;;  %1512 = vmatpush.bf16.msrb.mxu2 %v5154_v40  ;;  %v7853_v57 = vld [vmem:[%s11172_s1 + $0x188] sm:$0xff]  ;;  %v7975_v40 = vld [vmem:[%s11172_s1 + $0x138] sm:$0xff] }
 0x1b7   :  { %v7859_v4 = vld [vmem:[%s11172_s1 + $0x1c8] sm:$0xff] }
 0x1b8   :  { %v1159_v8 = vsel %vm1157_vm2, %v1154_v15, %v1158_v5  ;;  %v7847_v15 = vld [vmem:[%s11172_s1 + $0x1d0] sm:$0xff]  ;;  %v7865_v5 = vld [vmem:[%s11172_s1 + $0x180] sm:$0xff]  ;;  %vm4589_vm2 = vcmask 1041408  }
 0x1b9   :  { %v1160_v9 = vpack.c.bf16 %v1159_v8, %v1159_v8  ;;  %1526 = vmatpush.bf16.msrb.mxu3 %v5150_v47  ;;  %v7877_v8 = vld [vmem:[%s11172_s1 + $0x38] sm:$0xff]  ;;  %v8017_v47 = vld [vmem:[%s11172_s1 + $0x160] sm:$0xff] }
 0x1ba   :  { %1513 = vmatpush.bf16.msrb.mxu2 %v5146_v36  ;;  %v8011_v36 = vld [vmem:[%s11172_s1 + $0x120] sm:$0xff]  ;;  %11398 = vst [vmem:[#allocation12_spill] sm:$0xff] %v8017_v47 }
 0x1bb   :  { %1266 = vmatmul.bf16.vlgmr.msrb.gmra.mxu0 %v1160_v9  ;;  %1279 = vmatmul.bf16.vlgmr.msrb.gmra.mxu1 %v1160_v9  ;;  %v7883_v9 = vld [vmem:[%s11172_s1 + $0x78] sm:$0xff]  ;;  %11397 = vst [vmem:[#allocation11_spill] sm:$0xff] %v8011_v36 }
 0x1bc   :  { %1384 = vmatpush.bf16.msrb.mxu0 %v7739_v62  ;;  %1397 = vmatpush.bf16.msrb.mxu1 %v7745_v16 }
 0x1bd   :  { %1527 = vmatpush.bf16.msrb.mxu3 %v5142_v41  ;;  %v8053_v41 = vld [vmem:[%s11172_s1 + $0x148] sm:$0xff] }
 0x1be   :  { %1514 = vmatpush.bf16.msrb.mxu2 %v5138_v56  ;;  %v8035_v56 = vld [vmem:[%s11172_s1 + $0x110] sm:$0xff]  ;;  %11404 = vst [vmem:[#allocation21_spill] sm:$0xff] %v8053_v41 }
 0x1bf   :  { %11401 = vst [vmem:[#allocation18_spill] sm:$0xff] %v8035_v56 }
 0x1c0   :  { %1385 = vmatpush.bf16.msrb.mxu0 %v7775_v27  ;;  %1398 = vmatpush.bf16.msrb.mxu1 %v7781_v58 }
 0x1c4   :  { %1386 = vmatpush.bf16.msrb.mxu0 %v7799_v52  ;;  %1399 = vmatpush.bf16.msrb.mxu1 %v7805_v55 }
 0x1c8   :  { %1387 = vmatpush.bf16.msrb.mxu0 %v7817_v63  ;;  %1400 = vmatpush.bf16.msrb.mxu1 %v7823_v59 }
 0x1cb   :  { %1340 = vmatmul.bf16.vlgmr.msra.gmra.mxu0 %v1292_v12  ;;  %1353 = vmatmul.bf16.vlgmr.msra.gmra.mxu1 %v1293_v13  ;;  %v7891_v12 = vld [vmem:[%s11172_s1 + $0x30] sm:$0xff] }
 0x1cc   :  { %1388 = vmatpush.bf16.msrb.mxu0 %v7829_v0  ;;  %1401 = vmatpush.bf16.msrb.mxu1 %v7835_v42  ;;  %v7897_v13 = vld [vmem:[%s11172_s1 + $0x70] sm:$0xff] }
 0x1d0   :  { %1389 = vmatpush.bf16.msrb.mxu0 %v7841_v1  ;;  %1402 = vmatpush.bf16.msrb.mxu1 %v7847_v15 }
 0x1d4   :  { %1390 = vmatpush.bf16.msrb.mxu0 %v7853_v57  ;;  %1403 = vmatpush.bf16.msrb.mxu1 %v7859_v4 }
 0x1d8   :  { %1391 = vmatpush.bf16.msrb.mxu0 %v7865_v5  ;;  %1404 = vmatpush.bf16.msrb.mxu1 %v7871_v60 }
 0x1db   :  { %1392 = vmatmul.bf16.vlgmr.msrb.gmra.mxu0 %v7726_v39  ;;  %1405 = vmatmul.bf16.vlgmr.msrb.gmra.mxu1 %v7728_v6  ;;  %v7903_v39 = vld [vmem:[%s11172_s1 + $0x28] sm:$0xff] }
 0x1dc   :  { %1559 = vmatpush.bf16.msra.mxu0 %v7877_v8  ;;  %1572 = vmatpush.bf16.msra.mxu1 %v7883_v9  ;;  %v7909_v6 = vld [vmem:[%s11172_s1 + $0x68] sm:$0xff] }
 0x1e0   :  { %1560 = vmatpush.bf16.msra.mxu0 %v7891_v12  ;;  %1573 = vmatpush.bf16.msra.mxu1 %v7897_v13 }
 0x1e4   :  { %1561 = vmatpush.bf16.msra.mxu0 %v7903_v39  ;;  %1574 = vmatpush.bf16.msra.mxu1 %v7909_v6 }
 0x1e8   :  { %1562 = vmatpush.bf16.msra.mxu0 %v7915_v18  ;;  %1575 = vmatpush.bf16.msra.mxu1 %v7921_v61 }
 0x1ec   :  { %1563 = vmatpush.bf16.msra.mxu0 %v7927_v19  ;;  %1576 = vmatpush.bf16.msra.mxu1 %v7933_v17 }
 0x1f0   :  { %1564 = vmatpush.bf16.msra.mxu0 %v7939_v21  ;;  %1577 = vmatpush.bf16.msra.mxu1 %v7945_v22 }
 0x1f4   :  { %1565 = vmatpush.bf16.msra.mxu0 %v7951_v25  ;;  %1578 = vmatpush.bf16.msra.mxu1 %v7957_v30 }
 0x1f8   :  { %1566 = vmatpush.bf16.msra.mxu0 %v7963_v33  ;;  %1579 = vmatpush.bf16.msra.mxu1 %v7969_v45 }
 0x1fc   :  { %1611 = vmatpush.bf16.msrb.mxu0 %v7975_v40  ;;  %1624 = vmatpush.bf16.msrb.mxu1 %v7981_v24 }
 0x200   :  { %1612 = vmatpush.bf16.msrb.mxu0 %v7987_v38  ;;  %1625 = vmatpush.bf16.msrb.mxu1 %v7993_v14  ;;  %v6254_v14 = vld [vmem:[%s11174_s2 + $0x194] sm:$0xf0] }
 0x204   :  { %1613 = vmatpush.bf16.msrb.mxu0 %v7999_v49  ;;  %1626 = vmatpush.bf16.msrb.mxu1 %v8005_v31  ;;  %v6255_v31 = vld [vmem:[%s11174_s2 + $0x1a4] sm:$0xf]  ;;  %v5113_v49 = vld [vmem:[%s11174_s2 + $0x190] sm:$0xf] }
 0x208   :  { %1614 = vmatpush.bf16.msrb.mxu0 %v8011_v36  ;;  %1627 = vmatpush.bf16.msrb.mxu1 %v8017_v47  ;;  %v6256_v36 = vld [vmem:[%s11174_s2 + $0x1a4] sm:$0xf0] }
 0x20c   :  { %1615 = vmatpush.bf16.msrb.mxu0 %v8023_v48  ;;  %1628 = vmatpush.bf16.msrb.mxu1 %v8029_v51  ;;  %v6257_v51 = vld [vmem:[%s11174_s2 + $0x1b4] sm:$0xf]  ;;  %v5131_v48 = vld [vmem:[%s11174_s2 + $0x1b8] sm:$0xf0] }
 0x20d   :  { %v5134_v47 = vor.u32 %v6257_v51, %v5131_v48  ;;  %v5123_v48 = vld [vmem:[%s11174_s2 + $0x1a8] sm:$0xf0] }
 0x20e   :  { %v5126_v51 = vor.u32 %v6255_v31, %v5123_v48  ;;  %v5115_v31 = vld [vmem:[%s11174_s2 + $0x198] sm:$0xf0]  ;;  %v6252_v48 = vld [vmem:[%s11174_s2 + $0x184] sm:$0xf0] }
 0x20f   :  { %1528 = vmatpush.bf16.msrb.mxu3 %v5134_v47  ;;  %v5114_v47 = vor.u32 %v6254_v14, %v5113_v49  ;;  %v5107_v14 = vld [vmem:[%s11174_s2 + $0x188] sm:$0xf0] }
 0x210   :  { %1616 = vmatpush.bf16.msrb.mxu0 %v8035_v56  ;;  %1629 = vmatpush.bf16.msrb.mxu1 %v8041_v53  ;;  %v8059_v56 = vld [vmem:[%s11172_s1 + $0x100] sm:$0xff] }
 0x211   :  { %11405 = vst [vmem:[#allocation22_spill] sm:$0xff] %v8059_v56  ;;  %v8065_v53 = vld [vmem:[%s11172_s1 + $0x140] sm:$0xff] }
 0x212   :  { %11406 = vst [vmem:[#allocation23_spill] sm:$0xff] %v8065_v53 }
 0x213   :  { %1529 = vmatpush.bf16.msrb.mxu3 %v5126_v51  ;;  %v6251_v51 = vld [vmem:[%s11174_s2 + $0x184] sm:$0xf] }
 0x214   :  { %1617 = vmatpush.bf16.msrb.mxu0 %v8047_v20  ;;  %1630 = vmatpush.bf16.msrb.mxu1 %v8053_v41  ;;  %v5129_v20 = vld [vmem:[%s11174_s2 + $0x1b0] sm:$0xf]  ;;  %v6258_v41 = vld [vmem:[%s11174_s2 + $0x1b4] sm:$0xf0] }
 0x218   :  { %1618 = vmatpush.bf16.msrb.mxu0 %v8059_v56  ;;  %1631 = vmatpush.bf16.msrb.mxu1 %v8065_v53  ;;  %v5130_v56 = vor.u32 %v6258_v41, %v5129_v20  ;;  %v5121_v53 = vld [vmem:[%s11174_s2 + $0x1a0] sm:$0xf]  ;;  %v1315_v20 = vpop.f32.mrf.mxu2 }
 0x219   :  { %v5122_v41 = vor.u32 %v6256_v36, %v5121_v53  ;;  %v6253_v36 = vld [vmem:[%s11174_s2 + $0x194] sm:$0xf] }
 0x21a   :  { %1515 = vmatpush.bf16.msrb.mxu2 %v5130_v56  ;;  %v1328_v56 = vpop.f32.mrf.mxu3  ;;  %v5118_v53 = vor.u32 %v6253_v36, %v5115_v31  ;;  %v5110_v36 = vor.u32 %v6251_v51, %v5107_v14 }
 0x21c   :  { %1530 = vmatpush.bf16.msrb.mxu3 %v5118_v53 }
 0x21e   :  { %1516 = vmatpush.bf16.msrb.mxu2 %v5122_v41  ;;  %v5105_v41 = vld [vmem:[%s11174_s2 + $0x180] sm:$0xf] }
 0x21f   :  { %v5106_v38 = vor.u32 %v6252_v48, %v5105_v41 }
 0x220   :  { %v1317_v49 = vpop.f32.mrf.mxu2  ;;  %1531 = vmatpush.bf16.msrb.mxu3 %v5110_v36 }
 0x222   :  { %1517 = vmatpush.bf16.msrb.mxu2 %v5114_v47  ;;  %v1330_v31 = vpop.f32.mrf.mxu3 }
 0x224   :  { %1598 = vmatpush.bf16.msra.mxu3 %v7628_v29 }
 0x226   :  { %1518 = vmatpush.bf16.msrb.mxu2 %v5106_v38 }
 0x228   :  { %1599 = vmatpush.bf16.msra.mxu3 %v7640_v7  ;;  %v1367_v47 = vpop.f32.mrf.mxu2 }
 0x22a   :  { %1585 = vmatpush.bf16.msra.mxu2 %v7622_v26  ;;  %v1380_v41 = vpop.f32.mrf.mxu3 }
 0x22c   :  { %1600 = vmatpush.bf16.msra.mxu3 %v7652_v2 }
 0x22e   :  { %1586 = vmatpush.bf16.msra.mxu2 %v7634_v34 }
 0x230   :  { %1601 = vmatpush.bf16.msra.mxu3 %v7664_v50  ;;  %v1369_v38 = vpop.f32.mrf.mxu2 }
 0x232   :  { %1587 = vmatpush.bf16.msra.mxu2 %v7646_v23  ;;  %v1382_v53 = vpop.f32.mrf.mxu3 }
 0x233   :  { %v1329_v53 = vadd.f32 %v1328_v56, %v1315_v20  ;;  %v5248_v56 = vld [vmem:[%s11173_s0 + $0x28] sm:$0xff] }
 0x234   :  { %1602 = vmatpush.bf16.msra.mxu3 %v7682_v37 }
 0x236   :  { %1588 = vmatpush.bf16.msra.mxu2 %v7658_v10 }
 0x238   :  { %v1267_v48 = vpop.f32.mrf.mxu0  ;;  %v1280_v51 = vpop.f32.mrf.mxu1  ;;  %1603 = vmatpush.bf16.msra.mxu3 %v7694_v28 }
 0x239   :  { %v8127_v14 = vadd.f32 %v1267_v48, %v7668_v11  ;;  %v8130_v49 = vadd.f32 %v1280_v51, %v7671_v54  ;;  %v1543_v54 = vld [vmem:[#allocation1] sm:$0xff]  ;;  %v1544_v51 = vld [vmem:[#allocation1 + $0x9] sm:$0xff] }
 0x23a   :  { %1589 = vmatpush.bf16.msra.mxu2 %v7676_v3  ;;  %1567 = vmatmul.bf16.vlgmr.msra.gmra.mxu0 %v1543_v54  ;;  %v1548_v3 = vld [vmem:[#allocation1 + $0x2d] sm:$0xff]  ;;  %v6280_v54 = vld [vmem:[%s11174_s2 + $0x264] sm:$0xf0] }
 0x23b   :  { %11407 = vst [vmem:[#allocation24_spill] sm:$0xff] %v8127_v14  ;;  %1580 = vmatmul.bf16.vlgmr.msra.gmra.mxu1 %v1544_v51  ;;  %v6279_v51 = vld [vmem:[%s11174_s2 + $0x264] sm:$0xf] }
 0x23c   :  { %11408 = vst [vmem:[#allocation25_spill] sm:$0xff] %v8130_v49  ;;  %1604 = vmatpush.bf16.msra.mxu3 %v7706_v35 }
 0x23e   :  { %1590 = vmatpush.bf16.msra.mxu2 %v7688_v46 }
 0x240   :  { %v1269_v36 = vpop.f32.mrf.mxu0  ;;  %v1282_v31 = vpop.f32.mrf.mxu1  ;;  %1605 = vmatpush.bf16.msra.mxu3 %v7718_v44 }
 0x242   :  { %1591 = vmatpush.bf16.msra.mxu2 %v7700_v32 }
 0x246   :  { %1592 = vmatpush.bf16.msra.mxu2 %v7712_v43  ;;  %v1547_v43 = vld [vmem:[#allocation1 + $0x24] sm:$0xff] }
 0x248   :  { %v1341_v38 = vpop.f32.mrf.mxu0  ;;  %v1354_v11 = vpop.f32.mrf.mxu1 }
 0x249   :  { %v1342_v48 = vadd.f32 %v1341_v38, %v1329_v53  ;;  %v5234_v53 = vld [vmem:[%s11174_s2 + $0x260] sm:$0xf] }
 0x24a   :  { %1619 = vmatmul.bf16.vlgmr.msrb.gmra.mxu0 %v1547_v43  ;;  %v6281_v43 = vld [vmem:[%s11174_s2 + $0x274] sm:$0xf] }
 0x24b   :  { %v1355_v46 = vadd.f32 %v1354_v11, %v1342_v48  ;;  %1632 = vmatmul.bf16.vlgmr.msrb.gmra.mxu1 %v1548_v3  ;;  %v5242_v3 = vld [vmem:[%s11174_s2 + $0x270] sm:$0xf] }
 0x24d   :  { %v1368_v32 = vadd.f32 %v1367_v47, %v1355_v46  ;;  %v1545_v46 = vld [vmem:[#allocation1 + $0x12] sm:$0xff] }
 0x24e   :  { %v1549_v47 = vld [vmem:[#allocation1 + $0x36] sm:$0xff] }
 0x24f   :  { %v1381_v14 = vadd.f32 %v1380_v41, %v1368_v32  ;;  %v1546_v32 = vld [vmem:[#allocation1 + $0x1b] sm:$0xff] }
 0x250   :  { %v1343_v28 = vpop.f32.mrf.mxu0  ;;  %v1356_v49 = vpop.f32.mrf.mxu1  ;;  %v1550_v41 = vld [vmem:[#allocation1 + $0x3f] sm:$0xff] }
 0x251   :  { %1795 = vst [vmem:[#allocation1] ss:$9 sm:$0xff] %v5248_v56  ;;  %v5226_v56 = vld [vmem:[%s11174_s2 + $0x250] sm:$0xf] }
 0x258   :  { %v1393_v35 = vpop.f32.mrf.mxu0  ;;  %v1406_v36 = vpop.f32.mrf.mxu1 }
 0x259   :  { %v1394_v31 = vadd.f32 %v1393_v35, %v1381_v14  ;;  %v6282_v35 = vld [vmem:[%s11174_s2 + $0x274] sm:$0xf0]  ;;  %v5244_v14 = vld [vmem:[%s11174_s2 + $0x278] sm:$0xf0] }
 0x25a   :  { %v5247_v48 = vor.u32 %v6281_v43, %v5244_v14  ;;  %v6275_v14 = vld [vmem:[%s11174_s2 + $0x244] sm:$0xf] }
 0x25b   :  { %v1407_v37 = vadd.f32 %v1406_v36, %v1394_v31  ;;  %v5236_v36 = vld [vmem:[%s11174_s2 + $0x268] sm:$0xf0]  ;;  %v5235_v31 = vor.u32 %v6280_v54, %v5234_v53 }
 0x25c   :  { %1777 = vmatpush.bf16.msra.mxu1 %v5247_v48  ;;  %v5220_v53 = vld [vmem:[%s11174_s2 + $0x248] sm:$0xf0] }
 0x25d   :  { %vm1410_vm3 = vcmp.gt.f32.partialorder %v1407_v37, 0.0  ;;  %v1411_v20 = vmul.f32 0.2, %v1407_v37  ;;  %v5223_v48 = vor.u32 %v6275_v14, %v5220_v53  ;;  %v11413_v54 = vld [vmem:[#allocation11_spill] sm:$0xff]  ;;  %v5212_v14 = vld [vmem:[%s11174_s2 + $0x238] sm:$0xf0] }
 0x25f   :  { %v1412_v38 = vsel %vm1410_vm3, %v1407_v37, %v1411_v20  ;;  %v5243_v37 = vor.u32 %v6282_v35, %v5242_v3  ;;  %v5239_v20 = vor.u32 %v6279_v51, %v5236_v36  ;;  %v5218_v35 = vld [vmem:[%s11174_s2 + $0x240] sm:$0xf]  ;;  %v11414_v51 = vld [vmem:[#allocation12_spill] sm:$0xff]  ;;  %v11415_v36 = vld [vmem:[#allocation15_spill] sm:$0xff]  ;;  %vm4598_vm3 = vcmask 1024  }
 0x260   :  { %v1413_v11 = vpack.c.bf16 %v1412_v38, %v1412_v38  ;;  %v1395_v28 = vpop.f32.mrf.mxu0  ;;  %v1408_v49 = vpop.f32.mrf.mxu1  ;;  %v6278_v38 = vld [vmem:[%s11174_s2 + $0x254] sm:$0xf0] }
 0x261   :  { %1764 = vmatpush.bf16.msra.mxu0 %v5243_v37  ;;  %v5228_v28 = vld [vmem:[%s11174_s2 + $0x258] sm:$0xf0]  ;;  %v5227_v49 = vor.u32 %v6278_v38, %v5226_v56  ;;  %1778 = vmatpush.bf16.msra.mxu1 %v5239_v20  ;;  %v6276_v37 = vld [vmem:[%s11174_s2 + $0x244] sm:$0xf0]  ;;  %v11417_v20 = vld [vmem:[#allocation18_spill] sm:$0xff] }
 0x262   :  { %1519 = vmatmul.bf16.vlgmr.msrb.gmra.mxu2 %v1413_v11  ;;  %1532 = vmatmul.bf16.vlgmr.msrb.gmra.mxu3 %v1413_v11  ;;  %v6277_v11 = vld [vmem:[%s11174_s2 + $0x254] sm:$0xf]  ;;  %v5219_v43 = vor.u32 %v6276_v37, %v5218_v35  ;;  %v11418_v56 = vld [vmem:[#allocation19_spill] sm:$0xff]  ;;  %v6274_v35 = vld [vmem:[%s11174_s2 + $0x234] sm:$0xf0] }
 0x263   :  { %1637 = vmatpush.bf16.msrb.mxu2 %v7739_v62  ;;  %1650 = vmatpush.bf16.msrb.mxu3 %v7745_v16  ;;  %v5231_v3 = vor.u32 %v6277_v11, %v5228_v28  ;;  %v11419_v38 = vld [vmem:[#allocation20_spill] sm:$0xff]  ;;  %v11420_v11 = vld [vmem:[#allocation21_spill] sm:$0xff]  ;;  %v11421_v28 = vld [vmem:[#allocation22_spill] sm:$0xff] }
 0x264   :  { %v6273_v37 = vld [vmem:[%s11174_s2 + $0x234] sm:$0xf] }
 0x265   :  { %1765 = vmatpush.bf16.msra.mxu0 %v5235_v31  ;;  %1779 = vmatpush.bf16.msra.mxu1 %v5231_v3  ;;  %v11416_v31 = vld [vmem:[#allocation16_spill] sm:$0xff]  ;;  %v5215_v53 = vor.u32 %v6273_v37, %v5212_v14 }
 0x266   :  { %v5210_v3 = vld [vmem:[%s11174_s2 + $0x230] sm:$0xf] }
 0x267   :  { %1638 = vmatpush.bf16.msrb.mxu2 %v7775_v27  ;;  %1651 = vmatpush.bf16.msrb.mxu3 %v7781_v58 }
 0x269   :  { %1766 = vmatpush.bf16.msra.mxu0 %v5227_v49  ;;  %1780 = vmatpush.bf16.msra.mxu1 %v5223_v48  ;;  %v11422_v49 = vld [vmem:[#allocation23_spill] sm:$0xff]  ;;  %v5202_v48 = vld [vmem:[%s11174_s2 + $0x220] sm:$0xf] }
 0x26b   :  { %1639 = vmatpush.bf16.msrb.mxu2 %v7799_v52  ;;  %1652 = vmatpush.bf16.msrb.mxu3 %v7805_v55 }
 0x26d   :  { %1767 = vmatpush.bf16.msra.mxu0 %v5219_v43  ;;  %v5211_v43 = vor.u32 %v6274_v35, %v5210_v3  ;;  %1781 = vmatpush.bf16.msra.mxu1 %v5215_v53  ;;  %v5204_v35 = vld [vmem:[%s11174_s2 + $0x228] sm:$0xf0] }
 0x26f   :  { %1640 = vmatpush.bf16.msrb.mxu2 %v7817_v63  ;;  %1653 = vmatpush.bf16.msrb.mxu3 %v7823_v59 }
 0x271   :  { %1768 = vmatpush.bf16.msra.mxu0 %v5211_v43 }
 0x272   :  { %1593 = vmatmul.bf16.vlgmr.msra.gmra.mxu2 %v1545_v46  ;;  %1606 = vmatmul.bf16.vlgmr.msra.gmra.mxu3 %v1546_v32  ;;  %v11409_v46 = vld [vmem:[#allocation7_spill] sm:$0xff]  ;;  %v11410_v32 = vld [vmem:[#allocation8_spill] sm:$0xff] }
 0x273   :  { %1641 = vmatpush.bf16.msrb.mxu2 %v7829_v0  ;;  %1654 = vmatpush.bf16.msrb.mxu3 %v7835_v42 }
 0x277   :  { %1642 = vmatpush.bf16.msrb.mxu2 %v7841_v1  ;;  %1655 = vmatpush.bf16.msrb.mxu3 %v7847_v15 }
 0x27b   :  { %1643 = vmatpush.bf16.msrb.mxu2 %v7853_v57  ;;  %1656 = vmatpush.bf16.msrb.mxu3 %v7859_v4 }
 0x27f   :  { %1644 = vmatpush.bf16.msrb.mxu2 %v7865_v5  ;;  %1657 = vmatpush.bf16.msrb.mxu3 %v7871_v60 }
 0x282   :  { %1645 = vmatmul.bf16.vlgmr.msrb.gmra.mxu2 %v1549_v47  ;;  %1658 = vmatmul.bf16.vlgmr.msrb.gmra.mxu3 %v1550_v41  ;;  %v11411_v47 = vld [vmem:[#allocation9_spill] sm:$0xff]  ;;  %v11412_v41 = vld [vmem:[#allocation10_spill] sm:$0xff] }
 0x283   :  { %1812 = vmatpush.bf16.msra.mxu2 %v7877_v8  ;;  %1825 = vmatpush.bf16.msra.mxu3 %v7883_v9 }
 0x287   :  { %1813 = vmatpush.bf16.msra.mxu2 %v7891_v12  ;;  %1826 = vmatpush.bf16.msra.mxu3 %v7897_v13 }
 0x28b   :  { %1814 = vmatpush.bf16.msra.mxu2 %v7903_v39  ;;  %1827 = vmatpush.bf16.msra.mxu3 %v7909_v6 }
 0x28f   :  { %1815 = vmatpush.bf16.msra.mxu2 %v7915_v18  ;;  %1828 = vmatpush.bf16.msra.mxu3 %v7921_v61 }
 0x293   :  { %1816 = vmatpush.bf16.msra.mxu2 %v7927_v19  ;;  %1829 = vmatpush.bf16.msra.mxu3 %v7933_v17 }
 0x297   :  { %1817 = vmatpush.bf16.msra.mxu2 %v7939_v21  ;;  %1830 = vmatpush.bf16.msra.mxu3 %v7945_v22 }
 0x29b   :  { %1818 = vmatpush.bf16.msra.mxu2 %v7951_v25  ;;  %1831 = vmatpush.bf16.msra.mxu3 %v7957_v30 }
 0x29f   :  { %1819 = vmatpush.bf16.msra.mxu2 %v7963_v33  ;;  %1832 = vmatpush.bf16.msra.mxu3 %v7969_v45 }
 0x2a3   :  { %1864 = vmatpush.bf16.msrb.mxu2 %v7975_v40  ;;  %1877 = vmatpush.bf16.msrb.mxu3 %v7981_v24 }
 0x2a7   :  { %1865 = vmatpush.bf16.msrb.mxu2 %v11409_v46  ;;  %1878 = vmatpush.bf16.msrb.mxu3 %v11410_v32 }
 0x2ab   :  { %1866 = vmatpush.bf16.msrb.mxu2 %v11411_v47  ;;  %1879 = vmatpush.bf16.msrb.mxu3 %v11412_v41 }
 0x2af   :  { %1867 = vmatpush.bf16.msrb.mxu2 %v11413_v54  ;;  %1880 = vmatpush.bf16.msrb.mxu3 %v11414_v51 }
 0x2b3   :  { %1868 = vmatpush.bf16.msrb.mxu2 %v11415_v36  ;;  %1881 = vmatpush.bf16.msrb.mxu3 %v11416_v31 }
 0x2b7   :  { %1869 = vmatpush.bf16.msrb.mxu2 %v11417_v20  ;;  %1882 = vmatpush.bf16.msrb.mxu3 %v11418_v56  ;;  %v1568_v43 = vpop.f32.mrf.mxu0 }
 0x2b8   :  { %v1581_v14 = vpop.f32.mrf.mxu1 }
 0x2bb   :  { %1870 = vmatpush.bf16.msrb.mxu2 %v11419_v38  ;;  %1883 = vmatpush.bf16.msrb.mxu3 %v11420_v11  ;;  %v5194_v11 = vld [vmem:[%s11174_s2 + $0x210] sm:$0xf]  ;;  %v6270_v38 = vld [vmem:[%s11174_s2 + $0x214] sm:$0xf0] }
 0x2bc   :  { %v5195_v53 = vor.u32 %v6270_v38, %v5194_v11  ;;  %v5188_v38 = vld [vmem:[%s11174_s2 + $0x208] sm:$0xf0] }
 0x2bf   :  { %1871 = vmatpush.bf16.msrb.mxu2 %v11421_v28  ;;  %1884 = vmatpush.bf16.msrb.mxu3 %v11422_v49  ;;  %v6272_v49 = vld [vmem:[%s11174_s2 + $0x224] sm:$0xf0]  ;;  %v6271_v28 = vld [vmem:[%s11174_s2 + $0x224] sm:$0xf] }
 0x2c0   :  { %v5203_v3 = vor.u32 %v6272_v49, %v5202_v48  ;;  %v5207_v37 = vor.u32 %v6271_v28, %v5204_v35  ;;  %v6269_v49 = vld [vmem:[%s11174_s2 + $0x214] sm:$0xf]  ;;  %v5196_v28 = vld [vmem:[%s11174_s2 + $0x218] sm:$0xf0]  ;;  %v6268_v35 = vld [vmem:[%s11174_s2 + $0x204] sm:$0xf0] }
 0x2c1   :  { %v5199_v48 = vor.u32 %v6269_v49, %v5196_v28  ;;  %v1570_v49 = vpop.f32.mrf.mxu0  ;;  %v1583_v28 = vpop.f32.mrf.mxu1 }
 0x2c2   :  { %1769 = vmatpush.bf16.msra.mxu0 %v5203_v3  ;;  %1782 = vmatpush.bf16.msra.mxu1 %v5207_v37  ;;  %v5186_v3 = vld [vmem:[%s11174_s2 + $0x200] sm:$0xf]  ;;  %v6267_v37 = vld [vmem:[%s11174_s2 + $0x204] sm:$0xf] }
 0x2c3   :  { %v5187_v56 = vor.u32 %v6268_v35, %v5186_v3  ;;  %v5191_v11 = vor.u32 %v6267_v37, %v5188_v38  ;;  %v11423_v35 = vld [vmem:[#allocation13_spill] sm:$0xff]  ;;  %v11425_v37 = vld [vmem:[#allocation24_spill] sm:$0xff]  ;;  %v1796_v49 = vld [vmem:[#allocation1] sm:$0xff] }
 0x2c4   :  { %v11427_v38 = vld [vmem:[#allocation25_spill] sm:$0xff]  ;;  %1820 = vmatmul.bf16.vlgmr.msra.gmra.mxu2 %v1796_v49 }
 0x2c6   :  { %1770 = vmatpush.bf16.msra.mxu0 %v5195_v53  ;;  %1783 = vmatpush.bf16.msra.mxu1 %v5199_v48 }
 0x2c9   :  { %v1620_v53 = vpop.f32.mrf.mxu0  ;;  %v1633_v3 = vpop.f32.mrf.mxu1 }
 0x2ca   :  { %1771 = vmatpush.bf16.msra.mxu0 %v5187_v56  ;;  %1784 = vmatpush.bf16.msra.mxu1 %v5191_v11 }
 0x2ce   :  { %1838 = vmatpush.bf16.msrb.mxu0 %v7622_v26  ;;  %1851 = vmatpush.bf16.msrb.mxu1 %v7628_v29  ;;  %v11424_v26 = vld [vmem:[#allocation14_spill] sm:$0xff] }
 0x2d1   :  { %v1622_v56 = vpop.f32.mrf.mxu0  ;;  %v1635_v48 = vpop.f32.mrf.mxu1 }
 0x2d2   :  { %1839 = vmatpush.bf16.msrb.mxu0 %v7634_v34  ;;  %1852 = vmatpush.bf16.msrb.mxu1 %v7640_v7  ;;  %v1797_v48 = vld [vmem:[#allocation1 + $0x9] sm:$0xff] }
 0x2d3   :  { %1833 = vmatmul.bf16.vlgmr.msra.gmra.mxu3 %v1797_v48 }
 0x2d6   :  { %1840 = vmatpush.bf16.msrb.mxu0 %v7646_v23  ;;  %1853 = vmatpush.bf16.msrb.mxu1 %v7652_v2  ;;  %v11429_v23 = vld [vmem:[#allocation17_spill] sm:$0xff]  ;;  %v11430_v2 = vld [vmem:[#allocation3_spill] sm:$0xff] }
 0x2da   :  { %1841 = vmatpush.bf16.msrb.mxu0 %v7658_v10  ;;  %1854 = vmatpush.bf16.msrb.mxu1 %v7664_v50  ;;  %v11431_v10 = vld [vmem:[#allocation4_spill] sm:$0xff]  ;;  %v11432_v50 = vld [vmem:[#allocation5_spill] sm:$0xff] }
 0x2de   :  { %1842 = vmatpush.bf16.msrb.mxu0 %v11423_v35  ;;  %1855 = vmatpush.bf16.msrb.mxu1 %v11424_v26  ;;  %v11433_v35 = vld [vmem:[#allocation6_spill] sm:$0xff] }
 0x2e2   :  { %1843 = vmatpush.bf16.msrb.mxu0 %v11429_v23  ;;  %1856 = vmatpush.bf16.msrb.mxu1 %v11430_v2  ;;  %v1800_v23 = vld [vmem:[#allocation1 + $0x24] sm:$0xff] }
 0x2e3   :  { %1872 = vmatmul.bf16.vlgmr.msrb.gmra.mxu2 %v1800_v23  ;;  %v1802_v23 = vld [vmem:[#allocation1 + $0x36] sm:$0xff] }
 0x2e5   :  { %v1520_v29 = vpop.f32.mrf.mxu2  ;;  %v1533_v34 = vpop.f32.mrf.mxu3 }
 0x2e6   :  { %v8296_v7 = vadd.f32 %v1520_v29, %v11425_v37  ;;  %v8299_v11 = vadd.f32 %v1533_v34, %v11427_v38  ;;  %1844 = vmatpush.bf16.msrb.mxu0 %v11431_v10  ;;  %1857 = vmatpush.bf16.msrb.mxu1 %v11432_v50  ;;  %v1582_v34 = vadd.f32 %v1581_v14, %v1568_v43  ;;  %v1801_v50 = vld [vmem:[#allocation1 + $0x2d] sm:$0xff] }
 0x2e7   :  { %1885 = vmatmul.bf16.vlgmr.msrb.gmra.mxu3 %v1801_v50 }
 0x2e8   :  { %11426 = vst [vmem:[#allocation7_spill] sm:$0xff] %v8296_v7 }
 0x2e9   :  { %11428 = vst [vmem:[#allocation8_spill] sm:$0xff] %v8299_v11 }
 0x2ea   :  { %1845 = vmatpush.bf16.msrb.mxu0 %v11433_v35  ;;  %1858 = vmatpush.bf16.msrb.mxu1 %v7718_v44  ;;  %v5329_v44 = vld [vmem:[%s11173_s0 + $0x30] sm:$0xff] }
 0x2ed   :  { %v1522_v28 = vpop.f32.mrf.mxu2  ;;  %v1535_v56 = vpop.f32.mrf.mxu3 }
 0x2f5   :  { %v1594_v26 = vpop.f32.mrf.mxu2  ;;  %v1607_v29 = vpop.f32.mrf.mxu3 }
 0x2f6   :  { %v1595_v37 = vadd.f32 %v1594_v26, %v1582_v34  ;;  %v1798_v34 = vld [vmem:[#allocation1 + $0x12] sm:$0xff] }
 0x2f8   :  { %v1608_v38 = vadd.f32 %v1607_v29, %v1595_v37  ;;  %v1799_v37 = vld [vmem:[#allocation1 + $0x1b] sm:$0xff] }
 0x2fa   :  { %v1621_v28 = vadd.f32 %v1620_v53, %v1608_v38  ;;  %v5323_v53 = vld [vmem:[%s11174_s2 + $0x2f0] sm:$0xf]  ;;  %v5325_v38 = vld [vmem:[%s11174_s2 + $0x2f8] sm:$0xf0] }
 0x2fc   :  { %v1634_v56 = vadd.f32 %v1633_v3, %v1621_v28  ;;  %v6298_v3 = vld [vmem:[%s11174_s2 + $0x2f4] sm:$0xf0]  ;;  %v5317_v28 = vld [vmem:[%s11174_s2 + $0x2e8] sm:$0xf0] }
 0x2fd   :  { %v1596_v2 = vpop.f32.mrf.mxu2  ;;  %v1609_v10 = vpop.f32.mrf.mxu3 }
 0x2fe   :  { %v1803_v2 = vld [vmem:[#allocation1 + $0x3f] sm:$0xff] }
 0x2ff   :  { %2048 = vst [vmem:[#allocation1] ss:$9 sm:$0xff] %v5329_v44  ;;  %v5315_v10 = vld [vmem:[%s11174_s2 + $0x2e0] sm:$0xf]  ;;  %v6293_v44 = vld [vmem:[%s11174_s2 + $0x2d4] sm:$0xf] }
 0x305   :  { %v1646_v49 = vpop.f32.mrf.mxu2  ;;  %v1659_v11 = vpop.f32.mrf.mxu3 }
 0x306   :  { %v1647_v48 = vadd.f32 %v1646_v49, %v1634_v56 }
 0x308   :  { %v1660_v7 = vadd.f32 %v1659_v11, %v1647_v48  ;;  %v6297_v11 = vld [vmem:[%s11174_s2 + $0x2f4] sm:$0xf]  ;;  %v5307_v48 = vld [vmem:[%s11174_s2 + $0x2d0] sm:$0xf] }
 0x309   :  { %v5328_v50 = vor.u32 %v6297_v11, %v5325_v38 }
 0x30a   :  { %vm1663_vm4 = vcmp.gt.f32.partialorder %v1660_v7, 0.0  ;;  %v1664_v35 = vmul.f32 0.2, %v1660_v7 }
 0x30b   :  { %2030 = vmatpush.bf16.msra.mxu3 %v5328_v50  ;;  %v8515_v50 = vld [vmem:[%s11172_s1 + $0xd8] sm:$0xff] }
 0x30c   :  { %v1665_v43 = vsel %vm1663_vm4, %v1660_v7, %v1664_v35  ;;  %v5324_v7 = vor.u32 %v6298_v3, %v5323_v53  ;;  %v6294_v35 = vld [vmem:[%s11174_s2 + $0x2d4] sm:$0xf0]  ;;  %v6291_v53 = vld [vmem:[%s11174_s2 + $0x2c4] sm:$0xf]  ;;  %v5301_v3 = vld [vmem:[%s11174_s2 + $0x2c8] sm:$0xf0] }
 0x30d   :  { %v1666_v14 = vpack.c.bf16 %v1665_v43, %v1665_v43  ;;  %v1648_v26 = vpop.f32.mrf.mxu2  ;;  %v1661_v29 = vpop.f32.mrf.mxu3  ;;  %v5309_v43 = vld [vmem:[%s11174_s2 + $0x2d8] sm:$0xf0]  ;;  %11439 = vst [vmem:[#allocation9_spill] sm:$0xff] %v8515_v50 }
 0x30e   :  { %2017 = vmatpush.bf16.msra.mxu2 %v5324_v7  ;;  %v5312_v26 = vor.u32 %v6293_v44, %v5309_v43  ;;  %v5299_v29 = vld [vmem:[%s11174_s2 + $0x2c0] sm:$0xf]  ;;  %v5304_v7 = vor.u32 %v6291_v53, %v5301_v3  ;;  %v8533_v44 = vld [vmem:[%s11172_s1 + $0xd0] sm:$0xff]  ;;  %v8539_v43 = vld [vmem:[%s11172_s1 + $0x88] sm:$0xff] }
 0x30f   :  { %1772 = vmatmul.bf16.vlgmr.msra.gmra.mxu0 %v1666_v14  ;;  %1785 = vmatmul.bf16.vlgmr.msra.gmra.mxu1 %v1666_v14  ;;  %v5308_v14 = vor.u32 %v6294_v35, %v5307_v48  ;;  %v8527_v35 = vld [vmem:[%s11172_s1 + $0x90] sm:$0xff]  ;;  %11443 = vst [vmem:[#allocation11_spill] sm:$0xff] %v8533_v44 }
 0x310   :  { %1890 = vmatpush.bf16.msra.mxu0 %v7739_v62  ;;  %1903 = vmatpush.bf16.msra.mxu1 %v7745_v16  ;;  %v6296_v62 = vld [vmem:[%s11174_s2 + $0x2e4] sm:$0xf0]  ;;  %v6295_v16 = vld [vmem:[%s11174_s2 + $0x2e4] sm:$0xf]  ;;  %11442 = vst [vmem:[#allocation10_spill] sm:$0xff] %v8527_v35 }
 0x311   :  { %v5316_v56 = vor.u32 %v6296_v62, %v5315_v10  ;;  %v5320_v49 = vor.u32 %v6295_v16, %v5317_v28  ;;  %v8509_v10 = vld [vmem:[%s11172_s1 + $0x98] sm:$0xff]  ;;  %v11440_v28 = vld [vmem:[#allocation7_spill] sm:$0xff]  ;;  %11444 = vst [vmem:[#allocation12_spill] sm:$0xff] %v8539_v43 }
 0x313   :  { %2018 = vmatpush.bf16.msra.mxu2 %v5316_v56  ;;  %2031 = vmatpush.bf16.msra.mxu3 %v5320_v49  ;;  %v11441_v49 = vld [vmem:[#allocation8_spill] sm:$0xff] }
 0x314   :  { %1891 = vmatpush.bf16.msra.mxu0 %v7775_v27  ;;  %1904 = vmatpush.bf16.msra.mxu1 %v7781_v58  ;;  %v6292_v27 = vld [vmem:[%s11174_s2 + $0x2c4] sm:$0xf0] }
 0x315   :  { %v5300_v58 = vor.u32 %v6292_v27, %v5299_v29  ;;  %v8551_v27 = vld [vmem:[%s11172_s1 + $0x80] sm:$0xff] }
 0x316   :  { %11446 = vst [vmem:[#allocation16_spill] sm:$0xff] %v8551_v27 }
 0x317   :  { %2019 = vmatpush.bf16.msra.mxu2 %v5308_v14  ;;  %2032 = vmatpush.bf16.msra.mxu3 %v5312_v26  ;;  %v8545_v14 = vld [vmem:[%s11172_s1 + $0xc8] sm:$0xff] }
 0x318   :  { %1892 = vmatpush.bf16.msra.mxu0 %v7799_v52  ;;  %1905 = vmatpush.bf16.msra.mxu1 %v7805_v55  ;;  %v11434_v52 = vld [vmem:[#allocation19_spill] sm:$0xff]  ;;  %v11435_v55 = vld [vmem:[#allocation20_spill] sm:$0xff]  ;;  %11445 = vst [vmem:[#allocation15_spill] sm:$0xff] %v8545_v14 }
 0x31b   :  { %2020 = vmatpush.bf16.msra.mxu2 %v5300_v58  ;;  %2033 = vmatpush.bf16.msra.mxu3 %v5304_v7  ;;  %v8557_v58 = vld [vmem:[%s11172_s1 + $0xc0] sm:$0xff] }
 0x31c   :  { %1893 = vmatpush.bf16.msra.mxu0 %v7817_v63  ;;  %1906 = vmatpush.bf16.msra.mxu1 %v7823_v59  ;;  %v11436_v63 = vld [vmem:[#allocation21_spill] sm:$0xff]  ;;  %v11437_v59 = vld [vmem:[#allocation22_spill] sm:$0xff] }
 0x31f   :  { %1846 = vmatmul.bf16.vlgmr.msrb.gmra.mxu0 %v1798_v34  ;;  %1859 = vmatmul.bf16.vlgmr.msrb.gmra.mxu1 %v1799_v37  ;;  %v8485_v34 = vld [vmem:[%s11172_s1 + $0xa8] sm:$0xff] }
 0x320   :  { %1894 = vmatpush.bf16.msra.mxu0 %v7829_v0  ;;  %1907 = vmatpush.bf16.msra.mxu1 %v7835_v42  ;;  %v11438_v0 = vld [vmem:[#allocation23_spill] sm:$0xff]  ;;  %v5291_v42 = vld [vmem:[%s11174_s2 + $0x2b0] sm:$0xf] }
 0x321   :  { %v8491_v37 = vld [vmem:[%s11172_s1 + $0xe8] sm:$0xff] }
 0x324   :  { %1895 = vmatpush.bf16.msra.mxu0 %v7841_v1  ;;  %1908 = vmatpush.bf16.msra.mxu1 %v7847_v15  ;;  %v6290_v1 = vld [vmem:[%s11174_s2 + $0x2b4] sm:$0xf0]  ;;  %v6289_v15 = vld [vmem:[%s11174_s2 + $0x2b4] sm:$0xf] }
 0x328   :  { %1896 = vmatpush.bf16.msra.mxu0 %v7853_v57  ;;  %1909 = vmatpush.bf16.msra.mxu1 %v7859_v4  ;;  %v5292_v57 = vor.u32 %v6290_v1, %v5291_v42  ;;  %v5293_v4 = vld [vmem:[%s11174_s2 + $0x2b8] sm:$0xf0] }
 0x32a   :  { %2021 = vmatpush.bf16.msra.mxu2 %v5292_v57 }
 0x32c   :  { %1897 = vmatpush.bf16.msra.mxu0 %v7865_v5  ;;  %1910 = vmatpush.bf16.msra.mxu1 %v7871_v60  ;;  %v5296_v5 = vor.u32 %v6289_v15, %v5293_v4  ;;  %v5283_v60 = vld [vmem:[%s11174_s2 + $0x2a0] sm:$0xf] }
 0x32e   :  { %2034 = vmatpush.bf16.msra.mxu3 %v5296_v5 }
 0x32f   :  { %1898 = vmatmul.bf16.vlgmr.msra.gmra.mxu0 %v1802_v23  ;;  %1911 = vmatmul.bf16.vlgmr.msra.gmra.mxu1 %v1803_v2  ;;  %v8497_v23 = vld [vmem:[%s11172_s1 + $0xa0] sm:$0xff] }
 0x330   :  { %2065 = vmatpush.bf16.msrb.mxu0 %v7877_v8  ;;  %2078 = vmatpush.bf16.msrb.mxu1 %v7883_v9  ;;  %v6288_v8 = vld [vmem:[%s11174_s2 + $0x2a4] sm:$0xf0]  ;;  %v6287_v9 = vld [vmem:[%s11174_s2 + $0x2a4] sm:$0xf] }
 0x331   :  { %v8503_v2 = vld [vmem:[%s11172_s1 + $0xe0] sm:$0xff] }
 0x334   :  { %2066 = vmatpush.bf16.msrb.mxu0 %v7891_v12  ;;  %2079 = vmatpush.bf16.msrb.mxu1 %v7897_v13  ;;  %v5284_v12 = vor.u32 %v6288_v8, %v5283_v60  ;;  %v5285_v13 = vld [vmem:[%s11174_s2 + $0x2a8] sm:$0xf0]  ;;  %v2053_v8 = vld [vmem:[#allocation1 + $0x24] sm:$0xff] }
 0x336   :  { %2022 = vmatpush.bf16.msra.mxu2 %v5284_v12 }
 0x338   :  { %2067 = vmatpush.bf16.msrb.mxu0 %v7903_v39  ;;  %2080 = vmatpush.bf16.msrb.mxu1 %v7909_v6  ;;  %v5288_v39 = vor.u32 %v6287_v9, %v5285_v13  ;;  %v2054_v9 = vld [vmem:[#allocation1 + $0x2d] sm:$0xff]  ;;  %v5410_v13 = vld [vmem:[%s11173_s0 + $0x38] sm:$0xff] }
 0x33a   :  { %2035 = vmatpush.bf16.msra.mxu3 %v5288_v39 }
 0x33c   :  { %2068 = vmatpush.bf16.msrb.mxu0 %v7915_v18  ;;  %2081 = vmatpush.bf16.msrb.mxu1 %v7921_v61  ;;  %v5275_v61 = vld [vmem:[%s11174_s2 + $0x290] sm:$0xf] }
 0x340   :  { %2069 = vmatpush.bf16.msrb.mxu0 %v7927_v19  ;;  %2082 = vmatpush.bf16.msrb.mxu1 %v7933_v17  ;;  %v6286_v19 = vld [vmem:[%s11174_s2 + $0x294] sm:$0xf0]  ;;  %v6285_v17 = vld [vmem:[%s11174_s2 + $0x294] sm:$0xf] }
 0x344   :  { %2070 = vmatpush.bf16.msrb.mxu0 %v7939_v21  ;;  %2083 = vmatpush.bf16.msrb.mxu1 %v7945_v22  ;;  %v5276_v21 = vor.u32 %v6286_v19, %v5275_v61  ;;  %v5277_v22 = vld [vmem:[%s11174_s2 + $0x298] sm:$0xf0]  ;;  %v2051_v19 = vld [vmem:[#allocation1 + $0x12] sm:$0xff] }
 0x346   :  { %2023 = vmatpush.bf16.msra.mxu2 %v5276_v21  ;;  %v8565_v21 = vld [vmem:[#allocation1 + $0x36] sm:$0xff] }
 0x347   :  { %v8430_v6 = vpop.f32.mrf.mxu2 }
 0x348   :  { %2071 = vmatpush.bf16.msrb.mxu0 %v7951_v25  ;;  %2084 = vmatpush.bf16.msrb.mxu1 %v7957_v30  ;;  %v5280_v25 = vor.u32 %v6285_v17, %v5277_v22  ;;  %v5267_v30 = vld [vmem:[%s11174_s2 + $0x280] sm:$0xf] }
 0x349   :  { %v2052_v17 = vld [vmem:[#allocation1 + $0x1b] sm:$0xff] }
 0x34a   :  { %2036 = vmatpush.bf16.msra.mxu3 %v5280_v25  ;;  %v8567_v22 = vld [vmem:[#allocation1 + $0x3f] sm:$0xff]  ;;  %v5404_v25 = vld [vmem:[%s11174_s2 + $0x370] sm:$0xf] }
 0x34c   :  { %2072 = vmatpush.bf16.msrb.mxu0 %v7963_v33  ;;  %2085 = vmatpush.bf16.msrb.mxu1 %v7969_v45  ;;  %v6284_v33 = vld [vmem:[%s11174_s2 + $0x284] sm:$0xf0]  ;;  %v6283_v45 = vld [vmem:[%s11174_s2 + $0x284] sm:$0xf] }
 0x350   :  { %2117 = vmatpush.bf16.msra.mxu0 %v7975_v40  ;;  %2130 = vmatpush.bf16.msra.mxu1 %v7981_v24  ;;  %v5268_v40 = vor.u32 %v6284_v33, %v5267_v30  ;;  %v5269_v24 = vld [vmem:[%s11174_s2 + $0x288] sm:$0xf0]  ;;  %v6314_v30 = vld [vmem:[%s11174_s2 + $0x374] sm:$0xf0] }
 0x351   :  { %v8578_v33 = vld [vmem:[%s11172_s1 + $0x1b8] sm:$0xff] }
 0x352   :  { %2024 = vmatpush.bf16.msra.mxu2 %v5268_v40  ;;  %v5405_v40 = vor.u32 %v6314_v30, %v5404_v25  ;;  %v8754_v25 = vld [vmem:[%s11172_s1 + $0x20] sm:$0xff] }
 0x353   :  { %v8760_v30 = vld [vmem:[%s11172_s1 + $0x60] sm:$0xff] }
 0x354   :  { %2118 = vmatpush.bf16.msra.mxu0 %v11409_v46  ;;  %2131 = vmatpush.bf16.msra.mxu1 %v11410_v32  ;;  %v5272_v46 = vor.u32 %v6283_v45, %v5269_v24  ;;  %v1823_v32 = vpop.f32.mrf.mxu2  ;;  %v8584_v45 = vld [vmem:[%s11172_s1 + $0x1f8] sm:$0xff]  ;;  %v6313_v24 = vld [vmem:[%s11174_s2 + $0x374] sm:$0xf] }
 0x355   :  { %v5396_v32 = vld [vmem:[%s11174_s2 + $0x360] sm:$0xf] }
 0x356   :  { %v8432_v18 = vpop.f32.mrf.mxu3  ;;  %2037 = vmatpush.bf16.msra.mxu3 %v5272_v46  ;;  %v5406_v46 = vld [vmem:[%s11174_s2 + $0x378] sm:$0xf0] }
 0x357   :  { %v1835_v7 = vadd.f32 %v8432_v18, %v8430_v6 }
 0x358   :  { %2119 = vmatpush.bf16.msra.mxu0 %v11411_v47  ;;  %2132 = vmatpush.bf16.msra.mxu1 %v11412_v41  ;;  %v8461_v41 = vld [vmem:[%s11172_s1 + $0xb8] sm:$0xff] }
 0x359   :  { %2091 = vmatpush.bf16.msrb.mxu2 %v8461_v41 }
 0x35c   :  { %2120 = vmatpush.bf16.msra.mxu0 %v11413_v54  ;;  %2133 = vmatpush.bf16.msra.mxu1 %v11414_v51  ;;  %v8467_v54 = vld [vmem:[%s11172_s1 + $0xf8] sm:$0xff]  ;;  %v8473_v51 = vld [vmem:[%s11172_s1 + $0xb0] sm:$0xff] }
 0x35d   :  { %2104 = vmatpush.bf16.msrb.mxu3 %v8467_v54  ;;  %2092 = vmatpush.bf16.msrb.mxu2 %v8473_v51 }
 0x35e   :  { %v1836_v47 = vpop.f32.mrf.mxu3 }
 0x35f   :  { %v5409_v47 = vor.u32 %v6313_v24, %v5406_v46  ;;  %v8772_v24 = vld [vmem:[%s11172_s1 + $0x58] sm:$0xff]  ;;  %v8778_v46 = vld [vmem:[%s11172_s1 + $0x10] sm:$0xff] }
 0x360   :  { %2121 = vmatpush.bf16.msra.mxu0 %v11415_v36  ;;  %2134 = vmatpush.bf16.msra.mxu1 %v11416_v31  ;;  %v8479_v36 = vld [vmem:[%s11172_s1 + $0xf0] sm:$0xff] }
 0x361   :  { %2105 = vmatpush.bf16.msrb.mxu3 %v8479_v36  ;;  %2093 = vmatpush.bf16.msrb.mxu2 %v8485_v34 }
 0x364   :  { %2122 = vmatpush.bf16.msra.mxu0 %v11417_v20  ;;  %2135 = vmatpush.bf16.msra.mxu1 %v11434_v52 }
 0x365   :  { %2106 = vmatpush.bf16.msrb.mxu3 %v8491_v37  ;;  %2094 = vmatpush.bf16.msrb.mxu2 %v8497_v23 }
 0x366   :  { %v1873_v31 = vpop.f32.mrf.mxu2 }
 0x368   :  { %2123 = vmatpush.bf16.msra.mxu0 %v11435_v55  ;;  %2136 = vmatpush.bf16.msra.mxu1 %v11436_v63  ;;  %v2049_v55 = vld [vmem:[#allocation1] sm:$0xff]  ;;  %v2050_v63 = vld [vmem:[#allocation1 + $0x9] sm:$0xff] }
 0x369   :  { %2107 = vmatpush.bf16.msrb.mxu3 %v8503_v2  ;;  %2095 = vmatpush.bf16.msrb.mxu2 %v8509_v10  ;;  %2301 = vst [vmem:[#allocation1] ss:$9 sm:$0xff] %v5410_v13  ;;  %v8698_v13 = vld [vmem:[%s11172_s1 + $0x1c8] sm:$0xff] }
 0x36a   :  { %v1886_v20 = vpop.f32.mrf.mxu3  ;;  %2073 = vmatmul.bf16.vlgmr.msrb.gmra.mxu0 %v2049_v55  ;;  %2086 = vmatmul.bf16.vlgmr.msrb.gmra.mxu1 %v2050_v63  ;;  %v6308_v55 = vld [vmem:[%s11174_s2 + $0x344] sm:$0xf0] }
 0x36b   :  { %v8638_v63 = vld [vmem:[%s11172_s1 + $0x1a8] sm:$0xff] }
 0x36c   :  { %2124 = vmatpush.bf16.msra.mxu0 %v11437_v59  ;;  %2137 = vmatpush.bf16.msra.mxu1 %v11438_v0 }
 0x36d   :  { %2108 = vmatpush.bf16.msrb.mxu3 %v8515_v50  ;;  %2096 = vmatpush.bf16.msrb.mxu2 %v8527_v35 }
 0x36e   :  { %v1875_v11 = vpop.f32.mrf.mxu2 }
 0x36f   :  { %v5398_v11 = vld [vmem:[%s11174_s2 + $0x368] sm:$0xf0] }
 0x370   :  { %2270 = vmatpush.bf16.msrb.mxu0 %v5405_v40  ;;  %2283 = vmatpush.bf16.msrb.mxu1 %v5409_v47  ;;  %v8766_v40 = vld [vmem:[%s11172_s1 + $0x18] sm:$0xff]  ;;  %v8790_v47 = vld [vmem:[%s11172_s1 + $0x8] sm:$0xff] }
 0x371   :  { %2109 = vmatpush.bf16.msrb.mxu3 %v8533_v44  ;;  %2097 = vmatpush.bf16.msrb.mxu2 %v8539_v43 }
 0x372   :  { %v1888_v38 = vpop.f32.mrf.mxu3 }
 0x375   :  { %2110 = vmatpush.bf16.msrb.mxu3 %v8545_v14  ;;  %2098 = vmatpush.bf16.msrb.mxu2 %v8551_v27 }
 0x379   :  { %2111 = vmatpush.bf16.msrb.mxu3 %v8557_v58 }
 0x37a   :  { %2125 = vmatmul.bf16.vlgmr.msra.gmra.mxu0 %v2053_v8  ;;  %2138 = vmatmul.bf16.vlgmr.msra.gmra.mxu1 %v2054_v9  ;;  %v8680_v8 = vld [vmem:[%s11172_s1 + $0x190] sm:$0xff] }
 0x37b   :  { %v8686_v9 = vld [vmem:[%s11172_s1 + $0x1d0] sm:$0xff] }
 0x38c   :  { %v1773_v62 = vpop.f32.mrf.mxu0  ;;  %v1786_v16 = vpop.f32.mrf.mxu1 }
 0x38d   :  { %v8519_v56 = vadd.f32 %v1773_v62, %v11440_v28  ;;  %v8522_v48 = vadd.f32 %v1786_v16, %v11441_v49  ;;  %v5388_v16 = vld [vmem:[%s11174_s2 + $0x350] sm:$0xf]  ;;  %v6310_v28 = vld [vmem:[%s11174_s2 + $0x354] sm:$0xf0] }
 0x38e   :  { %v8614_v49 = vld [vmem:[%s11172_s1 + $0x1b0] sm:$0xff] }
 0x394   :  { %v1775_v26 = vpop.f32.mrf.mxu0  ;;  %v1788_v29 = vpop.f32.mrf.mxu1 }
 0x395   :  { %v8620_v26 = vld [vmem:[%s11172_s1 + $0x1f0] sm:$0xff] }
 0x396   :  { %v6309_v29 = vld [vmem:[%s11174_s2 + $0x354] sm:$0xf] }
 0x39c   :  { %v1847_v53 = vpop.f32.mrf.mxu0  ;;  %v1860_v3 = vpop.f32.mrf.mxu1 }
 0x39d   :  { %v1848_v52 = vadd.f32 %v1847_v53, %v1835_v7  ;;  %v5390_v53 = vld [vmem:[%s11174_s2 + $0x358] sm:$0xf0] }
 0x39e   :  { %v5393_v7 = vor.u32 %v6309_v29, %v5390_v53  ;;  %v8838_v29 = vld [vmem:[%s11172_s1 + $0x128] sm:$0xff] }
 0x39f   :  { %v1861_v59 = vadd.f32 %v1860_v3, %v1848_v52  ;;  %v5389_v3 = vor.u32 %v6310_v28, %v5388_v16  ;;  %v5380_v52 = vld [vmem:[%s11174_s2 + $0x340] sm:$0xf]  ;;  %v8826_v16 = vld [vmem:[%s11172_s1 + $0x130] sm:$0xff]  ;;  %11449 = vst [vmem:[#allocation14_spill] sm:$0xff] %v8838_v29  ;;  %v8844_v53 = vld [vmem:[%s11172_s1 + $0x168] sm:$0xff] }
 0x3a0   :  { %11447 = vst [vmem:[#allocation18_spill] sm:$0xff] %v8826_v16  ;;  %v8832_v28 = vld [vmem:[%s11172_s1 + $0x170] sm:$0xff] }
 0x3a1   :  { %v1874_v1 = vadd.f32 %v1873_v31, %v1861_v59  ;;  %v6312_v31 = vld [vmem:[%s11174_s2 + $0x364] sm:$0xf0]  ;;  %11448 = vst [vmem:[#allocation13_spill] sm:$0xff] %v8832_v28 }
 0x3a2   :  { %v5397_v38 = vor.u32 %v6312_v31, %v5396_v32  ;;  %v8644_v59 = vld [vmem:[%s11172_s1 + $0x1e8] sm:$0xff]  ;;  %v8784_v32 = vld [vmem:[%s11172_s1 + $0x50] sm:$0xff]  ;;  %11450 = vst [vmem:[#allocation24_spill] sm:$0xff] %v8844_v53 }
 0x3a3   :  { %v1887_v15 = vadd.f32 %v1886_v20, %v1874_v1  ;;  %v6311_v20 = vld [vmem:[%s11174_s2 + $0x364] sm:$0xf]  ;;  %v5382_v1 = vld [vmem:[%s11174_s2 + $0x348] sm:$0xf0] }
 0x3a4   :  { %v1849_v0 = vpop.f32.mrf.mxu0  ;;  %v1862_v42 = vpop.f32.mrf.mxu1  ;;  %v5401_v62 = vor.u32 %v6311_v20, %v5398_v11  ;;  %2271 = vmatpush.bf16.msrb.mxu0 %v5397_v38  ;;  %v8796_v31 = vld [vmem:[%s11172_s1 + $0x48] sm:$0xff]  ;;  %v8802_v20 = vld [vmem:[%s11172_s1] sm:$0xff]  ;;  %v8814_v38 = vld [vmem:[%s11172_s1 + $0x138] sm:$0xff] }
 0x3a5   :  { %v5381_v0 = vor.u32 %v6308_v55, %v5380_v52  ;;  %v6307_v42 = vld [vmem:[%s11174_s2 + $0x344] sm:$0xf]  ;;  %v8862_v52 = vld [vmem:[%s11172_s1 + $0x118] sm:$0xff] }
 0x3a6   :  { %2284 = vmatpush.bf16.msrb.mxu1 %v5401_v62  ;;  %v8808_v11 = vld [vmem:[%s11172_s1 + $0x40] sm:$0xff]  ;;  %v8820_v62 = vld [vmem:[%s11172_s1 + $0x178] sm:$0xff]  ;;  %11453 = vst [vmem:[#allocation3_spill] sm:$0xff] %v8862_v52 }
 0x3a7   :  { %v8868_v55 = vld [vmem:[%s11172_s1 + $0x158] sm:$0xff] }
 0x3a8   :  { %2272 = vmatpush.bf16.msrb.mxu0 %v5389_v3  ;;  %v8850_v3 = vld [vmem:[%s11172_s1 + $0x120] sm:$0xff]  ;;  %11454 = vst [vmem:[#allocation4_spill] sm:$0xff] %v8868_v55 }
 0x3a9   :  { %11451 = vst [vmem:[#allocation25_spill] sm:$0xff] %v8850_v3 }
 0x3aa   :  { %2285 = vmatpush.bf16.msrb.mxu1 %v5393_v7  ;;  %v8856_v7 = vld [vmem:[%s11172_s1 + $0x160] sm:$0xff] }
 0x3ab   :  { %11452 = vst [vmem:[#allocation17_spill] sm:$0xff] %v8856_v7 }
 0x3ac   :  { %v1899_v57 = vpop.f32.mrf.mxu0  ;;  %v1912_v4 = vpop.f32.mrf.mxu1  ;;  %2273 = vmatpush.bf16.msrb.mxu0 %v5381_v0  ;;  %v8874_v0 = vld [vmem:[%s11172_s1 + $0x110] sm:$0xff] }
 0x3ad   :  { %v1900_v5 = vadd.f32 %v1899_v57, %v1887_v15  ;;  %v8656_v15 = vld [vmem:[%s11172_s1 + $0x1a0] sm:$0xff]  ;;  %11455 = vst [vmem:[#allocation5_spill] sm:$0xff] %v8874_v0 }
 0x3ae   :  { %v8662_v57 = vld [vmem:[%s11172_s1 + $0x1e0] sm:$0xff] }
 0x3af   :  { %v1913_v60 = vadd.f32 %v1912_v4, %v1900_v5  ;;  %v5385_v4 = vor.u32 %v6307_v42, %v5382_v1  ;;  %v8668_v5 = vld [vmem:[%s11172_s1 + $0x198] sm:$0xff]  ;;  %v8880_v42 = vld [vmem:[%s11172_s1 + $0x150] sm:$0xff]  ;;  %v8886_v1 = vld [vmem:[%s11172_s1 + $0x108] sm:$0xff] }
 0x3b0   :  { %11456 = vst [vmem:[#allocation6_spill] sm:$0xff] %v8880_v42 }
 0x3b1   :  { %vm1916_vm5 = vcmp.gt.f32.partialorder %v1913_v60, 0.0  ;;  %v1917_v12 = vmul.f32 0.2, %v1913_v60  ;;  %2286 = vmatpush.bf16.msrb.mxu1 %v5385_v4  ;;  %11457 = vst [vmem:[#allocation19_spill] sm:$0xff] %v8886_v1  ;;  %v8892_v4 = vld [vmem:[%s11172_s1 + $0x148] sm:$0xff] }
 0x3b2   :  { %11458 = vst [vmem:[#allocation20_spill] sm:$0xff] %v8892_v4 }
 0x3b3   :  { %v1918_v39 = vsel %vm1916_vm5, %v1913_v60, %v1917_v12  ;;  %v8674_v60 = vld [vmem:[%s11172_s1 + $0x1d8] sm:$0xff]  ;;  %v8692_v12 = vld [vmem:[%s11172_s1 + $0x188] sm:$0xff] }
 0x3b4   :  { %v1919_v6 = vpack.c.bf16 %v1918_v39, %v1918_v39  ;;  %v1901_v18 = vpop.f32.mrf.mxu0  ;;  %v1914_v61 = vpop.f32.mrf.mxu1  ;;  %v8704_v39 = vld [vmem:[%s11172_s1 + $0x180] sm:$0xff] }
 0x3b5   :  { %v8716_v18 = vld [vmem:[%s11172_s1 + $0x38] sm:$0xff] }
 0x3b6   :  { %2025 = vmatmul.bf16.vlgmr.msra.gmra.mxu2 %v1919_v6  ;;  %2038 = vmatmul.bf16.vlgmr.msra.gmra.mxu3 %v1919_v6  ;;  %v8710_v6 = vld [vmem:[%s11172_s1 + $0x1c0] sm:$0xff]  ;;  %v8722_v61 = vld [vmem:[%s11172_s1 + $0x78] sm:$0xff] }
 0x3b7   :  { %2143 = vmatpush.bf16.msra.mxu2 %v8578_v33  ;;  %2156 = vmatpush.bf16.msra.mxu3 %v8584_v45 }
 0x3bb   :  { %2144 = vmatpush.bf16.msra.mxu2 %v8614_v49  ;;  %2157 = vmatpush.bf16.msra.mxu3 %v8620_v26 }
 0x3bf   :  { %2145 = vmatpush.bf16.msra.mxu2 %v8638_v63  ;;  %2158 = vmatpush.bf16.msra.mxu3 %v8644_v59 }
 0x3c3   :  { %2146 = vmatpush.bf16.msra.mxu2 %v8656_v15  ;;  %2159 = vmatpush.bf16.msra.mxu3 %v8662_v57 }
 0x3c6   :  { %2099 = vmatmul.bf16.vlgmr.msrb.gmra.mxu2 %v2051_v19  ;;  %2112 = vmatmul.bf16.vlgmr.msrb.gmra.mxu3 %v2052_v17  ;;  %v8730_v19 = vld [vmem:[%s11172_s1 + $0x30] sm:$0xff] }
 0x3c7   :  { %2147 = vmatpush.bf16.msra.mxu2 %v8668_v5  ;;  %2160 = vmatpush.bf16.msra.mxu3 %v8674_v60  ;;  %v8736_v17 = vld [vmem:[%s11172_s1 + $0x70] sm:$0xff] }
 0x3cb   :  { %2148 = vmatpush.bf16.msra.mxu2 %v8680_v8  ;;  %2161 = vmatpush.bf16.msra.mxu3 %v8686_v9 }
 0x3cf   :  { %2149 = vmatpush.bf16.msra.mxu2 %v8692_v12  ;;  %2162 = vmatpush.bf16.msra.mxu3 %v8698_v13 }
 0x3d3   :  { %2150 = vmatpush.bf16.msra.mxu2 %v8704_v39  ;;  %2163 = vmatpush.bf16.msra.mxu3 %v8710_v6 }
 0x3d6   :  { %2151 = vmatmul.bf16.vlgmr.msra.gmra.mxu2 %v8565_v21  ;;  %2164 = vmatmul.bf16.vlgmr.msra.gmra.mxu3 %v8567_v22  ;;  %v8742_v21 = vld [vmem:[%s11172_s1 + $0x28] sm:$0xff] }
 0x3d7   :  { %2318 = vmatpush.bf16.msrb.mxu2 %v8716_v18  ;;  %2331 = vmatpush.bf16.msrb.mxu3 %v8722_v61  ;;  %v8748_v22 = vld [vmem:[%s11172_s1 + $0x68] sm:$0xff] }
 0x3db   :  { %2319 = vmatpush.bf16.msrb.mxu2 %v8730_v19  ;;  %2332 = vmatpush.bf16.msrb.mxu3 %v8736_v17 }
 0x3df   :  { %2320 = vmatpush.bf16.msrb.mxu2 %v8742_v21  ;;  %2333 = vmatpush.bf16.msrb.mxu3 %v8748_v22 }
 0x3e3   :  { %2321 = vmatpush.bf16.msrb.mxu2 %v8754_v25  ;;  %2334 = vmatpush.bf16.msrb.mxu3 %v8760_v30 }
 0x3e7   :  { %2322 = vmatpush.bf16.msrb.mxu2 %v8766_v40  ;;  %2335 = vmatpush.bf16.msrb.mxu3 %v8772_v24 }
 0x3eb   :  { %2323 = vmatpush.bf16.msrb.mxu2 %v8778_v46  ;;  %2336 = vmatpush.bf16.msrb.mxu3 %v8784_v32 }
 0x3ef   :  { %2324 = vmatpush.bf16.msrb.mxu2 %v8790_v47  ;;  %2337 = vmatpush.bf16.msrb.mxu3 %v8796_v31 }
 0x3f3   :  { %2325 = vmatpush.bf16.msrb.mxu2 %v8802_v20  ;;  %2338 = vmatpush.bf16.msrb.mxu3 %v8808_v11 }
 0x3f7   :  { %2370 = vmatpush.bf16.msra.mxu2 %v8814_v38  ;;  %2383 = vmatpush.bf16.msra.mxu3 %v8820_v62 }
 0x3fb   :  { %2371 = vmatpush.bf16.msra.mxu2 %v8826_v16  ;;  %2384 = vmatpush.bf16.msra.mxu3 %v8832_v28  ;;  %v6302_v28 = vld [vmem:[%s11174_s2 + $0x314] sm:$0xf0] }
 0x3ff   :  { %2372 = vmatpush.bf16.msra.mxu2 %v8838_v29  ;;  %2385 = vmatpush.bf16.msra.mxu3 %v8844_v53  ;;  %v6303_v53 = vld [vmem:[%s11174_s2 + $0x324] sm:$0xf]  ;;  %v5356_v29 = vld [vmem:[%s11174_s2 + $0x310] sm:$0xf] }
 0x403   :  { %2373 = vmatpush.bf16.msra.mxu2 %v8850_v3  ;;  %2386 = vmatpush.bf16.msra.mxu3 %v8856_v7  ;;  %v6304_v3 = vld [vmem:[%s11174_s2 + $0x324] sm:$0xf0] }
 0x407   :  { %2374 = vmatpush.bf16.msra.mxu2 %v8862_v52  ;;  %2387 = vmatpush.bf16.msra.mxu3 %v8868_v55  ;;  %v6305_v55 = vld [vmem:[%s11174_s2 + $0x334] sm:$0xf]  ;;  %v5374_v52 = vld [vmem:[%s11174_s2 + $0x338] sm:$0xf0] }
 0x408   :  { %v5377_v7 = vor.u32 %v6305_v55, %v5374_v52  ;;  %v2074_v55 = vpop.f32.mrf.mxu0 }
 0x40a   :  { %2287 = vmatpush.bf16.msrb.mxu1 %v5377_v7  ;;  %v5357_v7 = vor.u32 %v6302_v28, %v5356_v29  ;;  %v5350_v28 = vld [vmem:[%s11174_s2 + $0x308] sm:$0xf0] }
 0x40b   :  { %2375 = vmatpush.bf16.msra.mxu2 %v8874_v0  ;;  %2388 = vmatpush.bf16.msra.mxu3 %v8880_v42  ;;  %v8898_v0 = vld [vmem:[%s11172_s1 + $0x100] sm:$0xff] }
 0x40c   :  { %11459 = vst [vmem:[#allocation21_spill] sm:$0xff] %v8898_v0  ;;  %v8904_v42 = vld [vmem:[%s11172_s1 + $0x140] sm:$0xff] }
 0x40d   :  { %11460 = vst [vmem:[#allocation22_spill] sm:$0xff] %v8904_v42 }
 0x40f   :  { %2376 = vmatpush.bf16.msra.mxu2 %v8886_v1  ;;  %2389 = vmatpush.bf16.msra.mxu3 %v8892_v4  ;;  %v5372_v1 = vld [vmem:[%s11174_s2 + $0x330] sm:$0xf]  ;;  %v6306_v4 = vld [vmem:[%s11174_s2 + $0x334] sm:$0xf0] }
 0x413   :  { %2377 = vmatpush.bf16.msra.mxu2 %v8898_v0  ;;  %2390 = vmatpush.bf16.msra.mxu3 %v8904_v42  ;;  %v5373_v0 = vor.u32 %v6306_v4, %v5372_v1  ;;  %v5364_v42 = vld [vmem:[%s11174_s2 + $0x320] sm:$0xf]  ;;  %v5366_v4 = vld [vmem:[%s11174_s2 + $0x328] sm:$0xf0] }
 0x414   :  { %v5365_v1 = vor.u32 %v6304_v3, %v5364_v42  ;;  %v5369_v52 = vor.u32 %v6303_v53, %v5366_v4  ;;  %v6301_v3 = vld [vmem:[%s11174_s2 + $0x314] sm:$0xf]  ;;  %v5358_v53 = vld [vmem:[%s11174_s2 + $0x318] sm:$0xf0]  ;;  %v6300_v4 = vld [vmem:[%s11174_s2 + $0x304] sm:$0xf0] }
 0x415   :  { %2274 = vmatpush.bf16.msrb.mxu0 %v5373_v0  ;;  %v2087_v0 = vpop.f32.mrf.mxu1  ;;  %v5361_v42 = vor.u32 %v6301_v3, %v5358_v53  ;;  %v2076_v3 = vpop.f32.mrf.mxu0 }
 0x416   :  { %2288 = vmatpush.bf16.msrb.mxu1 %v5369_v52  ;;  %v6299_v52 = vld [vmem:[%s11174_s2 + $0x304] sm:$0xf] }
 0x417   :  { %v5353_v29 = vor.u32 %v6299_v52, %v5350_v28  ;;  %v2302_v3 = vld [vmem:[#allocation1] sm:$0xff] }
 0x418   :  { %2326 = vmatmul.bf16.vlgmr.msrb.gmra.mxu2 %v2302_v3 }
 0x419   :  { %2275 = vmatpush.bf16.msrb.mxu0 %v5365_v1  ;;  %v5348_v1 = vld [vmem:[%s11174_s2 + $0x300] sm:$0xf] }
 0x41a   :  { %v5349_v16 = vor.u32 %v6300_v4, %v5348_v1  ;;  %2289 = vmatpush.bf16.msrb.mxu1 %v5361_v42 }
 0x41d   :  { %2276 = vmatpush.bf16.msrb.mxu0 %v5357_v7  ;;  %v2089_v53 = vpop.f32.mrf.mxu1  ;;  %v2126_v7 = vpop.f32.mrf.mxu0 }
 0x41e   :  { %2290 = vmatpush.bf16.msrb.mxu1 %v5353_v29 }
 0x421   :  { %2277 = vmatpush.bf16.msrb.mxu0 %v5349_v16 }
 0x422   :  { %2357 = vmatpush.bf16.msra.mxu1 %v8467_v54 }
 0x425   :  { %2344 = vmatpush.bf16.msra.mxu0 %v8461_v41  ;;  %v2139_v1 = vpop.f32.mrf.mxu1  ;;  %v2128_v16 = vpop.f32.mrf.mxu0 }
 0x426   :  { %2358 = vmatpush.bf16.msra.mxu1 %v8479_v36 }
 0x429   :  { %2345 = vmatpush.bf16.msra.mxu0 %v8473_v51 }
 0x42a   :  { %2359 = vmatpush.bf16.msra.mxu1 %v8491_v37 }
 0x42d   :  { %2346 = vmatpush.bf16.msra.mxu0 %v8485_v34  ;;  %v2141_v42 = vpop.f32.mrf.mxu1 }
 0x42e   :  { %2360 = vmatpush.bf16.msra.mxu1 %v8503_v2  ;;  %v2303_v42 = vld [vmem:[#allocation1 + $0x9] sm:$0xff] }
 0x42f   :  { %2339 = vmatmul.bf16.vlgmr.msrb.gmra.mxu3 %v2303_v42 }
 0x431   :  { %2347 = vmatpush.bf16.msra.mxu0 %v8497_v23 }
 0x432   :  { %2361 = vmatpush.bf16.msra.mxu1 %v8515_v50 }
 0x435   :  { %2348 = vmatpush.bf16.msra.mxu0 %v8509_v10 }
 0x436   :  { %2362 = vmatpush.bf16.msra.mxu1 %v8533_v44  ;;  %v2306_v44 = vld [vmem:[#allocation1 + $0x24] sm:$0xff] }
 0x437   :  { %2378 = vmatmul.bf16.vlgmr.msra.gmra.mxu2 %v2306_v44  ;;  %v2305_v44 = vld [vmem:[#allocation1 + $0x1b] sm:$0xff] }
 0x439   :  { %v2026_v4 = vpop.f32.mrf.mxu2  ;;  %v2039_v52 = vpop.f32.mrf.mxu3  ;;  %2349 = vmatpush.bf16.msra.mxu0 %v8527_v35 }
 0x43a   :  { %v8966_v28 = vadd.f32 %v2026_v4, %v8519_v56  ;;  %v8969_v29 = vadd.f32 %v2039_v52, %v8522_v48  ;;  %2363 = vmatpush.bf16.msra.mxu1 %v8545_v14  ;;  %v2088_v4 = vadd.f32 %v2087_v0, %v2074_v55  ;;  %v2307_v14 = vld [vmem:[#allocation1 + $0x2d] sm:$0xff]  ;;  %v5491_v55 = vld [vmem:[%s11173_s0 + $0x40] sm:$0xff] }
 0x43c   :  { %11461 = vst [vmem:[#allocation23_spill] sm:$0xff] %v8966_v28 }
 0x43d   :  { %11462 = vst [vmem:[#allocation7_spill] sm:$0xff] %v8969_v29  ;;  %2350 = vmatpush.bf16.msra.mxu0 %v8539_v43 }
 0x43e   :  { %2364 = vmatpush.bf16.msra.mxu1 %v8557_v58 }
 0x43f   :  { %2391 = vmatmul.bf16.vlgmr.msra.gmra.mxu3 %v2307_v14  ;;  %v2309_v14 = vld [vmem:[#allocation1 + $0x3f] sm:$0xff] }
 0x441   :  { %v2028_v53 = vpop.f32.mrf.mxu2  ;;  %v2041_v16 = vpop.f32.mrf.mxu3  ;;  %2351 = vmatpush.bf16.msra.mxu0 %v8551_v27 }
 0x449   :  { %v2100_v56 = vpop.f32.mrf.mxu2  ;;  %v2113_v48 = vpop.f32.mrf.mxu3 }
 0x44a   :  { %v2101_v52 = vadd.f32 %v2100_v56, %v2088_v4  ;;  %v2308_v4 = vld [vmem:[#allocation1 + $0x36] sm:$0xff] }
 0x44c   :  { %v2114_v35 = vadd.f32 %v2113_v48, %v2101_v52 }
 0x44e   :  { %v2127_v53 = vadd.f32 %v2126_v7, %v2114_v35  ;;  %v5485_v35 = vld [vmem:[%s11174_s2 + $0x3f0] sm:$0xf]  ;;  %v6330_v7 = vld [vmem:[%s11174_s2 + $0x3f4] sm:$0xf0] }
 0x450   :  { %v2140_v16 = vadd.f32 %v2139_v1, %v2127_v53  ;;  %v5487_v1 = vld [vmem:[%s11174_s2 + $0x3f8] sm:$0xf0]  ;;  %v6328_v53 = vld [vmem:[%s11174_s2 + $0x3e4] sm:$0xf0] }
 0x451   :  { %v2102_v29 = vpop.f32.mrf.mxu2  ;;  %v2115_v43 = vpop.f32.mrf.mxu3 }
 0x452   :  { %v2304_v43 = vld [vmem:[#allocation1 + $0x12] sm:$0xff] }
 0x453   :  { %2554 = vst [vmem:[#allocation1] ss:$9 sm:$0xff] %v5491_v55 }
 0x459   :  { %v2152_v3 = vpop.f32.mrf.mxu2  ;;  %v2165_v28 = vpop.f32.mrf.mxu3 }
 0x45a   :  { %v2153_v42 = vadd.f32 %v2152_v3, %v2140_v16  ;;  %v6327_v16 = vld [vmem:[%s11174_s2 + $0x3e4] sm:$0xf]  ;;  %v5479_v3 = vld [vmem:[%s11174_s2 + $0x3e8] sm:$0xf0] }
 0x45b   :  { %v5482_v55 = vor.u32 %v6327_v16, %v5479_v3  ;;  %v11467_v16 = vld [vmem:[#allocation25_spill] sm:$0xff] }
 0x45c   :  { %v2166_v50 = vadd.f32 %v2165_v28, %v2153_v42  ;;  %v5477_v28 = vld [vmem:[%s11174_s2 + $0x3e0] sm:$0xf]  ;;  %v11468_v3 = vld [vmem:[#allocation17_spill] sm:$0xff] }
 0x45d   :  { %v5478_v42 = vor.u32 %v6328_v53, %v5477_v28  ;;  %v6323_v28 = vld [vmem:[%s11174_s2 + $0x3c4] sm:$0xf] }
 0x45e   :  { %vm2169_vm6 = vcmp.gt.f32.partialorder %v2166_v50, 0.0  ;;  %v2170_v27 = vmul.f32 0.2, %v2166_v50 }
 0x460   :  { %v2171_v0 = vsel %vm2169_vm6, %v2166_v50, %v2170_v27  ;;  %v5486_v50 = vor.u32 %v6330_v7, %v5485_v35  ;;  %v6329_v27 = vld [vmem:[%s11174_s2 + $0x3f4] sm:$0xf] }
 0x461   :  { %v2172_v56 = vpack.c.bf16 %v2171_v0, %v2171_v0  ;;  %v2154_v48 = vpop.f32.mrf.mxu2  ;;  %v2167_v29 = vpop.f32.mrf.mxu3  ;;  %v5490_v52 = vor.u32 %v6329_v27, %v5487_v1  ;;  %v5469_v0 = vld [vmem:[%s11174_s2 + $0x3d0] sm:$0xf]  ;;  %v6324_v27 = vld [vmem:[%s11174_s2 + $0x3c4] sm:$0xf0] }
 0x462   :  { %2523 = vmatpush.bf16.msrb.mxu2 %v5486_v50  ;;  %v6325_v48 = vld [vmem:[%s11174_s2 + $0x3d4] sm:$0xf]  ;;  %v5471_v29 = vld [vmem:[%s11174_s2 + $0x3d8] sm:$0xf0]  ;;  %v5461_v50 = vld [vmem:[%s11174_s2 + $0x3c0] sm:$0xf] }
 0x463   :  { %2278 = vmatmul.bf16.vlgmr.msrb.gmra.mxu0 %v2172_v56  ;;  %2291 = vmatmul.bf16.vlgmr.msrb.gmra.mxu1 %v2172_v56  ;;  %v6326_v56 = vld [vmem:[%s11174_s2 + $0x3d4] sm:$0xf0]  ;;  %v5474_v7 = vor.u32 %v6325_v48, %v5471_v29  ;;  %v5462_v1 = vor.u32 %v6324_v27, %v5461_v50  ;;  %v11473_v48 = vld [vmem:[#allocation19_spill] sm:$0xff]  ;;  %v11474_v29 = vld [vmem:[#allocation20_spill] sm:$0xff] }
 0x464   :  { %2396 = vmatpush.bf16.msrb.mxu0 %v8578_v33  ;;  %2409 = vmatpush.bf16.msrb.mxu1 %v8584_v45  ;;  %v5470_v35 = vor.u32 %v6326_v56, %v5469_v0  ;;  %v11471_v0 = vld [vmem:[#allocation5_spill] sm:$0xff]  ;;  %v11472_v56 = vld [vmem:[#allocation6_spill] sm:$0xff]  ;;  %v5453_v50 = vld [vmem:[%s11174_s2 + $0x3b0] sm:$0xf] }
 0x465   :  { %2536 = vmatpush.bf16.msrb.mxu3 %v5490_v52  ;;  %v5463_v52 = vld [vmem:[%s11174_s2 + $0x3c8] sm:$0xf0]  ;;  %v6322_v27 = vld [vmem:[%s11174_s2 + $0x3b4] sm:$0xf0] }
 0x466   :  { %2524 = vmatpush.bf16.msrb.mxu2 %v5478_v42  ;;  %v5466_v53 = vor.u32 %v6323_v28, %v5463_v52  ;;  %v11469_v42 = vld [vmem:[#allocation3_spill] sm:$0xff]  ;;  %v5454_v28 = vor.u32 %v6322_v27, %v5453_v50  ;;  %v5455_v52 = vld [vmem:[%s11174_s2 + $0x3b8] sm:$0xf0] }
 0x467   :  { %v5447_v27 = vld [vmem:[%s11174_s2 + $0x3a8] sm:$0xf0] }
 0x468   :  { %2397 = vmatpush.bf16.msrb.mxu0 %v8614_v49  ;;  %2410 = vmatpush.bf16.msrb.mxu1 %v8620_v26 }
 0x469   :  { %2537 = vmatpush.bf16.msrb.mxu3 %v5482_v55  ;;  %v11470_v55 = vld [vmem:[#allocation4_spill] sm:$0xff] }
 0x46a   :  { %2525 = vmatpush.bf16.msrb.mxu2 %v5470_v35  ;;  %v11475_v35 = vld [vmem:[#allocation21_spill] sm:$0xff] }
 0x46c   :  { %2398 = vmatpush.bf16.msrb.mxu0 %v8638_v63  ;;  %2411 = vmatpush.bf16.msrb.mxu1 %v8644_v59 }
 0x46d   :  { %2538 = vmatpush.bf16.msrb.mxu3 %v5474_v7  ;;  %v11476_v7 = vld [vmem:[#allocation22_spill] sm:$0xff] }
 0x46e   :  { %2526 = vmatpush.bf16.msrb.mxu2 %v5462_v1  ;;  %v6321_v1 = vld [vmem:[%s11174_s2 + $0x3b4] sm:$0xf] }
 0x470   :  { %2399 = vmatpush.bf16.msrb.mxu0 %v8656_v15  ;;  %2412 = vmatpush.bf16.msrb.mxu1 %v8662_v57 }
 0x471   :  { %2539 = vmatpush.bf16.msrb.mxu3 %v5466_v53  ;;  %v5458_v53 = vor.u32 %v6321_v1, %v5455_v52 }
 0x472   :  { %2527 = vmatpush.bf16.msrb.mxu2 %v5454_v28 }
 0x473   :  { %2352 = vmatmul.bf16.vlgmr.msra.gmra.mxu0 %v2304_v43  ;;  %2365 = vmatmul.bf16.vlgmr.msra.gmra.mxu1 %v2305_v44  ;;  %v11463_v43 = vld [vmem:[#allocation18_spill] sm:$0xff]  ;;  %v11464_v44 = vld [vmem:[#allocation13_spill] sm:$0xff] }
 0x474   :  { %2400 = vmatpush.bf16.msrb.mxu0 %v8668_v5  ;;  %2413 = vmatpush.bf16.msrb.mxu1 %v8674_v60 }
 0x475   :  { %2540 = vmatpush.bf16.msrb.mxu3 %v5458_v53 }
 0x478   :  { %2401 = vmatpush.bf16.msrb.mxu0 %v8680_v8  ;;  %2414 = vmatpush.bf16.msrb.mxu1 %v8686_v9 }
 0x47c   :  { %2402 = vmatpush.bf16.msrb.mxu0 %v8692_v12  ;;  %2415 = vmatpush.bf16.msrb.mxu1 %v8698_v13 }
 0x480   :  { %2403 = vmatpush.bf16.msrb.mxu0 %v8704_v39  ;;  %2416 = vmatpush.bf16.msrb.mxu1 %v8710_v6 }
 0x483   :  { %2404 = vmatmul.bf16.vlgmr.msrb.gmra.mxu0 %v2308_v4  ;;  %2417 = vmatmul.bf16.vlgmr.msrb.gmra.mxu1 %v2309_v14  ;;  %v11465_v4 = vld [vmem:[#allocation14_spill] sm:$0xff]  ;;  %v11466_v14 = vld [vmem:[#allocation24_spill] sm:$0xff] }
 0x484   :  { %2571 = vmatpush.bf16.msra.mxu0 %v8716_v18  ;;  %2584 = vmatpush.bf16.msra.mxu1 %v8722_v61 }
 0x488   :  { %2572 = vmatpush.bf16.msra.mxu0 %v8730_v19  ;;  %2585 = vmatpush.bf16.msra.mxu1 %v8736_v17 }
 0x48c   :  { %2573 = vmatpush.bf16.msra.mxu0 %v8742_v21  ;;  %2586 = vmatpush.bf16.msra.mxu1 %v8748_v22 }
 0x490   :  { %2574 = vmatpush.bf16.msra.mxu0 %v8754_v25  ;;  %2587 = vmatpush.bf16.msra.mxu1 %v8760_v30 }
 0x494   :  { %2575 = vmatpush.bf16.msra.mxu0 %v8766_v40  ;;  %2588 = vmatpush.bf16.msra.mxu1 %v8772_v24 }
 0x498   :  { %2576 = vmatpush.bf16.msra.mxu0 %v8778_v46  ;;  %2589 = vmatpush.bf16.msra.mxu1 %v8784_v32 }
 0x49b   :  { %v2327_v28 = vpop.f32.mrf.mxu2 }
 0x49c   :  { %2577 = vmatpush.bf16.msra.mxu0 %v8790_v47  ;;  %2590 = vmatpush.bf16.msra.mxu1 %v8796_v31 }
 0x4a0   :  { %2578 = vmatpush.bf16.msra.mxu0 %v8802_v20  ;;  %2591 = vmatpush.bf16.msra.mxu1 %v8808_v11 }
 0x4a4   :  { %2623 = vmatpush.bf16.msrb.mxu0 %v8814_v38  ;;  %2636 = vmatpush.bf16.msrb.mxu1 %v8820_v62 }
 0x4a8   :  { %2624 = vmatpush.bf16.msrb.mxu0 %v11463_v43  ;;  %2637 = vmatpush.bf16.msrb.mxu1 %v11464_v44 }
 0x4ac   :  { %2625 = vmatpush.bf16.msrb.mxu0 %v11465_v4  ;;  %2638 = vmatpush.bf16.msrb.mxu1 %v11466_v14 }
 0x4b0   :  { %2626 = vmatpush.bf16.msrb.mxu0 %v11467_v16  ;;  %2639 = vmatpush.bf16.msrb.mxu1 %v11468_v3 }
 0x4b2   :  { %v2340_v52 = vpop.f32.mrf.mxu3 }
 0x4b4   :  { %2627 = vmatpush.bf16.msrb.mxu0 %v11469_v42  ;;  %2640 = vmatpush.bf16.msrb.mxu1 %v11470_v55 }
 0x4b8   :  { %2628 = vmatpush.bf16.msrb.mxu0 %v11471_v0  ;;  %2641 = vmatpush.bf16.msrb.mxu1 %v11472_v56  ;;  %v6318_v56 = vld [vmem:[%s11174_s2 + $0x394] sm:$0xf0] }
 0x4bc   :  { %2629 = vmatpush.bf16.msrb.mxu0 %v11473_v48  ;;  %2642 = vmatpush.bf16.msrb.mxu1 %v11474_v29  ;;  %v6319_v29 = vld [vmem:[%s11174_s2 + $0x3a4] sm:$0xf]  ;;  %v5437_v48 = vld [vmem:[%s11174_s2 + $0x390] sm:$0xf] }
 0x4bd   :  { %v5450_v1 = vor.u32 %v6319_v29, %v5447_v27  ;;  %v5439_v29 = vld [vmem:[%s11174_s2 + $0x398] sm:$0xf0]  ;;  %v6316_v27 = vld [vmem:[%s11174_s2 + $0x384] sm:$0xf0] }
 0x4bf   :  { %2541 = vmatpush.bf16.msrb.mxu3 %v5450_v1  ;;  %v6315_v1 = vld [vmem:[%s11174_s2 + $0x384] sm:$0xf] }
 0x4c0   :  { %2630 = vmatpush.bf16.msrb.mxu0 %v11475_v35  ;;  %2643 = vmatpush.bf16.msrb.mxu1 %v11476_v7  ;;  %v5445_v7 = vld [vmem:[%s11174_s2 + $0x3a0] sm:$0xf]  ;;  %v6320_v35 = vld [vmem:[%s11174_s2 + $0x3a4] sm:$0xf0] }
 0x4c1   :  { %v5446_v50 = vor.u32 %v6320_v35, %v5445_v7  ;;  %v6317_v35 = vld [vmem:[%s11174_s2 + $0x394] sm:$0xf]  ;;  %v5438_v7 = vor.u32 %v6318_v56, %v5437_v48  ;;  %v5431_v56 = vld [vmem:[%s11174_s2 + $0x388] sm:$0xf0] }
 0x4c2   :  { %v5442_v53 = vor.u32 %v6317_v35, %v5439_v29  ;;  %v5434_v48 = vor.u32 %v6315_v1, %v5431_v56  ;;  %v2329_v35 = vpop.f32.mrf.mxu2  ;;  %v2342_v29 = vpop.f32.mrf.mxu3  ;;  %v11480_v1 = vld [vmem:[#allocation7_spill] sm:$0xff] }
 0x4c3   :  { %2528 = vmatpush.bf16.msrb.mxu2 %v5446_v50  ;;  %v5429_v50 = vld [vmem:[%s11174_s2 + $0x380] sm:$0xf]  ;;  %v11486_v35 = vld [vmem:[#allocation16_spill] sm:$0xff] }
 0x4c4   :  { %v5430_v0 = vor.u32 %v6316_v27, %v5429_v50  ;;  %2542 = vmatpush.bf16.msrb.mxu3 %v5442_v53  ;;  %v11478_v27 = vld [vmem:[#allocation23_spill] sm:$0xff] }
 0x4c7   :  { %2529 = vmatpush.bf16.msrb.mxu2 %v5438_v7 }
 0x4c8   :  { %2543 = vmatpush.bf16.msrb.mxu3 %v5434_v48 }
 0x4ca   :  { %v2379_v7 = vpop.f32.mrf.mxu2  ;;  %v2392_v50 = vpop.f32.mrf.mxu3 }
 0x4cb   :  { %2530 = vmatpush.bf16.msrb.mxu2 %v5430_v0 }
 0x4cc   :  { %2610 = vmatpush.bf16.msra.mxu3 %v8467_v54 }
 0x4cf   :  { %2597 = vmatpush.bf16.msra.mxu2 %v8461_v41  ;;  %v11477_v41 = vld [vmem:[#allocation9_spill] sm:$0xff] }
 0x4d0   :  { %2611 = vmatpush.bf16.msra.mxu3 %v8479_v36 }
 0x4d2   :  { %v2381_v0 = vpop.f32.mrf.mxu2  ;;  %v2394_v53 = vpop.f32.mrf.mxu3 }
 0x4d3   :  { %2598 = vmatpush.bf16.msra.mxu2 %v8473_v51  ;;  %v2341_v53 = vadd.f32 %v2340_v52, %v2327_v28  ;;  %v5572_v28 = vld [vmem:[%s11173_s0 + $0x48] sm:$0xff] }
 0x4d4   :  { %2612 = vmatpush.bf16.msra.mxu3 %v8491_v37  ;;  %v11483_v37 = vld [vmem:[#allocation11_spill] sm:$0xff] }
 0x4d7   :  { %2599 = vmatpush.bf16.msra.mxu2 %v8485_v34  ;;  %v11482_v34 = vld [vmem:[#allocation10_spill] sm:$0xff] }
 0x4d8   :  { %2613 = vmatpush.bf16.msra.mxu3 %v8503_v2  ;;  %v11485_v2 = vld [vmem:[#allocation15_spill] sm:$0xff] }
 0x4db   :  { %2600 = vmatpush.bf16.msra.mxu2 %v8497_v23  ;;  %v11484_v23 = vld [vmem:[#allocation12_spill] sm:$0xff] }
 0x4dc   :  { %2614 = vmatpush.bf16.msra.mxu3 %v11477_v41 }
 0x4df   :  { %2601 = vmatpush.bf16.msra.mxu2 %v8509_v10 }
 0x4e0   :  { %v2279_v54 = vpop.f32.mrf.mxu0  ;;  %v2292_v51 = vpop.f32.mrf.mxu1  ;;  %2615 = vmatpush.bf16.msra.mxu3 %v11483_v37 }
 0x4e1   :  { %v9135_v36 = vadd.f32 %v2279_v54, %v11478_v27  ;;  %v9138_v56 = vadd.f32 %v2292_v51, %v11480_v1  ;;  %v2555_v54 = vld [vmem:[#allocation1] sm:$0xff]  ;;  %v2556_v51 = vld [vmem:[#allocation1 + $0x9] sm:$0xff] }
 0x4e2   :  { %2579 = vmatmul.bf16.vlgmr.msra.gmra.mxu0 %v2555_v54  ;;  %2592 = vmatmul.bf16.vlgmr.msra.gmra.mxu1 %v2556_v51  ;;  %v2562_v54 = vld [vmem:[#allocation1 + $0x3f] sm:$0xff]  ;;  %v6346_v51 = vld [vmem:[%s11174_s2 + $0x474] sm:$0xf0] }
 0x4e3   :  { %11479 = vst [vmem:[#allocation8_spill] sm:$0xff] %v9135_v36  ;;  %2602 = vmatpush.bf16.msra.mxu2 %v11482_v34  ;;  %v2560_v36 = vld [vmem:[#allocation1 + $0x2d] sm:$0xff] }
 0x4e4   :  { %11481 = vst [vmem:[#allocation18_spill] sm:$0xff] %v9138_v56  ;;  %2616 = vmatpush.bf16.msra.mxu3 %v11485_v2 }
 0x4e7   :  { %2603 = vmatpush.bf16.msra.mxu2 %v11484_v23 }
 0x4e8   :  { %v2281_v48 = vpop.f32.mrf.mxu0  ;;  %v2294_v10 = vpop.f32.mrf.mxu1  ;;  %2617 = vmatpush.bf16.msra.mxu3 %v8557_v58 }
 0x4eb   :  { %2604 = vmatpush.bf16.msra.mxu2 %v11486_v35  ;;  %v2559_v35 = vld [vmem:[#allocation1 + $0x24] sm:$0xff] }
 0x4f0   :  { %v2353_v29 = vpop.f32.mrf.mxu0  ;;  %v2366_v0 = vpop.f32.mrf.mxu1 }
 0x4f1   :  { %v2354_v41 = vadd.f32 %v2353_v29, %v2341_v53 }
 0x4f2   :  { %2631 = vmatmul.bf16.vlgmr.msrb.gmra.mxu0 %v2559_v35  ;;  %2644 = vmatmul.bf16.vlgmr.msrb.gmra.mxu1 %v2560_v36  ;;  %v5566_v36 = vld [vmem:[%s11174_s2 + $0x470] sm:$0xf]  ;;  %v6342_v35 = vld [vmem:[%s11174_s2 + $0x454] sm:$0xf0] }
 0x4f3   :  { %v2367_v27 = vadd.f32 %v2366_v0, %v2354_v41  ;;  %v2561_v41 = vld [vmem:[#allocation1 + $0x36] sm:$0xff] }
 0x4f5   :  { %v2380_v37 = vadd.f32 %v2379_v7, %v2367_v27  ;;  %v2557_v7 = vld [vmem:[#allocation1 + $0x12] sm:$0xff] }
 0x4f6   :  { %v6345_v27 = vld [vmem:[%s11174_s2 + $0x474] sm:$0xf] }
 0x4f7   :  { %v2393_v23 = vadd.f32 %v2392_v50, %v2380_v37  ;;  %v2558_v50 = vld [vmem:[#allocation1 + $0x1b] sm:$0xff] }
 0x4f8   :  { %v2355_v1 = vpop.f32.mrf.mxu0  ;;  %v2368_v34 = vpop.f32.mrf.mxu1  ;;  %2807 = vst [vmem:[#allocation1] ss:$9 sm:$0xff] %v5572_v28  ;;  %v5552_v28 = vld [vmem:[%s11174_s2 + $0x458] sm:$0xf0] }
 0x4f9   :  { %v5568_v1 = vld [vmem:[%s11174_s2 + $0x478] sm:$0xf0]  ;;  %v5558_v34 = vld [vmem:[%s11174_s2 + $0x460] sm:$0xf] }
 0x4fa   :  { %v5571_v37 = vor.u32 %v6345_v27, %v5568_v1  ;;  %v9342_v27 = vld [vmem:[%s11172_s1 + $0xe0] sm:$0xff] }
 0x4fc   :  { %2789 = vmatpush.bf16.msra.mxu1 %v5571_v37  ;;  %v9348_v37 = vld [vmem:[%s11172_s1 + $0x98] sm:$0xff] }
 0x4fd   :  { %11493 = vst [vmem:[#allocation13_spill] sm:$0xff] %v9348_v37 }
 0x500   :  { %v2405_v2 = vpop.f32.mrf.mxu0  ;;  %v2418_v48 = vpop.f32.mrf.mxu1 }
 0x501   :  { %v2406_v10 = vadd.f32 %v2405_v2, %v2393_v23  ;;  %v5560_v23 = vld [vmem:[%s11174_s2 + $0x468] sm:$0xf0] }
 0x503   :  { %v2419_v56 = vadd.f32 %v2418_v48, %v2406_v10  ;;  %v5550_v10 = vld [vmem:[%s11174_s2 + $0x450] sm:$0xf] }
 0x505   :  { %vm2422_vm7 = vcmp.gt.f32.partialorder %v2419_v56, 0.0  ;;  %v2423_v58 = vmul.f32 0.2, %v2419_v56 }
 0x507   :  { %v2424_v52 = vsel %vm2422_vm7, %v2419_v56, %v2423_v58  ;;  %v5567_v56 = vor.u32 %v6346_v51, %v5566_v36  ;;  %v6341_v58 = vld [vmem:[%s11174_s2 + $0x454] sm:$0xf]  ;;  %v5544_v36 = vld [vmem:[%s11174_s2 + $0x448] sm:$0xf0] }
 0x508   :  { %v2425_v29 = vpack.c.bf16 %v2424_v52, %v2424_v52  ;;  %v2407_v0 = vpop.f32.mrf.mxu0  ;;  %v2420_v53 = vpop.f32.mrf.mxu1  ;;  %v5551_v52 = vor.u32 %v6342_v35, %v5550_v10  ;;  %v11496_v10 = vld [vmem:[#allocation18_spill] sm:$0xff] }
 0x509   :  { %2776 = vmatpush.bf16.msra.mxu0 %v5567_v56  ;;  %v5542_v0 = vld [vmem:[%s11174_s2 + $0x440] sm:$0xf]  ;;  %v6339_v53 = vld [vmem:[%s11174_s2 + $0x444] sm:$0xf] }
 0x50a   :  { %2531 = vmatmul.bf16.vlgmr.msrb.gmra.mxu2 %v2425_v29  ;;  %2544 = vmatmul.bf16.vlgmr.msrb.gmra.mxu3 %v2425_v29  ;;  %v5555_v29 = vor.u32 %v6341_v58, %v5552_v28  ;;  %v5547_v51 = vor.u32 %v6339_v53, %v5544_v36  ;;  %v9336_v56 = vld [vmem:[%s11172_s1 + $0xa0] sm:$0xff]  ;;  %v9366_v58 = vld [vmem:[%s11172_s1 + $0x90] sm:$0xff] }
 0x50b   :  { %2649 = vmatpush.bf16.msrb.mxu2 %v8578_v33  ;;  %2662 = vmatpush.bf16.msrb.mxu3 %v8584_v45  ;;  %v6344_v33 = vld [vmem:[%s11174_s2 + $0x464] sm:$0xf0]  ;;  %v6343_v45 = vld [vmem:[%s11174_s2 + $0x464] sm:$0xf]  ;;  %11497 = vst [vmem:[#allocation24_spill] sm:$0xff] %v9366_v58  ;;  %v9372_v28 = vld [vmem:[%s11172_s1 + $0xd0] sm:$0xff] }
 0x50c   :  { %v5559_v2 = vor.u32 %v6344_v33, %v5558_v34  ;;  %v5563_v48 = vor.u32 %v6343_v45, %v5560_v23  ;;  %v9354_v33 = vld [vmem:[%s11172_s1 + $0xd8] sm:$0xff]  ;;  %11498 = vst [vmem:[#allocation25_spill] sm:$0xff] %v9372_v28  ;;  %v2809_v53 = vld [vmem:[#allocation1 + $0x9] sm:$0xff]  ;;  %v9390_v36 = vld [vmem:[%s11172_s1 + $0x80] sm:$0xff] }
 0x50d   :  { %11494 = vst [vmem:[#allocation14_spill] sm:$0xff] %v9354_v33 }
 0x50e   :  { %2777 = vmatpush.bf16.msra.mxu0 %v5559_v2  ;;  %2790 = vmatpush.bf16.msra.mxu1 %v5563_v48  ;;  %v11495_v2 = vld [vmem:[#allocation8_spill] sm:$0xff]  ;;  %11501 = vst [vmem:[#allocation4_spill] sm:$0xff] %v9390_v36 }
 0x50f   :  { %2650 = vmatpush.bf16.msrb.mxu2 %v8614_v49  ;;  %2663 = vmatpush.bf16.msrb.mxu3 %v8620_v26  ;;  %v6340_v49 = vld [vmem:[%s11174_s2 + $0x444] sm:$0xf0] }
 0x510   :  { %v5543_v26 = vor.u32 %v6340_v49, %v5542_v0  ;;  %v2808_v0 = vld [vmem:[#allocation1] sm:$0xff] }
 0x512   :  { %2778 = vmatpush.bf16.msra.mxu0 %v5551_v52  ;;  %2791 = vmatpush.bf16.msra.mxu1 %v5555_v29  ;;  %v9378_v52 = vld [vmem:[%s11172_s1 + $0x88] sm:$0xff] }
 0x513   :  { %2651 = vmatpush.bf16.msrb.mxu2 %v8638_v63  ;;  %2664 = vmatpush.bf16.msrb.mxu3 %v8644_v59  ;;  %v11487_v63 = vld [vmem:[#allocation5_spill] sm:$0xff]  ;;  %v11488_v59 = vld [vmem:[#allocation6_spill] sm:$0xff]  ;;  %11499 = vst [vmem:[#allocation17_spill] sm:$0xff] %v9378_v52  ;;  %v9384_v29 = vld [vmem:[%s11172_s1 + $0xc8] sm:$0xff] }
 0x514   :  { %11500 = vst [vmem:[#allocation3_spill] sm:$0xff] %v9384_v29 }
 0x516   :  { %2779 = vmatpush.bf16.msra.mxu0 %v5543_v26  ;;  %2792 = vmatpush.bf16.msra.mxu1 %v5547_v51  ;;  %v9396_v51 = vld [vmem:[%s11172_s1 + $0xc0] sm:$0xff] }
 0x517   :  { %2652 = vmatpush.bf16.msrb.mxu2 %v8656_v15  ;;  %2665 = vmatpush.bf16.msrb.mxu3 %v8662_v57  ;;  %v11489_v15 = vld [vmem:[#allocation19_spill] sm:$0xff]  ;;  %v11490_v57 = vld [vmem:[#allocation20_spill] sm:$0xff] }
 0x51a   :  { %2605 = vmatmul.bf16.vlgmr.msra.gmra.mxu2 %v2557_v7  ;;  %2618 = vmatmul.bf16.vlgmr.msra.gmra.mxu3 %v2558_v50 }
 0x51b   :  { %2653 = vmatpush.bf16.msrb.mxu2 %v8668_v5  ;;  %2666 = vmatpush.bf16.msrb.mxu3 %v8674_v60  ;;  %v11491_v5 = vld [vmem:[#allocation21_spill] sm:$0xff]  ;;  %v11492_v60 = vld [vmem:[#allocation22_spill] sm:$0xff] }
 0x51f   :  { %2654 = vmatpush.bf16.msrb.mxu2 %v8680_v8  ;;  %2667 = vmatpush.bf16.msrb.mxu3 %v8686_v9  ;;  %v5534_v8 = vld [vmem:[%s11174_s2 + $0x430] sm:$0xf]  ;;  %v6338_v9 = vld [vmem:[%s11174_s2 + $0x434] sm:$0xf0] }
 0x523   :  { %2655 = vmatpush.bf16.msrb.mxu2 %v8692_v12  ;;  %2668 = vmatpush.bf16.msrb.mxu3 %v8698_v13  ;;  %v6337_v12 = vld [vmem:[%s11174_s2 + $0x434] sm:$0xf]  ;;  %v5535_v13 = vor.u32 %v6338_v9, %v5534_v8 }
 0x525   :  { %2780 = vmatpush.bf16.msra.mxu0 %v5535_v13 }
 0x527   :  { %2656 = vmatpush.bf16.msrb.mxu2 %v8704_v39  ;;  %2669 = vmatpush.bf16.msrb.mxu3 %v8710_v6  ;;  %v5536_v39 = vld [vmem:[%s11174_s2 + $0x438] sm:$0xf0] }
 0x528   :  { %v5539_v6 = vor.u32 %v6337_v12, %v5536_v39  ;;  %v2813_v12 = vld [vmem:[#allocation1 + $0x2d] sm:$0xff] }
 0x52a   :  { %2657 = vmatmul.bf16.vlgmr.msrb.gmra.mxu2 %v2561_v41  ;;  %2670 = vmatmul.bf16.vlgmr.msrb.gmra.mxu3 %v2562_v54  ;;  %v9324_v41 = vld [vmem:[%s11172_s1 + $0xa8] sm:$0xff] }
 0x52b   :  { %2824 = vmatpush.bf16.msra.mxu2 %v8716_v18  ;;  %2837 = vmatpush.bf16.msra.mxu3 %v8722_v61  ;;  %v5526_v18 = vld [vmem:[%s11174_s2 + $0x420] sm:$0xf]  ;;  %v6336_v61 = vld [vmem:[%s11174_s2 + $0x424] sm:$0xf0] }
 0x52c   :  { %2793 = vmatpush.bf16.msra.mxu1 %v5539_v6  ;;  %v9330_v54 = vld [vmem:[%s11172_s1 + $0xe8] sm:$0xff] }
 0x52f   :  { %2825 = vmatpush.bf16.msra.mxu2 %v8730_v19  ;;  %2838 = vmatpush.bf16.msra.mxu3 %v8736_v17  ;;  %v6335_v19 = vld [vmem:[%s11174_s2 + $0x424] sm:$0xf]  ;;  %v5527_v17 = vor.u32 %v6336_v61, %v5526_v18 }
 0x531   :  { %2781 = vmatpush.bf16.msra.mxu0 %v5527_v17 }
 0x533   :  { %2826 = vmatpush.bf16.msra.mxu2 %v8742_v21  ;;  %2839 = vmatpush.bf16.msra.mxu3 %v8748_v22  ;;  %v5528_v21 = vld [vmem:[%s11174_s2 + $0x428] sm:$0xf0] }
 0x534   :  { %v5531_v22 = vor.u32 %v6335_v19, %v5528_v21  ;;  %v5653_v21 = vld [vmem:[%s11173_s0 + $0x50] sm:$0xff] }
 0x536   :  { %2794 = vmatpush.bf16.msra.mxu1 %v5531_v22 }
 0x537   :  { %2827 = vmatpush.bf16.msra.mxu2 %v8754_v25  ;;  %2840 = vmatpush.bf16.msra.mxu3 %v8760_v30 }
 0x53b   :  { %2828 = vmatpush.bf16.msra.mxu2 %v8766_v40  ;;  %2841 = vmatpush.bf16.msra.mxu3 %v8772_v24  ;;  %v5518_v40 = vld [vmem:[%s11174_s2 + $0x410] sm:$0xf]  ;;  %v6334_v24 = vld [vmem:[%s11174_s2 + $0x414] sm:$0xf0] }
 0x53f   :  { %2829 = vmatpush.bf16.msra.mxu2 %v8778_v46  ;;  %2842 = vmatpush.bf16.msra.mxu3 %v8784_v32  ;;  %v6333_v46 = vld [vmem:[%s11174_s2 + $0x414] sm:$0xf]  ;;  %v5519_v32 = vor.u32 %v6334_v24, %v5518_v40 }
 0x540   :  { %v2810_v24 = vld [vmem:[#allocation1 + $0x12] sm:$0xff] }
 0x541   :  { %2782 = vmatpush.bf16.msra.mxu0 %v5519_v32  ;;  %v9404_v32 = vld [vmem:[#allocation1 + $0x36] sm:$0xff] }
 0x543   :  { %2830 = vmatpush.bf16.msra.mxu2 %v8790_v47  ;;  %2843 = vmatpush.bf16.msra.mxu3 %v8796_v31  ;;  %v5520_v47 = vld [vmem:[%s11174_s2 + $0x418] sm:$0xf0] }
 0x544   :  { %v5523_v31 = vor.u32 %v6333_v46, %v5520_v47  ;;  %v2811_v46 = vld [vmem:[#allocation1 + $0x1b] sm:$0xff] }
 0x545   :  { %v9406_v47 = vld [vmem:[#allocation1 + $0x3f] sm:$0xff] }
 0x546   :  { %2795 = vmatpush.bf16.msra.mxu1 %v5523_v31  ;;  %v5647_v31 = vld [vmem:[%s11174_s2 + $0x4f0] sm:$0xf] }
 0x547   :  { %2831 = vmatpush.bf16.msra.mxu2 %v8802_v20  ;;  %2844 = vmatpush.bf16.msra.mxu3 %v8808_v11  ;;  %v5510_v20 = vld [vmem:[%s11174_s2 + $0x400] sm:$0xf]  ;;  %v6332_v11 = vld [vmem:[%s11174_s2 + $0x404] sm:$0xf0] }
 0x54a   :  { %2832 = vmatmul.bf16.vlgmr.msra.gmra.mxu2 %v2808_v0  ;;  %2845 = vmatmul.bf16.vlgmr.msra.gmra.mxu3 %v2809_v53  ;;  %v9459_v0 = vld [vmem:[%s11172_s1 + $0x1f0] sm:$0xff] }
 0x54b   :  { %2876 = vmatpush.bf16.msrb.mxu2 %v8814_v38  ;;  %2889 = vmatpush.bf16.msrb.mxu3 %v8820_v62  ;;  %v6331_v38 = vld [vmem:[%s11174_s2 + $0x404] sm:$0xf]  ;;  %v5511_v62 = vor.u32 %v6332_v11, %v5510_v20  ;;  %v6362_v20 = vld [vmem:[%s11174_s2 + $0x4f4] sm:$0xf0] }
 0x54c   :  { %v9417_v11 = vld [vmem:[%s11172_s1 + $0x1b8] sm:$0xff] }
 0x54d   :  { %2783 = vmatpush.bf16.msra.mxu0 %v5511_v62  ;;  %v5648_v62 = vor.u32 %v6362_v20, %v5647_v31  ;;  %v9593_v31 = vld [vmem:[%s11172_s1 + $0x20] sm:$0xff] }
 0x54e   :  { %v9599_v20 = vld [vmem:[%s11172_s1 + $0x60] sm:$0xff] }
 0x54f   :  { %2877 = vmatpush.bf16.msrb.mxu2 %v11463_v43  ;;  %2890 = vmatpush.bf16.msrb.mxu3 %v11464_v44  ;;  %v5512_v43 = vld [vmem:[%s11174_s2 + $0x408] sm:$0xf0] }
 0x550   :  { %v5515_v44 = vor.u32 %v6331_v38, %v5512_v43  ;;  %v9423_v38 = vld [vmem:[%s11172_s1 + $0x1f8] sm:$0xff]  ;;  %v6361_v43 = vld [vmem:[%s11174_s2 + $0x4f4] sm:$0xf] }
 0x552   :  { %2796 = vmatpush.bf16.msra.mxu1 %v5515_v44  ;;  %v5649_v44 = vld [vmem:[%s11174_s2 + $0x4f8] sm:$0xf0] }
 0x553   :  { %2878 = vmatpush.bf16.msrb.mxu2 %v11465_v4  ;;  %2891 = vmatpush.bf16.msrb.mxu3 %v11466_v14 }
 0x557   :  { %2879 = vmatpush.bf16.msrb.mxu2 %v11467_v16  ;;  %2892 = vmatpush.bf16.msrb.mxu3 %v11468_v3  ;;  %v9300_v16 = vld [vmem:[%s11172_s1 + $0xb8] sm:$0xff] }
 0x558   :  { %2850 = vmatpush.bf16.msrb.mxu0 %v9300_v16  ;;  %v9306_v3 = vld [vmem:[%s11172_s1 + $0xf8] sm:$0xff] }
 0x559   :  { %2863 = vmatpush.bf16.msrb.mxu1 %v9306_v3 }
 0x55b   :  { %2880 = vmatpush.bf16.msrb.mxu2 %v11469_v42  ;;  %2893 = vmatpush.bf16.msrb.mxu3 %v11470_v55  ;;  %v9312_v42 = vld [vmem:[%s11172_s1 + $0xb0] sm:$0xff] }
 0x55c   :  { %2851 = vmatpush.bf16.msrb.mxu0 %v9312_v42  ;;  %v9318_v55 = vld [vmem:[%s11172_s1 + $0xf0] sm:$0xff] }
 0x55d   :  { %2864 = vmatpush.bf16.msrb.mxu1 %v9318_v55 }
 0x55f   :  { %2881 = vmatpush.bf16.msrb.mxu2 %v11487_v63  ;;  %2894 = vmatpush.bf16.msrb.mxu3 %v11488_v59  ;;  %v9269_v25 = vpop.f32.mrf.mxu0  ;;  %v9271_v30 = vpop.f32.mrf.mxu1 }
 0x560   :  { %2852 = vmatpush.bf16.msrb.mxu0 %v9324_v41 }
 0x561   :  { %2865 = vmatpush.bf16.msrb.mxu1 %v9330_v54 }
 0x563   :  { %2882 = vmatpush.bf16.msrb.mxu2 %v11489_v15  ;;  %2895 = vmatpush.bf16.msrb.mxu3 %v11490_v57  ;;  %v2594_v15 = vadd.f32 %v9271_v30, %v9269_v25 }
 0x564   :  { %2853 = vmatpush.bf16.msrb.mxu0 %v9336_v56 }
 0x565   :  { %2866 = vmatpush.bf16.msrb.mxu1 %v9342_v27 }
 0x567   :  { %2883 = vmatpush.bf16.msrb.mxu2 %v11491_v5  ;;  %2896 = vmatpush.bf16.msrb.mxu3 %v11492_v60  ;;  %v2582_v4 = vpop.f32.mrf.mxu0  ;;  %v2595_v14 = vpop.f32.mrf.mxu1  ;;  %v2812_v60 = vld [vmem:[#allocation1 + $0x24] sm:$0xff] }
 0x568   :  { %2854 = vmatpush.bf16.msrb.mxu0 %v9348_v37  ;;  %3060 = vst [vmem:[#allocation1] ss:$9 sm:$0xff] %v5653_v21  ;;  %v5639_v4 = vld [vmem:[%s11174_s2 + $0x4e0] sm:$0xf]  ;;  %v5652_v14 = vor.u32 %v6361_v43, %v5649_v44  ;;  %v9537_v21 = vld [vmem:[%s11172_s1 + $0x1c8] sm:$0xff]  ;;  %v9611_v43 = vld [vmem:[%s11172_s1 + $0x58] sm:$0xff] }
 0x569   :  { %2867 = vmatpush.bf16.msrb.mxu1 %v9354_v33  ;;  %v9617_v44 = vld [vmem:[%s11172_s1 + $0x10] sm:$0xff] }
 0x56a   :  { %2884 = vmatmul.bf16.vlgmr.msrb.gmra.mxu2 %v2812_v60  ;;  %2897 = vmatmul.bf16.vlgmr.msrb.gmra.mxu3 %v2813_v12  ;;  %v9495_v12 = vld [vmem:[%s11172_s1 + $0x1a0] sm:$0xff] }
 0x56b   :  { %3029 = vmatpush.bf16.msra.mxu2 %v5648_v62  ;;  %3042 = vmatpush.bf16.msra.mxu3 %v5652_v14  ;;  %v9605_v62 = vld [vmem:[%s11172_s1 + $0x18] sm:$0xff]  ;;  %v9629_v14 = vld [vmem:[%s11172_s1 + $0x8] sm:$0xff] }
 0x56c   :  { %2855 = vmatpush.bf16.msrb.mxu0 %v9366_v58 }
 0x56d   :  { %2868 = vmatpush.bf16.msrb.mxu1 %v9372_v28 }
 0x56f   :  { %v2632_v7 = vpop.f32.mrf.mxu0  ;;  %v2645_v50 = vpop.f32.mrf.mxu1 }
 0x570   :  { %2856 = vmatpush.bf16.msrb.mxu0 %v9378_v52 }
 0x571   :  { %2869 = vmatpush.bf16.msrb.mxu1 %v9384_v29 }
 0x574   :  { %2857 = vmatpush.bf16.msrb.mxu0 %v9390_v36 }
 0x575   :  { %2870 = vmatpush.bf16.msrb.mxu1 %v9396_v51 }
 0x577   :  { %v2634_v1 = vpop.f32.mrf.mxu0  ;;  %v2647_v34 = vpop.f32.mrf.mxu1 }
 0x578   :  { %v5641_v1 = vld [vmem:[%s11174_s2 + $0x4e8] sm:$0xf0] }
 0x58d   :  { %v2532_v45 = vpop.f32.mrf.mxu2  ;;  %v2545_v23 = vpop.f32.mrf.mxu3 }
 0x58e   :  { %v9358_v48 = vadd.f32 %v2532_v45, %v11495_v2  ;;  %v9361_v35 = vadd.f32 %v2545_v23, %v11496_v10  ;;  %v5631_v23 = vld [vmem:[%s11174_s2 + $0x4d0] sm:$0xf]  ;;  %v6358_v2 = vld [vmem:[%s11174_s2 + $0x4d4] sm:$0xf0] }
 0x58f   :  { %v9453_v10 = vld [vmem:[%s11172_s1 + $0x1b0] sm:$0xff]  ;;  %v5632_v53 = vor.u32 %v6358_v2, %v5631_v23 }
 0x590   :  { %v9665_v23 = vld [vmem:[%s11172_s1 + $0x130] sm:$0xff] }
 0x591   :  { %11502 = vst [vmem:[#allocation9_spill] sm:$0xff] %v9665_v23  ;;  %v9671_v2 = vld [vmem:[%s11172_s1 + $0x170] sm:$0xff] }
 0x592   :  { %11503 = vst [vmem:[#allocation23_spill] sm:$0xff] %v9671_v2 }
 0x595   :  { %v2534_v49 = vpop.f32.mrf.mxu2  ;;  %v2547_v26 = vpop.f32.mrf.mxu3 }
 0x596   :  { %v6357_v49 = vld [vmem:[%s11174_s2 + $0x4d4] sm:$0xf]  ;;  %v5633_v26 = vld [vmem:[%s11174_s2 + $0x4d8] sm:$0xf0] }
 0x59d   :  { %v2606_v63 = vpop.f32.mrf.mxu2  ;;  %v2619_v59 = vpop.f32.mrf.mxu3 }
 0x59e   :  { %v2607_v57 = vadd.f32 %v2606_v63, %v2594_v15  ;;  %v5636_v63 = vor.u32 %v6357_v49, %v5633_v26  ;;  %v6356_v15 = vld [vmem:[%s11174_s2 + $0x4c4] sm:$0xf0] }
 0x59f   :  { %v9677_v49 = vld [vmem:[%s11172_s1 + $0x128] sm:$0xff] }
 0x5a0   :  { %v2620_v5 = vadd.f32 %v2619_v59, %v2607_v57  ;;  %v5623_v59 = vld [vmem:[%s11174_s2 + $0x4c0] sm:$0xf]  ;;  %v9477_v57 = vld [vmem:[%s11172_s1 + $0x1a8] sm:$0xff]  ;;  %11504 = vst [vmem:[#allocation7_spill] sm:$0xff] %v9677_v49 }
 0x5a1   :  { %v5624_v60 = vor.u32 %v6356_v15, %v5623_v59  ;;  %v9683_v26 = vld [vmem:[%s11172_s1 + $0x168] sm:$0xff]  ;;  %v9701_v59 = vld [vmem:[%s11172_s1 + $0x118] sm:$0xff] }
 0x5a2   :  { %v2633_v13 = vadd.f32 %v2632_v7, %v2620_v5  ;;  %v6360_v7 = vld [vmem:[%s11174_s2 + $0x4e4] sm:$0xf0]  ;;  %11505 = vst [vmem:[#allocation10_spill] sm:$0xff] %v9683_v26  ;;  %v9707_v15 = vld [vmem:[%s11172_s1 + $0x158] sm:$0xff] }
 0x5a3   :  { %v5640_v34 = vor.u32 %v6360_v7, %v5639_v4  ;;  %v9483_v5 = vld [vmem:[%s11172_s1 + $0x1e8] sm:$0xff]  ;;  %v9623_v4 = vld [vmem:[%s11172_s1 + $0x50] sm:$0xff]  ;;  %11508 = vst [vmem:[#allocation15_spill] sm:$0xff] %v9701_v59 }
 0x5a4   :  { %v2646_v39 = vadd.f32 %v2645_v50, %v2633_v13  ;;  %v6359_v50 = vld [vmem:[%s11174_s2 + $0x4e4] sm:$0xf]  ;;  %v9635_v7 = vld [vmem:[%s11172_s1 + $0x48] sm:$0xff]  ;;  %11509 = vst [vmem:[#allocation16_spill] sm:$0xff] %v9707_v15 }
 0x5a5   :  { %v2608_v8 = vpop.f32.mrf.mxu2  ;;  %v2621_v9 = vpop.f32.mrf.mxu3  ;;  %v5644_v45 = vor.u32 %v6359_v50, %v5641_v1  ;;  %3030 = vmatpush.bf16.msra.mxu2 %v5640_v34  ;;  %v9501_v13 = vld [vmem:[%s11172_s1 + $0x1e0] sm:$0xff]  ;;  %v9653_v34 = vld [vmem:[%s11172_s1 + $0x138] sm:$0xff] }
 0x5a6   :  { %v6355_v8 = vld [vmem:[%s11174_s2 + $0x4c4] sm:$0xf]  ;;  %v5625_v9 = vld [vmem:[%s11174_s2 + $0x4c8] sm:$0xf0] }
 0x5a7   :  { %3043 = vmatpush.bf16.msra.mxu3 %v5644_v45  ;;  %v9641_v50 = vld [vmem:[%s11172_s1] sm:$0xff]  ;;  %v9659_v45 = vld [vmem:[%s11172_s1 + $0x178] sm:$0xff] }
 0x5a8   :  { %v9647_v1 = vld [vmem:[%s11172_s1 + $0x40] sm:$0xff] }
 0x5a9   :  { %3031 = vmatpush.bf16.msra.mxu2 %v5632_v53  ;;  %v9689_v53 = vld [vmem:[%s11172_s1 + $0x120] sm:$0xff] }
 0x5aa   :  { %11506 = vst [vmem:[#allocation11_spill] sm:$0xff] %v9689_v53 }
 0x5ab   :  { %3044 = vmatpush.bf16.msra.mxu3 %v5636_v63  ;;  %v9695_v63 = vld [vmem:[%s11172_s1 + $0x160] sm:$0xff] }
 0x5ac   :  { %11507 = vst [vmem:[#allocation12_spill] sm:$0xff] %v9695_v63 }
 0x5ad   :  { %v2658_v6 = vpop.f32.mrf.mxu2  ;;  %v2671_v18 = vpop.f32.mrf.mxu3  ;;  %3032 = vmatpush.bf16.msra.mxu2 %v5624_v60  ;;  %v9713_v60 = vld [vmem:[%s11172_s1 + $0x110] sm:$0xff] }
 0x5ae   :  { %v2659_v61 = vadd.f32 %v2658_v6, %v2646_v39  ;;  %v5628_v39 = vor.u32 %v6355_v8, %v5625_v9  ;;  %v9507_v6 = vld [vmem:[%s11172_s1 + $0x198] sm:$0xff]  ;;  %11510 = vst [vmem:[#allocation5_spill] sm:$0xff] %v9713_v60  ;;  %v9719_v8 = vld [vmem:[%s11172_s1 + $0x150] sm:$0xff]  ;;  %v9725_v9 = vld [vmem:[%s11172_s1 + $0x108] sm:$0xff] }
 0x5af   :  { %11511 = vst [vmem:[#allocation6_spill] sm:$0xff] %v9719_v8 }
 0x5b0   :  { %v2672_v19 = vadd.f32 %v2671_v18, %v2659_v61  ;;  %v9513_v18 = vld [vmem:[%s11172_s1 + $0x1d8] sm:$0xff]  ;;  %3045 = vmatpush.bf16.msra.mxu3 %v5628_v39  ;;  %v9519_v61 = vld [vmem:[%s11172_s1 + $0x190] sm:$0xff]  ;;  %11512 = vst [vmem:[#allocation19_spill] sm:$0xff] %v9725_v9  ;;  %v9731_v39 = vld [vmem:[%s11172_s1 + $0x148] sm:$0xff] }
 0x5b1   :  { %11513 = vst [vmem:[#allocation20_spill] sm:$0xff] %v9731_v39 }
 0x5b2   :  { %vm2675_vm8 = vcmp.gt.f32.partialorder %v2672_v19, 0.0  ;;  %v2676_v17 = vmul.f32 0.2, %v2672_v19 }
 0x5b4   :  { %v2677_v22 = vsel %vm2675_vm8, %v2672_v19, %v2676_v17  ;;  %v9525_v19 = vld [vmem:[%s11172_s1 + $0x1d0] sm:$0xff]  ;;  %v9531_v17 = vld [vmem:[%s11172_s1 + $0x188] sm:$0xff] }
 0x5b5   :  { %v2678_v25 = vpack.c.bf16 %v2677_v22, %v2677_v22  ;;  %v2660_v30 = vpop.f32.mrf.mxu2  ;;  %v2673_v40 = vpop.f32.mrf.mxu3  ;;  %v9543_v22 = vld [vmem:[%s11172_s1 + $0x180] sm:$0xff] }
 0x5b6   :  { %v9555_v30 = vld [vmem:[%s11172_s1 + $0x38] sm:$0xff] }
 0x5b7   :  { %2784 = vmatmul.bf16.vlgmr.msra.gmra.mxu0 %v2678_v25  ;;  %2797 = vmatmul.bf16.vlgmr.msra.gmra.mxu1 %v2678_v25  ;;  %v9549_v25 = vld [vmem:[%s11172_s1 + $0x1c0] sm:$0xff]  ;;  %v9561_v40 = vld [vmem:[%s11172_s1 + $0x78] sm:$0xff] }
 0x5b8   :  { %2902 = vmatpush.bf16.msra.mxu0 %v9417_v11  ;;  %2915 = vmatpush.bf16.msra.mxu1 %v9423_v38 }
 0x5bc   :  { %2903 = vmatpush.bf16.msra.mxu0 %v9453_v10  ;;  %2916 = vmatpush.bf16.msra.mxu1 %v9459_v0 }
 0x5c0   :  { %2904 = vmatpush.bf16.msra.mxu0 %v9477_v57  ;;  %2917 = vmatpush.bf16.msra.mxu1 %v9483_v5 }
 0x5c4   :  { %2905 = vmatpush.bf16.msra.mxu0 %v9495_v12  ;;  %2918 = vmatpush.bf16.msra.mxu1 %v9501_v13 }
 0x5c7   :  { %2858 = vmatmul.bf16.vlgmr.msrb.gmra.mxu0 %v2810_v24  ;;  %2871 = vmatmul.bf16.vlgmr.msrb.gmra.mxu1 %v2811_v46  ;;  %v9569_v24 = vld [vmem:[%s11172_s1 + $0x30] sm:$0xff] }
 0x5c8   :  { %2906 = vmatpush.bf16.msra.mxu0 %v9507_v6  ;;  %2919 = vmatpush.bf16.msra.mxu1 %v9513_v18  ;;  %v9575_v46 = vld [vmem:[%s11172_s1 + $0x70] sm:$0xff] }
 0x5cc   :  { %2907 = vmatpush.bf16.msra.mxu0 %v9519_v61  ;;  %2920 = vmatpush.bf16.msra.mxu1 %v9525_v19 }
 0x5d0   :  { %2908 = vmatpush.bf16.msra.mxu0 %v9531_v17  ;;  %2921 = vmatpush.bf16.msra.mxu1 %v9537_v21 }
 0x5d4   :  { %2909 = vmatpush.bf16.msra.mxu0 %v9543_v22  ;;  %2922 = vmatpush.bf16.msra.mxu1 %v9549_v25 }
 0x5d7   :  { %2910 = vmatmul.bf16.vlgmr.msra.gmra.mxu0 %v9404_v32  ;;  %2923 = vmatmul.bf16.vlgmr.msra.gmra.mxu1 %v9406_v47  ;;  %v9581_v32 = vld [vmem:[%s11172_s1 + $0x28] sm:$0xff] }
 0x5d8   :  { %3077 = vmatpush.bf16.msrb.mxu0 %v9555_v30  ;;  %3090 = vmatpush.bf16.msrb.mxu1 %v9561_v40  ;;  %v9587_v47 = vld [vmem:[%s11172_s1 + $0x68] sm:$0xff] }
 0x5dc   :  { %3078 = vmatpush.bf16.msrb.mxu0 %v9569_v24  ;;  %3091 = vmatpush.bf16.msrb.mxu1 %v9575_v46 }
 0x5e0   :  { %3079 = vmatpush.bf16.msrb.mxu0 %v9581_v32  ;;  %3092 = vmatpush.bf16.msrb.mxu1 %v9587_v47 }
 0x5e4   :  { %3080 = vmatpush.bf16.msrb.mxu0 %v9593_v31  ;;  %3093 = vmatpush.bf16.msrb.mxu1 %v9599_v20 }
 0x5e8   :  { %3081 = vmatpush.bf16.msrb.mxu0 %v9605_v62  ;;  %3094 = vmatpush.bf16.msrb.mxu1 %v9611_v43 }
 0x5ec   :  { %3082 = vmatpush.bf16.msrb.mxu0 %v9617_v44  ;;  %3095 = vmatpush.bf16.msrb.mxu1 %v9623_v4 }
 0x5f0   :  { %3083 = vmatpush.bf16.msrb.mxu0 %v9629_v14  ;;  %3096 = vmatpush.bf16.msrb.mxu1 %v9635_v7 }
 0x5f4   :  { %3084 = vmatpush.bf16.msrb.mxu0 %v9641_v50  ;;  %3097 = vmatpush.bf16.msrb.mxu1 %v9647_v1 }
 0x5f8   :  { %3129 = vmatpush.bf16.msra.mxu0 %v9653_v34  ;;  %3142 = vmatpush.bf16.msra.mxu1 %v9659_v45 }
 0x5fc   :  { %3130 = vmatpush.bf16.msra.mxu0 %v9665_v23  ;;  %3143 = vmatpush.bf16.msra.mxu1 %v9671_v2  ;;  %v6350_v2 = vld [vmem:[%s11174_s2 + $0x494] sm:$0xf0] }
 0x600   :  { %3131 = vmatpush.bf16.msra.mxu0 %v9677_v49  ;;  %3144 = vmatpush.bf16.msra.mxu1 %v9683_v26  ;;  %v6351_v26 = vld [vmem:[%s11174_s2 + $0x4a4] sm:$0xf]  ;;  %v5599_v49 = vld [vmem:[%s11174_s2 + $0x490] sm:$0xf] }
 0x604   :  { %3132 = vmatpush.bf16.msra.mxu0 %v9689_v53  ;;  %3145 = vmatpush.bf16.msra.mxu1 %v9695_v63  ;;  %v6352_v53 = vld [vmem:[%s11174_s2 + $0x4a4] sm:$0xf0] }
 0x608   :  { %3133 = vmatpush.bf16.msra.mxu0 %v9701_v59  ;;  %3146 = vmatpush.bf16.msra.mxu1 %v9707_v15  ;;  %v6353_v15 = vld [vmem:[%s11174_s2 + $0x4b4] sm:$0xf]  ;;  %v5617_v59 = vld [vmem:[%s11174_s2 + $0x4b8] sm:$0xf0] }
 0x609   :  { %v5620_v63 = vor.u32 %v6353_v15, %v5617_v59  ;;  %v2833_v15 = vpop.f32.mrf.mxu2 }
 0x60b   :  { %3046 = vmatpush.bf16.msra.mxu3 %v5620_v63  ;;  %v5600_v63 = vor.u32 %v6350_v2, %v5599_v49  ;;  %v5593_v2 = vld [vmem:[%s11174_s2 + $0x488] sm:$0xf0] }
 0x60c   :  { %3134 = vmatpush.bf16.msra.mxu0 %v9713_v60  ;;  %3147 = vmatpush.bf16.msra.mxu1 %v9719_v8  ;;  %v9737_v60 = vld [vmem:[%s11172_s1 + $0x100] sm:$0xff] }
 0x60d   :  { %11514 = vst [vmem:[#allocation21_spill] sm:$0xff] %v9737_v60  ;;  %v9743_v8 = vld [vmem:[%s11172_s1 + $0x140] sm:$0xff] }
 0x60e   :  { %11515 = vst [vmem:[#allocation22_spill] sm:$0xff] %v9743_v8 }
 0x610   :  { %3135 = vmatpush.bf16.msra.mxu0 %v9725_v9  ;;  %3148 = vmatpush.bf16.msra.mxu1 %v9731_v39  ;;  %v5615_v9 = vld [vmem:[%s11174_s2 + $0x4b0] sm:$0xf]  ;;  %v6354_v39 = vld [vmem:[%s11174_s2 + $0x4b4] sm:$0xf0] }
 0x614   :  { %3136 = vmatpush.bf16.msra.mxu0 %v9737_v60  ;;  %3149 = vmatpush.bf16.msra.mxu1 %v9743_v8  ;;  %v5616_v60 = vor.u32 %v6354_v39, %v5615_v9  ;;  %v5607_v8 = vld [vmem:[%s11174_s2 + $0x4a0] sm:$0xf]  ;;  %v5609_v39 = vld [vmem:[%s11174_s2 + $0x4a8] sm:$0xf0] }
 0x615   :  { %v5608_v9 = vor.u32 %v6352_v53, %v5607_v8  ;;  %v5612_v59 = vor.u32 %v6351_v26, %v5609_v39  ;;  %v6349_v53 = vld [vmem:[%s11174_s2 + $0x494] sm:$0xf]  ;;  %v5601_v26 = vld [vmem:[%s11174_s2 + $0x498] sm:$0xf0]  ;;  %v6348_v39 = vld [vmem:[%s11174_s2 + $0x484] sm:$0xf0] }
 0x616   :  { %3033 = vmatpush.bf16.msra.mxu2 %v5616_v60  ;;  %v2846_v60 = vpop.f32.mrf.mxu3  ;;  %v5604_v8 = vor.u32 %v6349_v53, %v5601_v26  ;;  %v2835_v53 = vpop.f32.mrf.mxu2 }
 0x617   :  { %3047 = vmatpush.bf16.msra.mxu3 %v5612_v59  ;;  %v6347_v59 = vld [vmem:[%s11174_s2 + $0x484] sm:$0xf] }
 0x618   :  { %v5596_v49 = vor.u32 %v6347_v59, %v5593_v2 }
 0x61a   :  { %3034 = vmatpush.bf16.msra.mxu2 %v5608_v9  ;;  %v5591_v9 = vld [vmem:[%s11174_s2 + $0x480] sm:$0xf] }
 0x61b   :  { %v5592_v23 = vor.u32 %v6348_v39, %v5591_v9  ;;  %3048 = vmatpush.bf16.msra.mxu3 %v5604_v8 }
 0x61e   :  { %3035 = vmatpush.bf16.msra.mxu2 %v5600_v63  ;;  %v2848_v26 = vpop.f32.mrf.mxu3  ;;  %v2885_v63 = vpop.f32.mrf.mxu2 }
 0x61f   :  { %3049 = vmatpush.bf16.msra.mxu3 %v5596_v49 }
 0x622   :  { %3036 = vmatpush.bf16.msra.mxu2 %v5592_v23 }
 0x623   :  { %3116 = vmatpush.bf16.msrb.mxu3 %v9306_v3 }
 0x626   :  { %3103 = vmatpush.bf16.msrb.mxu2 %v9300_v16  ;;  %v2898_v9 = vpop.f32.mrf.mxu3  ;;  %v2887_v23 = vpop.f32.mrf.mxu2 }
 0x627   :  { %3117 = vmatpush.bf16.msrb.mxu3 %v9318_v55 }
 0x62a   :  { %3104 = vmatpush.bf16.msrb.mxu2 %v9312_v42 }
 0x62b   :  { %3118 = vmatpush.bf16.msrb.mxu3 %v9330_v54 }
 0x62e   :  { %3105 = vmatpush.bf16.msrb.mxu2 %v9324_v41  ;;  %v2900_v8 = vpop.f32.mrf.mxu3 }
 0x62f   :  { %3119 = vmatpush.bf16.msrb.mxu3 %v9342_v27  ;;  %v2847_v8 = vadd.f32 %v2846_v60, %v2833_v15  ;;  %v5734_v60 = vld [vmem:[%s11173_s0 + $0x58] sm:$0xff] }
 0x632   :  { %3106 = vmatpush.bf16.msrb.mxu2 %v9336_v56 }
 0x633   :  { %3120 = vmatpush.bf16.msrb.mxu3 %v9354_v33 }
 0x634   :  { %v2785_v39 = vpop.f32.mrf.mxu0  ;;  %v2798_v59 = vpop.f32.mrf.mxu1 }
 0x635   :  { %v9805_v2 = vadd.f32 %v2785_v39, %v9358_v48  ;;  %v9808_v49 = vadd.f32 %v2798_v59, %v9361_v35  ;;  %v3061_v35 = vld [vmem:[#allocation1] sm:$0xff]  ;;  %v3062_v59 = vld [vmem:[#allocation1 + $0x9] sm:$0xff] }
 0x636   :  { %3107 = vmatpush.bf16.msrb.mxu2 %v9348_v37  ;;  %3085 = vmatmul.bf16.vlgmr.msrb.gmra.mxu0 %v3061_v35  ;;  %v3066_v37 = vld [vmem:[#allocation1 + $0x2d] sm:$0xff]  ;;  %v6376_v35 = vld [vmem:[%s11174_s2 + $0x564] sm:$0xf0] }
 0x637   :  { %11516 = vst [vmem:[#allocation8_spill] sm:$0xff] %v9805_v2  ;;  %3121 = vmatpush.bf16.msrb.mxu3 %v9372_v28  ;;  %3098 = vmatmul.bf16.vlgmr.msrb.gmra.mxu1 %v3062_v59  ;;  %v6375_v59 = vld [vmem:[%s11174_s2 + $0x564] sm:$0xf] }
 0x638   :  { %11517 = vst [vmem:[#allocation18_spill] sm:$0xff] %v9808_v49 }
 0x63a   :  { %3108 = vmatpush.bf16.msrb.mxu2 %v9366_v58 }
 0x63b   :  { %3122 = vmatpush.bf16.msrb.mxu3 %v9384_v29 }
 0x63c   :  { %v2787_v53 = vpop.f32.mrf.mxu0  ;;  %v2800_v26 = vpop.f32.mrf.mxu1 }
 0x63e   :  { %3109 = vmatpush.bf16.msrb.mxu2 %v9378_v52 }
 0x63f   :  { %3123 = vmatpush.bf16.msrb.mxu3 %v9396_v51 }
 0x642   :  { %3110 = vmatpush.bf16.msrb.mxu2 %v9390_v36  ;;  %v3065_v36 = vld [vmem:[#allocation1 + $0x24] sm:$0xff] }
 0x644   :  { %v2859_v23 = vpop.f32.mrf.mxu0  ;;  %v2872_v48 = vpop.f32.mrf.mxu1 }
 0x645   :  { %v2860_v39 = vadd.f32 %v2859_v23, %v2847_v8  ;;  %v5720_v8 = vld [vmem:[%s11174_s2 + $0x560] sm:$0xf] }
 0x646   :  { %3137 = vmatmul.bf16.vlgmr.msra.gmra.mxu0 %v3065_v36  ;;  %v6377_v36 = vld [vmem:[%s11174_s2 + $0x574] sm:$0xf] }
 0x647   :  { %v2873_v58 = vadd.f32 %v2872_v48, %v2860_v39  ;;  %3150 = vmatmul.bf16.vlgmr.msra.gmra.mxu1 %v3066_v37  ;;  %v5728_v37 = vld [vmem:[%s11174_s2 + $0x570] sm:$0xf] }
 0x649   :  { %v2886_v52 = vadd.f32 %v2885_v63, %v2873_v58  ;;  %v3063_v58 = vld [vmem:[#allocation1 + $0x12] sm:$0xff] }
 0x64a   :  { %v3067_v63 = vld [vmem:[#allocation1 + $0x36] sm:$0xff] }
 0x64b   :  { %v2899_v2 = vadd.f32 %v2898_v9, %v2886_v52  ;;  %v3064_v52 = vld [vmem:[#allocation1 + $0x1b] sm:$0xff] }
 0x64c   :  { %v2861_v28 = vpop.f32.mrf.mxu0  ;;  %v2874_v49 = vpop.f32.mrf.mxu1  ;;  %v3068_v9 = vld [vmem:[#allocation1 + $0x3f] sm:$0xff] }
 0x64d   :  { %3313 = vst [vmem:[#allocation1] ss:$9 sm:$0xff] %v5734_v60  ;;  %v5712_v60 = vld [vmem:[%s11174_s2 + $0x550] sm:$0xf] }
 0x654   :  { %v2911_v29 = vpop.f32.mrf.mxu0  ;;  %v2924_v53 = vpop.f32.mrf.mxu1 }
 0x655   :  { %v2912_v26 = vadd.f32 %v2911_v29, %v2899_v2  ;;  %v6378_v29 = vld [vmem:[%s11174_s2 + $0x574] sm:$0xf0]  ;;  %v5730_v2 = vld [vmem:[%s11174_s2 + $0x578] sm:$0xf0] }
 0x656   :  { %v5733_v39 = vor.u32 %v6377_v36, %v5730_v2  ;;  %v6371_v2 = vld [vmem:[%s11174_s2 + $0x544] sm:$0xf] }
 0x657   :  { %v2925_v33 = vadd.f32 %v2924_v53, %v2912_v26  ;;  %v5722_v53 = vld [vmem:[%s11174_s2 + $0x568] sm:$0xf0]  ;;  %v5721_v26 = vor.u32 %v6376_v35, %v5720_v8 }
 0x658   :  { %3295 = vmatpush.bf16.msrb.mxu1 %v5733_v39  ;;  %v5706_v8 = vld [vmem:[%s11174_s2 + $0x548] sm:$0xf0] }
 0x659   :  { %vm2928_vm9 = vcmp.gt.f32.partialorder %v2925_v33, 0.0  ;;  %v2929_v15 = vmul.f32 0.2, %v2925_v33  ;;  %v5709_v39 = vor.u32 %v6371_v2, %v5706_v8  ;;  %v11522_v35 = vld [vmem:[#allocation11_spill] sm:$0xff]  ;;  %v5698_v2 = vld [vmem:[%s11174_s2 + $0x538] sm:$0xf0] }
 0x65b   :  { %v2930_v23 = vsel %vm2928_vm9, %v2925_v33, %v2929_v15  ;;  %v5729_v33 = vor.u32 %v6378_v29, %v5728_v37  ;;  %v5725_v15 = vor.u32 %v6375_v59, %v5722_v53  ;;  %v5704_v29 = vld [vmem:[%s11174_s2 + $0x540] sm:$0xf]  ;;  %v11523_v59 = vld [vmem:[#allocation12_spill] sm:$0xff]  ;;  %v11524_v53 = vld [vmem:[#allocation15_spill] sm:$0xff] }
 0x65c   :  { %v2931_v48 = vpack.c.bf16 %v2930_v23, %v2930_v23  ;;  %v2913_v28 = vpop.f32.mrf.mxu0  ;;  %v2926_v49 = vpop.f32.mrf.mxu1  ;;  %v6374_v23 = vld [vmem:[%s11174_s2 + $0x554] sm:$0xf0] }
 0x65d   :  { %3282 = vmatpush.bf16.msrb.mxu0 %v5729_v33  ;;  %v5714_v28 = vld [vmem:[%s11174_s2 + $0x558] sm:$0xf0]  ;;  %v5713_v49 = vor.u32 %v6374_v23, %v5712_v60  ;;  %3296 = vmatpush.bf16.msrb.mxu1 %v5725_v15  ;;  %v6372_v33 = vld [vmem:[%s11174_s2 + $0x544] sm:$0xf0]  ;;  %v11527_v60 = vld [vmem:[#allocation6_spill] sm:$0xff] }
 0x65e   :  { %3037 = vmatmul.bf16.vlgmr.msra.gmra.mxu2 %v2931_v48  ;;  %3050 = vmatmul.bf16.vlgmr.msra.gmra.mxu3 %v2931_v48  ;;  %v6373_v48 = vld [vmem:[%s11174_s2 + $0x554] sm:$0xf]  ;;  %v5705_v36 = vor.u32 %v6372_v33, %v5704_v29  ;;  %v11526_v15 = vld [vmem:[#allocation5_spill] sm:$0xff]  ;;  %v11528_v23 = vld [vmem:[#allocation19_spill] sm:$0xff] }
 0x65f   :  { %3155 = vmatpush.bf16.msra.mxu2 %v9417_v11  ;;  %3168 = vmatpush.bf16.msra.mxu3 %v9423_v38  ;;  %v5717_v37 = vor.u32 %v6373_v48, %v5714_v28  ;;  %v11529_v48 = vld [vmem:[#allocation20_spill] sm:$0xff]  ;;  %v11530_v28 = vld [vmem:[#allocation21_spill] sm:$0xff] }
 0x660   :  { %v6370_v29 = vld [vmem:[%s11174_s2 + $0x534] sm:$0xf0]  ;;  %v6369_v33 = vld [vmem:[%s11174_s2 + $0x534] sm:$0xf] }
 0x661   :  { %3283 = vmatpush.bf16.msrb.mxu0 %v5721_v26  ;;  %3297 = vmatpush.bf16.msrb.mxu1 %v5717_v37  ;;  %v11525_v26 = vld [vmem:[#allocation16_spill] sm:$0xff]  ;;  %v5701_v8 = vor.u32 %v6369_v33, %v5698_v2 }
 0x662   :  { %v5696_v37 = vld [vmem:[%s11174_s2 + $0x530] sm:$0xf] }
 0x663   :  { %3156 = vmatpush.bf16.msra.mxu2 %v9453_v10  ;;  %3169 = vmatpush.bf16.msra.mxu3 %v9459_v0 }
 0x665   :  { %3284 = vmatpush.bf16.msrb.mxu0 %v5713_v49  ;;  %3298 = vmatpush.bf16.msrb.mxu1 %v5709_v39  ;;  %v11531_v49 = vld [vmem:[#allocation22_spill] sm:$0xff] }
 0x666   :  { %v5688_v39 = vld [vmem:[%s11174_s2 + $0x520] sm:$0xf] }
 0x667   :  { %3157 = vmatpush.bf16.msra.mxu2 %v9477_v57  ;;  %3170 = vmatpush.bf16.msra.mxu3 %v9483_v5 }
 0x669   :  { %3285 = vmatpush.bf16.msrb.mxu0 %v5705_v36  ;;  %v5697_v36 = vor.u32 %v6370_v29, %v5696_v37  ;;  %3299 = vmatpush.bf16.msrb.mxu1 %v5701_v8  ;;  %v5690_v29 = vld [vmem:[%s11174_s2 + $0x528] sm:$0xf0] }
 0x66b   :  { %3158 = vmatpush.bf16.msra.mxu2 %v9495_v12  ;;  %3171 = vmatpush.bf16.msra.mxu3 %v9501_v13 }
 0x66d   :  { %3286 = vmatpush.bf16.msrb.mxu0 %v5697_v36 }
 0x66e   :  { %3111 = vmatmul.bf16.vlgmr.msrb.gmra.mxu2 %v3063_v58  ;;  %3124 = vmatmul.bf16.vlgmr.msrb.gmra.mxu3 %v3064_v52  ;;  %v11518_v58 = vld [vmem:[#allocation9_spill] sm:$0xff]  ;;  %v11519_v52 = vld [vmem:[#allocation23_spill] sm:$0xff] }
 0x66f   :  { %3159 = vmatpush.bf16.msra.mxu2 %v9507_v6  ;;  %3172 = vmatpush.bf16.msra.mxu3 %v9513_v18 }
 0x673   :  { %3160 = vmatpush.bf16.msra.mxu2 %v9519_v61  ;;  %3173 = vmatpush.bf16.msra.mxu3 %v9525_v19 }
 0x677   :  { %3161 = vmatpush.bf16.msra.mxu2 %v9531_v17  ;;  %3174 = vmatpush.bf16.msra.mxu3 %v9537_v21 }
 0x67b   :  { %3162 = vmatpush.bf16.msra.mxu2 %v9543_v22  ;;  %3175 = vmatpush.bf16.msra.mxu3 %v9549_v25 }
 0x67e   :  { %3163 = vmatmul.bf16.vlgmr.msra.gmra.mxu2 %v3067_v63  ;;  %3176 = vmatmul.bf16.vlgmr.msra.gmra.mxu3 %v3068_v9  ;;  %v11520_v63 = vld [vmem:[#allocation7_spill] sm:$0xff]  ;;  %v11521_v9 = vld [vmem:[#allocation10_spill] sm:$0xff] }
 0x67f   :  { %3330 = vmatpush.bf16.msrb.mxu2 %v9555_v30  ;;  %3343 = vmatpush.bf16.msrb.mxu3 %v9561_v40 }
 0x683   :  { %3331 = vmatpush.bf16.msrb.mxu2 %v9569_v24  ;;  %3344 = vmatpush.bf16.msrb.mxu3 %v9575_v46 }
 0x687   :  { %3332 = vmatpush.bf16.msrb.mxu2 %v9581_v32  ;;  %3345 = vmatpush.bf16.msrb.mxu3 %v9587_v47 }
 0x68b   :  { %3333 = vmatpush.bf16.msrb.mxu2 %v9593_v31  ;;  %3346 = vmatpush.bf16.msrb.mxu3 %v9599_v20 }
 0x68f   :  { %3334 = vmatpush.bf16.msrb.mxu2 %v9605_v62  ;;  %3347 = vmatpush.bf16.msrb.mxu3 %v9611_v43 }
 0x693   :  { %3335 = vmatpush.bf16.msrb.mxu2 %v9617_v44  ;;  %3348 = vmatpush.bf16.msrb.mxu3 %v9623_v4 }
 0x697   :  { %3336 = vmatpush.bf16.msrb.mxu2 %v9629_v14  ;;  %3349 = vmatpush.bf16.msrb.mxu3 %v9635_v7 }
 0x69b   :  { %3337 = vmatpush.bf16.msrb.mxu2 %v9641_v50  ;;  %3350 = vmatpush.bf16.msrb.mxu3 %v9647_v1 }
 0x69f   :  { %3382 = vmatpush.bf16.msra.mxu2 %v9653_v34  ;;  %3395 = vmatpush.bf16.msra.mxu3 %v9659_v45 }
 0x6a3   :  { %3383 = vmatpush.bf16.msra.mxu2 %v11518_v58  ;;  %3396 = vmatpush.bf16.msra.mxu3 %v11519_v52 }
 0x6a7   :  { %3384 = vmatpush.bf16.msra.mxu2 %v11520_v63  ;;  %3397 = vmatpush.bf16.msra.mxu3 %v11521_v9 }
 0x6ab   :  { %3385 = vmatpush.bf16.msra.mxu2 %v11522_v35  ;;  %3398 = vmatpush.bf16.msra.mxu3 %v11523_v59 }
 0x6af   :  { %3386 = vmatpush.bf16.msra.mxu2 %v11524_v53  ;;  %3399 = vmatpush.bf16.msra.mxu3 %v11525_v26 }
 0x6b3   :  { %3387 = vmatpush.bf16.msra.mxu2 %v11526_v15  ;;  %3400 = vmatpush.bf16.msra.mxu3 %v11527_v60  ;;  %v3086_v36 = vpop.f32.mrf.mxu0 }
 0x6b4   :  { %v3099_v2 = vpop.f32.mrf.mxu1 }
 0x6b7   :  { %3388 = vmatpush.bf16.msra.mxu2 %v11528_v23  ;;  %3401 = vmatpush.bf16.msra.mxu3 %v11529_v48  ;;  %v5680_v48 = vld [vmem:[%s11174_s2 + $0x510] sm:$0xf]  ;;  %v6366_v23 = vld [vmem:[%s11174_s2 + $0x514] sm:$0xf0] }
 0x6b8   :  { %v5681_v8 = vor.u32 %v6366_v23, %v5680_v48  ;;  %v5674_v23 = vld [vmem:[%s11174_s2 + $0x508] sm:$0xf0] }
 0x6bb   :  { %3389 = vmatpush.bf16.msra.mxu2 %v11530_v28  ;;  %3402 = vmatpush.bf16.msra.mxu3 %v11531_v49  ;;  %v6368_v49 = vld [vmem:[%s11174_s2 + $0x524] sm:$0xf0]  ;;  %v6367_v28 = vld [vmem:[%s11174_s2 + $0x524] sm:$0xf] }
 0x6bc   :  { %v5689_v37 = vor.u32 %v6368_v49, %v5688_v39  ;;  %v5693_v33 = vor.u32 %v6367_v28, %v5690_v29  ;;  %v6365_v49 = vld [vmem:[%s11174_s2 + $0x514] sm:$0xf]  ;;  %v5682_v28 = vld [vmem:[%s11174_s2 + $0x518] sm:$0xf0]  ;;  %v6364_v29 = vld [vmem:[%s11174_s2 + $0x504] sm:$0xf0] }
 0x6bd   :  { %v5685_v39 = vor.u32 %v6365_v49, %v5682_v28  ;;  %v3088_v49 = vpop.f32.mrf.mxu0  ;;  %v3101_v28 = vpop.f32.mrf.mxu1 }
 0x6be   :  { %3287 = vmatpush.bf16.msrb.mxu0 %v5689_v37  ;;  %3300 = vmatpush.bf16.msrb.mxu1 %v5693_v33  ;;  %v5672_v37 = vld [vmem:[%s11174_s2 + $0x500] sm:$0xf]  ;;  %v6363_v33 = vld [vmem:[%s11174_s2 + $0x504] sm:$0xf] }
 0x6bf   :  { %v5673_v60 = vor.u32 %v6364_v29, %v5672_v37  ;;  %v5677_v48 = vor.u32 %v6363_v33, %v5674_v23  ;;  %v11532_v29 = vld [vmem:[#allocation13_spill] sm:$0xff]  ;;  %v11534_v33 = vld [vmem:[#allocation8_spill] sm:$0xff]  ;;  %v11536_v23 = vld [vmem:[#allocation18_spill] sm:$0xff] }
 0x6c0   :  { %v3314_v49 = vld [vmem:[#allocation1] sm:$0xff] }
 0x6c1   :  { %3338 = vmatmul.bf16.vlgmr.msrb.gmra.mxu2 %v3314_v49 }
 0x6c2   :  { %3288 = vmatpush.bf16.msrb.mxu0 %v5681_v8  ;;  %3301 = vmatpush.bf16.msrb.mxu1 %v5685_v39 }
 0x6c5   :  { %v3138_v8 = vpop.f32.mrf.mxu0  ;;  %v3151_v37 = vpop.f32.mrf.mxu1 }
 0x6c6   :  { %3289 = vmatpush.bf16.msrb.mxu0 %v5673_v60  ;;  %3302 = vmatpush.bf16.msrb.mxu1 %v5677_v48 }
 0x6ca   :  { %3356 = vmatpush.bf16.msra.mxu0 %v9300_v16  ;;  %3369 = vmatpush.bf16.msra.mxu1 %v9306_v3  ;;  %v11533_v16 = vld [vmem:[#allocation14_spill] sm:$0xff] }
 0x6cd   :  { %v3140_v60 = vpop.f32.mrf.mxu0  ;;  %v3153_v39 = vpop.f32.mrf.mxu1 }
 0x6ce   :  { %3357 = vmatpush.bf16.msra.mxu0 %v9312_v42  ;;  %3370 = vmatpush.bf16.msra.mxu1 %v9318_v55  ;;  %v3315_v39 = vld [vmem:[#allocation1 + $0x9] sm:$0xff] }
 0x6cf   :  { %3351 = vmatmul.bf16.vlgmr.msrb.gmra.mxu3 %v3315_v39 }
 0x6d2   :  { %3358 = vmatpush.bf16.msra.mxu0 %v9324_v41  ;;  %3371 = vmatpush.bf16.msra.mxu1 %v9330_v54  ;;  %v11538_v41 = vld [vmem:[#allocation24_spill] sm:$0xff]  ;;  %v11539_v54 = vld [vmem:[#allocation25_spill] sm:$0xff] }
 0x6d6   :  { %3359 = vmatpush.bf16.msra.mxu0 %v9336_v56  ;;  %3372 = vmatpush.bf16.msra.mxu1 %v9342_v27  ;;  %v11540_v56 = vld [vmem:[#allocation17_spill] sm:$0xff]  ;;  %v11541_v27 = vld [vmem:[#allocation3_spill] sm:$0xff] }
 0x6da   :  { %3360 = vmatpush.bf16.msra.mxu0 %v11532_v29  ;;  %3373 = vmatpush.bf16.msra.mxu1 %v11533_v16  ;;  %v11542_v29 = vld [vmem:[#allocation4_spill] sm:$0xff] }
 0x6de   :  { %3361 = vmatpush.bf16.msra.mxu0 %v11538_v41  ;;  %3374 = vmatpush.bf16.msra.mxu1 %v11539_v54  ;;  %v3318_v41 = vld [vmem:[#allocation1 + $0x24] sm:$0xff] }
 0x6df   :  { %3390 = vmatmul.bf16.vlgmr.msra.gmra.mxu2 %v3318_v41  ;;  %v3320_v41 = vld [vmem:[#allocation1 + $0x36] sm:$0xff] }
 0x6e1   :  { %v3038_v3 = vpop.f32.mrf.mxu2  ;;  %v3051_v42 = vpop.f32.mrf.mxu3 }
 0x6e2   :  { %v9974_v55 = vadd.f32 %v3038_v3, %v11534_v33  ;;  %v9977_v48 = vadd.f32 %v3051_v42, %v11536_v23  ;;  %3362 = vmatpush.bf16.msra.mxu0 %v11540_v56  ;;  %3375 = vmatpush.bf16.msra.mxu1 %v11541_v27  ;;  %v3100_v42 = vadd.f32 %v3099_v2, %v3086_v36  ;;  %v3319_v27 = vld [vmem:[#allocation1 + $0x2d] sm:$0xff] }
 0x6e3   :  { %3403 = vmatmul.bf16.vlgmr.msra.gmra.mxu3 %v3319_v27 }
 0x6e4   :  { %11535 = vst [vmem:[#allocation9_spill] sm:$0xff] %v9974_v55 }
 0x6e5   :  { %11537 = vst [vmem:[#allocation23_spill] sm:$0xff] %v9977_v48 }
 0x6e6   :  { %3363 = vmatpush.bf16.msra.mxu0 %v11542_v29  ;;  %3376 = vmatpush.bf16.msra.mxu1 %v9396_v51  ;;  %v5815_v51 = vld [vmem:[%s11173_s0 + $0x60] sm:$0xff] }
 0x6e9   :  { %v3040_v28 = vpop.f32.mrf.mxu2  ;;  %v3053_v60 = vpop.f32.mrf.mxu3 }
 0x6f1   :  { %v3112_v16 = vpop.f32.mrf.mxu2  ;;  %v3125_v3 = vpop.f32.mrf.mxu3 }
 0x6f2   :  { %v3113_v33 = vadd.f32 %v3112_v16, %v3100_v42  ;;  %v3316_v42 = vld [vmem:[#allocation1 + $0x12] sm:$0xff] }
 0x6f4   :  { %v3126_v23 = vadd.f32 %v3125_v3, %v3113_v33  ;;  %v3317_v33 = vld [vmem:[#allocation1 + $0x1b] sm:$0xff] }
 0x6f6   :  { %v3139_v28 = vadd.f32 %v3138_v8, %v3126_v23  ;;  %v5809_v8 = vld [vmem:[%s11174_s2 + $0x5f0] sm:$0xf]  ;;  %v5811_v23 = vld [vmem:[%s11174_s2 + $0x5f8] sm:$0xf0] }
 0x6f8   :  { %v3152_v60 = vadd.f32 %v3151_v37, %v3139_v28  ;;  %v6394_v37 = vld [vmem:[%s11174_s2 + $0x5f4] sm:$0xf0]  ;;  %v5803_v28 = vld [vmem:[%s11174_s2 + $0x5e8] sm:$0xf0] }
 0x6f9   :  { %v3114_v54 = vpop.f32.mrf.mxu2  ;;  %v3127_v56 = vpop.f32.mrf.mxu3 }
 0x6fa   :  { %v3321_v54 = vld [vmem:[#allocation1 + $0x3f] sm:$0xff] }
 0x6fb   :  { %3566 = vst [vmem:[#allocation1] ss:$9 sm:$0xff] %v5815_v51  ;;  %v5801_v56 = vld [vmem:[%s11174_s2 + $0x5e0] sm:$0xf]  ;;  %v6389_v51 = vld [vmem:[%s11174_s2 + $0x5d4] sm:$0xf] }
 0x701   :  { %v3164_v49 = vpop.f32.mrf.mxu2  ;;  %v3177_v48 = vpop.f32.mrf.mxu3 }
 0x702   :  { %v3165_v39 = vadd.f32 %v3164_v49, %v3152_v60 }
 0x704   :  { %v3178_v55 = vadd.f32 %v3177_v48, %v3165_v39  ;;  %v6393_v48 = vld [vmem:[%s11174_s2 + $0x5f4] sm:$0xf]  ;;  %v5793_v39 = vld [vmem:[%s11174_s2 + $0x5d0] sm:$0xf] }
 0x705   :  { %v5814_v27 = vor.u32 %v6393_v48, %v5811_v23 }
 0x706   :  { %vm3181_vm10 = vcmp.gt.f32.partialorder %v3178_v55, 0.0  ;;  %v3182_v29 = vmul.f32 0.2, %v3178_v55 }
 0x707   :  { %3548 = vmatpush.bf16.msrb.mxu3 %v5814_v27  ;;  %v10193_v27 = vld [vmem:[%s11172_s1 + $0xd8] sm:$0xff] }
 0x708   :  { %v3183_v36 = vsel %vm3181_vm10, %v3178_v55, %v3182_v29  ;;  %v5810_v55 = vor.u32 %v6394_v37, %v5809_v8  ;;  %v6390_v29 = vld [vmem:[%s11174_s2 + $0x5d4] sm:$0xf0]  ;;  %v6387_v8 = vld [vmem:[%s11174_s2 + $0x5c4] sm:$0xf]  ;;  %v5787_v37 = vld [vmem:[%s11174_s2 + $0x5c8] sm:$0xf0] }
 0x709   :  { %v3184_v2 = vpack.c.bf16 %v3183_v36, %v3183_v36  ;;  %v3166_v16 = vpop.f32.mrf.mxu2  ;;  %v3179_v3 = vpop.f32.mrf.mxu3  ;;  %v5795_v36 = vld [vmem:[%s11174_s2 + $0x5d8] sm:$0xf0]  ;;  %11548 = vst [vmem:[#allocation7_spill] sm:$0xff] %v10193_v27 }
 0x70a   :  { %3535 = vmatpush.bf16.msrb.mxu2 %v5810_v55  ;;  %v5798_v16 = vor.u32 %v6389_v51, %v5795_v36  ;;  %v5785_v3 = vld [vmem:[%s11174_s2 + $0x5c0] sm:$0xf]  ;;  %v5790_v55 = vor.u32 %v6387_v8, %v5787_v37  ;;  %v10211_v51 = vld [vmem:[%s11172_s1 + $0xd0] sm:$0xff]  ;;  %v10217_v36 = vld [vmem:[%s11172_s1 + $0x88] sm:$0xff] }
 0x70b   :  { %3290 = vmatmul.bf16.vlgmr.msrb.gmra.mxu0 %v3184_v2  ;;  %3303 = vmatmul.bf16.vlgmr.msrb.gmra.mxu1 %v3184_v2  ;;  %v5794_v2 = vor.u32 %v6390_v29, %v5793_v39  ;;  %v10205_v29 = vld [vmem:[%s11172_s1 + $0x90] sm:$0xff]  ;;  %11552 = vst [vmem:[#allocation11_spill] sm:$0xff] %v10211_v51 }
 0x70c   :  { %3408 = vmatpush.bf16.msrb.mxu0 %v9417_v11  ;;  %3421 = vmatpush.bf16.msrb.mxu1 %v9423_v38  ;;  %v6392_v11 = vld [vmem:[%s11174_s2 + $0x5e4] sm:$0xf0]  ;;  %v6391_v38 = vld [vmem:[%s11174_s2 + $0x5e4] sm:$0xf]  ;;  %11551 = vst [vmem:[#allocation10_spill] sm:$0xff] %v10205_v29 }
 0x70d   :  { %v5802_v60 = vor.u32 %v6392_v11, %v5801_v56  ;;  %v5806_v49 = vor.u32 %v6391_v38, %v5803_v28  ;;  %v10187_v56 = vld [vmem:[%s11172_s1 + $0x98] sm:$0xff]  ;;  %11553 = vst [vmem:[#allocation12_spill] sm:$0xff] %v10217_v36 }
 0x70e   :  { %v11549_v28 = vld [vmem:[#allocation9_spill] sm:$0xff] }
 0x70f   :  { %3536 = vmatpush.bf16.msrb.mxu2 %v5802_v60  ;;  %3549 = vmatpush.bf16.msrb.mxu3 %v5806_v49  ;;  %v11550_v49 = vld [vmem:[#allocation23_spill] sm:$0xff] }
 0x710   :  { %3409 = vmatpush.bf16.msrb.mxu0 %v9453_v10  ;;  %3422 = vmatpush.bf16.msrb.mxu1 %v9459_v0  ;;  %v6388_v10 = vld [vmem:[%s11174_s2 + $0x5c4] sm:$0xf0] }
 0x711   :  { %v5786_v0 = vor.u32 %v6388_v10, %v5785_v3  ;;  %v10229_v10 = vld [vmem:[%s11172_s1 + $0x80] sm:$0xff] }
 0x712   :  { %11555 = vst [vmem:[#allocation16_spill] sm:$0xff] %v10229_v10 }
 0x713   :  { %3537 = vmatpush.bf16.msrb.mxu2 %v5794_v2  ;;  %3550 = vmatpush.bf16.msrb.mxu3 %v5798_v16  ;;  %v10223_v2 = vld [vmem:[%s11172_s1 + $0xc8] sm:$0xff] }
 0x714   :  { %3410 = vmatpush.bf16.msrb.mxu0 %v9477_v57  ;;  %3423 = vmatpush.bf16.msrb.mxu1 %v9483_v5  ;;  %v11543_v57 = vld [vmem:[#allocation6_spill] sm:$0xff]  ;;  %v11544_v5 = vld [vmem:[#allocation19_spill] sm:$0xff]  ;;  %11554 = vst [vmem:[#allocation15_spill] sm:$0xff] %v10223_v2 }
 0x717   :  { %3538 = vmatpush.bf16.msrb.mxu2 %v5786_v0  ;;  %3551 = vmatpush.bf16.msrb.mxu3 %v5790_v55  ;;  %v10235_v0 = vld [vmem:[%s11172_s1 + $0xc0] sm:$0xff] }
 0x718   :  { %3411 = vmatpush.bf16.msrb.mxu0 %v9495_v12  ;;  %3424 = vmatpush.bf16.msrb.mxu1 %v9501_v13  ;;  %v11545_v12 = vld [vmem:[#allocation20_spill] sm:$0xff]  ;;  %v11546_v13 = vld [vmem:[#allocation21_spill] sm:$0xff] }
 0x71b   :  { %3364 = vmatmul.bf16.vlgmr.msra.gmra.mxu0 %v3316_v42  ;;  %3377 = vmatmul.bf16.vlgmr.msra.gmra.mxu1 %v3317_v33  ;;  %v10163_v42 = vld [vmem:[%s11172_s1 + $0xa8] sm:$0xff] }
 0x71c   :  { %3412 = vmatpush.bf16.msrb.mxu0 %v9507_v6  ;;  %3425 = vmatpush.bf16.msrb.mxu1 %v9513_v18  ;;  %v11547_v6 = vld [vmem:[#allocation22_spill] sm:$0xff]  ;;  %v5777_v18 = vld [vmem:[%s11174_s2 + $0x5b0] sm:$0xf]  ;;  %v10169_v33 = vld [vmem:[%s11172_s1 + $0xe8] sm:$0xff] }
 0x720   :  { %3413 = vmatpush.bf16.msrb.mxu0 %v9519_v61  ;;  %3426 = vmatpush.bf16.msrb.mxu1 %v9525_v19  ;;  %v6386_v61 = vld [vmem:[%s11174_s2 + $0x5b4] sm:$0xf0]  ;;  %v6385_v19 = vld [vmem:[%s11174_s2 + $0x5b4] sm:$0xf] }
 0x724   :  { %3414 = vmatpush.bf16.msrb.mxu0 %v9531_v17  ;;  %3427 = vmatpush.bf16.msrb.mxu1 %v9537_v21  ;;  %v5778_v17 = vor.u32 %v6386_v61, %v5777_v18  ;;  %v5779_v21 = vld [vmem:[%s11174_s2 + $0x5b8] sm:$0xf0] }
 0x726   :  { %3539 = vmatpush.bf16.msrb.mxu2 %v5778_v17 }
 0x728   :  { %3415 = vmatpush.bf16.msrb.mxu0 %v9543_v22  ;;  %3428 = vmatpush.bf16.msrb.mxu1 %v9549_v25  ;;  %v5782_v22 = vor.u32 %v6385_v19, %v5779_v21  ;;  %v5769_v25 = vld [vmem:[%s11174_s2 + $0x5a0] sm:$0xf] }
 0x72a   :  { %3552 = vmatpush.bf16.msrb.mxu3 %v5782_v22 }
 0x72b   :  { %3416 = vmatmul.bf16.vlgmr.msrb.gmra.mxu0 %v3320_v41  ;;  %3429 = vmatmul.bf16.vlgmr.msrb.gmra.mxu1 %v3321_v54  ;;  %v10175_v41 = vld [vmem:[%s11172_s1 + $0xa0] sm:$0xff] }
 0x72c   :  { %3583 = vmatpush.bf16.msra.mxu0 %v9555_v30  ;;  %3596 = vmatpush.bf16.msra.mxu1 %v9561_v40  ;;  %v6384_v30 = vld [vmem:[%s11174_s2 + $0x5a4] sm:$0xf0]  ;;  %v6383_v40 = vld [vmem:[%s11174_s2 + $0x5a4] sm:$0xf] }
 0x72d   :  { %v10181_v54 = vld [vmem:[%s11172_s1 + $0xe0] sm:$0xff] }
 0x730   :  { %3584 = vmatpush.bf16.msra.mxu0 %v9569_v24  ;;  %3597 = vmatpush.bf16.msra.mxu1 %v9575_v46  ;;  %v5770_v24 = vor.u32 %v6384_v30, %v5769_v25  ;;  %v5771_v46 = vld [vmem:[%s11174_s2 + $0x5a8] sm:$0xf0]  ;;  %v3571_v30 = vld [vmem:[#allocation1 + $0x24] sm:$0xff] }
 0x732   :  { %3540 = vmatpush.bf16.msrb.mxu2 %v5770_v24 }
 0x734   :  { %3585 = vmatpush.bf16.msra.mxu0 %v9581_v32  ;;  %3598 = vmatpush.bf16.msra.mxu1 %v9587_v47  ;;  %v5774_v32 = vor.u32 %v6383_v40, %v5771_v46  ;;  %v3572_v40 = vld [vmem:[#allocation1 + $0x2d] sm:$0xff] }
 0x735   :  { %v5896_v46 = vld [vmem:[%s11173_s0 + $0x68] sm:$0xff] }
 0x736   :  { %3553 = vmatpush.bf16.msrb.mxu3 %v5774_v32 }
 0x738   :  { %3586 = vmatpush.bf16.msra.mxu0 %v9593_v31  ;;  %3599 = vmatpush.bf16.msra.mxu1 %v9599_v20  ;;  %v5761_v20 = vld [vmem:[%s11174_s2 + $0x590] sm:$0xf] }
 0x73c   :  { %3587 = vmatpush.bf16.msra.mxu0 %v9605_v62  ;;  %3600 = vmatpush.bf16.msra.mxu1 %v9611_v43  ;;  %v6382_v62 = vld [vmem:[%s11174_s2 + $0x594] sm:$0xf0]  ;;  %v6381_v43 = vld [vmem:[%s11174_s2 + $0x594] sm:$0xf] }
 0x740   :  { %3588 = vmatpush.bf16.msra.mxu0 %v9617_v44  ;;  %3601 = vmatpush.bf16.msra.mxu1 %v9623_v4  ;;  %v5762_v44 = vor.u32 %v6382_v62, %v5761_v20  ;;  %v5763_v4 = vld [vmem:[%s11174_s2 + $0x598] sm:$0xf0]  ;;  %v3569_v62 = vld [vmem:[#allocation1 + $0x12] sm:$0xff] }
 0x742   :  { %3541 = vmatpush.bf16.msrb.mxu2 %v5762_v44  ;;  %v10243_v44 = vld [vmem:[#allocation1 + $0x36] sm:$0xff] }
 0x744   :  { %3589 = vmatpush.bf16.msra.mxu0 %v9629_v14  ;;  %3602 = vmatpush.bf16.msra.mxu1 %v9635_v7  ;;  %v10108_v47 = vpop.f32.mrf.mxu2  ;;  %v5766_v14 = vor.u32 %v6381_v43, %v5763_v4  ;;  %v5753_v7 = vld [vmem:[%s11174_s2 + $0x580] sm:$0xf] }
 0x745   :  { %v3570_v43 = vld [vmem:[#allocation1 + $0x1b] sm:$0xff] }
 0x746   :  { %3554 = vmatpush.bf16.msrb.mxu3 %v5766_v14  ;;  %v10245_v4 = vld [vmem:[#allocation1 + $0x3f] sm:$0xff]  ;;  %v5890_v14 = vld [vmem:[%s11174_s2 + $0x670] sm:$0xf] }
 0x748   :  { %3590 = vmatpush.bf16.msra.mxu0 %v9641_v50  ;;  %3603 = vmatpush.bf16.msra.mxu1 %v9647_v1  ;;  %v6380_v50 = vld [vmem:[%s11174_s2 + $0x584] sm:$0xf0]  ;;  %v6379_v1 = vld [vmem:[%s11174_s2 + $0x584] sm:$0xf] }
 0x74c   :  { %3635 = vmatpush.bf16.msrb.mxu0 %v9653_v34  ;;  %3648 = vmatpush.bf16.msrb.mxu1 %v9659_v45  ;;  %v5754_v34 = vor.u32 %v6380_v50, %v5753_v7  ;;  %v5755_v45 = vld [vmem:[%s11174_s2 + $0x588] sm:$0xf0]  ;;  %v6410_v7 = vld [vmem:[%s11174_s2 + $0x674] sm:$0xf0] }
 0x74d   :  { %v10256_v50 = vld [vmem:[%s11172_s1 + $0x1b8] sm:$0xff] }
 0x74e   :  { %3542 = vmatpush.bf16.msrb.mxu2 %v5754_v34  ;;  %v5891_v34 = vor.u32 %v6410_v7, %v5890_v14  ;;  %v10432_v14 = vld [vmem:[%s11172_s1 + $0x20] sm:$0xff] }
 0x74f   :  { %v10438_v7 = vld [vmem:[%s11172_s1 + $0x60] sm:$0xff] }
 0x750   :  { %3636 = vmatpush.bf16.msrb.mxu0 %v11518_v58  ;;  %3649 = vmatpush.bf16.msrb.mxu1 %v11519_v52  ;;  %v5758_v58 = vor.u32 %v6379_v1, %v5755_v45  ;;  %v3341_v52 = vpop.f32.mrf.mxu2  ;;  %v10262_v1 = vld [vmem:[%s11172_s1 + $0x1f8] sm:$0xff]  ;;  %v6409_v45 = vld [vmem:[%s11174_s2 + $0x674] sm:$0xf] }
 0x751   :  { %v5882_v52 = vld [vmem:[%s11174_s2 + $0x660] sm:$0xf] }
 0x752   :  { %v10110_v31 = vpop.f32.mrf.mxu3  ;;  %3555 = vmatpush.bf16.msrb.mxu3 %v5758_v58  ;;  %v5892_v58 = vld [vmem:[%s11174_s2 + $0x678] sm:$0xf0] }
 0x753   :  { %v3353_v55 = vadd.f32 %v10110_v31, %v10108_v47 }
 0x754   :  { %3637 = vmatpush.bf16.msrb.mxu0 %v11520_v63  ;;  %3650 = vmatpush.bf16.msrb.mxu1 %v11521_v9  ;;  %v10139_v9 = vld [vmem:[%s11172_s1 + $0xb8] sm:$0xff] }
 0x755   :  { %3609 = vmatpush.bf16.msra.mxu2 %v10139_v9 }
 0x758   :  { %3638 = vmatpush.bf16.msrb.mxu0 %v11522_v35  ;;  %3651 = vmatpush.bf16.msrb.mxu1 %v11523_v59  ;;  %v10145_v35 = vld [vmem:[%s11172_s1 + $0xf8] sm:$0xff]  ;;  %v10151_v59 = vld [vmem:[%s11172_s1 + $0xb0] sm:$0xff] }
 0x759   :  { %3622 = vmatpush.bf16.msra.mxu3 %v10145_v35  ;;  %3610 = vmatpush.bf16.msra.mxu2 %v10151_v59 }
 0x75a   :  { %v3354_v63 = vpop.f32.mrf.mxu3 }
 0x75b   :  { %v5895_v63 = vor.u32 %v6409_v45, %v5892_v58  ;;  %v10450_v45 = vld [vmem:[%s11172_s1 + $0x58] sm:$0xff]  ;;  %v10456_v58 = vld [vmem:[%s11172_s1 + $0x10] sm:$0xff] }
 0x75c   :  { %3639 = vmatpush.bf16.msrb.mxu0 %v11524_v53  ;;  %3652 = vmatpush.bf16.msrb.mxu1 %v11525_v26  ;;  %v10157_v53 = vld [vmem:[%s11172_s1 + $0xf0] sm:$0xff] }
 0x75d   :  { %3623 = vmatpush.bf16.msra.mxu3 %v10157_v53  ;;  %3611 = vmatpush.bf16.msra.mxu2 %v10163_v42 }
 0x760   :  { %3640 = vmatpush.bf16.msrb.mxu0 %v11526_v15  ;;  %3653 = vmatpush.bf16.msrb.mxu1 %v11543_v57 }
 0x761   :  { %3624 = vmatpush.bf16.msra.mxu3 %v10169_v33  ;;  %3612 = vmatpush.bf16.msra.mxu2 %v10175_v41 }
 0x762   :  { %v3391_v26 = vpop.f32.mrf.mxu2 }
 0x764   :  { %3641 = vmatpush.bf16.msrb.mxu0 %v11544_v5  ;;  %3654 = vmatpush.bf16.msrb.mxu1 %v11545_v12  ;;  %v3567_v5 = vld [vmem:[#allocation1] sm:$0xff]  ;;  %v3568_v12 = vld [vmem:[#allocation1 + $0x9] sm:$0xff] }
 0x765   :  { %3625 = vmatpush.bf16.msra.mxu3 %v10181_v54  ;;  %3613 = vmatpush.bf16.msra.mxu2 %v10187_v56  ;;  %3819 = vst [vmem:[#allocation1] ss:$9 sm:$0xff] %v5896_v46  ;;  %v10376_v46 = vld [vmem:[%s11172_s1 + $0x1c8] sm:$0xff] }
 0x766   :  { %v3404_v15 = vpop.f32.mrf.mxu3  ;;  %3591 = vmatmul.bf16.vlgmr.msra.gmra.mxu0 %v3567_v5  ;;  %3604 = vmatmul.bf16.vlgmr.msra.gmra.mxu1 %v3568_v12  ;;  %v6404_v5 = vld [vmem:[%s11174_s2 + $0x644] sm:$0xf0] }
 0x767   :  { %v10316_v12 = vld [vmem:[%s11172_s1 + $0x1a8] sm:$0xff] }
 0x768   :  { %3642 = vmatpush.bf16.msrb.mxu0 %v11546_v13  ;;  %3655 = vmatpush.bf16.msrb.mxu1 %v11547_v6 }
 0x769   :  { %3626 = vmatpush.bf16.msra.mxu3 %v10193_v27  ;;  %3614 = vmatpush.bf16.msra.mxu2 %v10205_v29 }
 0x76a   :  { %v3393_v48 = vpop.f32.mrf.mxu2 }
 0x76b   :  { %v5884_v48 = vld [vmem:[%s11174_s2 + $0x668] sm:$0xf0] }
 0x76c   :  { %3788 = vmatpush.bf16.msra.mxu0 %v5891_v34  ;;  %3801 = vmatpush.bf16.msra.mxu1 %v5895_v63  ;;  %v10444_v34 = vld [vmem:[%s11172_s1 + $0x18] sm:$0xff]  ;;  %v10468_v63 = vld [vmem:[%s11172_s1 + $0x8] sm:$0xff] }
 0x76d   :  { %3627 = vmatpush.bf16.msra.mxu3 %v10211_v51  ;;  %3615 = vmatpush.bf16.msra.mxu2 %v10217_v36 }
 0x76e   :  { %v3406_v23 = vpop.f32.mrf.mxu3 }
 0x771   :  { %3628 = vmatpush.bf16.msra.mxu3 %v10223_v2  ;;  %3616 = vmatpush.bf16.msra.mxu2 %v10229_v10 }
 0x775   :  { %3629 = vmatpush.bf16.msra.mxu3 %v10235_v0 }
 0x776   :  { %3643 = vmatmul.bf16.vlgmr.msrb.gmra.mxu0 %v3571_v30  ;;  %3656 = vmatmul.bf16.vlgmr.msrb.gmra.mxu1 %v3572_v40  ;;  %v10358_v30 = vld [vmem:[%s11172_s1 + $0x190] sm:$0xff] }
 0x777   :  { %v10364_v40 = vld [vmem:[%s11172_s1 + $0x1d0] sm:$0xff] }
 0x788   :  { %v3291_v11 = vpop.f32.mrf.mxu0  ;;  %v3304_v38 = vpop.f32.mrf.mxu1 }
 0x789   :  { %v10197_v60 = vadd.f32 %v3291_v11, %v11549_v28  ;;  %v10200_v39 = vadd.f32 %v3304_v38, %v11550_v49  ;;  %v5874_v38 = vld [vmem:[%s11174_s2 + $0x650] sm:$0xf]  ;;  %v6406_v28 = vld [vmem:[%s11174_s2 + $0x654] sm:$0xf0] }
 0x78a   :  { %v10292_v49 = vld [vmem:[%s11172_s1 + $0x1b0] sm:$0xff] }
 0x790   :  { %v3293_v16 = vpop.f32.mrf.mxu0  ;;  %v3306_v3 = vpop.f32.mrf.mxu1 }
 0x791   :  { %v10298_v16 = vld [vmem:[%s11172_s1 + $0x1f0] sm:$0xff] }
 0x792   :  { %v6405_v3 = vld [vmem:[%s11174_s2 + $0x654] sm:$0xf] }
 0x798   :  { %v3365_v8 = vpop.f32.mrf.mxu0  ;;  %v3378_v37 = vpop.f32.mrf.mxu1 }
 0x799   :  { %v3366_v57 = vadd.f32 %v3365_v8, %v3353_v55  ;;  %v5876_v8 = vld [vmem:[%s11174_s2 + $0x658] sm:$0xf0] }
 0x79a   :  { %v5879_v55 = vor.u32 %v6405_v3, %v5876_v8  ;;  %v10516_v3 = vld [vmem:[%s11172_s1 + $0x128] sm:$0xff] }
 0x79b   :  { %v3379_v13 = vadd.f32 %v3378_v37, %v3366_v57  ;;  %v5875_v37 = vor.u32 %v6406_v28, %v5874_v38  ;;  %v5866_v57 = vld [vmem:[%s11174_s2 + $0x640] sm:$0xf]  ;;  %v10504_v38 = vld [vmem:[%s11172_s1 + $0x130] sm:$0xff]  ;;  %11558 = vst [vmem:[#allocation14_spill] sm:$0xff] %v10516_v3  ;;  %v10522_v8 = vld [vmem:[%s11172_s1 + $0x168] sm:$0xff] }
 0x79c   :  { %11556 = vst [vmem:[#allocation5_spill] sm:$0xff] %v10504_v38  ;;  %v10510_v28 = vld [vmem:[%s11172_s1 + $0x170] sm:$0xff] }
 0x79d   :  { %v3392_v61 = vadd.f32 %v3391_v26, %v3379_v13  ;;  %v6408_v26 = vld [vmem:[%s11174_s2 + $0x664] sm:$0xf0]  ;;  %11557 = vst [vmem:[#allocation13_spill] sm:$0xff] %v10510_v28 }
 0x79e   :  { %v5883_v23 = vor.u32 %v6408_v26, %v5882_v52  ;;  %v10322_v13 = vld [vmem:[%s11172_s1 + $0x1e8] sm:$0xff]  ;;  %v10462_v52 = vld [vmem:[%s11172_s1 + $0x50] sm:$0xff]  ;;  %11559 = vst [vmem:[#allocation8_spill] sm:$0xff] %v10522_v8 }
 0x79f   :  { %v3405_v19 = vadd.f32 %v3404_v15, %v3392_v61  ;;  %v6407_v15 = vld [vmem:[%s11174_s2 + $0x664] sm:$0xf]  ;;  %v5868_v61 = vld [vmem:[%s11174_s2 + $0x648] sm:$0xf0] }
 0x7a0   :  { %v3367_v6 = vpop.f32.mrf.mxu0  ;;  %v3380_v18 = vpop.f32.mrf.mxu1  ;;  %v5887_v11 = vor.u32 %v6407_v15, %v5884_v48  ;;  %3789 = vmatpush.bf16.msra.mxu0 %v5883_v23  ;;  %v10474_v26 = vld [vmem:[%s11172_s1 + $0x48] sm:$0xff]  ;;  %v10480_v15 = vld [vmem:[%s11172_s1] sm:$0xff]  ;;  %v10492_v23 = vld [vmem:[%s11172_s1 + $0x138] sm:$0xff] }
 0x7a1   :  { %v5867_v6 = vor.u32 %v6404_v5, %v5866_v57  ;;  %v6403_v18 = vld [vmem:[%s11174_s2 + $0x644] sm:$0xf]  ;;  %v10540_v57 = vld [vmem:[%s11172_s1 + $0x118] sm:$0xff] }
 0x7a2   :  { %3802 = vmatpush.bf16.msra.mxu1 %v5887_v11  ;;  %v10486_v48 = vld [vmem:[%s11172_s1 + $0x40] sm:$0xff]  ;;  %v10498_v11 = vld [vmem:[%s11172_s1 + $0x178] sm:$0xff]  ;;  %11562 = vst [vmem:[#allocation25_spill] sm:$0xff] %v10540_v57 }
 0x7a3   :  { %v10546_v5 = vld [vmem:[%s11172_s1 + $0x158] sm:$0xff] }
 0x7a4   :  { %3790 = vmatpush.bf16.msra.mxu0 %v5875_v37  ;;  %v10528_v37 = vld [vmem:[%s11172_s1 + $0x120] sm:$0xff]  ;;  %11563 = vst [vmem:[#allocation17_spill] sm:$0xff] %v10546_v5 }
 0x7a5   :  { %11560 = vst [vmem:[#allocation18_spill] sm:$0xff] %v10528_v37 }
 0x7a6   :  { %3803 = vmatpush.bf16.msra.mxu1 %v5879_v55  ;;  %v10534_v55 = vld [vmem:[%s11172_s1 + $0x160] sm:$0xff] }
 0x7a7   :  { %11561 = vst [vmem:[#allocation24_spill] sm:$0xff] %v10534_v55 }
 0x7a8   :  { %v3417_v17 = vpop.f32.mrf.mxu0  ;;  %v3430_v21 = vpop.f32.mrf.mxu1  ;;  %3791 = vmatpush.bf16.msra.mxu0 %v5867_v6  ;;  %v10552_v6 = vld [vmem:[%s11172_s1 + $0x110] sm:$0xff] }
 0x7a9   :  { %v3418_v22 = vadd.f32 %v3417_v17, %v3405_v19  ;;  %v10334_v19 = vld [vmem:[%s11172_s1 + $0x1a0] sm:$0xff]  ;;  %11564 = vst [vmem:[#allocation3_spill] sm:$0xff] %v10552_v6 }
 0x7aa   :  { %v10340_v17 = vld [vmem:[%s11172_s1 + $0x1e0] sm:$0xff] }
 0x7ab   :  { %v3431_v25 = vadd.f32 %v3430_v21, %v3418_v22  ;;  %v5871_v21 = vor.u32 %v6403_v18, %v5868_v61  ;;  %v10346_v22 = vld [vmem:[%s11172_s1 + $0x198] sm:$0xff]  ;;  %v10558_v18 = vld [vmem:[%s11172_s1 + $0x150] sm:$0xff]  ;;  %v10564_v61 = vld [vmem:[%s11172_s1 + $0x108] sm:$0xff] }
 0x7ac   :  { %11565 = vst [vmem:[#allocation4_spill] sm:$0xff] %v10558_v18 }
 0x7ad   :  { %vm3434_vm11 = vcmp.gt.f32.partialorder %v3431_v25, 0.0  ;;  %v3435_v24 = vmul.f32 0.2, %v3431_v25  ;;  %3804 = vmatpush.bf16.msra.mxu1 %v5871_v21  ;;  %11566 = vst [vmem:[#allocation6_spill] sm:$0xff] %v10564_v61  ;;  %v10570_v21 = vld [vmem:[%s11172_s1 + $0x148] sm:$0xff] }
 0x7ae   :  { %11567 = vst [vmem:[#allocation19_spill] sm:$0xff] %v10570_v21 }
 0x7af   :  { %v3436_v32 = vsel %vm3434_vm11, %v3431_v25, %v3435_v24  ;;  %v10352_v25 = vld [vmem:[%s11172_s1 + $0x1d8] sm:$0xff]  ;;  %v10370_v24 = vld [vmem:[%s11172_s1 + $0x188] sm:$0xff] }
 0x7b0   :  { %v3437_v47 = vpack.c.bf16 %v3436_v32, %v3436_v32  ;;  %v3419_v31 = vpop.f32.mrf.mxu0  ;;  %v3432_v20 = vpop.f32.mrf.mxu1  ;;  %v10382_v32 = vld [vmem:[%s11172_s1 + $0x180] sm:$0xff] }
 0x7b1   :  { %v10394_v31 = vld [vmem:[%s11172_s1 + $0x38] sm:$0xff] }
 0x7b2   :  { %3543 = vmatmul.bf16.vlgmr.msrb.gmra.mxu2 %v3437_v47  ;;  %3556 = vmatmul.bf16.vlgmr.msrb.gmra.mxu3 %v3437_v47  ;;  %v10388_v47 = vld [vmem:[%s11172_s1 + $0x1c0] sm:$0xff]  ;;  %v10400_v20 = vld [vmem:[%s11172_s1 + $0x78] sm:$0xff] }
 0x7b3   :  { %3661 = vmatpush.bf16.msrb.mxu2 %v10256_v50  ;;  %3674 = vmatpush.bf16.msrb.mxu3 %v10262_v1 }
 0x7b7   :  { %3662 = vmatpush.bf16.msrb.mxu2 %v10292_v49  ;;  %3675 = vmatpush.bf16.msrb.mxu3 %v10298_v16 }
 0x7bb   :  { %3663 = vmatpush.bf16.msrb.mxu2 %v10316_v12  ;;  %3676 = vmatpush.bf16.msrb.mxu3 %v10322_v13 }
 0x7bf   :  { %3664 = vmatpush.bf16.msrb.mxu2 %v10334_v19  ;;  %3677 = vmatpush.bf16.msrb.mxu3 %v10340_v17 }
 0x7c2   :  { %3617 = vmatmul.bf16.vlgmr.msra.gmra.mxu2 %v3569_v62  ;;  %3630 = vmatmul.bf16.vlgmr.msra.gmra.mxu3 %v3570_v43  ;;  %v10408_v62 = vld [vmem:[%s11172_s1 + $0x30] sm:$0xff] }
 0x7c3   :  { %3665 = vmatpush.bf16.msrb.mxu2 %v10346_v22  ;;  %3678 = vmatpush.bf16.msrb.mxu3 %v10352_v25  ;;  %v10414_v43 = vld [vmem:[%s11172_s1 + $0x70] sm:$0xff] }
 0x7c7   :  { %3666 = vmatpush.bf16.msrb.mxu2 %v10358_v30  ;;  %3679 = vmatpush.bf16.msrb.mxu3 %v10364_v40 }
 0x7cb   :  { %3667 = vmatpush.bf16.msrb.mxu2 %v10370_v24  ;;  %3680 = vmatpush.bf16.msrb.mxu3 %v10376_v46 }
 0x7cf   :  { %3668 = vmatpush.bf16.msrb.mxu2 %v10382_v32  ;;  %3681 = vmatpush.bf16.msrb.mxu3 %v10388_v47 }
 0x7d2   :  { %3669 = vmatmul.bf16.vlgmr.msrb.gmra.mxu2 %v10243_v44  ;;  %3682 = vmatmul.bf16.vlgmr.msrb.gmra.mxu3 %v10245_v4  ;;  %v10420_v44 = vld [vmem:[%s11172_s1 + $0x28] sm:$0xff] }
 0x7d3   :  { %3836 = vmatpush.bf16.msra.mxu2 %v10394_v31  ;;  %3849 = vmatpush.bf16.msra.mxu3 %v10400_v20  ;;  %v10426_v4 = vld [vmem:[%s11172_s1 + $0x68] sm:$0xff] }
 0x7d7   :  { %3837 = vmatpush.bf16.msra.mxu2 %v10408_v62  ;;  %3850 = vmatpush.bf16.msra.mxu3 %v10414_v43 }
 0x7db   :  { %3838 = vmatpush.bf16.msra.mxu2 %v10420_v44  ;;  %3851 = vmatpush.bf16.msra.mxu3 %v10426_v4 }
 0x7df   :  { %3839 = vmatpush.bf16.msra.mxu2 %v10432_v14  ;;  %3852 = vmatpush.bf16.msra.mxu3 %v10438_v7 }
 0x7e3   :  { %3840 = vmatpush.bf16.msra.mxu2 %v10444_v34  ;;  %3853 = vmatpush.bf16.msra.mxu3 %v10450_v45 }
 0x7e7   :  { %3841 = vmatpush.bf16.msra.mxu2 %v10456_v58  ;;  %3854 = vmatpush.bf16.msra.mxu3 %v10462_v52 }
 0x7eb   :  { %3842 = vmatpush.bf16.msra.mxu2 %v10468_v63  ;;  %3855 = vmatpush.bf16.msra.mxu3 %v10474_v26 }
 0x7ef   :  { %3843 = vmatpush.bf16.msra.mxu2 %v10480_v15  ;;  %3856 = vmatpush.bf16.msra.mxu3 %v10486_v48 }
 0x7f3   :  { %3888 = vmatpush.bf16.msrb.mxu2 %v10492_v23  ;;  %3901 = vmatpush.bf16.msrb.mxu3 %v10498_v11 }
 0x7f7   :  { %3889 = vmatpush.bf16.msrb.mxu2 %v10504_v38  ;;  %3902 = vmatpush.bf16.msrb.mxu3 %v10510_v28  ;;  %v6398_v28 = vld [vmem:[%s11174_s2 + $0x614] sm:$0xf0] }
 0x7fb   :  { %3890 = vmatpush.bf16.msrb.mxu2 %v10516_v3  ;;  %3903 = vmatpush.bf16.msrb.mxu3 %v10522_v8  ;;  %v6399_v8 = vld [vmem:[%s11174_s2 + $0x624] sm:$0xf]  ;;  %v5842_v3 = vld [vmem:[%s11174_s2 + $0x610] sm:$0xf] }
 0x7ff   :  { %3891 = vmatpush.bf16.msrb.mxu2 %v10528_v37  ;;  %3904 = vmatpush.bf16.msrb.mxu3 %v10534_v55  ;;  %v6400_v37 = vld [vmem:[%s11174_s2 + $0x624] sm:$0xf0] }
 0x803   :  { %3892 = vmatpush.bf16.msrb.mxu2 %v10540_v57  ;;  %3905 = vmatpush.bf16.msrb.mxu3 %v10546_v5  ;;  %v6401_v5 = vld [vmem:[%s11174_s2 + $0x634] sm:$0xf]  ;;  %v5860_v57 = vld [vmem:[%s11174_s2 + $0x638] sm:$0xf0] }
 0x804   :  { %v5863_v55 = vor.u32 %v6401_v5, %v5860_v57  ;;  %v3592_v5 = vpop.f32.mrf.mxu0 }
 0x806   :  { %3805 = vmatpush.bf16.msra.mxu1 %v5863_v55  ;;  %v5843_v55 = vor.u32 %v6398_v28, %v5842_v3  ;;  %v5836_v28 = vld [vmem:[%s11174_s2 + $0x608] sm:$0xf0] }
 0x807   :  { %3893 = vmatpush.bf16.msrb.mxu2 %v10552_v6  ;;  %3906 = vmatpush.bf16.msrb.mxu3 %v10558_v18  ;;  %v10576_v6 = vld [vmem:[%s11172_s1 + $0x100] sm:$0xff] }
 0x808   :  { %11568 = vst [vmem:[#allocation20_spill] sm:$0xff] %v10576_v6  ;;  %v10582_v18 = vld [vmem:[%s11172_s1 + $0x140] sm:$0xff] }
 0x809   :  { %11569 = vst [vmem:[#allocation21_spill] sm:$0xff] %v10582_v18 }
 0x80b   :  { %3894 = vmatpush.bf16.msrb.mxu2 %v10564_v61  ;;  %3907 = vmatpush.bf16.msrb.mxu3 %v10570_v21  ;;  %v5858_v61 = vld [vmem:[%s11174_s2 + $0x630] sm:$0xf]  ;;  %v6402_v21 = vld [vmem:[%s11174_s2 + $0x634] sm:$0xf0] }
 0x80f   :  { %3895 = vmatpush.bf16.msrb.mxu2 %v10576_v6  ;;  %3908 = vmatpush.bf16.msrb.mxu3 %v10582_v18  ;;  %v5859_v6 = vor.u32 %v6402_v21, %v5858_v61  ;;  %v5850_v18 = vld [vmem:[%s11174_s2 + $0x620] sm:$0xf]  ;;  %v5852_v21 = vld [vmem:[%s11174_s2 + $0x628] sm:$0xf0] }
 0x810   :  { %v5851_v61 = vor.u32 %v6400_v37, %v5850_v18  ;;  %v5855_v57 = vor.u32 %v6399_v8, %v5852_v21  ;;  %v6397_v37 = vld [vmem:[%s11174_s2 + $0x614] sm:$0xf]  ;;  %v5844_v8 = vld [vmem:[%s11174_s2 + $0x618] sm:$0xf0]  ;;  %v6396_v21 = vld [vmem:[%s11174_s2 + $0x604] sm:$0xf0] }
 0x811   :  { %3792 = vmatpush.bf16.msra.mxu0 %v5859_v6  ;;  %v3605_v6 = vpop.f32.mrf.mxu1  ;;  %v5847_v18 = vor.u32 %v6397_v37, %v5844_v8  ;;  %v3594_v37 = vpop.f32.mrf.mxu0 }
 0x812   :  { %3806 = vmatpush.bf16.msra.mxu1 %v5855_v57  ;;  %v6395_v57 = vld [vmem:[%s11174_s2 + $0x604] sm:$0xf] }
 0x813   :  { %v5839_v3 = vor.u32 %v6395_v57, %v5836_v28  ;;  %v3820_v37 = vld [vmem:[#allocation1] sm:$0xff] }
 0x814   :  { %3844 = vmatmul.bf16.vlgmr.msra.gmra.mxu2 %v3820_v37 }
 0x815   :  { %3793 = vmatpush.bf16.msra.mxu0 %v5851_v61  ;;  %v5834_v61 = vld [vmem:[%s11174_s2 + $0x600] sm:$0xf] }
 0x816   :  { %v5835_v38 = vor.u32 %v6396_v21, %v5834_v61  ;;  %3807 = vmatpush.bf16.msra.mxu1 %v5847_v18 }
 0x819   :  { %3794 = vmatpush.bf16.msra.mxu0 %v5843_v55  ;;  %v3607_v8 = vpop.f32.mrf.mxu1  ;;  %v3644_v55 = vpop.f32.mrf.mxu0 }
 0x81a   :  { %3808 = vmatpush.bf16.msra.mxu1 %v5839_v3 }
 0x81d   :  { %3795 = vmatpush.bf16.msra.mxu0 %v5835_v38 }
 0x81e   :  { %3875 = vmatpush.bf16.msrb.mxu1 %v10145_v35 }
 0x821   :  { %3862 = vmatpush.bf16.msrb.mxu0 %v10139_v9  ;;  %v3657_v61 = vpop.f32.mrf.mxu1  ;;  %v3646_v38 = vpop.f32.mrf.mxu0 }
 0x822   :  { %3876 = vmatpush.bf16.msrb.mxu1 %v10157_v53 }
 0x825   :  { %3863 = vmatpush.bf16.msrb.mxu0 %v10151_v59 }
 0x826   :  { %3877 = vmatpush.bf16.msrb.mxu1 %v10169_v33 }
 0x829   :  { %3864 = vmatpush.bf16.msrb.mxu0 %v10163_v42  ;;  %v3659_v18 = vpop.f32.mrf.mxu1 }
 0x82a   :  { %3878 = vmatpush.bf16.msrb.mxu1 %v10181_v54  ;;  %v3821_v18 = vld [vmem:[#allocation1 + $0x9] sm:$0xff] }
 0x82b   :  { %3857 = vmatmul.bf16.vlgmr.msra.gmra.mxu3 %v3821_v18 }
 0x82d   :  { %3865 = vmatpush.bf16.msrb.mxu0 %v10175_v41 }
 0x82e   :  { %3879 = vmatpush.bf16.msrb.mxu1 %v10193_v27 }
 0x831   :  { %3866 = vmatpush.bf16.msrb.mxu0 %v10187_v56 }
 0x832   :  { %3880 = vmatpush.bf16.msrb.mxu1 %v10211_v51  ;;  %v3824_v51 = vld [vmem:[#allocation1 + $0x24] sm:$0xff] }
 0x833   :  { %3896 = vmatmul.bf16.vlgmr.msrb.gmra.mxu2 %v3824_v51  ;;  %v3823_v51 = vld [vmem:[#allocation1 + $0x1b] sm:$0xff] }
 0x835   :  { %v3544_v21 = vpop.f32.mrf.mxu2  ;;  %v3557_v57 = vpop.f32.mrf.mxu3  ;;  %3867 = vmatpush.bf16.msrb.mxu0 %v10205_v29 }
 0x836   :  { %v10644_v28 = vadd.f32 %v3544_v21, %v10197_v60  ;;  %v10647_v3 = vadd.f32 %v3557_v57, %v10200_v39  ;;  %3881 = vmatpush.bf16.msrb.mxu1 %v10223_v2  ;;  %v3606_v21 = vadd.f32 %v3605_v6, %v3592_v5  ;;  %v3825_v2 = vld [vmem:[#allocation1 + $0x2d] sm:$0xff] }
 0x837   :  { %v5977_v5 = vld [vmem:[%s11173_s0 + $0x70] sm:$0xff] }
 0x838   :  { %11570 = vst [vmem:[#allocation22_spill] sm:$0xff] %v10644_v28 }
 0x839   :  { %11571 = vst [vmem:[#allocation9_spill] sm:$0xff] %v10647_v3  ;;  %3868 = vmatpush.bf16.msrb.mxu0 %v10217_v36 }
 0x83a   :  { %3882 = vmatpush.bf16.msrb.mxu1 %v10235_v0 }
 0x83b   :  { %3909 = vmatmul.bf16.vlgmr.msrb.gmra.mxu3 %v3825_v2  ;;  %v3827_v2 = vld [vmem:[#allocation1 + $0x3f] sm:$0xff] }
 0x83d   :  { %v3546_v8 = vpop.f32.mrf.mxu2  ;;  %v3559_v38 = vpop.f32.mrf.mxu3  ;;  %3869 = vmatpush.bf16.msrb.mxu0 %v10229_v10 }
 0x845   :  { %v3618_v60 = vpop.f32.mrf.mxu2  ;;  %v3631_v39 = vpop.f32.mrf.mxu3 }
 0x846   :  { %v3619_v57 = vadd.f32 %v3618_v60, %v3606_v21  ;;  %v3826_v21 = vld [vmem:[#allocation1 + $0x36] sm:$0xff] }
 0x848   :  { %v3632_v29 = vadd.f32 %v3631_v39, %v3619_v57 }
 0x84a   :  { %v3645_v8 = vadd.f32 %v3644_v55, %v3632_v29  ;;  %v5971_v29 = vld [vmem:[%s11174_s2 + $0x6f0] sm:$0xf]  ;;  %v6426_v55 = vld [vmem:[%s11174_s2 + $0x6f4] sm:$0xf0] }
 0x84c   :  { %v3658_v38 = vadd.f32 %v3657_v61, %v3645_v8  ;;  %v5973_v61 = vld [vmem:[%s11174_s2 + $0x6f8] sm:$0xf0]  ;;  %v6424_v8 = vld [vmem:[%s11174_s2 + $0x6e4] sm:$0xf0] }
 0x84d   :  { %v3620_v3 = vpop.f32.mrf.mxu2  ;;  %v3633_v36 = vpop.f32.mrf.mxu3 }
 0x84e   :  { %v3822_v36 = vld [vmem:[#allocation1 + $0x12] sm:$0xff] }
 0x84f   :  { %4072 = vst [vmem:[#allocation1] ss:$9 sm:$0xff] %v5977_v5 }
 0x855   :  { %v3670_v37 = vpop.f32.mrf.mxu2  ;;  %v3683_v28 = vpop.f32.mrf.mxu3 }
 0x856   :  { %v3671_v18 = vadd.f32 %v3670_v37, %v3658_v38  ;;  %v6423_v38 = vld [vmem:[%s11174_s2 + $0x6e4] sm:$0xf]  ;;  %v5965_v37 = vld [vmem:[%s11174_s2 + $0x6e8] sm:$0xf0] }
 0x857   :  { %v5968_v5 = vor.u32 %v6423_v38, %v5965_v37  ;;  %v11576_v38 = vld [vmem:[#allocation18_spill] sm:$0xff]  ;;  %v11577_v37 = vld [vmem:[#allocation24_spill] sm:$0xff] }
 0x858   :  { %v3684_v27 = vadd.f32 %v3683_v28, %v3671_v18  ;;  %v5963_v28 = vld [vmem:[%s11174_s2 + $0x6e0] sm:$0xf] }
 0x859   :  { %v5964_v18 = vor.u32 %v6424_v8, %v5963_v28  ;;  %v6419_v28 = vld [vmem:[%s11174_s2 + $0x6c4] sm:$0xf] }
 0x85a   :  { %vm3687_vm12 = vcmp.gt.f32.partialorder %v3684_v27, 0.0  ;;  %v3688_v10 = vmul.f32 0.2, %v3684_v27 }
 0x85c   :  { %v3689_v6 = vsel %vm3687_vm12, %v3684_v27, %v3688_v10  ;;  %v5972_v27 = vor.u32 %v6426_v55, %v5971_v29  ;;  %v6425_v10 = vld [vmem:[%s11174_s2 + $0x6f4] sm:$0xf] }
 0x85d   :  { %v3690_v60 = vpack.c.bf16 %v3689_v6, %v3689_v6  ;;  %v3672_v39 = vpop.f32.mrf.mxu2  ;;  %v3685_v3 = vpop.f32.mrf.mxu3  ;;  %v5976_v57 = vor.u32 %v6425_v10, %v5973_v61  ;;  %v5955_v6 = vld [vmem:[%s11174_s2 + $0x6d0] sm:$0xf]  ;;  %v6420_v10 = vld [vmem:[%s11174_s2 + $0x6c4] sm:$0xf0] }
 0x85e   :  { %4041 = vmatpush.bf16.msra.mxu2 %v5972_v27  ;;  %v6421_v39 = vld [vmem:[%s11174_s2 + $0x6d4] sm:$0xf]  ;;  %v5957_v3 = vld [vmem:[%s11174_s2 + $0x6d8] sm:$0xf0]  ;;  %v5947_v27 = vld [vmem:[%s11174_s2 + $0x6c0] sm:$0xf] }
 0x85f   :  { %3796 = vmatmul.bf16.vlgmr.msra.gmra.mxu0 %v3690_v60  ;;  %3809 = vmatmul.bf16.vlgmr.msra.gmra.mxu1 %v3690_v60  ;;  %v6422_v60 = vld [vmem:[%s11174_s2 + $0x6d4] sm:$0xf0]  ;;  %v5960_v55 = vor.u32 %v6421_v39, %v5957_v3  ;;  %v5948_v61 = vor.u32 %v6420_v10, %v5947_v27  ;;  %v11582_v39 = vld [vmem:[#allocation6_spill] sm:$0xff]  ;;  %v11583_v3 = vld [vmem:[#allocation19_spill] sm:$0xff] }
 0x860   :  { %3914 = vmatpush.bf16.msra.mxu0 %v10256_v50  ;;  %3927 = vmatpush.bf16.msra.mxu1 %v10262_v1  ;;  %v5956_v29 = vor.u32 %v6422_v60, %v5955_v6  ;;  %v11580_v6 = vld [vmem:[#allocation3_spill] sm:$0xff]  ;;  %v11581_v60 = vld [vmem:[#allocation4_spill] sm:$0xff]  ;;  %v6418_v10 = vld [vmem:[%s11174_s2 + $0x6b4] sm:$0xf0] }
 0x861   :  { %4054 = vmatpush.bf16.msra.mxu3 %v5976_v57  ;;  %v5949_v57 = vld [vmem:[%s11174_s2 + $0x6c8] sm:$0xf0]  ;;  %v5939_v27 = vld [vmem:[%s11174_s2 + $0x6b0] sm:$0xf] }
 0x862   :  { %4042 = vmatpush.bf16.msra.mxu2 %v5964_v18  ;;  %v5952_v8 = vor.u32 %v6419_v28, %v5949_v57  ;;  %v11578_v18 = vld [vmem:[#allocation25_spill] sm:$0xff]  ;;  %v5940_v28 = vor.u32 %v6418_v10, %v5939_v27  ;;  %v5933_v10 = vld [vmem:[%s11174_s2 + $0x6a8] sm:$0xf0] }
 0x863   :  { %v5941_v57 = vld [vmem:[%s11174_s2 + $0x6b8] sm:$0xf0] }
 0x864   :  { %3915 = vmatpush.bf16.msra.mxu0 %v10292_v49  ;;  %3928 = vmatpush.bf16.msra.mxu1 %v10298_v16 }
 0x865   :  { %4055 = vmatpush.bf16.msra.mxu3 %v5968_v5  ;;  %v11579_v5 = vld [vmem:[#allocation17_spill] sm:$0xff] }
 0x866   :  { %4043 = vmatpush.bf16.msra.mxu2 %v5956_v29  ;;  %v11584_v29 = vld [vmem:[#allocation20_spill] sm:$0xff] }
 0x868   :  { %3916 = vmatpush.bf16.msra.mxu0 %v10316_v12  ;;  %3929 = vmatpush.bf16.msra.mxu1 %v10322_v13 }
 0x869   :  { %4056 = vmatpush.bf16.msra.mxu3 %v5960_v55  ;;  %v11585_v55 = vld [vmem:[#allocation21_spill] sm:$0xff] }
 0x86a   :  { %4044 = vmatpush.bf16.msra.mxu2 %v5948_v61  ;;  %v6417_v61 = vld [vmem:[%s11174_s2 + $0x6b4] sm:$0xf] }
 0x86c   :  { %3917 = vmatpush.bf16.msra.mxu0 %v10334_v19  ;;  %3930 = vmatpush.bf16.msra.mxu1 %v10340_v17 }
 0x86d   :  { %4057 = vmatpush.bf16.msra.mxu3 %v5952_v8  ;;  %v5944_v8 = vor.u32 %v6417_v61, %v5941_v57 }
 0x86e   :  { %4045 = vmatpush.bf16.msra.mxu2 %v5940_v28 }
 0x86f   :  { %3870 = vmatmul.bf16.vlgmr.msrb.gmra.mxu0 %v3822_v36  ;;  %3883 = vmatmul.bf16.vlgmr.msrb.gmra.mxu1 %v3823_v51  ;;  %v11572_v36 = vld [vmem:[#allocation5_spill] sm:$0xff] }
 0x870   :  { %3918 = vmatpush.bf16.msra.mxu0 %v10346_v22  ;;  %3931 = vmatpush.bf16.msra.mxu1 %v10352_v25  ;;  %v11573_v51 = vld [vmem:[#allocation13_spill] sm:$0xff] }
 0x871   :  { %4058 = vmatpush.bf16.msra.mxu3 %v5944_v8 }
 0x874   :  { %3919 = vmatpush.bf16.msra.mxu0 %v10358_v30  ;;  %3932 = vmatpush.bf16.msra.mxu1 %v10364_v40 }
 0x878   :  { %3920 = vmatpush.bf16.msra.mxu0 %v10370_v24  ;;  %3933 = vmatpush.bf16.msra.mxu1 %v10376_v46 }
 0x87c   :  { %3921 = vmatpush.bf16.msra.mxu0 %v10382_v32  ;;  %3934 = vmatpush.bf16.msra.mxu1 %v10388_v47 }
 0x87f   :  { %3922 = vmatmul.bf16.vlgmr.msra.gmra.mxu0 %v3826_v21  ;;  %3935 = vmatmul.bf16.vlgmr.msra.gmra.mxu1 %v3827_v2  ;;  %v11574_v21 = vld [vmem:[#allocation14_spill] sm:$0xff]  ;;  %v11575_v2 = vld [vmem:[#allocation8_spill] sm:$0xff] }
 0x880   :  { %4089 = vmatpush.bf16.msrb.mxu0 %v10394_v31  ;;  %4102 = vmatpush.bf16.msrb.mxu1 %v10400_v20 }
 0x884   :  { %4090 = vmatpush.bf16.msrb.mxu0 %v10408_v62  ;;  %4103 = vmatpush.bf16.msrb.mxu1 %v10414_v43 }
 0x888   :  { %4091 = vmatpush.bf16.msrb.mxu0 %v10420_v44  ;;  %4104 = vmatpush.bf16.msrb.mxu1 %v10426_v4 }
 0x88c   :  { %4092 = vmatpush.bf16.msrb.mxu0 %v10432_v14  ;;  %4105 = vmatpush.bf16.msrb.mxu1 %v10438_v7 }
 0x890   :  { %4093 = vmatpush.bf16.msrb.mxu0 %v10444_v34  ;;  %4106 = vmatpush.bf16.msrb.mxu1 %v10450_v45 }
 0x894   :  { %4094 = vmatpush.bf16.msrb.mxu0 %v10456_v58  ;;  %4107 = vmatpush.bf16.msrb.mxu1 %v10462_v52 }
 0x897   :  { %v3845_v28 = vpop.f32.mrf.mxu2 }
 0x898   :  { %4095 = vmatpush.bf16.msrb.mxu0 %v10468_v63  ;;  %4108 = vmatpush.bf16.msrb.mxu1 %v10474_v26 }
 0x89c   :  { %4096 = vmatpush.bf16.msrb.mxu0 %v10480_v15  ;;  %4109 = vmatpush.bf16.msrb.mxu1 %v10486_v48 }
 0x8a0   :  { %4141 = vmatpush.bf16.msra.mxu0 %v10492_v23  ;;  %4154 = vmatpush.bf16.msra.mxu1 %v10498_v11 }
 0x8a4   :  { %4142 = vmatpush.bf16.msra.mxu0 %v11572_v36  ;;  %4155 = vmatpush.bf16.msra.mxu1 %v11573_v51 }
 0x8a8   :  { %4143 = vmatpush.bf16.msra.mxu0 %v11574_v21  ;;  %4156 = vmatpush.bf16.msra.mxu1 %v11575_v2 }
 0x8ac   :  { %4144 = vmatpush.bf16.msra.mxu0 %v11576_v38  ;;  %4157 = vmatpush.bf16.msra.mxu1 %v11577_v37 }
 0x8ae   :  { %v3858_v57 = vpop.f32.mrf.mxu3 }
 0x8b0   :  { %4145 = vmatpush.bf16.msra.mxu0 %v11578_v18  ;;  %4158 = vmatpush.bf16.msra.mxu1 %v11579_v5 }
 0x8b4   :  { %4146 = vmatpush.bf16.msra.mxu0 %v11580_v6  ;;  %4159 = vmatpush.bf16.msra.mxu1 %v11581_v60  ;;  %v6414_v60 = vld [vmem:[%s11174_s2 + $0x694] sm:$0xf0] }
 0x8b8   :  { %4147 = vmatpush.bf16.msra.mxu0 %v11582_v39  ;;  %4160 = vmatpush.bf16.msra.mxu1 %v11583_v3  ;;  %v6415_v3 = vld [vmem:[%s11174_s2 + $0x6a4] sm:$0xf]  ;;  %v5923_v39 = vld [vmem:[%s11174_s2 + $0x690] sm:$0xf] }
 0x8b9   :  { %v5936_v61 = vor.u32 %v6415_v3, %v5933_v10  ;;  %v5925_v3 = vld [vmem:[%s11174_s2 + $0x698] sm:$0xf0]  ;;  %v6412_v10 = vld [vmem:[%s11174_s2 + $0x684] sm:$0xf0] }
 0x8bb   :  { %4059 = vmatpush.bf16.msra.mxu3 %v5936_v61  ;;  %v6411_v61 = vld [vmem:[%s11174_s2 + $0x684] sm:$0xf] }
 0x8bc   :  { %4148 = vmatpush.bf16.msra.mxu0 %v11584_v29  ;;  %4161 = vmatpush.bf16.msra.mxu1 %v11585_v55  ;;  %v5931_v55 = vld [vmem:[%s11174_s2 + $0x6a0] sm:$0xf]  ;;  %v6416_v29 = vld [vmem:[%s11174_s2 + $0x6a4] sm:$0xf0] }
 0x8bd   :  { %v5932_v27 = vor.u32 %v6416_v29, %v5931_v55  ;;  %v6413_v29 = vld [vmem:[%s11174_s2 + $0x694] sm:$0xf]  ;;  %v5924_v55 = vor.u32 %v6414_v60, %v5923_v39  ;;  %v5917_v60 = vld [vmem:[%s11174_s2 + $0x688] sm:$0xf0] }
 0x8be   :  { %v5928_v8 = vor.u32 %v6413_v29, %v5925_v3  ;;  %v5920_v39 = vor.u32 %v6411_v61, %v5917_v60  ;;  %v3847_v29 = vpop.f32.mrf.mxu2  ;;  %v3860_v3 = vpop.f32.mrf.mxu3  ;;  %v11589_v61 = vld [vmem:[#allocation9_spill] sm:$0xff] }
 0x8bf   :  { %4046 = vmatpush.bf16.msra.mxu2 %v5932_v27  ;;  %v5915_v27 = vld [vmem:[%s11174_s2 + $0x680] sm:$0xf]  ;;  %v11595_v29 = vld [vmem:[#allocation16_spill] sm:$0xff] }
 0x8c0   :  { %v5916_v6 = vor.u32 %v6412_v10, %v5915_v27  ;;  %4060 = vmatpush.bf16.msra.mxu3 %v5928_v8  ;;  %v11587_v10 = vld [vmem:[#allocation22_spill] sm:$0xff] }
 0x8c3   :  { %4047 = vmatpush.bf16.msra.mxu2 %v5924_v55 }
 0x8c4   :  { %4061 = vmatpush.bf16.msra.mxu3 %v5920_v39 }
 0x8c6   :  { %v3897_v55 = vpop.f32.mrf.mxu2  ;;  %v3910_v27 = vpop.f32.mrf.mxu3 }
 0x8c7   :  { %4048 = vmatpush.bf16.msra.mxu2 %v5916_v6 }
 0x8c8   :  { %4128 = vmatpush.bf16.msrb.mxu3 %v10145_v35 }
 0x8cb   :  { %4115 = vmatpush.bf16.msrb.mxu2 %v10139_v9  ;;  %v11586_v9 = vld [vmem:[#allocation7_spill] sm:$0xff] }
 0x8cc   :  { %4129 = vmatpush.bf16.msrb.mxu3 %v10157_v53 }
 0x8ce   :  { %v3899_v6 = vpop.f32.mrf.mxu2  ;;  %v3912_v8 = vpop.f32.mrf.mxu3 }
 0x8cf   :  { %4116 = vmatpush.bf16.msrb.mxu2 %v10151_v59  ;;  %v3859_v8 = vadd.f32 %v3858_v57, %v3845_v28  ;;  %v6058_v28 = vld [vmem:[%s11173_s0 + $0x78] sm:$0xff] }
 0x8d0   :  { %4130 = vmatpush.bf16.msrb.mxu3 %v10169_v33  ;;  %v11592_v33 = vld [vmem:[#allocation11_spill] sm:$0xff] }
 0x8d3   :  { %4117 = vmatpush.bf16.msrb.mxu2 %v10163_v42  ;;  %v11591_v42 = vld [vmem:[#allocation10_spill] sm:$0xff] }
 0x8d4   :  { %4131 = vmatpush.bf16.msrb.mxu3 %v10181_v54  ;;  %v11594_v54 = vld [vmem:[#allocation15_spill] sm:$0xff] }
 0x8d7   :  { %4118 = vmatpush.bf16.msrb.mxu2 %v10175_v41  ;;  %v11593_v41 = vld [vmem:[#allocation12_spill] sm:$0xff] }
 0x8d8   :  { %4132 = vmatpush.bf16.msrb.mxu3 %v11586_v9 }
 0x8db   :  { %4119 = vmatpush.bf16.msrb.mxu2 %v10187_v56 }
 0x8dc   :  { %v3797_v35 = vpop.f32.mrf.mxu0  ;;  %v3810_v59 = vpop.f32.mrf.mxu1  ;;  %4133 = vmatpush.bf16.msrb.mxu3 %v11592_v33 }
 0x8dd   :  { %v10813_v53 = vadd.f32 %v3797_v35, %v11587_v10  ;;  %v10816_v60 = vadd.f32 %v3810_v59, %v11589_v61  ;;  %v4073_v35 = vld [vmem:[#allocation1] sm:$0xff]  ;;  %v4074_v59 = vld [vmem:[#allocation1 + $0x9] sm:$0xff] }
 0x8de   :  { %4097 = vmatmul.bf16.vlgmr.msrb.gmra.mxu0 %v4073_v35  ;;  %4110 = vmatmul.bf16.vlgmr.msrb.gmra.mxu1 %v4074_v59  ;;  %v4080_v35 = vld [vmem:[#allocation1 + $0x3f] sm:$0xff]  ;;  %v6442_v59 = vld [vmem:[%s11174_s2 + $0x774] sm:$0xf0] }
 0x8df   :  { %11588 = vst [vmem:[#allocation23_spill] sm:$0xff] %v10813_v53  ;;  %4120 = vmatpush.bf16.msrb.mxu2 %v11591_v42  ;;  %v4078_v53 = vld [vmem:[#allocation1 + $0x2d] sm:$0xff] }
 0x8e0   :  { %11590 = vst [vmem:[#allocation5_spill] sm:$0xff] %v10816_v60  ;;  %4134 = vmatpush.bf16.msrb.mxu3 %v11594_v54 }
 0x8e3   :  { %4121 = vmatpush.bf16.msrb.mxu2 %v11593_v41 }
 0x8e4   :  { %v3799_v39 = vpop.f32.mrf.mxu0  ;;  %v3812_v56 = vpop.f32.mrf.mxu1  ;;  %4135 = vmatpush.bf16.msrb.mxu3 %v10235_v0 }
 0x8e7   :  { %4122 = vmatpush.bf16.msrb.mxu2 %v11595_v29  ;;  %v4077_v29 = vld [vmem:[#allocation1 + $0x24] sm:$0xff] }
 0x8ec   :  { %v3871_v3 = vpop.f32.mrf.mxu0  ;;  %v3884_v6 = vpop.f32.mrf.mxu1 }
 0x8ed   :  { %v3872_v9 = vadd.f32 %v3871_v3, %v3859_v8 }
 0x8ee   :  { %4149 = vmatmul.bf16.vlgmr.msra.gmra.mxu0 %v4077_v29  ;;  %4162 = vmatmul.bf16.vlgmr.msra.gmra.mxu1 %v4078_v53  ;;  %v6052_v53 = vld [vmem:[%s11174_s2 + $0x770] sm:$0xf]  ;;  %v6438_v29 = vld [vmem:[%s11174_s2 + $0x754] sm:$0xf0] }
 0x8ef   :  { %v3885_v10 = vadd.f32 %v3884_v6, %v3872_v9  ;;  %v4079_v9 = vld [vmem:[#allocation1 + $0x36] sm:$0xff] }
 0x8f1   :  { %v3898_v33 = vadd.f32 %v3897_v55, %v3885_v10  ;;  %v4075_v55 = vld [vmem:[#allocation1 + $0x12] sm:$0xff] }
 0x8f2   :  { %v6441_v10 = vld [vmem:[%s11174_s2 + $0x774] sm:$0xf] }
 0x8f3   :  { %v3911_v41 = vadd.f32 %v3910_v27, %v3898_v33  ;;  %v4076_v27 = vld [vmem:[#allocation1 + $0x1b] sm:$0xff] }
 0x8f4   :  { %v3873_v61 = vpop.f32.mrf.mxu0  ;;  %v3886_v42 = vpop.f32.mrf.mxu1  ;;  %4325 = vst [vmem:[#allocation1] ss:$9 sm:$0xff] %v6058_v28  ;;  %v6038_v28 = vld [vmem:[%s11174_s2 + $0x758] sm:$0xf0] }
 0x8f5   :  { %v6054_v61 = vld [vmem:[%s11174_s2 + $0x778] sm:$0xf0]  ;;  %v6044_v42 = vld [vmem:[%s11174_s2 + $0x760] sm:$0xf] }
 0x8f6   :  { %v6057_v33 = vor.u32 %v6441_v10, %v6054_v61  ;;  %v6715_v61 = vld [vmem:[%s11172_s1 + $0xb8] sm:$0xff] }
 0x8f8   :  { %4307 = vmatpush.bf16.msrb.mxu1 %v6057_v33  ;;  %v6717_v33 = vld [vmem:[%s11172_s1 + $0xb0] sm:$0xff] }
 0x8fc   :  { %v3923_v54 = vpop.f32.mrf.mxu0  ;;  %v3936_v39 = vpop.f32.mrf.mxu1 }
 0x8fd   :  { %v3924_v56 = vadd.f32 %v3923_v54, %v3911_v41  ;;  %v6046_v41 = vld [vmem:[%s11174_s2 + $0x768] sm:$0xf0] }
 0x8ff   :  { %v3937_v60 = vadd.f32 %v3936_v39, %v3924_v56  ;;  %v6036_v56 = vld [vmem:[%s11174_s2 + $0x750] sm:$0xf] }
 0x901   :  { %vm3940_vm13 = vcmp.gt.f32.partialorder %v3937_v60, 0.0  ;;  %v3941_v0 = vmul.f32 0.2, %v3937_v60 }
 0x903   :  { %v3942_v57 = vsel %vm3940_vm13, %v3937_v60, %v3941_v0  ;;  %v6053_v60 = vor.u32 %v6442_v59, %v6052_v53  ;;  %v6437_v0 = vld [vmem:[%s11174_s2 + $0x754] sm:$0xf]  ;;  %v6030_v53 = vld [vmem:[%s11174_s2 + $0x748] sm:$0xf0] }
 0x904   :  { %v3943_v3 = vpack.c.bf16 %v3942_v57, %v3942_v57  ;;  %v3925_v6 = vpop.f32.mrf.mxu0  ;;  %v3938_v8 = vpop.f32.mrf.mxu1  ;;  %v6037_v57 = vor.u32 %v6438_v29, %v6036_v56  ;;  %v6721_v56 = vld [vmem:[%s11172_s1 + $0xa0] sm:$0xff] }
 0x905   :  { %4294 = vmatpush.bf16.msrb.mxu0 %v6053_v60  ;;  %v6028_v6 = vld [vmem:[%s11174_s2 + $0x740] sm:$0xf]  ;;  %v6435_v8 = vld [vmem:[%s11174_s2 + $0x744] sm:$0xf] }
 0x906   :  { %4049 = vmatmul.bf16.vlgmr.msra.gmra.mxu2 %v3943_v3  ;;  %4062 = vmatmul.bf16.vlgmr.msra.gmra.mxu3 %v3943_v3  ;;  %v6041_v3 = vor.u32 %v6437_v0, %v6038_v28  ;;  %v6033_v59 = vor.u32 %v6435_v8, %v6030_v53  ;;  %v6722_v29 = vld [vmem:[%s11172_s1 + $0xe0] sm:$0xff]  ;;  %v11603_v53 = vld [vmem:[#allocation5_spill] sm:$0xff] }
 0x907   :  { %4167 = vmatpush.bf16.msra.mxu2 %v10256_v50  ;;  %4180 = vmatpush.bf16.msra.mxu3 %v10262_v1  ;;  %v6440_v50 = vld [vmem:[%s11174_s2 + $0x764] sm:$0xf0]  ;;  %v6439_v1 = vld [vmem:[%s11174_s2 + $0x764] sm:$0xf] }
 0x908   :  { %v6045_v54 = vor.u32 %v6440_v50, %v6044_v42  ;;  %v6049_v39 = vor.u32 %v6439_v1, %v6046_v41  ;;  %v6716_v42 = vld [vmem:[%s11172_s1 + $0xf8] sm:$0xff]  ;;  %v6718_v50 = vld [vmem:[%s11172_s1 + $0xf0] sm:$0xff] }
 0x90a   :  { %4295 = vmatpush.bf16.msrb.mxu0 %v6045_v54  ;;  %4308 = vmatpush.bf16.msrb.mxu1 %v6049_v39  ;;  %v6719_v54 = vld [vmem:[%s11172_s1 + $0xa8] sm:$0xff] }
 0x90b   :  { %4168 = vmatpush.bf16.msra.mxu2 %v10292_v49  ;;  %4181 = vmatpush.bf16.msra.mxu3 %v10298_v16  ;;  %v6436_v49 = vld [vmem:[%s11174_s2 + $0x744] sm:$0xf0] }
 0x90c   :  { %v6029_v16 = vor.u32 %v6436_v49, %v6028_v6  ;;  %v6720_v39 = vld [vmem:[%s11172_s1 + $0xe8] sm:$0xff] }
 0x90e   :  { %4296 = vmatpush.bf16.msrb.mxu0 %v6037_v57  ;;  %4309 = vmatpush.bf16.msrb.mxu1 %v6041_v3  ;;  %v6723_v57 = vld [vmem:[%s11172_s1 + $0x98] sm:$0xff] }
 0x90f   :  { %4169 = vmatpush.bf16.msra.mxu2 %v10316_v12  ;;  %4182 = vmatpush.bf16.msra.mxu3 %v10322_v13  ;;  %v11596_v12 = vld [vmem:[#allocation3_spill] sm:$0xff]  ;;  %v11597_v13 = vld [vmem:[#allocation4_spill] sm:$0xff]  ;;  %v6724_v3 = vld [vmem:[%s11172_s1 + $0xd8] sm:$0xff] }
 0x912   :  { %4297 = vmatpush.bf16.msrb.mxu0 %v6029_v16  ;;  %4310 = vmatpush.bf16.msrb.mxu1 %v6033_v59  ;;  %v11602_v16 = vld [vmem:[#allocation23_spill] sm:$0xff] }
 0x913   :  { %4170 = vmatpush.bf16.msra.mxu2 %v10334_v19  ;;  %4183 = vmatpush.bf16.msra.mxu3 %v10340_v17 }
 0x916   :  { %4123 = vmatmul.bf16.vlgmr.msrb.gmra.mxu2 %v4075_v55  ;;  %4136 = vmatmul.bf16.vlgmr.msrb.gmra.mxu3 %v4076_v27  ;;  %v6427_v55 = vld [vmem:[%s11174_s2 + $0x704] sm:$0xf] }
 0x917   :  { %4171 = vmatpush.bf16.msra.mxu2 %v10346_v22  ;;  %4184 = vmatpush.bf16.msra.mxu3 %v10352_v25 }
 0x91b   :  { %4172 = vmatpush.bf16.msra.mxu2 %v10358_v30  ;;  %4185 = vmatpush.bf16.msra.mxu3 %v10364_v40 }
 0x91f   :  { %4173 = vmatpush.bf16.msra.mxu2 %v10370_v24  ;;  %4186 = vmatpush.bf16.msra.mxu3 %v10376_v46 }
 0x923   :  { %4174 = vmatpush.bf16.msra.mxu2 %v10382_v32  ;;  %4187 = vmatpush.bf16.msra.mxu3 %v10388_v47 }
 0x926   :  { %4175 = vmatmul.bf16.vlgmr.msra.gmra.mxu2 %v4079_v9  ;;  %4188 = vmatmul.bf16.vlgmr.msra.gmra.mxu3 %v4080_v35  ;;  %v5998_v9 = vld [vmem:[%s11174_s2 + $0x708] sm:$0xf0] }
 0x927   :  { %4342 = vmatpush.bf16.msrb.mxu2 %v10394_v31  ;;  %4355 = vmatpush.bf16.msrb.mxu3 %v10400_v20  ;;  %v11598_v31 = vld [vmem:[#allocation6_spill] sm:$0xff]  ;;  %v11599_v20 = vld [vmem:[#allocation19_spill] sm:$0xff]  ;;  %v6001_v35 = vor.u32 %v6427_v55, %v5998_v9 }
 0x92b   :  { %4343 = vmatpush.bf16.msrb.mxu2 %v10408_v62  ;;  %4356 = vmatpush.bf16.msrb.mxu3 %v10414_v43  ;;  %v11600_v62 = vld [vmem:[#allocation20_spill] sm:$0xff]  ;;  %v11601_v43 = vld [vmem:[#allocation21_spill] sm:$0xff] }
 0x92f   :  { %4344 = vmatpush.bf16.msrb.mxu2 %v10420_v44  ;;  %4357 = vmatpush.bf16.msrb.mxu3 %v10426_v4  ;;  %v6020_v44 = vld [vmem:[%s11174_s2 + $0x730] sm:$0xf]  ;;  %v6434_v4 = vld [vmem:[%s11174_s2 + $0x734] sm:$0xf0] }
 0x933   :  { %4345 = vmatpush.bf16.msrb.mxu2 %v10432_v14  ;;  %4358 = vmatpush.bf16.msrb.mxu3 %v10438_v7  ;;  %v6433_v14 = vld [vmem:[%s11174_s2 + $0x734] sm:$0xf]  ;;  %v6021_v7 = vor.u32 %v6434_v4, %v6020_v44  ;;  %v4327_v4 = vld [vmem:[#allocation1 + $0x9] sm:$0xff] }
 0x935   :  { %4298 = vmatpush.bf16.msrb.mxu0 %v6021_v7  ;;  %v6730_v7 = vld [vmem:[%s11172_s1 + $0xc0] sm:$0xff] }
 0x937   :  { %4346 = vmatpush.bf16.msrb.mxu2 %v10444_v34  ;;  %4359 = vmatpush.bf16.msrb.mxu3 %v10450_v45  ;;  %v6022_v34 = vld [vmem:[%s11174_s2 + $0x738] sm:$0xf0] }
 0x938   :  { %v6025_v45 = vor.u32 %v6433_v14, %v6022_v34  ;;  %v6729_v14 = vld [vmem:[%s11172_s1 + $0x80] sm:$0xff] }
 0x93a   :  { %4311 = vmatpush.bf16.msrb.mxu1 %v6025_v45 }
 0x93b   :  { %4347 = vmatpush.bf16.msrb.mxu2 %v10456_v58  ;;  %4360 = vmatpush.bf16.msrb.mxu3 %v10462_v52  ;;  %v6012_v58 = vld [vmem:[%s11174_s2 + $0x720] sm:$0xf]  ;;  %v6432_v52 = vld [vmem:[%s11174_s2 + $0x724] sm:$0xf0] }
 0x93f   :  { %4348 = vmatpush.bf16.msrb.mxu2 %v10468_v63  ;;  %4361 = vmatpush.bf16.msrb.mxu3 %v10474_v26  ;;  %v6431_v63 = vld [vmem:[%s11174_s2 + $0x724] sm:$0xf]  ;;  %v6013_v26 = vor.u32 %v6432_v52, %v6012_v58 }
 0x941   :  { %4299 = vmatpush.bf16.msrb.mxu0 %v6013_v26  ;;  %v4330_v26 = vld [vmem:[#allocation1 + $0x24] sm:$0xff] }
 0x943   :  { %4349 = vmatpush.bf16.msrb.mxu2 %v10480_v15  ;;  %4362 = vmatpush.bf16.msrb.mxu3 %v10486_v48  ;;  %v6014_v15 = vld [vmem:[%s11174_s2 + $0x728] sm:$0xf0] }
 0x944   :  { %v6017_v48 = vor.u32 %v6431_v63, %v6014_v15 }
 0x946   :  { %4312 = vmatpush.bf16.msrb.mxu1 %v6017_v48  ;;  %4363 = vmatmul.bf16.vlgmr.msrb.gmra.mxu3 %v4327_v4 }
 0x947   :  { %4394 = vmatpush.bf16.msra.mxu2 %v10492_v23  ;;  %4407 = vmatpush.bf16.msra.mxu3 %v10498_v11 }
 0x94b   :  { %4395 = vmatpush.bf16.msra.mxu2 %v11572_v36  ;;  %4408 = vmatpush.bf16.msra.mxu3 %v11573_v51  ;;  %v6004_v36 = vld [vmem:[%s11174_s2 + $0x710] sm:$0xf]  ;;  %v6430_v51 = vld [vmem:[%s11174_s2 + $0x714] sm:$0xf0] }
 0x94f   :  { %4396 = vmatpush.bf16.msra.mxu2 %v11574_v21  ;;  %4409 = vmatpush.bf16.msra.mxu3 %v11575_v2  ;;  %v6429_v21 = vld [vmem:[%s11174_s2 + $0x714] sm:$0xf]  ;;  %v6005_v2 = vor.u32 %v6430_v51, %v6004_v36 }
 0x950   :  { %v4331_v36 = vld [vmem:[#allocation1 + $0x2d] sm:$0xff] }
 0x951   :  { %4300 = vmatpush.bf16.msrb.mxu0 %v6005_v2 }
 0x953   :  { %4397 = vmatpush.bf16.msra.mxu2 %v11576_v38  ;;  %4410 = vmatpush.bf16.msra.mxu3 %v11577_v37  ;;  %v6006_v38 = vld [vmem:[%s11174_s2 + $0x718] sm:$0xf0] }
 0x954   :  { %v6009_v37 = vor.u32 %v6429_v21, %v6006_v38 }
 0x956   :  { %4313 = vmatpush.bf16.msrb.mxu1 %v6009_v37 }
 0x957   :  { %4398 = vmatpush.bf16.msra.mxu2 %v11578_v18  ;;  %4411 = vmatpush.bf16.msra.mxu3 %v11579_v5  ;;  %v5996_v18 = vld [vmem:[%s11174_s2 + $0x700] sm:$0xf]  ;;  %v6428_v5 = vld [vmem:[%s11174_s2 + $0x704] sm:$0xf0] }
 0x958   :  { %v5997_v27 = vor.u32 %v6428_v5, %v5996_v18 }
 0x95a   :  { %4301 = vmatpush.bf16.msrb.mxu0 %v5997_v27  ;;  %4314 = vmatpush.bf16.msrb.mxu1 %v6001_v35  ;;  %v6732_v35 = vld [vmem:[%s11172_s1 + $0x1f8] sm:$0xff] }
 0x95b   :  { %4399 = vmatpush.bf16.msra.mxu2 %v11596_v12  ;;  %4412 = vmatpush.bf16.msra.mxu3 %v11597_v13  ;;  %v10947_v23 = vpop.f32.mrf.mxu0  ;;  %v10949_v11 = vpop.f32.mrf.mxu1  ;;  %v6725_v12 = vld [vmem:[%s11172_s1 + $0x90] sm:$0xff] }
 0x95c   :  { %v6726_v13 = vld [vmem:[%s11172_s1 + $0xd0] sm:$0xff]  ;;  %v4112_v58 = vadd.f32 %v10949_v11, %v10947_v23  ;;  %v6731_v11 = vld [vmem:[%s11172_s1 + $0x1b8] sm:$0xff] }
 0x95e   :  { %4368 = vmatpush.bf16.msra.mxu0 %v6715_v61  ;;  %4381 = vmatpush.bf16.msra.mxu1 %v6716_v42  ;;  %v6735_v61 = vld [vmem:[%s11172_s1 + $0x1a8] sm:$0xff] }
 0x95f   :  { %4400 = vmatpush.bf16.msra.mxu2 %v11598_v31  ;;  %4413 = vmatpush.bf16.msra.mxu3 %v11599_v20  ;;  %v6727_v31 = vld [vmem:[%s11172_s1 + $0x88] sm:$0xff] }
 0x960   :  { %v6728_v20 = vld [vmem:[%s11172_s1 + $0xc8] sm:$0xff] }
 0x961   :  { %v6736_v42 = vld [vmem:[%s11172_s1 + $0x1e8] sm:$0xff] }
 0x962   :  { %4369 = vmatpush.bf16.msra.mxu0 %v6717_v33  ;;  %4382 = vmatpush.bf16.msra.mxu1 %v6718_v50  ;;  %v4328_v33 = vld [vmem:[#allocation1 + $0x12] sm:$0xff]  ;;  %v4329_v50 = vld [vmem:[#allocation1 + $0x1b] sm:$0xff] }
 0x963   :  { %4401 = vmatpush.bf16.msra.mxu2 %v11600_v62  ;;  %4414 = vmatpush.bf16.msra.mxu3 %v11601_v43  ;;  %v4100_v60 = vpop.f32.mrf.mxu0  ;;  %v4113_v10 = vpop.f32.mrf.mxu1  ;;  %v4326_v62 = vld [vmem:[#allocation1] sm:$0xff] }
 0x964   :  { %4350 = vmatmul.bf16.vlgmr.msrb.gmra.mxu2 %v4326_v62  ;;  %v6733_v60 = vld [vmem:[%s11172_s1 + $0x1b0] sm:$0xff] }
 0x965   :  { %v6734_v10 = vld [vmem:[%s11172_s1 + $0x1f0] sm:$0xff] }
 0x966   :  { %4370 = vmatpush.bf16.msra.mxu0 %v6719_v54  ;;  %4383 = vmatpush.bf16.msra.mxu1 %v6720_v39  ;;  %v6455_v54 = vld [vmem:[%s11174_s2 + $0x7e4] sm:$0xf]  ;;  %v6127_v39 = vld [vmem:[%s11174_s2 + $0x7e8] sm:$0xf0] }
 0x967   :  { %4415 = vmatmul.bf16.vlgmr.msra.gmra.mxu3 %v4331_v36 }
 0x96a   :  { %4371 = vmatpush.bf16.msra.mxu0 %v6721_v56  ;;  %4384 = vmatpush.bf16.msra.mxu1 %v6722_v29 }
 0x96b   :  { %v4150_v1 = vpop.f32.mrf.mxu0  ;;  %v4163_v41 = vpop.f32.mrf.mxu1 }
 0x96e   :  { %4372 = vmatpush.bf16.msra.mxu0 %v6723_v57  ;;  %4385 = vmatpush.bf16.msra.mxu1 %v6724_v3  ;;  %v6117_v57 = vld [vmem:[%s11174_s2 + $0x7d0] sm:$0xf]  ;;  %v6454_v3 = vld [vmem:[%s11174_s2 + $0x7d4] sm:$0xf0] }
 0x972   :  { %4373 = vmatpush.bf16.msra.mxu0 %v6725_v12  ;;  %4386 = vmatpush.bf16.msra.mxu1 %v6726_v13  ;;  %v6109_v13 = vld [vmem:[%s11174_s2 + $0x7c0] sm:$0xf] }
 0x973   :  { %v4152_v0 = vpop.f32.mrf.mxu0  ;;  %v4165_v28 = vpop.f32.mrf.mxu1 }
 0x974   :  { %4402 = vmatmul.bf16.vlgmr.msra.gmra.mxu2 %v4330_v26  ;;  %v6130_v0 = vor.u32 %v6455_v54, %v6127_v39 }
 0x976   :  { %4374 = vmatpush.bf16.msra.mxu0 %v6727_v31  ;;  %4387 = vmatpush.bf16.msra.mxu1 %v6728_v20  ;;  %v6452_v31 = vld [vmem:[%s11174_s2 + $0x7c4] sm:$0xf0]  ;;  %v6451_v20 = vld [vmem:[%s11174_s2 + $0x7c4] sm:$0xf] }
 0x977   :  { %v6110_v62 = vor.u32 %v6452_v31, %v6109_v13 }
 0x97a   :  { %4375 = vmatpush.bf16.msra.mxu0 %v6729_v14  ;;  %4388 = vmatpush.bf16.msra.mxu1 %v6730_v7  ;;  %v6101_v14 = vld [vmem:[%s11174_s2 + $0x7b0] sm:$0xf]  ;;  %v6450_v7 = vld [vmem:[%s11174_s2 + $0x7b4] sm:$0xf0] }
 0x989   :  { %v4050_v6 = vpop.f32.mrf.mxu2  ;;  %v4063_v49 = vpop.f32.mrf.mxu3 }
 0x98a   :  { %v11006_v8 = vadd.f32 %v4050_v6, %v11602_v16  ;;  %v11009_v59 = vadd.f32 %v4063_v49, %v11603_v53  ;;  %v6453_v6 = vld [vmem:[%s11174_s2 + $0x7d4] sm:$0xf]  ;;  %v6118_v49 = vor.u32 %v6454_v3, %v6117_v57  ;;  %v6119_v16 = vld [vmem:[%s11174_s2 + $0x7d8] sm:$0xf0] }
 0x98b   :  { %v6122_v53 = vor.u32 %v6453_v6, %v6119_v16 }
 0x991   :  { %v4052_v43 = vpop.f32.mrf.mxu2  ;;  %v4065_v44 = vpop.f32.mrf.mxu3 }
 0x992   :  { %v6111_v43 = vld [vmem:[%s11174_s2 + $0x7c8] sm:$0xf0] }
 0x993   :  { %v6114_v4 = vor.u32 %v6451_v20, %v6111_v43 }
 0x999   :  { %v4124_v34 = vpop.f32.mrf.mxu2  ;;  %v4137_v45 = vpop.f32.mrf.mxu3 }
 0x99a   :  { %v4125_v52 = vadd.f32 %v4124_v34, %v4112_v58  ;;  %v6449_v34 = vld [vmem:[%s11174_s2 + $0x7b4] sm:$0xf]  ;;  %v6103_v58 = vld [vmem:[%s11174_s2 + $0x7b8] sm:$0xf0] }
 0x99b   :  { %v6106_v26 = vor.u32 %v6449_v34, %v6103_v58  ;;  %v4596_v58 = vstv %s11176_s4 }
 0x99c   :  { %v4138_v63 = vadd.f32 %v4137_v45, %v4125_v52  ;;  %v6102_v45 = vor.u32 %v6450_v7, %v6101_v14  ;;  %v6093_v52 = vld [vmem:[%s11174_s2 + $0x7a0] sm:$0xf] }
 0x99e   :  { %v4151_v51 = vadd.f32 %v4150_v1, %v4138_v63  ;;  %v6448_v63 = vld [vmem:[%s11174_s2 + $0x7a4] sm:$0xf0] }
 0x99f   :  { %v6094_v36 = vor.u32 %v6448_v63, %v6093_v52 }
 0x9a0   :  { %v4164_v21 = vadd.f32 %v4163_v41, %v4151_v51 }
 0x9a1   :  { %v4126_v15 = vpop.f32.mrf.mxu2  ;;  %v4139_v48 = vpop.f32.mrf.mxu3 }
 0x9a2   :  { %v6447_v15 = vld [vmem:[%s11174_s2 + $0x7a4] sm:$0xf]  ;;  %v6095_v48 = vld [vmem:[%s11174_s2 + $0x7a8] sm:$0xf0] }
 0x9a9   :  { %v4176_v2 = vpop.f32.mrf.mxu2  ;;  %v4189_v38 = vpop.f32.mrf.mxu3 }
 0x9aa   :  { %v4177_v37 = vadd.f32 %v4176_v2, %v4164_v21  ;;  %v6098_v21 = vor.u32 %v6447_v15, %v6095_v48 }
 0x9ac   :  { %v4190_v18 = vadd.f32 %v4189_v38, %v4177_v37 }
 0x9ae   :  { %vm4193_vm14 = vcmp.gt.f32.partialorder %v4190_v18, 0.0  ;;  %v4194_v5 = vmul.f32 0.2, %v4190_v18 }
 0x9b0   :  { %v4195_v55 = vsel %vm4193_vm14, %v4190_v18, %v4194_v5  ;;  %v6085_v18 = vld [vmem:[%s11174_s2 + $0x790] sm:$0xf]  ;;  %v6446_v5 = vld [vmem:[%s11174_s2 + $0x794] sm:$0xf0] }
 0x9b1   :  { %v4196_v27 = vpack.c.bf16 %v4195_v55, %v4195_v55  ;;  %v4178_v9 = vpop.f32.mrf.mxu2  ;;  %v4191_v23 = vpop.f32.mrf.mxu3  ;;  %v6445_v55 = vld [vmem:[%s11174_s2 + $0x794] sm:$0xf] }
 0x9b2   :  { %v6086_v23 = vor.u32 %v6446_v5, %v6085_v18 }
 0x9b3   :  { %4302 = vmatmul.bf16.vlgmr.msrb.gmra.mxu0 %v4196_v27  ;;  %4315 = vmatmul.bf16.vlgmr.msrb.gmra.mxu1 %v4196_v27 }
 0x9b4   :  { %4420 = vmatpush.bf16.msrb.mxu0 %v6731_v11  ;;  %4433 = vmatpush.bf16.msrb.mxu1 %v6732_v35  ;;  %v6087_v11 = vld [vmem:[%s11174_s2 + $0x798] sm:$0xf0] }
 0x9b5   :  { %v6090_v35 = vor.u32 %v6445_v55, %v6087_v11 }
 0x9b8   :  { %4421 = vmatpush.bf16.msrb.mxu0 %v6733_v60  ;;  %4434 = vmatpush.bf16.msrb.mxu1 %v6734_v10  ;;  %v6077_v60 = vld [vmem:[%s11174_s2 + $0x780] sm:$0xf]  ;;  %v6444_v10 = vld [vmem:[%s11174_s2 + $0x784] sm:$0xf0] }
 0x9bc   :  { %4422 = vmatpush.bf16.msrb.mxu0 %v6735_v61  ;;  %4435 = vmatpush.bf16.msrb.mxu1 %v6736_v42  ;;  %v6079_v61 = vld [vmem:[%s11174_s2 + $0x788] sm:$0xf0] }
 0x9c0   :  { %4423 = vmatpush.bf16.msrb.mxu0 %v10334_v19  ;;  %4436 = vmatpush.bf16.msrb.mxu1 %v10340_v17  ;;  %v4332_v19 = vld [vmem:[#allocation1 + $0x36] sm:$0xff]  ;;  %v4333_v17 = vld [vmem:[#allocation1 + $0x3f] sm:$0xff] }
 0x9c3   :  { %4376 = vmatmul.bf16.vlgmr.msra.gmra.mxu0 %v4328_v33  ;;  %4389 = vmatmul.bf16.vlgmr.msra.gmra.mxu1 %v4329_v50 }
 0x9c4   :  { %4424 = vmatpush.bf16.msrb.mxu0 %v10346_v22  ;;  %4437 = vmatpush.bf16.msrb.mxu1 %v10352_v25  ;;  %v6133_v25 = vld [vmem:[%s11174_s2 + $0x7f0] sm:$0xf] }
 0x9c8   :  { %4425 = vmatpush.bf16.msrb.mxu0 %v10358_v30  ;;  %4438 = vmatpush.bf16.msrb.mxu1 %v10364_v40  ;;  %v6458_v30 = vld [vmem:[%s11174_s2 + $0x7f4] sm:$0xf0]  ;;  %v6457_v40 = vld [vmem:[%s11174_s2 + $0x7f4] sm:$0xf] }
 0x9c9   :  { %v11061_v22 = vpop.f32.mrf.mxu3 }
 0x9cc   :  { %4426 = vmatpush.bf16.msrb.mxu0 %v10370_v24  ;;  %4439 = vmatpush.bf16.msrb.mxu1 %v10376_v46  ;;  %v6134_v24 = vor.u32 %v6458_v30, %v6133_v25  ;;  %v6135_v46 = vld [vmem:[%s11174_s2 + $0x7f8] sm:$0xf0] }
 0x9cd   :  { %v6138_v41 = vor.u32 %v6457_v40, %v6135_v46 }
 0x9ce   :  { %4547 = vmatpush.bf16.msrb.mxu2 %v6134_v24 }
 0x9cf   :  { %4560 = vmatpush.bf16.msrb.mxu3 %v6138_v41 }
 0x9d0   :  { %4427 = vmatpush.bf16.msrb.mxu0 %v10382_v32  ;;  %4440 = vmatpush.bf16.msrb.mxu1 %v10388_v47  ;;  %v6125_v32 = vld [vmem:[%s11174_s2 + $0x7e0] sm:$0xf]  ;;  %v6456_v47 = vld [vmem:[%s11174_s2 + $0x7e4] sm:$0xf0] }
 0x9d1   :  { %v6126_v56 = vor.u32 %v6456_v47, %v6125_v32  ;;  %v4366_v28 = vpop.f32.mrf.mxu3 }
 0x9d3   :  { %4428 = vmatmul.bf16.vlgmr.msrb.gmra.mxu0 %v4332_v19  ;;  %4441 = vmatmul.bf16.vlgmr.msrb.gmra.mxu1 %v4333_v17 }
 0x9d4   :  { %4548 = vmatpush.bf16.msrb.mxu2 %v6126_v56  ;;  %4561 = vmatpush.bf16.msrb.mxu3 %v6130_v0 }
 0x9d8   :  { %4549 = vmatpush.bf16.msrb.mxu2 %v6118_v49  ;;  %4562 = vmatpush.bf16.msrb.mxu3 %v6122_v53 }
 0x9dc   :  { %4550 = vmatpush.bf16.msrb.mxu2 %v6110_v62  ;;  %4563 = vmatpush.bf16.msrb.mxu3 %v6114_v4 }
 0x9e0   :  { %4551 = vmatpush.bf16.msrb.mxu2 %v6102_v45  ;;  %4564 = vmatpush.bf16.msrb.mxu3 %v6106_v26 }
 0x9e4   :  { %4552 = vmatpush.bf16.msrb.mxu2 %v6094_v36  ;;  %4565 = vmatpush.bf16.msrb.mxu3 %v6098_v21 }
 0x9e7   :  { %v11059_v1 = vpop.f32.mrf.mxu2 }
 0x9e8   :  { %4553 = vmatpush.bf16.msrb.mxu2 %v6086_v23  ;;  %4566 = vmatpush.bf16.msrb.mxu3 %v6090_v35  ;;  %v4365_v25 = vadd.f32 %v11061_v22, %v11059_v1  ;;  %v4581_v1 = vld [vmem:[%s11175_s3] sm:$0x3] }
 0x9e9   :  { %v4583_v53 = vperm.slane %v4581_v1, 0 }
 0x9ea   :  { %v4416_v44 = vpop.f32.mrf.mxu3 }
 0x9ef   :  { %v4353_v29 = vpop.f32.mrf.mxu2 }
 0x9f2   :  { %v4418_v2 = vpop.f32.mrf.mxu3 }
 0x9f7   :  { %v4403_v12 = vpop.f32.mrf.mxu2 }
 0x9ff   :  { %v4405_v51 = vpop.f32.mrf.mxu2 }
 0xa30   :  { %v4303_v38 = vpop.f32.mrf.mxu0  ;;  %v4316_v37 = vpop.f32.mrf.mxu1 }
 0xa31   :  { %v4320_v27 = vadd.f32 %v4303_v38, %v11006_v8  ;;  %v4321_v9 = vadd.f32 %v4316_v37, %v11009_v59  ;;  %v6443_v8 = vld [vmem:[%s11174_s2 + $0x784] sm:$0xf]  ;;  %v6078_v59 = vor.u32 %v6444_v10, %v6077_v60 }
 0xa32   :  { %v6082_v42 = vor.u32 %v6443_v8, %v6079_v61 }
 0xa33   :  { %4554 = vmatpush.bf16.msrb.mxu2 %v6078_v59 }
 0xa34   :  { %4567 = vmatpush.bf16.msrb.mxu3 %v6082_v42 }
 0xa38   :  { %v4305_v33 = vpop.f32.mrf.mxu0  ;;  %v4318_v50 = vpop.f32.mrf.mxu1 }
 0xa40   :  { %v4377_v19 = vpop.f32.mrf.mxu0  ;;  %v4390_v17 = vpop.f32.mrf.mxu1 }
 0xa41   :  { %v4378_v30 = vadd.f32 %v4377_v19, %v4365_v25 }
 0xa43   :  { %v4391_v40 = vadd.f32 %v4390_v17, %v4378_v30 }
 0xa45   :  { %v4404_v32 = vadd.f32 %v4403_v12, %v4391_v40  ;;  %v4584_v12 = vperm.slane %v4581_v1, 1 }
 0xa47   :  { %v4417_v47 = vadd.f32 %v4416_v44, %v4404_v32 }
 0xa48   :  { %v4379_v24 = vpop.f32.mrf.mxu0  ;;  %v4392_v46 = vpop.f32.mrf.mxu1 }
 0xa50   :  { %v4429_v41 = vpop.f32.mrf.mxu0  ;;  %v4442_v54 = vpop.f32.mrf.mxu1 }
 0xa51   :  { %v4430_v39 = vadd.f32 %v4429_v41, %v4417_v47 }
 0xa53   :  { %v4443_v56 = vadd.f32 %v4442_v54, %v4430_v39 }
 0xa55   :  { %vm4446_vm15 = vcmp.gt.f32.partialorder %v4443_v56, 0.0  ;;  %v4447_v29 = vmul.f32 0.2, %v4443_v56 }
 0xa57   :  { %v4448_v0 = vsel %vm4446_vm15, %v4443_v56, %v4447_v29 }
 0xa58   :  { %v4449_v28 = vpack.c.bf16 %v4448_v0, %v4448_v0  ;;  %v4431_v57 = vpop.f32.mrf.mxu0  ;;  %v4444_v3 = vpop.f32.mrf.mxu1 }
 0xa5a   :  { %4555 = vmatmul.bf16.vlgmr.msrb.gmra.mxu2 %v4449_v28  ;;  %4568 = vmatmul.bf16.vlgmr.msrb.gmra.mxu3 %v4449_v28 }
 0xadd   :  { %v4556_v22 = vpop.f32.mrf.mxu2  ;;  %v4569_v6 = vpop.f32.mrf.mxu3 }
 0xade   :  { %v4573_v49 = vadd.f32 %v4556_v22, %v4320_v27  ;;  %v4574_v16 = vadd.f32 %v4569_v6, %v4321_v9 }
 0xae0   :  { %vm4575_vm0 = vcmp.gt.f32.partialorder %v4573_v49, 0.0  ;;  %v4577_v13 = vmul.f32 0.2, %v4573_v49  ;;  %vm4576_vm1 = vcmp.gt.f32.partialorder %v4574_v16, 0.0  ;;  %v4578_v31 = vmul.f32 0.2, %v4574_v16 }
 0xae2   :  { %v4579_v20 = vsel %vm4575_vm0, %v4573_v49, %v4577_v13  ;;  %v4580_v62 = vsel %vm4576_vm1, %v4574_v16, %v4578_v31 }
 0xae3   :  { %v4587_v43 = vmul.f32 %v4583_v53, %v4579_v20  ;;  %v4588_v44 = vmul.f32 %v4584_v12, %v4580_v62 }
 0xae5   :  { %v4558_v4 = vpop.f32.mrf.mxu2  ;;  %v4571_v14 = vpop.f32.mrf.mxu3  ;;  %v4590_v7 = vsel %vm4589_vm2, %v4587_v43, 0.0  ;;  %v4591_v34 = vsel %vm4589_vm2, %v4588_v44, 0.0 }
 0xae6   :  { %v4592_v45 = vadd.f32 %v4591_v34, %v4590_v7 }
 0xae8   :  { %4593 = vadd.xlane.f32.xlu0 %v4592_v45 }
 0xb5b   :  { %v4594_v52 = vpop.xlane.xlu0 %4593 }
 0xb5c   :  { %v4597_v63 = vadd.f32 %v4596_v58, %v4594_v52 }
 0xb5e   :  { %4599 = vst.msk [vmem:[%s11177_s5] sm:$0x3] %vm4598_vm3, %v4597_v63 }

</bundles_post_ra>
